<compile_context>
chip_gen: v5e
topology: v5e:2x2
jax: 0.10.0
libtpu: 0.0.40
codegen_flags: <defaults>
</compile_context>

<pallas_src>
import functools

import jax
import jax.numpy as jnp
from jax.experimental import pallas as pl
from jax.experimental.pallas import tpu as pltpu

_F32 = jnp.float32
_BF16 = jnp.bfloat16


# ----------------------------------------------------------------------------
# small helpers
# ----------------------------------------------------------------------------
def _round_up(x, m):
    return (x + m - 1) // m * m


def _row_tile(r, cap=256):
    """Pick a row tile (multiple of 8) and the padded row count."""
    if r <= cap:
        t = _round_up(r, 8)
        return t, t
    return cap, _round_up(r, cap)


def _seq_tile(n, cap=256):
    if n <= cap:
        t = _round_up(n, 8)
        return t, t
    return cap, _round_up(n, cap)


def _pad_rows(x, rp):
    r = x.shape[0]
    if rp == r:
        return x
    return jnp.pad(x, ((0, rp - r),) + ((0, 0),) * (x.ndim - 1))


def _cparams(sem):
    return pltpu.CompilerParams(dimension_semantics=sem,
                                vmem_limit_bytes=32 * 1024 * 1024)


# ----------------------------------------------------------------------------
# plain matmul (+ optional bias)   -- context KV projection, fuser linear
# ----------------------------------------------------------------------------
def _mm_kernel(x_ref, w_ref, o_ref):
    o_ref[...] = jnp.dot(x_ref[...].astype(_BF16), w_ref[...],
                         preferred_element_type=_F32).astype(o_ref.dtype)


def _mm_bias_kernel(x_ref, w_ref, b_ref, o_ref):
    acc = jnp.dot(x_ref[...].astype(_BF16), w_ref[...], preferred_element_type=_F32)
    o_ref[...] = (acc + b_ref[...]).astype(o_ref.dtype)


def pallas_matmul(x, w, b=None):
    R, Din = x.shape
    Dout = w.shape[1]
    tm, Rp = _row_tile(R)
    xp = _pad_rows(x, Rp)
    in_specs = [pl.BlockSpec((tm, Din), lambda i: (i, 0)),
                pl.BlockSpec((Din, Dout), lambda i: (0, 0))]
    args = [xp, w.astype(_BF16)]
    kern = _mm_kernel
    if b is not None:
        in_specs.append(pl.BlockSpec((1, Dout), lambda i: (0, 0)))
        args.append(b.reshape(1, Dout).astype(_F32))
        kern = _mm_bias_kernel
    out = pl.pallas_call(
        kern,
        out_shape=jax.ShapeDtypeStruct((Rp, Dout), x.dtype),
        grid=(Rp // tm,),
        in_specs=in_specs,
        out_specs=pl.BlockSpec((tm, Dout), lambda i: (i, 0)),
        compiler_params=_cparams(("parallel",)),
    )(*args)
    return out[:R]


# ----------------------------------------------------------------------------
# LayerNorm fused into the consumer matmul (QKV / Q projections)
# ----------------------------------------------------------------------------
def _ln_mm_kernel(x_ref, g_ref, b_ref, w_ref, o_ref, *, eps):
    x = x_ref[...].astype(_F32)
    mu = jnp.mean(x, axis=-1, keepdims=True)
    var = jnp.mean((x - mu) ** 2, axis=-1, keepdims=True)
    xn = (x - mu) * jax.lax.rsqrt(var + eps) * g_ref[...] + b_ref[...]
    o_ref[...] = jnp.dot(xn.astype(_BF16), w_ref[...],
                         preferred_element_type=_F32).astype(o_ref.dtype)


def pallas_ln_matmul(x, g, b, w, eps=1e-5):
    R, Din = x.shape
    Dout = w.shape[1]
    tm, Rp = _row_tile(R)
    xp = _pad_rows(x, Rp)
    out = pl.pallas_call(
        functools.partial(_ln_mm_kernel, eps=eps),
        out_shape=jax.ShapeDtypeStruct((Rp, Dout), x.dtype),
        grid=(Rp // tm,),
        in_specs=[pl.BlockSpec((tm, Din), lambda i: (i, 0)),
                  pl.BlockSpec((1, Din), lambda i: (0, 0)),
                  pl.BlockSpec((1, Din), lambda i: (0, 0)),
                  pl.BlockSpec((Din, Dout), lambda i: (0, 0))],
        out_specs=pl.BlockSpec((tm, Dout), lambda i: (i, 0)),
        compiler_params=_cparams(("parallel",)),
    )(xp, g.reshape(1, Din).astype(_F32), b.reshape(1, Din).astype(_F32),
      w.astype(_BF16))
    return out[:R]


# ----------------------------------------------------------------------------
# LayerNorm + GEGLU (w1 projection + x * gelu(gate)) in one kernel
# ----------------------------------------------------------------------------
def _ln_geglu_kernel(x_ref, g_ref, b_ref, wa_ref, ba_ref, wg_ref, bg_ref, o_ref, *, eps):
    x = x_ref[...].astype(_F32)
    mu = jnp.mean(x, axis=-1, keepdims=True)
    var = jnp.mean((x - mu) ** 2, axis=-1, keepdims=True)
    xn = ((x - mu) * jax.lax.rsqrt(var + eps) * g_ref[...] + b_ref[...]).astype(_BF16)
    a = jnp.dot(xn, wa_ref[...], preferred_element_type=_F32) + ba_ref[...]
    gt = jnp.dot(xn, wg_ref[...], preferred_element_type=_F32) + bg_ref[...]
    gelu = 0.5 * gt * (1.0 + jax.lax.erf(gt * 0.7071067811865476))   # exact GELU
    o_ref[...] = (a * gelu).astype(o_ref.dtype)


def pallas_ln_geglu(x, g, b, wa, ba, wg, bg, eps=1e-5):
    R, Din = x.shape
    Dout = wa.shape[1]
    tm, Rp = _row_tile(R)
    xp = _pad_rows(x, Rp)
    out = pl.pallas_call(
        functools.partial(_ln_geglu_kernel, eps=eps),
        out_shape=jax.ShapeDtypeStruct((Rp, Dout), x.dtype),
        grid=(Rp // tm,),
        in_specs=[pl.BlockSpec((tm, Din), lambda i: (i, 0)),
                  pl.BlockSpec((1, Din), lambda i: (0, 0)),
                  pl.BlockSpec((1, Din), lambda i: (0, 0)),
                  pl.BlockSpec((Din, Dout), lambda i: (0, 0)),
                  pl.BlockSpec((1, Dout), lambda i: (0, 0)),
                  pl.BlockSpec((Din, Dout), lambda i: (0, 0)),
                  pl.BlockSpec((1, Dout), lambda i: (0, 0))],
        out_specs=pl.BlockSpec((tm, Dout), lambda i: (i, 0)),
        compiler_params=_cparams(("parallel",)),
    )(xp, g.reshape(1, Din).astype(_F32), b.reshape(1, Din).astype(_F32),
      wa.astype(_BF16), ba.reshape(1, Dout).astype(_F32),
      wg.astype(_BF16), bg.reshape(1, Dout).astype(_F32))
    return out[:R]


# ----------------------------------------------------------------------------
# output projection with fused  residual + gate * (x @ w + b)  epilogue
# ----------------------------------------------------------------------------
def _out_proj_kernel(x_ref, w_ref, b_ref, res_ref, gate_ref, o_ref):
    y = jnp.dot(x_ref[...].astype(_BF16), w_ref[...], preferred_element_type=_F32)
    y = y + b_ref[...]
    o_ref[...] = (res_ref[...].astype(_F32) + gate_ref[...] * y).astype(o_ref.dtype)


def pallas_out_proj(x, w, b, res, gate):
    """res + gate * (x @ w + b).  x: (R, Din), res: (R, Dout), gate: scalar-like."""
    R, Din = x.shape
    Dout = w.shape[1]
    tm, Rp = _row_tile(R)
    xp = _pad_rows(x, Rp)
    rp = _pad_rows(res, Rp)
    out = pl.pallas_call(
        _out_proj_kernel,
        out_shape=jax.ShapeDtypeStruct((Rp, Dout), res.dtype),
        grid=(Rp // tm,),
        in_specs=[pl.BlockSpec((tm, Din), lambda i: (i, 0)),
                  pl.BlockSpec((Din, Dout), lambda i: (0, 0)),
                  pl.BlockSpec((1, Dout), lambda i: (0, 0)),
                  pl.BlockSpec((tm, Dout), lambda i: (i, 0)),
                  pl.BlockSpec((1, 1), lambda i: (0, 0))],
        out_specs=pl.BlockSpec((tm, Dout), lambda i: (i, 0)),
        compiler_params=_cparams(("parallel",)),
    )(xp, w.astype(_BF16), b.reshape(1, Dout).astype(_F32), rp,
      jnp.reshape(gate, (1, 1)).astype(_F32))
    return out[:R]


# ----------------------------------------------------------------------------
# flash-style attention: grid (BH, q-tiles, kv-tiles), online softmax in VMEM
# ----------------------------------------------------------------------------
def _flash_attn_kernel(q_ref, k_ref, v_ref, o_ref, m_sc, l_sc, acc_sc, *,
                       scale, kv_len):
    ki = pl.program_id(2)

    @pl.when(ki == 0)
    def _init():
        m_sc[...] = jnp.full(m_sc.shape, -jnp.inf, m_sc.dtype)
        l_sc[...] = jnp.zeros(l_sc.shape, l_sc.dtype)
        acc_sc[...] = jnp.zeros(acc_sc.shape, acc_sc.dtype)

    # scale folded into q (O(N*C) instead of O(N*M)); bf16 operands, f32 acc
    q = (q_ref[0].astype(_F32) * scale).astype(_BF16)        # (tq, C)
    k = k_ref[0].astype(_BF16)                                # (tk, C)
    v = v_ref[0].astype(_BF16)

    s = jax.lax.dot_general(q, k, (((1,), (1,)), ((), ())),
                            preferred_element_type=_F32)      # (tq, tk)
    if kv_len is not None:  # mask padded kv columns (static decision)
        tk = k.shape[0]
        col = ki * tk + jax.lax.broadcasted_iota(jnp.int32, s.shape, 1)
        s = jnp.where(col < kv_len, s, -jnp.inf)

    m_prev = m_sc[...]
    m_new = jnp.maximum(m_prev, jnp.max(s, axis=-1, keepdims=True))
    alpha = jnp.exp(m_prev - m_new)
    p = jnp.exp(s - m_new)
    l_sc[...] = alpha * l_sc[...] + jnp.sum(p, axis=-1, keepdims=True)
    acc_sc[...] = alpha * acc_sc[...] + jnp.dot(p.astype(_BF16), v,
                                                preferred_element_type=_F32)
    m_sc[...] = m_new

    @pl.when(ki == pl.num_programs(2) - 1)
    def _fin():
        inv = pl.reciprocal(l_sc[...], approx=True)
        o_ref[0] = (acc_sc[...] * inv).astype(o_ref.dtype)


def pallas_flash_attention(q, k, v):
    """q: (BH, N, C), k/v: (BH, M, C) -> (BH, N, C)."""
    BH, N, C = q.shape
    M = k.shape[1]
    scale = float(C) ** -0.5
    tq, Np = _seq_tile(N)
    tk, Mp = _seq_tile(M)
    if Np != N:
        q = jnp.pad(q, ((0, 0), (0, Np - N), (0, 0)))
    if Mp != M:
        k = jnp.pad(k, ((0, 0), (0, Mp - M), (0, 0)))
        v = jnp.pad(v, ((0, 0), (0, Mp - M), (0, 0)))
    kv_len = M if Mp != M else None
    out = pl.pallas_call(
        functools.partial(_flash_attn_kernel, scale=scale, kv_len=kv_len),
        out_shape=jax.ShapeDtypeStruct((BH, Np, C), q.dtype),
        grid=(BH, Np // tq, Mp // tk),
        in_specs=[pl.BlockSpec((1, tq, C), lambda b, qi, ki: (b, qi, 0)),
                  pl.BlockSpec((1, tk, C), lambda b, qi, ki: (b, ki, 0)),
                  pl.BlockSpec((1, tk, C), lambda b, qi, ki: (b, ki, 0))],
        out_specs=pl.BlockSpec((1, tq, C), lambda b, qi, ki: (b, qi, 0)),
        scratch_shapes=[pltpu.VMEM((tq, 1), _F32),
                        pltpu.VMEM((tq, 1), _F32),
                        pltpu.VMEM((tq, C), _F32)],
        compiler_params=_cparams(("parallel", "parallel", "arbitrary")),
    )(q, k, v)
    return out[:, :N, :] if Np != N else out


# ----------------------------------------------------------------------------
# GroupNorm(32, eps=1e-6, affine) fused with proj_in (1x1 conv == matmul)
# ----------------------------------------------------------------------------
def _gn_proj_kernel(x_ref, oh_ref, oht_ref, g_ref, b_ref, w_ref, bw_ref, o_ref, *,
                    inv_n, eps):
    x = x_ref[0].astype(_F32)                                     # (HW, Cin)
    oh = oh_ref[...]                                              # (Cin, G)
    oht = oht_ref[...]                                            # (G, Cin)
    s1 = jnp.sum(x, axis=0, keepdims=True)                        # (1, Cin)
    s2 = jnp.sum(x * x, axis=0, keepdims=True)
    gmean = jnp.dot(s1, oh, preferred_element_type=_F32) * inv_n  # (1, G)
    gmsq = jnp.dot(s2, oh, preferred_element_type=_F32) * inv_n
    gvar = jnp.maximum(gmsq - gmean * gmean, 0.0)
    ginv = jax.lax.rsqrt(gvar + eps)
    cmean = jnp.dot(gmean, oht, preferred_element_type=_F32)      # (1, Cin)
    cinv = jnp.dot(ginv, oht, preferred_element_type=_F32)
    xn = (x - cmean) * cinv * g_ref[...] + b_ref[...]
    o_ref[0] = (jnp.dot(xn.astype(_BF16), w_ref[...], preferred_element_type=_F32)
                + bw_ref[...]).astype(o_ref.dtype)


def pallas_groupnorm_proj(x_tok, gn_g, gn_b, w, b, groups, eps=1e-6):
    """x_tok: (B, HW, Cin) -> GroupNorm over (group-channels, HW) + proj_in matmul."""
    B, HW, Cin = x_tok.shape
    Dout = w.shape[1]
    cg = Cin // groups
    onehot = (jnp.arange(Cin)[:, None] // cg ==
              jnp.arange(groups)[None, :]).astype(_F32)           # (Cin, G)
    return pl.pallas_call(
        functools.partial(_gn_proj_kernel, inv_n=1.0 / float(HW * cg), eps=eps),
        out_shape=jax.ShapeDtypeStruct((B, HW, Dout), x_tok.dtype),
        grid=(B,),
        in_specs=[pl.BlockSpec((1, HW, Cin), lambda i: (i, 0, 0)),
                  pl.BlockSpec((Cin, groups), lambda i: (0, 0)),
                  pl.BlockSpec((groups, Cin), lambda i: (0, 0)),
                  pl.BlockSpec((1, Cin), lambda i: (0, 0)),
                  pl.BlockSpec((1, Cin), lambda i: (0, 0)),
                  pl.BlockSpec((Cin, Dout), lambda i: (0, 0)),
                  pl.BlockSpec((1, Dout), lambda i: (0, 0))],
        out_specs=pl.BlockSpec((1, HW, Dout), lambda i: (i, 0, 0)),
        compiler_params=_cparams(("parallel",)),
    )(x_tok, onehot, onehot.T, gn_g.reshape(1, Cin).astype(_F32),
      gn_b.reshape(1, Cin).astype(_F32), w.astype(_BF16),
      b.reshape(1, Dout).astype(_F32))


# ----------------------------------------------------------------------------
# module composition (JAX glue around the kernels)
# ----------------------------------------------------------------------------
def _split_heads(t2d, B, T, H, C):
    return t2d.reshape(B, T, H, C).transpose(0, 2, 1, 3).reshape(B * H, T, C)


def _merge_heads(t, B, H):
    BH, T, C = t.shape
    return t.reshape(B, H, T, C).transpose(0, 2, 1, 3).reshape(B * T, H * C)


def _mha(q2d, k2d, v2d, B, Tq, Tkv, H):
    inner = q2d.shape[1]
    C = inner // H
    o = pallas_flash_attention(_split_heads(q2d, B, Tq, H, C),
                               _split_heads(k2d, B, Tkv, H, C),
                               _split_heads(v2d, B, Tkv, H, C))
    return _merge_heads(o, B, H)                                  # (B*Tq, inner)


def self_attention_block(x, ln_g, ln_b, ap, H, *, residual2d, gate, out_tokens=None):
    """residual + gate * to_out(attn(LN(x)))   with fused LN+QKV and fused epilogue."""
    B, T, D = x.shape
    inner = ap["wq"].shape[1]
    wqkv = jnp.concatenate([ap["wq"], ap["wk"], ap["wv"]], axis=1)   # fused QKV
    qkv = pallas_ln_matmul(x.reshape(B * T, D), ln_g, ln_b, wqkv)
    o = _mha(qkv[:, :inner], qkv[:, inner:2 * inner], qkv[:, 2 * inner:], B, T, T, H)
    if out_tokens is not None and out_tokens != T:
        o = o.reshape(B, T, inner)[:, :out_tokens].reshape(B * out_tokens, inner)
    return pallas_out_proj(o, ap["wo"], ap["bo"], residual2d, gate)


def cross_attention_block(x, context, ln_g, ln_b, ap, H, *, residual2d, gate):
    B, N, D = x.shape
    M = context.shape[1]
    inner = ap["wq"].shape[1]
    q2d = pallas_ln_matmul(x.reshape(B * N, D), ln_g, ln_b, ap["wq"])
    wkv = jnp.concatenate([ap["wk"], ap["wv"]], axis=1)              # fused KV
    kv = pallas_matmul(context.reshape(B * M, context.shape[-1]), wkv)
    o = _mha(q2d, kv[:, :inner], kv[:, inner:], B, N, M, H)
    return pallas_out_proj(o, ap["wo"], ap["bo"], residual2d, gate)


def feedforward_block(x2d, ln_g, ln_b, fp, *, residual2d, gate):
    """residual + gate * Linear(GEGLU(LN(x)))."""
    ffi = fp["w2"].shape[0]
    h = pallas_ln_geglu(x2d, ln_g, ln_b,
                        fp["w1"][:, :ffi], fp["b1"][:ffi],
                        fp["w1"][:, ffi:], fp["b1"][ffi:])
    return pallas_out_proj(h, fp["w2"], fp["b2"], residual2d, gate)


def fuser_forward(fp, x, objs, H):
    """GatedSelfAttentionDense."""
    B, Nv, D = x.shape
    x2d = x.reshape(B * Nv, D)
    objs_p = pallas_matmul(objs.reshape(-1, objs.shape[-1]), fp["lin_w"], fp["lin_b"])
    cat = jnp.concatenate([x, objs_p.reshape(B, -1, D)], axis=1)     # (B, Nv+O, D)
    gate_a = jnp.tanh(fp["alpha_attn"])
    x2d = self_attention_block(cat, fp["norm1_g"], fp["norm1_b"], fp["attn"], H,
                               residual2d=x2d, gate=gate_a, out_tokens=Nv)
    gate_d = jnp.tanh(fp["alpha_dense"])
    x2d = feedforward_block(x2d, fp["norm2_g"], fp["norm2_b"], fp["ff"],
                            residual2d=x2d, gate=gate_d)
    return x2d.reshape(B, Nv, D)


def basic_transformer_block(p, x, context, objs, H):
    B, N, D = x.shape
    one = jnp.ones((1, 1), _F32)
    # x = attn1(norm1(x)) + x
    x2d = self_attention_block(x, p["norm1_g"], p["norm1_b"], p["attn1"], H,
                               residual2d=x.reshape(B * N, D), gate=one)
    x = x2d.reshape(B, N, D)
    # x = fuser(x, objs)
    x = fuser_forward(p["fuser"], x, objs, H)
    # x = attn2(norm2(x), context, context) + x
    x2d = cross_attention_block(x, context, p["norm2_g"], p["norm2_b"], p["attn2"], H,
                                residual2d=x.reshape(B * N, D), gate=one)
    x = x2d.reshape(B, N, D)
    # x = ff(norm3(x)) + x
    x2d = feedforward_block(x.reshape(B * N, D), p["norm3_g"], p["norm3_b"], p["ff"],
                            residual2d=x.reshape(B * N, D), gate=one)
    return x2d.reshape(B, N, D)


def spatial_transformer(params, x, context, objs, H):
    """x: (B, Cin, Hs, Ws) NCHW -> NCHW (same shape)."""
    B, Cin, Hs, Ws = x.shape
    HW = Hs * Ws
    x_tok = x.reshape(B, Cin, HW).transpose(0, 2, 1)                 # (B, HW, Cin)
    h = pallas_groupnorm_proj(x_tok, params["gn_g"], params["gn_b"],
                              params["proj_in_w"], params["proj_in_b"], groups=32)
    for bp in params["blocks"]:
        h = basic_transformer_block(bp, h, context, objs, H)
    one = jnp.ones((1, 1), _F32)
    # proj_out (1x1 conv) + residual x_in fused in one kernel
    out_tok = pallas_out_proj(h.reshape(B * HW, h.shape[-1]),
                              params["proj_out_w"], params["proj_out_b"],
                              x_tok.reshape(B * HW, Cin), one)
    return out_tok.reshape(B, HW, Cin).transpose(0, 2, 1).reshape(B, Cin, Hs, Ws)


# ----------------------------------------------------------------------------
# deterministic parameter init (shapes from the module's __init__)
# ----------------------------------------------------------------------------
def init_params(key, in_channels, ctx_dim, n_heads, d_head, depth):
    D = n_heads * d_head          # query_dim
    inner = D                     # attention inner dim
    ffi = 4 * D                   # FeedForward inner dim (mult=4)
    keys = iter(jax.random.split(key, 256))

    def w(shape, scale=0.02):
        return jax.random.normal(next(keys), shape, _F32) * scale

    def ln():
        return jnp.ones((D,), _F32), jnp.zeros((D,), _F32)

    def attn_p(dq, dk, dv):
        return dict(wq=w((dq, inner)), wk=w((dk, inner)), wv=w((dv, inner)),
                    wo=w((inner, dq)), bo=w((dq,)))

    def ff_p(d):
        return dict(w1=w((d, 2 * ffi)), b1=w((2 * ffi,)), w2=w((ffi, d)), b2=w((d,)))

    def block_p():
        n1g, n1b = ln(); n2g, n2b = ln(); n3g, n3b = ln()
        f1g, f1b = ln(); f2g, f2b = ln()
        return dict(
            norm1_g=n1g, norm1_b=n1b, norm2_g=n2g, norm2_b=n2b,
            norm3_g=n3g, norm3_b=n3b,
            attn1=attn_p(D, D, D),
            attn2=attn_p(D, ctx_dim, ctx_dim),
            ff=ff_p(D),
            fuser=dict(
                lin_w=w((ctx_dim, D)), lin_b=w((D,)),
                attn=attn_p(D, D, D), ff=ff_p(D),
                norm1_g=f1g, norm1_b=f1b, norm2_g=f2g, norm2_b=f2b,
                # reference inits these to 0.0 (zeroing the gated branch);
                # use small nonzero values so the gated path is exercised.
                alpha_attn=jnp.array(0.1, _F32),
                alpha_dense=jnp.array(0.2, _F32),
            ),
        )

    return dict(
        gn_g=jnp.ones((in_channels,), _F32),
        gn_b=jnp.zeros((in_channels,), _F32),
        proj_in_w=w((in_channels, D)), proj_in_b=w((D,)),
        blocks=[block_p() for _ in range(depth)],
        # zero_module() zeroes proj_out in the reference; small nonzero here so
        # the kernel path is exercised (forward math is unchanged).
        proj_out_w=w((D, in_channels)), proj_out_b=w((in_channels,)),
    )


# ----------------------------------------------------------------------------
if __name__ == "__main__":
    # in_channels=32 (GroupNorm(32) requires divisibility), n_heads=4, d_head=8
    # -> query_dim = 32; key_dim = value_dim = 64; depth = 1
    Cin, Hds, Ch = 32, 4, 8
    Dk = 64
    B, Hs, Ws = 2, 8, 8            # 64 visual tokens
    M, O = 8, 4                    # context tokens, grounding objects
    depth = 1

    key = jax.random.PRNGKey(0)
    kx, kc, ko, kp = jax.random.split(key, 4)
    x = jax.random.normal(kx, (B, Cin, Hs, Ws), _F32)
    context = jax.random.normal(kc, (B, M, Dk), _F32)
    objs = jax.random.normal(ko, (B, O, Dk), _F32)

    params = init_params(kp, Cin, Dk, Hds, Ch, depth)

    fwd = jax.jit(functools.partial(spatial_transformer, H=Hds))
    out = jax.block_until_ready(fwd(params, x, context, objs))

    assert out.shape == x.shape, out.shape
    assert bool(jnp.all(jnp.isfinite(out)))
    print("KERNEL_OK")
</pallas_src>

<mosaic_0001>
module attributes {stable_mosaic.version = 11 : i64} {
  func.func @_gn_proj_kernel(%arg0: i32, %arg1: memref<1x64x32xf32, #tpu.memory_space<vmem>>, %arg2: memref<32x32xf32, #tpu.memory_space<vmem>>, %arg3: memref<32x32xf32, #tpu.memory_space<vmem>>, %arg4: memref<1x32xf32, #tpu.memory_space<vmem>>, %arg5: memref<1x32xf32, #tpu.memory_space<vmem>>, %arg6: memref<32x32xbf16, #tpu.memory_space<vmem>>, %arg7: memref<1x32xf32, #tpu.memory_space<vmem>>, %arg8: memref<1x64x32xf32, #tpu.memory_space<vmem>>) attributes {dimension_semantics = [#tpu.dimension_semantics<parallel>], iteration_bounds = array<i64: 2>, scalar_prefetch = 0 : i64, scratch_operands = 0 : i64, tpu.core_type = #tpu.core_type<tc>, window_params = [{transform_indices = @transform_0, window_bounds = array<i64: 1, 64, 32>}, {pipeline_mode = #tpu.pipeline_mode<synchronous>, transform_indices = @transform_1, window_bounds = array<i64: 32, 32>}, {pipeline_mode = #tpu.pipeline_mode<synchronous>, transform_indices = @transform_2, window_bounds = array<i64: 32, 32>}, {pipeline_mode = #tpu.pipeline_mode<synchronous>, transform_indices = @transform_3, window_bounds = array<i64: 1, 32>}, {pipeline_mode = #tpu.pipeline_mode<synchronous>, transform_indices = @transform_4, window_bounds = array<i64: 1, 32>}, {pipeline_mode = #tpu.pipeline_mode<synchronous>, transform_indices = @transform_5, window_bounds = array<i64: 32, 32>}, {pipeline_mode = #tpu.pipeline_mode<synchronous>, transform_indices = @transform_6, window_bounds = array<i64: 1, 32>}, {transform_indices = @transform_7, window_bounds = array<i64: 1, 64, 32>}]} {
    %c0 = arith.constant 0 : index
    %c0_0 = arith.constant 0 : index
    %c0_1 = arith.constant 0 : index
    %0 = vector.load %arg1[%c0, %c0_0, %c0_1] : memref<1x64x32xf32, #tpu.memory_space<vmem>>, vector<1x64x32xf32>
    %1 = vector.shape_cast %0 : vector<1x64x32xf32> to vector<64x32xf32>
    %c0_2 = arith.constant 0 : index
    %c0_3 = arith.constant 0 : index
    %2 = vector.load %arg2[%c0_2, %c0_3] : memref<32x32xf32, #tpu.memory_space<vmem>>, vector<32x32xf32>
    %c0_4 = arith.constant 0 : index
    %c0_5 = arith.constant 0 : index
    %3 = vector.load %arg3[%c0_4, %c0_5] : memref<32x32xf32, #tpu.memory_space<vmem>>, vector<32x32xf32>
    %cst = arith.constant dense<0.000000e+00> : vector<32xf32>
    %4 = vector.multi_reduction <add>, %1, %cst [0] : vector<64x32xf32> to vector<32xf32>
    %5 = vector.shape_cast %4 : vector<32xf32> to vector<1x32xf32>
    %6 = arith.mulf %1, %1 : vector<64x32xf32>
    %cst_6 = arith.constant dense<0.000000e+00> : vector<32xf32>
    %7 = vector.multi_reduction <add>, %6, %cst_6 [0] : vector<64x32xf32> to vector<32xf32>
    %8 = vector.shape_cast %7 : vector<32xf32> to vector<1x32xf32>
    %cst_7 = arith.constant dense<0.000000e+00> : vector<1x32xf32>
    %9 = tpu.matmul %5, %2, %cst_7 {dimension_numbers = #tpu.dot_dimension_numbers<[1], [0], [0], [1], [0, 0, 1, 1], [], []>} : vector<1x32xf32>, vector<32x32xf32>, vector<1x32xf32> -> vector<1x32xf32>
    %cst_8 = arith.constant 1.562500e-02 : f32
    %10 = vector.broadcast %cst_8 : f32 to vector<1x32xf32>
    %11 = arith.mulf %9, %10 : vector<1x32xf32>
    %cst_9 = arith.constant dense<0.000000e+00> : vector<1x32xf32>
    %12 = tpu.matmul %8, %2, %cst_9 {dimension_numbers = #tpu.dot_dimension_numbers<[1], [0], [0], [1], [0, 0, 1, 1], [], []>} : vector<1x32xf32>, vector<32x32xf32>, vector<1x32xf32> -> vector<1x32xf32>
    %cst_10 = arith.constant 1.562500e-02 : f32
    %13 = vector.broadcast %cst_10 : f32 to vector<1x32xf32>
    %14 = arith.mulf %12, %13 : vector<1x32xf32>
    %15 = arith.mulf %11, %11 : vector<1x32xf32>
    %16 = arith.subf %14, %15 : vector<1x32xf32>
    %cst_11 = arith.constant 0.000000e+00 : f32
    %17 = vector.broadcast %cst_11 : f32 to vector<1x32xf32>
    %18 = arith.maximumf %16, %17 : vector<1x32xf32>
    %cst_12 = arith.constant 9.99999997E-7 : f32
    %19 = vector.broadcast %cst_12 : f32 to vector<1x32xf32>
    %20 = arith.addf %18, %19 : vector<1x32xf32>
    %21 = math.rsqrt %20 : vector<1x32xf32>
    %cst_13 = arith.constant dense<0.000000e+00> : vector<1x32xf32>
    %22 = tpu.matmul %11, %3, %cst_13 {dimension_numbers = #tpu.dot_dimension_numbers<[1], [0], [0], [1], [0, 0, 1, 1], [], []>} : vector<1x32xf32>, vector<32x32xf32>, vector<1x32xf32> -> vector<1x32xf32>
    %cst_14 = arith.constant dense<0.000000e+00> : vector<1x32xf32>
    %23 = tpu.matmul %21, %3, %cst_14 {dimension_numbers = #tpu.dot_dimension_numbers<[1], [0], [0], [1], [0, 0, 1, 1], [], []>} : vector<1x32xf32>, vector<32x32xf32>, vector<1x32xf32> -> vector<1x32xf32>
    %24 = vector.broadcast %22 : vector<1x32xf32> to vector<64x32xf32>
    %25 = arith.subf %1, %24 : vector<64x32xf32>
    %26 = vector.broadcast %23 : vector<1x32xf32> to vector<64x32xf32>
    %27 = arith.mulf %25, %26 : vector<64x32xf32>
    %c0_15 = arith.constant 0 : index
    %c0_16 = arith.constant 0 : index
    %28 = vector.load %arg4[%c0_15, %c0_16] : memref<1x32xf32, #tpu.memory_space<vmem>>, vector<1x32xf32>
    %29 = vector.broadcast %28 : vector<1x32xf32> to vector<64x32xf32>
    %30 = arith.mulf %27, %29 : vector<64x32xf32>
    %c0_17 = arith.constant 0 : index
    %c0_18 = arith.constant 0 : index
    %31 = vector.load %arg5[%c0_17, %c0_18] : memref<1x32xf32, #tpu.memory_space<vmem>>, vector<1x32xf32>
    %32 = vector.broadcast %31 : vector<1x32xf32> to vector<64x32xf32>
    %33 = arith.addf %30, %32 : vector<64x32xf32>
    %34 = arith.truncf %33 : vector<64x32xf32> to vector<64x32xbf16>
    %c0_19 = arith.constant 0 : index
    %c0_20 = arith.constant 0 : index
    %35 = vector.load %arg6[%c0_19, %c0_20] : memref<32x32xbf16, #tpu.memory_space<vmem>>, vector<32x32xbf16>
    %cst_21 = arith.constant dense<0.000000e+00> : vector<64x32xf32>
    %36 = tpu.matmul %34, %35, %cst_21 {dimension_numbers = #tpu.dot_dimension_numbers<[1], [0], [0], [1], [0, 0, 1, 1], [], []>} : vector<64x32xbf16>, vector<32x32xbf16>, vector<64x32xf32> -> vector<64x32xf32>
    %c0_22 = arith.constant 0 : index
    %c0_23 = arith.constant 0 : index
    %37 = vector.load %arg7[%c0_22, %c0_23] : memref<1x32xf32, #tpu.memory_space<vmem>>, vector<1x32xf32>
    %38 = vector.broadcast %37 : vector<1x32xf32> to vector<64x32xf32>
    %39 = arith.addf %36, %38 : vector<64x32xf32>
    %c0_24 = arith.constant 0 : index
    %c0_25 = arith.constant 0 : index
    %c0_26 = arith.constant 0 : index
    %40 = vector.load %arg8[%c0_24, %c0_25, %c0_26] : memref<1x64x32xf32, #tpu.memory_space<vmem>>, vector<1x64x32xf32>
    %41 = vector.shape_cast %40 : vector<1x64x32xf32> to vector<64x32xf32>
    %42 = vector.shape_cast %39 : vector<64x32xf32> to vector<1x64x32xf32>
    tpu.vector_store %arg8[%c0_24, %c0_25, %c0_26], %42 {strides = array<i32>} : memref<1x64x32xf32, #tpu.memory_space<vmem>>, vector<1x64x32xf32>,
    return
  }
  func.func @transform_0(%arg0: i32) -> (i32, i32, i32) {
    %c0_i32 = arith.constant 0 : i32
    %c0_i32_0 = arith.constant 0 : i32
    %c0_i32_1 = arith.constant 0 : i32
    return %arg0, %c0_i32, %c0_i32_0 : i32, i32, i32
  }
  func.func @transform_1(%arg0: i32) -> (i32, i32) {
    %c0_i32 = arith.constant 0 : i32
    %c0_i32_0 = arith.constant 0 : i32
    %c0_i32_1 = arith.constant 0 : i32
    return %c0_i32, %c0_i32_0 : i32, i32
  }
  func.func @transform_2(%arg0: i32) -> (i32, i32) {
    %c0_i32 = arith.constant 0 : i32
    %c0_i32_0 = arith.constant 0 : i32
    %c0_i32_1 = arith.constant 0 : i32
    return %c0_i32, %c0_i32_0 : i32, i32
  }
  func.func @transform_3(%arg0: i32) -> (i32, i32) {
    %c0_i32 = arith.constant 0 : i32
    %c0_i32_0 = arith.constant 0 : i32
    %c0_i32_1 = arith.constant 0 : i32
    return %c0_i32, %c0_i32_0 : i32, i32
  }
  func.func @transform_4(%arg0: i32) -> (i32, i32) {
    %c0_i32 = arith.constant 0 : i32
    %c0_i32_0 = arith.constant 0 : i32
    %c0_i32_1 = arith.constant 0 : i32
    return %c0_i32, %c0_i32_0 : i32, i32
  }
  func.func @transform_5(%arg0: i32) -> (i32, i32) {
    %c0_i32 = arith.constant 0 : i32
    %c0_i32_0 = arith.constant 0 : i32
    %c0_i32_1 = arith.constant 0 : i32
    return %c0_i32, %c0_i32_0 : i32, i32
  }
  func.func @transform_6(%arg0: i32) -> (i32, i32) {
    %c0_i32 = arith.constant 0 : i32
    %c0_i32_0 = arith.constant 0 : i32
    %c0_i32_1 = arith.constant 0 : i32
    return %c0_i32, %c0_i32_0 : i32, i32
  }
  func.func @transform_7(%arg0: i32) -> (i32, i32, i32) {
    %c0_i32 = arith.constant 0 : i32
    %c0_i32_0 = arith.constant 0 : i32
    %c0_i32_1 = arith.constant 0 : i32
    return %arg0, %c0_i32, %c0_i32_0 : i32, i32, i32
  }
}

module attributes {stable_mosaic.version = 11 : i64} {
  func.func @_ln_mm_kernel(%arg0: i32, %arg1: memref<128x32xf32, #tpu.memory_space<vmem>>, %arg2: memref<1x32xf32, #tpu.memory_space<vmem>>, %arg3: memref<1x32xf32, #tpu.memory_space<vmem>>, %arg4: memref<32x96xbf16, #tpu.memory_space<vmem>>, %arg5: memref<128x96xf32, #tpu.memory_space<vmem>>) attributes {dimension_semantics = [#tpu.dimension_semantics<parallel>], iteration_bounds = array<i64: 1>, scalar_prefetch = 0 : i64, scratch_operands = 0 : i64, tpu.core_type = #tpu.core_type<tc>, window_params = [{transform_indices = @transform_0, window_bounds = array<i64: 128, 32>}, {pipeline_mode = #tpu.pipeline_mode<synchronous>, transform_indices = @transform_1, window_bounds = array<i64: 1, 32>}, {pipeline_mode = #tpu.pipeline_mode<synchronous>, transform_indices = @transform_2, window_bounds = array<i64: 1, 32>}, {pipeline_mode = #tpu.pipeline_mode<synchronous>, transform_indices = @transform_3, window_bounds = array<i64: 32, 96>}, {transform_indices = @transform_4, window_bounds = array<i64: 128, 96>}]} {
    %c0 = arith.constant 0 : index
    %c0_0 = arith.constant 0 : index
    %0 = vector.load %arg1[%c0, %c0_0] : memref<128x32xf32, #tpu.memory_space<vmem>>, vector<128x32xf32>
    %cst = arith.constant dense<0.000000e+00> : vector<128xf32>
    %1 = vector.multi_reduction <add>, %0, %cst [1] : vector<128x32xf32> to vector<128xf32>
    %2 = vector.shape_cast %1 : vector<128xf32> to vector<128x1xf32>
    %cst_1 = arith.constant 3.200000e+01 : f32
    %3 = vector.broadcast %cst_1 : f32 to vector<128x1xf32>
    %4 = arith.divf %2, %3 : vector<128x1xf32>
    %5 = vector.broadcast %4 : vector<128x1xf32> to vector<128x32xf32>
    %6 = arith.subf %0, %5 : vector<128x32xf32>
    %7 = arith.mulf %6, %6 : vector<128x32xf32>
    %cst_2 = arith.constant dense<0.000000e+00> : vector<128xf32>
    %8 = vector.multi_reduction <add>, %7, %cst_2 [1] : vector<128x32xf32> to vector<128xf32>
    %9 = vector.shape_cast %8 : vector<128xf32> to vector<128x1xf32>
    %cst_3 = arith.constant 3.200000e+01 : f32
    %10 = vector.broadcast %cst_3 : f32 to vector<128x1xf32>
    %11 = arith.divf %9, %10 : vector<128x1xf32>
    %12 = vector.broadcast %4 : vector<128x1xf32> to vector<128x32xf32>
    %13 = arith.subf %0, %12 : vector<128x32xf32>
    %cst_4 = arith.constant 9.99999974E-6 : f32
    %14 = vector.broadcast %cst_4 : f32 to vector<128x1xf32>
    %15 = arith.addf %11, %14 : vector<128x1xf32>
    %16 = math.rsqrt %15 : vector<128x1xf32>
    %17 = vector.broadcast %16 : vector<128x1xf32> to vector<128x32xf32>
    %18 = arith.mulf %13, %17 : vector<128x32xf32>
    %c0_5 = arith.constant 0 : index
    %c0_6 = arith.constant 0 : index
    %19 = vector.load %arg2[%c0_5, %c0_6] : memref<1x32xf32, #tpu.memory_space<vmem>>, vector<1x32xf32>
    %20 = vector.broadcast %19 : vector<1x32xf32> to vector<128x32xf32>
    %21 = arith.mulf %18, %20 : vector<128x32xf32>
    %c0_7 = arith.constant 0 : index
    %c0_8 = arith.constant 0 : index
    %22 = vector.load %arg3[%c0_7, %c0_8] : memref<1x32xf32, #tpu.memory_space<vmem>>, vector<1x32xf32>
    %23 = vector.broadcast %22 : vector<1x32xf32> to vector<128x32xf32>
    %24 = arith.addf %21, %23 : vector<128x32xf32>
    %25 = arith.truncf %24 : vector<128x32xf32> to vector<128x32xbf16>
    %c0_9 = arith.constant 0 : index
    %c0_10 = arith.constant 0 : index
    %26 = vector.load %arg4[%c0_9, %c0_10] : memref<32x96xbf16, #tpu.memory_space<vmem>>, vector<32x96xbf16>
    %cst_11 = arith.constant dense<0.000000e+00> : vector<128x96xf32>
    %27 = tpu.matmul %25, %26, %cst_11 {dimension_numbers = #tpu.dot_dimension_numbers<[1], [0], [0], [1], [0, 0, 1, 1], [], []>} : vector<128x32xbf16>, vector<32x96xbf16>, vector<128x96xf32> -> vector<128x96xf32>
    %c0_12 = arith.constant 0 : index
    %c0_13 = arith.constant 0 : index
    %28 = vector.load %arg5[%c0_12, %c0_13] : memref<128x96xf32, #tpu.memory_space<vmem>>, vector<128x96xf32>
    tpu.vector_store %arg5[%c0_12, %c0_13], %27 {strides = array<i32>} : memref<128x96xf32, #tpu.memory_space<vmem>>, vector<128x96xf32>,
    return
  }
  func.func @transform_0(%arg0: i32) -> (i32, i32) {
    %c0_i32 = arith.constant 0 : i32
    %c0_i32_0 = arith.constant 0 : i32
    return %arg0, %c0_i32 : i32, i32
  }
  func.func @transform_1(%arg0: i32) -> (i32, i32) {
    %c0_i32 = arith.constant 0 : i32
    %c0_i32_0 = arith.constant 0 : i32
    %c0_i32_1 = arith.constant 0 : i32
    return %c0_i32, %c0_i32_0 : i32, i32
  }
  func.func @transform_2(%arg0: i32) -> (i32, i32) {
    %c0_i32 = arith.constant 0 : i32
    %c0_i32_0 = arith.constant 0 : i32
    %c0_i32_1 = arith.constant 0 : i32
    return %c0_i32, %c0_i32_0 : i32, i32
  }
  func.func @transform_3(%arg0: i32) -> (i32, i32) {
    %c0_i32 = arith.constant 0 : i32
    %c0_i32_0 = arith.constant 0 : i32
    %c0_i32_1 = arith.constant 0 : i32
    return %c0_i32, %c0_i32_0 : i32, i32
  }
  func.func @transform_4(%arg0: i32) -> (i32, i32) {
    %c0_i32 = arith.constant 0 : i32
    %c0_i32_0 = arith.constant 0 : i32
    return %arg0, %c0_i32 : i32, i32
  }
}

module attributes {stable_mosaic.version = 11 : i64} {
  func.func @_flash_attn_kernel(%arg0: i32, %arg1: i32, %arg2: i32, %arg3: memref<1x64x8xf32, #tpu.memory_space<vmem>>, %arg4: memref<1x64x8xf32, #tpu.memory_space<vmem>>, %arg5: memref<1x64x8xf32, #tpu.memory_space<vmem>>, %arg6: memref<1x64x8xf32, #tpu.memory_space<vmem>>, %arg7: memref<64x1xf32, #tpu.memory_space<vmem>>, %arg8: memref<64x1xf32, #tpu.memory_space<vmem>>, %arg9: memref<64x8xf32, #tpu.memory_space<vmem>>) attributes {dimension_semantics = [#tpu.dimension_semantics<parallel>, #tpu.dimension_semantics<parallel>, #tpu.dimension_semantics<arbitrary>], iteration_bounds = array<i64: 8, 1, 1>, scalar_prefetch = 0 : i64, scratch_operands = 3 : i64, tpu.core_type = #tpu.core_type<tc>, window_params = [{transform_indices = @transform_0, window_bounds = array<i64: 1, 64, 8>}, {transform_indices = @transform_1, window_bounds = array<i64: 1, 64, 8>}, {transform_indices = @transform_2, window_bounds = array<i64: 1, 64, 8>}, {transform_indices = @transform_3, window_bounds = array<i64: 1, 64, 8>}]} {
    %c0_i32 = arith.constant 0 : i32
    %0 = arith.cmpi eq, %arg2, %c0_i32 : i32
    %1 = arith.extui %0 : i1 to i32
    %c0_i32_0 = arith.constant 0 : i32
    %2 = arith.cmpi ne, %1, %c0_i32_0 : i32
    scf.if %2 {
      %cst_27 = arith.constant 0xFF800000 : f32
      %41 = vector.broadcast %cst_27 : f32 to vector<64x1xf32>
      %c0_28 = arith.constant 0 : index
      %c0_29 = arith.constant 0 : index
      %42 = vector.load %arg7[%c0_28, %c0_29] : memref<64x1xf32, #tpu.memory_space<vmem>>, vector<64x1xf32>
      tpu.vector_store %arg7[%c0_28, %c0_29], %41 {strides = array<i32>} : memref<64x1xf32, #tpu.memory_space<vmem>>, vector<64x1xf32>,
      %cst_30 = arith.constant 0.000000e+00 : f32
      %43 = vector.broadcast %cst_30 : f32 to vector<64x1xf32>
      %c0_31 = arith.constant 0 : index
      %c0_32 = arith.constant 0 : index
      %44 = vector.load %arg8[%c0_31, %c0_32] : memref<64x1xf32, #tpu.memory_space<vmem>>, vector<64x1xf32>
      tpu.vector_store %arg8[%c0_31, %c0_32], %43 {strides = array<i32>} : memref<64x1xf32, #tpu.memory_space<vmem>>, vector<64x1xf32>,
      %cst_33 = arith.constant 0.000000e+00 : f32
      %45 = vector.broadcast %cst_33 : f32 to vector<64x8xf32>
      %c0_34 = arith.constant 0 : index
      %c0_35 = arith.constant 0 : index
      %46 = vector.load %arg9[%c0_34, %c0_35] : memref<64x8xf32, #tpu.memory_space<vmem>>, vector<64x8xf32>
      tpu.vector_store %arg9[%c0_34, %c0_35], %45 {strides = array<i32>} : memref<64x8xf32, #tpu.memory_space<vmem>>, vector<64x8xf32>,
    } else {
    }
    %c0 = arith.constant 0 : index
    %c0_1 = arith.constant 0 : index
    %c0_2 = arith.constant 0 : index
    %3 = vector.load %arg3[%c0, %c0_1, %c0_2] : memref<1x64x8xf32, #tpu.memory_space<vmem>>, vector<1x64x8xf32>
    %4 = vector.shape_cast %3 : vector<1x64x8xf32> to vector<64x8xf32>
    %cst = arith.constant 0.353553385 : f32
    %5 = vector.broadcast %cst : f32 to vector<64x8xf32>
    %6 = arith.mulf %4, %5 : vector<64x8xf32>
    %7 = arith.truncf %6 : vector<64x8xf32> to vector<64x8xbf16>
    %c0_3 = arith.constant 0 : index
    %c0_4 = arith.constant 0 : index
    %c0_5 = arith.constant 0 : index
    %8 = vector.load %arg4[%c0_3, %c0_4, %c0_5] : memref<1x64x8xf32, #tpu.memory_space<vmem>>, vector<1x64x8xf32>
    %9 = vector.shape_cast %8 : vector<1x64x8xf32> to vector<64x8xf32>
    %10 = arith.truncf %9 : vector<64x8xf32> to vector<64x8xbf16>
    %c0_6 = arith.constant 0 : index
    %c0_7 = arith.constant 0 : index
    %c0_8 = arith.constant 0 : index
    %11 = vector.load %arg5[%c0_6, %c0_7, %c0_8] : memref<1x64x8xf32, #tpu.memory_space<vmem>>, vector<1x64x8xf32>
    %12 = vector.shape_cast %11 : vector<1x64x8xf32> to vector<64x8xf32>
    %13 = arith.truncf %12 : vector<64x8xf32> to vector<64x8xbf16>
    %cst_9 = arith.constant dense<0.000000e+00> : vector<64x64xf32>
    %14 = tpu.matmul %7, %10, %cst_9 {dimension_numbers = #tpu.dot_dimension_numbers<[1], [1], [0], [0], [0, 0, 1, 0], [], []>} : vector<64x8xbf16>, vector<64x8xbf16>, vector<64x64xf32> -> vector<64x64xf32>
    %c0_10 = arith.constant 0 : index
    %c0_11 = arith.constant 0 : index
    %15 = vector.load %arg7[%c0_10, %c0_11] : memref<64x1xf32, #tpu.memory_space<vmem>>, vector<64x1xf32>
    %cst_12 = arith.constant dense<0xFF800000> : vector<64xf32>
    %16 = vector.multi_reduction <maximumf>, %14, %cst_12 [1] : vector<64x64xf32> to vector<64xf32>
    %17 = vector.shape_cast %16 : vector<64xf32> to vector<64x1xf32>
    %18 = arith.maximumf %15, %17 : vector<64x1xf32>
    %19 = arith.subf %15, %18 : vector<64x1xf32>
    %20 = math.exp %19 : vector<64x1xf32>
    %21 = vector.broadcast %18 : vector<64x1xf32> to vector<64x64xf32>
    %22 = arith.subf %14, %21 : vector<64x64xf32>
    %23 = math.exp %22 : vector<64x64xf32>
    %c0_13 = arith.constant 0 : index
    %c0_14 = arith.constant 0 : index
    %24 = vector.load %arg8[%c0_13, %c0_14] : memref<64x1xf32, #tpu.memory_space<vmem>>, vector<64x1xf32>
    %25 = arith.mulf %20, %24 : vector<64x1xf32>
    %cst_15 = arith.constant dense<0.000000e+00> : vector<64xf32>
    %26 = vector.multi_reduction <add>, %23, %cst_15 [1] : vector<64x64xf32> to vector<64xf32>
    %27 = vector.shape_cast %26 : vector<64xf32> to vector<64x1xf32>
    %28 = arith.addf %25, %27 : vector<64x1xf32>
    %c0_16 = arith.constant 0 : index
    %c0_17 = arith.constant 0 : index
    %29 = vector.load %arg8[%c0_16, %c0_17] : memref<64x1xf32, #tpu.memory_space<vmem>>, vector<64x1xf32>
    tpu.vector_store %arg8[%c0_16, %c0_17], %28 {strides = array<i32>} : memref<64x1xf32, #tpu.memory_space<vmem>>, vector<64x1xf32>,
    %c0_18 = arith.constant 0 : index
    %c0_19 = arith.constant 0 : index
    %30 = vector.load %arg9[%c0_18, %c0_19] : memref<64x8xf32, #tpu.memory_space<vmem>>, vector<64x8xf32>
    %31 = vector.broadcast %20 : vector<64x1xf32> to vector<64x8xf32>
    %32 = arith.mulf %31, %30 : vector<64x8xf32>
    %33 = arith.truncf %23 : vector<64x64xf32> to vector<64x64xbf16>
    %cst_20 = arith.constant dense<0.000000e+00> : vector<64x8xf32>
    %34 = tpu.matmul %33, %13, %cst_20 {dimension_numbers = #tpu.dot_dimension_numbers<[1], [0], [0], [1], [0, 0, 1, 1], [], []>} : vector<64x64xbf16>, vector<64x8xbf16>, vector<64x8xf32> -> vector<64x8xf32>
    %35 = arith.addf %32, %34 : vector<64x8xf32>
    %c0_21 = arith.constant 0 : index
    %c0_22 = arith.constant 0 : index
    %36 = vector.load %arg9[%c0_21, %c0_22] : memref<64x8xf32, #tpu.memory_space<vmem>>, vector<64x8xf32>
    tpu.vector_store %arg9[%c0_21, %c0_22], %35 {strides = array<i32>} : memref<64x8xf32, #tpu.memory_space<vmem>>, vector<64x8xf32>,
    %c0_23 = arith.constant 0 : index
    %c0_24 = arith.constant 0 : index
    %37 = vector.load %arg7[%c0_23, %c0_24] : memref<64x1xf32, #tpu.memory_space<vmem>>, vector<64x1xf32>
    tpu.vector_store %arg7[%c0_23, %c0_24], %18 {strides = array<i32>} : memref<64x1xf32, #tpu.memory_space<vmem>>, vector<64x1xf32>,
    %c0_i32_25 = arith.constant 0 : i32
    %38 = arith.cmpi eq, %arg2, %c0_i32_25 : i32
    %39 = arith.extui %38 : i1 to i32
    %c0_i32_26 = arith.constant 0 : i32
    %40 = arith.cmpi ne, %39, %c0_i32_26 : i32
    scf.if %40 {
      %c0_27 = arith.constant 0 : index
      %c0_28 = arith.constant 0 : index
      %41 = vector.load %arg8[%c0_27, %c0_28] : memref<64x1xf32, #tpu.memory_space<vmem>>, vector<64x1xf32>
      %42 = tpu.reciprocal %41 {approx = true} : vector<64x1xf32> -> vector<64x1xf32>
      %c0_29 = arith.constant 0 : index
      %c0_30 = arith.constant 0 : index
      %43 = vector.load %arg9[%c0_29, %c0_30] : memref<64x8xf32, #tpu.memory_space<vmem>>, vector<64x8xf32>
      %44 = vector.broadcast %42 : vector<64x1xf32> to vector<64x8xf32>
      %45 = arith.mulf %43, %44 : vector<64x8xf32>
      %c0_31 = arith.constant 0 : index
      %c0_32 = arith.constant 0 : index
      %c0_33 = arith.constant 0 : index
      %46 = vector.load %arg6[%c0_31, %c0_32, %c0_33] : memref<1x64x8xf32, #tpu.memory_space<vmem>>, vector<1x64x8xf32>
      %47 = vector.shape_cast %46 : vector<1x64x8xf32> to vector<64x8xf32>
      %48 = vector.shape_cast %45 : vector<64x8xf32> to vector<1x64x8xf32>
      tpu.vector_store %arg6[%c0_31, %c0_32, %c0_33], %48 {strides = array<i32>} : memref<1x64x8xf32, #tpu.memory_space<vmem>>, vector<1x64x8xf32>,
    } else {
    }
    return
  }
  func.func @transform_0(%arg0: i32, %arg1: i32, %arg2: i32) -> (i32, i32, i32) {
    %c0_i32 = arith.constant 0 : i32
    %c0_i32_0 = arith.constant 0 : i32
    return %arg0, %arg1, %c0_i32 : i32, i32, i32
  }
  func.func @transform_1(%arg0: i32, %arg1: i32, %arg2: i32) -> (i32, i32, i32) {
    %c0_i32 = arith.constant 0 : i32
    %c0_i32_0 = arith.constant 0 : i32
    return %arg0, %arg2, %c0_i32 : i32, i32, i32
  }
  func.func @transform_2(%arg0: i32, %arg1: i32, %arg2: i32) -> (i32, i32, i32) {
    %c0_i32 = arith.constant 0 : i32
    %c0_i32_0 = arith.constant 0 : i32
    return %arg0, %arg2, %c0_i32 : i32, i32, i32
  }
  func.func @transform_3(%arg0: i32, %arg1: i32, %arg2: i32) -> (i32, i32, i32) {
    %c0_i32 = arith.constant 0 : i32
    %c0_i32_0 = arith.constant 0 : i32
    return %arg0, %arg1, %c0_i32 : i32, i32, i32
  }
}

module attributes {stable_mosaic.version = 11 : i64} {
  func.func @_mm_bias_kernel(%arg0: i32, %arg1: memref<8x64xf32, #tpu.memory_space<vmem>>, %arg2: memref<64x32xbf16, #tpu.memory_space<vmem>>, %arg3: memref<1x32xf32, #tpu.memory_space<vmem>>, %arg4: memref<8x32xf32, #tpu.memory_space<vmem>>) attributes {dimension_semantics = [#tpu.dimension_semantics<parallel>], iteration_bounds = array<i64: 1>, scalar_prefetch = 0 : i64, scratch_operands = 0 : i64, tpu.core_type = #tpu.core_type<tc>, window_params = [{transform_indices = @transform_0, window_bounds = array<i64: 8, 64>}, {pipeline_mode = #tpu.pipeline_mode<synchronous>, transform_indices = @transform_1, window_bounds = array<i64: 64, 32>}, {pipeline_mode = #tpu.pipeline_mode<synchronous>, transform_indices = @transform_2, window_bounds = array<i64: 1, 32>}, {transform_indices = @transform_3, window_bounds = array<i64: 8, 32>}]} {
    %c0 = arith.constant 0 : index
    %c0_0 = arith.constant 0 : index
    %0 = vector.load %arg1[%c0, %c0_0] : memref<8x64xf32, #tpu.memory_space<vmem>>, vector<8x64xf32>
    %1 = arith.truncf %0 : vector<8x64xf32> to vector<8x64xbf16>
    %c0_1 = arith.constant 0 : index
    %c0_2 = arith.constant 0 : index
    %2 = vector.load %arg2[%c0_1, %c0_2] : memref<64x32xbf16, #tpu.memory_space<vmem>>, vector<64x32xbf16>
    %cst = arith.constant dense<0.000000e+00> : vector<8x32xf32>
    %3 = tpu.matmul %1, %2, %cst {dimension_numbers = #tpu.dot_dimension_numbers<[1], [0], [0], [1], [0, 0, 1, 1], [], []>} : vector<8x64xbf16>, vector<64x32xbf16>, vector<8x32xf32> -> vector<8x32xf32>
    %c0_3 = arith.constant 0 : index
    %c0_4 = arith.constant 0 : index
    %4 = vector.load %arg3[%c0_3, %c0_4] : memref<1x32xf32, #tpu.memory_space<vmem>>, vector<1x32xf32>
    %5 = vector.broadcast %4 : vector<1x32xf32> to vector<8x32xf32>
    %6 = arith.addf %3, %5 : vector<8x32xf32>
    %c0_5 = arith.constant 0 : index
    %c0_6 = arith.constant 0 : index
    %7 = vector.load %arg4[%c0_5, %c0_6] : memref<8x32xf32, #tpu.memory_space<vmem>>, vector<8x32xf32>
    tpu.vector_store %arg4[%c0_5, %c0_6], %6 {strides = array<i32>} : memref<8x32xf32, #tpu.memory_space<vmem>>, vector<8x32xf32>,
    return
  }
  func.func @transform_0(%arg0: i32) -> (i32, i32) {
    %c0_i32 = arith.constant 0 : i32
    %c0_i32_0 = arith.constant 0 : i32
    return %arg0, %c0_i32 : i32, i32
  }
  func.func @transform_1(%arg0: i32) -> (i32, i32) {
    %c0_i32 = arith.constant 0 : i32
    %c0_i32_0 = arith.constant 0 : i32
    %c0_i32_1 = arith.constant 0 : i32
    return %c0_i32, %c0_i32_0 : i32, i32
  }
  func.func @transform_2(%arg0: i32) -> (i32, i32) {
    %c0_i32 = arith.constant 0 : i32
    %c0_i32_0 = arith.constant 0 : i32
    %c0_i32_1 = arith.constant 0 : i32
    return %c0_i32, %c0_i32_0 : i32, i32
  }
  func.func @transform_3(%arg0: i32) -> (i32, i32) {
    %c0_i32 = arith.constant 0 : i32
    %c0_i32_0 = arith.constant 0 : i32
    return %arg0, %c0_i32 : i32, i32
  }
}

module attributes {stable_mosaic.version = 11 : i64} {
  func.func @_out_proj_kernel(%arg0: i32, %arg1: memref<128x32xf32, #tpu.memory_space<vmem>>, %arg2: memref<32x32xbf16, #tpu.memory_space<vmem>>, %arg3: memref<1x32xf32, #tpu.memory_space<vmem>>, %arg4: memref<128x32xf32, #tpu.memory_space<vmem>>, %arg5: memref<1x1xf32, #tpu.memory_space<vmem>>, %arg6: memref<128x32xf32, #tpu.memory_space<vmem>>) attributes {dimension_semantics = [#tpu.dimension_semantics<parallel>], iteration_bounds = array<i64: 1>, scalar_prefetch = 0 : i64, scratch_operands = 0 : i64, tpu.core_type = #tpu.core_type<tc>, window_params = [{transform_indices = @transform_0, window_bounds = array<i64: 128, 32>}, {pipeline_mode = #tpu.pipeline_mode<synchronous>, transform_indices = @transform_1, window_bounds = array<i64: 32, 32>}, {pipeline_mode = #tpu.pipeline_mode<synchronous>, transform_indices = @transform_2, window_bounds = array<i64: 1, 32>}, {transform_indices = @transform_3, window_bounds = array<i64: 128, 32>}, {pipeline_mode = #tpu.pipeline_mode<synchronous>, transform_indices = @transform_4, window_bounds = array<i64: 1, 1>}, {transform_indices = @transform_5, window_bounds = array<i64: 128, 32>}]} {
    %c0 = arith.constant 0 : index
    %c0_0 = arith.constant 0 : index
    %0 = vector.load %arg1[%c0, %c0_0] : memref<128x32xf32, #tpu.memory_space<vmem>>, vector<128x32xf32>
    %1 = arith.truncf %0 : vector<128x32xf32> to vector<128x32xbf16>
    %c0_1 = arith.constant 0 : index
    %c0_2 = arith.constant 0 : index
    %2 = vector.load %arg2[%c0_1, %c0_2] : memref<32x32xbf16, #tpu.memory_space<vmem>>, vector<32x32xbf16>
    %cst = arith.constant dense<0.000000e+00> : vector<128x32xf32>
    %3 = tpu.matmul %1, %2, %cst {dimension_numbers = #tpu.dot_dimension_numbers<[1], [0], [0], [1], [0, 0, 1, 1], [], []>} : vector<128x32xbf16>, vector<32x32xbf16>, vector<128x32xf32> -> vector<128x32xf32>
    %c0_3 = arith.constant 0 : index
    %c0_4 = arith.constant 0 : index
    %4 = vector.load %arg3[%c0_3, %c0_4] : memref<1x32xf32, #tpu.memory_space<vmem>>, vector<1x32xf32>
    %5 = vector.broadcast %4 : vector<1x32xf32> to vector<128x32xf32>
    %6 = arith.addf %3, %5 : vector<128x32xf32>
    %c0_5 = arith.constant 0 : index
    %c0_6 = arith.constant 0 : index
    %7 = vector.load %arg4[%c0_5, %c0_6] : memref<128x32xf32, #tpu.memory_space<vmem>>, vector<128x32xf32>
    %c0_7 = arith.constant 0 : index
    %c0_8 = arith.constant 0 : index
    %8 = vector.load %arg5[%c0_7, %c0_8] : memref<1x1xf32, #tpu.memory_space<vmem>>, vector<1x1xf32>
    %9 = vector.broadcast %8 : vector<1x1xf32> to vector<128x32xf32>
    %10 = arith.mulf %9, %6 : vector<128x32xf32>
    %11 = arith.addf %7, %10 : vector<128x32xf32>
    %c0_9 = arith.constant 0 : index
    %c0_10 = arith.constant 0 : index
    %12 = vector.load %arg6[%c0_9, %c0_10] : memref<128x32xf32, #tpu.memory_space<vmem>>, vector<128x32xf32>
    tpu.vector_store %arg6[%c0_9, %c0_10], %11 {strides = array<i32>} : memref<128x32xf32, #tpu.memory_space<vmem>>, vector<128x32xf32>,
    return
  }
  func.func @transform_0(%arg0: i32) -> (i32, i32) {
    %c0_i32 = arith.constant 0 : i32
    %c0_i32_0 = arith.constant 0 : i32
    return %arg0, %c0_i32 : i32, i32
  }
  func.func @transform_1(%arg0: i32) -> (i32, i32) {
    %c0_i32 = arith.constant 0 : i32
    %c0_i32_0 = arith.constant 0 : i32
    %c0_i32_1 = arith.constant 0 : i32
    return %c0_i32, %c0_i32_0 : i32, i32
  }
  func.func @transform_2(%arg0: i32) -> (i32, i32) {
    %c0_i32 = arith.constant 0 : i32
    %c0_i32_0 = arith.constant 0 : i32
    %c0_i32_1 = arith.constant 0 : i32
    return %c0_i32, %c0_i32_0 : i32, i32
  }
  func.func @transform_3(%arg0: i32) -> (i32, i32) {
    %c0_i32 = arith.constant 0 : i32
    %c0_i32_0 = arith.constant 0 : i32
    return %arg0, %c0_i32 : i32, i32
  }
  func.func @transform_4(%arg0: i32) -> (i32, i32) {
    %c0_i32 = arith.constant 0 : i32
    %c0_i32_0 = arith.constant 0 : i32
    %c0_i32_1 = arith.constant 0 : i32
    return %c0_i32, %c0_i32_0 : i32, i32
  }
  func.func @transform_5(%arg0: i32) -> (i32, i32) {
    %c0_i32 = arith.constant 0 : i32
    %c0_i32_0 = arith.constant 0 : i32
    return %arg0, %c0_i32 : i32, i32
  }
}

module attributes {stable_mosaic.version = 11 : i64} {
  func.func @_ln_mm_kernel(%arg0: i32, %arg1: memref<136x32xf32, #tpu.memory_space<vmem>>, %arg2: memref<1x32xf32, #tpu.memory_space<vmem>>, %arg3: memref<1x32xf32, #tpu.memory_space<vmem>>, %arg4: memref<32x96xbf16, #tpu.memory_space<vmem>>, %arg5: memref<136x96xf32, #tpu.memory_space<vmem>>) attributes {dimension_semantics = [#tpu.dimension_semantics<parallel>], iteration_bounds = array<i64: 1>, scalar_prefetch = 0 : i64, scratch_operands = 0 : i64, tpu.core_type = #tpu.core_type<tc>, window_params = [{transform_indices = @transform_0, window_bounds = array<i64: 136, 32>}, {pipeline_mode = #tpu.pipeline_mode<synchronous>, transform_indices = @transform_1, window_bounds = array<i64: 1, 32>}, {pipeline_mode = #tpu.pipeline_mode<synchronous>, transform_indices = @transform_2, window_bounds = array<i64: 1, 32>}, {pipeline_mode = #tpu.pipeline_mode<synchronous>, transform_indices = @transform_3, window_bounds = array<i64: 32, 96>}, {transform_indices = @transform_4, window_bounds = array<i64: 136, 96>}]} {
    %c0 = arith.constant 0 : index
    %c0_0 = arith.constant 0 : index
    %0 = vector.load %arg1[%c0, %c0_0] : memref<136x32xf32, #tpu.memory_space<vmem>>, vector<136x32xf32>
    %cst = arith.constant dense<0.000000e+00> : vector<136xf32>
    %1 = vector.multi_reduction <add>, %0, %cst [1] : vector<136x32xf32> to vector<136xf32>
    %2 = vector.shape_cast %1 : vector<136xf32> to vector<136x1xf32>
    %cst_1 = arith.constant 3.200000e+01 : f32
    %3 = vector.broadcast %cst_1 : f32 to vector<136x1xf32>
    %4 = arith.divf %2, %3 : vector<136x1xf32>
    %5 = vector.broadcast %4 : vector<136x1xf32> to vector<136x32xf32>
    %6 = arith.subf %0, %5 : vector<136x32xf32>
    %7 = arith.mulf %6, %6 : vector<136x32xf32>
    %cst_2 = arith.constant dense<0.000000e+00> : vector<136xf32>
    %8 = vector.multi_reduction <add>, %7, %cst_2 [1] : vector<136x32xf32> to vector<136xf32>
    %9 = vector.shape_cast %8 : vector<136xf32> to vector<136x1xf32>
    %cst_3 = arith.constant 3.200000e+01 : f32
    %10 = vector.broadcast %cst_3 : f32 to vector<136x1xf32>
    %11 = arith.divf %9, %10 : vector<136x1xf32>
    %12 = vector.broadcast %4 : vector<136x1xf32> to vector<136x32xf32>
    %13 = arith.subf %0, %12 : vector<136x32xf32>
    %cst_4 = arith.constant 9.99999974E-6 : f32
    %14 = vector.broadcast %cst_4 : f32 to vector<136x1xf32>
    %15 = arith.addf %11, %14 : vector<136x1xf32>
    %16 = math.rsqrt %15 : vector<136x1xf32>
    %17 = vector.broadcast %16 : vector<136x1xf32> to vector<136x32xf32>
    %18 = arith.mulf %13, %17 : vector<136x32xf32>
    %c0_5 = arith.constant 0 : index
    %c0_6 = arith.constant 0 : index
    %19 = vector.load %arg2[%c0_5, %c0_6] : memref<1x32xf32, #tpu.memory_space<vmem>>, vector<1x32xf32>
    %20 = vector.broadcast %19 : vector<1x32xf32> to vector<136x32xf32>
    %21 = arith.mulf %18, %20 : vector<136x32xf32>
    %c0_7 = arith.constant 0 : index
    %c0_8 = arith.constant 0 : index
    %22 = vector.load %arg3[%c0_7, %c0_8] : memref<1x32xf32, #tpu.memory_space<vmem>>, vector<1x32xf32>
    %23 = vector.broadcast %22 : vector<1x32xf32> to vector<136x32xf32>
    %24 = arith.addf %21, %23 : vector<136x32xf32>
    %25 = arith.truncf %24 : vector<136x32xf32> to vector<136x32xbf16>
    %c0_9 = arith.constant 0 : index
    %c0_10 = arith.constant 0 : index
    %26 = vector.load %arg4[%c0_9, %c0_10] : memref<32x96xbf16, #tpu.memory_space<vmem>>, vector<32x96xbf16>
    %cst_11 = arith.constant dense<0.000000e+00> : vector<136x96xf32>
    %27 = tpu.matmul %25, %26, %cst_11 {dimension_numbers = #tpu.dot_dimension_numbers<[1], [0], [0], [1], [0, 0, 1, 1], [], []>} : vector<136x32xbf16>, vector<32x96xbf16>, vector<136x96xf32> -> vector<136x96xf32>
    %c0_12 = arith.constant 0 : index
    %c0_13 = arith.constant 0 : index
    %28 = vector.load %arg5[%c0_12, %c0_13] : memref<136x96xf32, #tpu.memory_space<vmem>>, vector<136x96xf32>
    tpu.vector_store %arg5[%c0_12, %c0_13], %27 {strides = array<i32>} : memref<136x96xf32, #tpu.memory_space<vmem>>, vector<136x96xf32>,
    return
  }
  func.func @transform_0(%arg0: i32) -> (i32, i32) {
    %c0_i32 = arith.constant 0 : i32
    %c0_i32_0 = arith.constant 0 : i32
    return %arg0, %c0_i32 : i32, i32
  }
  func.func @transform_1(%arg0: i32) -> (i32, i32) {
    %c0_i32 = arith.constant 0 : i32
    %c0_i32_0 = arith.constant 0 : i32
    %c0_i32_1 = arith.constant 0 : i32
    return %c0_i32, %c0_i32_0 : i32, i32
  }
  func.func @transform_2(%arg0: i32) -> (i32, i32) {
    %c0_i32 = arith.constant 0 : i32
    %c0_i32_0 = arith.constant 0 : i32
    %c0_i32_1 = arith.constant 0 : i32
    return %c0_i32, %c0_i32_0 : i32, i32
  }
  func.func @transform_3(%arg0: i32) -> (i32, i32) {
    %c0_i32 = arith.constant 0 : i32
    %c0_i32_0 = arith.constant 0 : i32
    %c0_i32_1 = arith.constant 0 : i32
    return %c0_i32, %c0_i32_0 : i32, i32
  }
  func.func @transform_4(%arg0: i32) -> (i32, i32) {
    %c0_i32 = arith.constant 0 : i32
    %c0_i32_0 = arith.constant 0 : i32
    return %arg0, %c0_i32 : i32, i32
  }
}

module attributes {stable_mosaic.version = 11 : i64} {
  func.func @_flash_attn_kernel(%arg0: i32, %arg1: i32, %arg2: i32, %arg3: memref<1x72x8xf32, #tpu.memory_space<vmem>>, %arg4: memref<1x72x8xf32, #tpu.memory_space<vmem>>, %arg5: memref<1x72x8xf32, #tpu.memory_space<vmem>>, %arg6: memref<1x72x8xf32, #tpu.memory_space<vmem>>, %arg7: memref<72x1xf32, #tpu.memory_space<vmem>>, %arg8: memref<72x1xf32, #tpu.memory_space<vmem>>, %arg9: memref<72x8xf32, #tpu.memory_space<vmem>>) attributes {dimension_semantics = [#tpu.dimension_semantics<parallel>, #tpu.dimension_semantics<parallel>, #tpu.dimension_semantics<arbitrary>], iteration_bounds = array<i64: 8, 1, 1>, scalar_prefetch = 0 : i64, scratch_operands = 3 : i64, tpu.core_type = #tpu.core_type<tc>, window_params = [{transform_indices = @transform_0, window_bounds = array<i64: 1, 72, 8>}, {transform_indices = @transform_1, window_bounds = array<i64: 1, 72, 8>}, {transform_indices = @transform_2, window_bounds = array<i64: 1, 72, 8>}, {transform_indices = @transform_3, window_bounds = array<i64: 1, 72, 8>}]} {
    %c0_i32 = arith.constant 0 : i32
    %0 = arith.cmpi eq, %arg2, %c0_i32 : i32
    %1 = arith.extui %0 : i1 to i32
    %c0_i32_0 = arith.constant 0 : i32
    %2 = arith.cmpi ne, %1, %c0_i32_0 : i32
    scf.if %2 {
      %cst_28 = arith.constant 0xFF800000 : f32
      %49 = vector.broadcast %cst_28 : f32 to vector<72x1xf32>
      %c0_29 = arith.constant 0 : index
      %c0_30 = arith.constant 0 : index
      %50 = vector.load %arg7[%c0_29, %c0_30] : memref<72x1xf32, #tpu.memory_space<vmem>>, vector<72x1xf32>
      tpu.vector_store %arg7[%c0_29, %c0_30], %49 {strides = array<i32>} : memref<72x1xf32, #tpu.memory_space<vmem>>, vector<72x1xf32>,
      %cst_31 = arith.constant 0.000000e+00 : f32
      %51 = vector.broadcast %cst_31 : f32 to vector<72x1xf32>
      %c0_32 = arith.constant 0 : index
      %c0_33 = arith.constant 0 : index
      %52 = vector.load %arg8[%c0_32, %c0_33] : memref<72x1xf32, #tpu.memory_space<vmem>>, vector<72x1xf32>
      tpu.vector_store %arg8[%c0_32, %c0_33], %51 {strides = array<i32>} : memref<72x1xf32, #tpu.memory_space<vmem>>, vector<72x1xf32>,
      %cst_34 = arith.constant 0.000000e+00 : f32
      %53 = vector.broadcast %cst_34 : f32 to vector<72x8xf32>
      %c0_35 = arith.constant 0 : index
      %c0_36 = arith.constant 0 : index
      %54 = vector.load %arg9[%c0_35, %c0_36] : memref<72x8xf32, #tpu.memory_space<vmem>>, vector<72x8xf32>
      tpu.vector_store %arg9[%c0_35, %c0_36], %53 {strides = array<i32>} : memref<72x8xf32, #tpu.memory_space<vmem>>, vector<72x8xf32>,
    } else {
    }
    %c0 = arith.constant 0 : index
    %c0_1 = arith.constant 0 : index
    %c0_2 = arith.constant 0 : index
    %3 = vector.load %arg3[%c0, %c0_1, %c0_2] : memref<1x72x8xf32, #tpu.memory_space<vmem>>, vector<1x72x8xf32>
    %4 = vector.shape_cast %3 : vector<1x72x8xf32> to vector<72x8xf32>
    %cst = arith.constant 0.353553385 : f32
    %5 = vector.broadcast %cst : f32 to vector<72x8xf32>
    %6 = arith.mulf %4, %5 : vector<72x8xf32>
    %7 = arith.truncf %6 : vector<72x8xf32> to vector<72x8xbf16>
    %c0_3 = arith.constant 0 : index
    %c0_4 = arith.constant 0 : index
    %c0_5 = arith.constant 0 : index
    %8 = vector.load %arg4[%c0_3, %c0_4, %c0_5] : memref<1x72x8xf32, #tpu.memory_space<vmem>>, vector<1x72x8xf32>
    %9 = vector.shape_cast %8 : vector<1x72x8xf32> to vector<72x8xf32>
    %10 = arith.truncf %9 : vector<72x8xf32> to vector<72x8xbf16>
    %c0_6 = arith.constant 0 : index
    %c0_7 = arith.constant 0 : index
    %c0_8 = arith.constant 0 : index
    %11 = vector.load %arg5[%c0_6, %c0_7, %c0_8] : memref<1x72x8xf32, #tpu.memory_space<vmem>>, vector<1x72x8xf32>
    %12 = vector.shape_cast %11 : vector<1x72x8xf32> to vector<72x8xf32>
    %13 = arith.truncf %12 : vector<72x8xf32> to vector<72x8xbf16>
    %cst_9 = arith.constant dense<0.000000e+00> : vector<72x72xf32>
    %14 = tpu.matmul %7, %10, %cst_9 {dimension_numbers = #tpu.dot_dimension_numbers<[1], [1], [0], [0], [0, 0, 1, 0], [], []>} : vector<72x8xbf16>, vector<72x8xbf16>, vector<72x72xf32> -> vector<72x72xf32>
    %c72_i32 = arith.constant 72 : i32
    %15 = arith.muli %arg2, %c72_i32 : i32
    %16 = tpu.iota {dimensions = array<i32: 1>} : vector<72x72xi32>
    %17 = vector.broadcast %15 : i32 to vector<72x72xi32>
    %18 = arith.addi %17, %16 : vector<72x72xi32>
    %c68_i32 = arith.constant 68 : i32
    %19 = vector.broadcast %c68_i32 : i32 to vector<72x72xi32>
    %20 = arith.cmpi slt, %18, %19 : vector<72x72xi32>
    %cst_10 = arith.constant 0xFF800000 : f32
    %21 = vector.broadcast %cst_10 : f32 to vector<72x72xf32>
    %22 = arith.select %20, %14, %21 : vector<72x72xi1>, vector<72x72xf32>
    %c0_11 = arith.constant 0 : index
    %c0_12 = arith.constant 0 : index
    %23 = vector.load %arg7[%c0_11, %c0_12] : memref<72x1xf32, #tpu.memory_space<vmem>>, vector<72x1xf32>
    %cst_13 = arith.constant dense<0xFF800000> : vector<72xf32>
    %24 = vector.multi_reduction <maximumf>, %22, %cst_13 [1] : vector<72x72xf32> to vector<72xf32>
    %25 = vector.shape_cast %24 : vector<72xf32> to vector<72x1xf32>
    %26 = arith.maximumf %23, %25 : vector<72x1xf32>
    %27 = arith.subf %23, %26 : vector<72x1xf32>
    %28 = math.exp %27 : vector<72x1xf32>
    %29 = vector.broadcast %26 : vector<72x1xf32> to vector<72x72xf32>
    %30 = arith.subf %22, %29 : vector<72x72xf32>
    %31 = math.exp %30 : vector<72x72xf32>
    %c0_14 = arith.constant 0 : index
    %c0_15 = arith.constant 0 : index
    %32 = vector.load %arg8[%c0_14, %c0_15] : memref<72x1xf32, #tpu.memory_space<vmem>>, vector<72x1xf32>
    %33 = arith.mulf %28, %32 : vector<72x1xf32>
    %cst_16 = arith.constant dense<0.000000e+00> : vector<72xf32>
    %34 = vector.multi_reduction <add>, %31, %cst_16 [1] : vector<72x72xf32> to vector<72xf32>
    %35 = vector.shape_cast %34 : vector<72xf32> to vector<72x1xf32>
    %36 = arith.addf %33, %35 : vector<72x1xf32>
    %c0_17 = arith.constant 0 : index
    %c0_18 = arith.constant 0 : index
    %37 = vector.load %arg8[%c0_17, %c0_18] : memref<72x1xf32, #tpu.memory_space<vmem>>, vector<72x1xf32>
    tpu.vector_store %arg8[%c0_17, %c0_18], %36 {strides = array<i32>} : memref<72x1xf32, #tpu.memory_space<vmem>>, vector<72x1xf32>,
    %c0_19 = arith.constant 0 : index
    %c0_20 = arith.constant 0 : index
    %38 = vector.load %arg9[%c0_19, %c0_20] : memref<72x8xf32, #tpu.memory_space<vmem>>, vector<72x8xf32>
    %39 = vector.broadcast %28 : vector<72x1xf32> to vector<72x8xf32>
    %40 = arith.mulf %39, %38 : vector<72x8xf32>
    %41 = arith.truncf %31 : vector<72x72xf32> to vector<72x72xbf16>
    %cst_21 = arith.constant dense<0.000000e+00> : vector<72x8xf32>
    %42 = tpu.matmul %41, %13, %cst_21 {dimension_numbers = #tpu.dot_dimension_numbers<[1], [0], [0], [1], [0, 0, 1, 1], [], []>} : vector<72x72xbf16>, vector<72x8xbf16>, vector<72x8xf32> -> vector<72x8xf32>
    %43 = arith.addf %40, %42 : vector<72x8xf32>
    %c0_22 = arith.constant 0 : index
    %c0_23 = arith.constant 0 : index
    %44 = vector.load %arg9[%c0_22, %c0_23] : memref<72x8xf32, #tpu.memory_space<vmem>>, vector<72x8xf32>
    tpu.vector_store %arg9[%c0_22, %c0_23], %43 {strides = array<i32>} : memref<72x8xf32, #tpu.memory_space<vmem>>, vector<72x8xf32>,
    %c0_24 = arith.constant 0 : index
    %c0_25 = arith.constant 0 : index
    %45 = vector.load %arg7[%c0_24, %c0_25] : memref<72x1xf32, #tpu.memory_space<vmem>>, vector<72x1xf32>
    tpu.vector_store %arg7[%c0_24, %c0_25], %26 {strides = array<i32>} : memref<72x1xf32, #tpu.memory_space<vmem>>, vector<72x1xf32>,
    %c0_i32_26 = arith.constant 0 : i32
    %46 = arith.cmpi eq, %arg2, %c0_i32_26 : i32
    %47 = arith.extui %46 : i1 to i32
    %c0_i32_27 = arith.constant 0 : i32
    %48 = arith.cmpi ne, %47, %c0_i32_27 : i32
    scf.if %48 {
      %c0_28 = arith.constant 0 : index
      %c0_29 = arith.constant 0 : index
      %49 = vector.load %arg8[%c0_28, %c0_29] : memref<72x1xf32, #tpu.memory_space<vmem>>, vector<72x1xf32>
      %50 = tpu.reciprocal %49 {approx = true} : vector<72x1xf32> -> vector<72x1xf32>
      %c0_30 = arith.constant 0 : index
      %c0_31 = arith.constant 0 : index
      %51 = vector.load %arg9[%c0_30, %c0_31] : memref<72x8xf32, #tpu.memory_space<vmem>>, vector<72x8xf32>
      %52 = vector.broadcast %50 : vector<72x1xf32> to vector<72x8xf32>
      %53 = arith.mulf %51, %52 : vector<72x8xf32>
      %c0_32 = arith.constant 0 : index
      %c0_33 = arith.constant 0 : index
      %c0_34 = arith.constant 0 : index
      %54 = vector.load %arg6[%c0_32, %c0_33, %c0_34] : memref<1x72x8xf32, #tpu.memory_space<vmem>>, vector<1x72x8xf32>
      %55 = vector.shape_cast %54 : vector<1x72x8xf32> to vector<72x8xf32>
      %56 = vector.shape_cast %53 : vector<72x8xf32> to vector<1x72x8xf32>
      tpu.vector_store %arg6[%c0_32, %c0_33, %c0_34], %56 {strides = array<i32>} : memref<1x72x8xf32, #tpu.memory_space<vmem>>, vector<1x72x8xf32>,
    } else {
    }
    return
  }
  func.func @transform_0(%arg0: i32, %arg1: i32, %arg2: i32) -> (i32, i32, i32) {
    %c0_i32 = arith.constant 0 : i32
    %c0_i32_0 = arith.constant 0 : i32
    return %arg0, %arg1, %c0_i32 : i32, i32, i32
  }
  func.func @transform_1(%arg0: i32, %arg1: i32, %arg2: i32) -> (i32, i32, i32) {
    %c0_i32 = arith.constant 0 : i32
    %c0_i32_0 = arith.constant 0 : i32
    return %arg0, %arg2, %c0_i32 : i32, i32, i32
  }
  func.func @transform_2(%arg0: i32, %arg1: i32, %arg2: i32) -> (i32, i32, i32) {
    %c0_i32 = arith.constant 0 : i32
    %c0_i32_0 = arith.constant 0 : i32
    return %arg0, %arg2, %c0_i32 : i32, i32, i32
  }
  func.func @transform_3(%arg0: i32, %arg1: i32, %arg2: i32) -> (i32, i32, i32) {
    %c0_i32 = arith.constant 0 : i32
    %c0_i32_0 = arith.constant 0 : i32
    return %arg0, %arg1, %c0_i32 : i32, i32, i32
  }
}

module attributes {stable_mosaic.version = 11 : i64} {
  func.func @_out_proj_kernel(%arg0: i32, %arg1: memref<128x128xf32, #tpu.memory_space<vmem>>, %arg2: memref<128x32xbf16, #tpu.memory_space<vmem>>, %arg3: memref<1x32xf32, #tpu.memory_space<vmem>>, %arg4: memref<128x32xf32, #tpu.memory_space<vmem>>, %arg5: memref<1x1xf32, #tpu.memory_space<vmem>>, %arg6: memref<128x32xf32, #tpu.memory_space<vmem>>) attributes {dimension_semantics = [#tpu.dimension_semantics<parallel>], iteration_bounds = array<i64: 1>, scalar_prefetch = 0 : i64, scratch_operands = 0 : i64, tpu.core_type = #tpu.core_type<tc>, window_params = [{transform_indices = @transform_0, window_bounds = array<i64: 128, 128>}, {pipeline_mode = #tpu.pipeline_mode<synchronous>, transform_indices = @transform_1, window_bounds = array<i64: 128, 32>}, {pipeline_mode = #tpu.pipeline_mode<synchronous>, transform_indices = @transform_2, window_bounds = array<i64: 1, 32>}, {transform_indices = @transform_3, window_bounds = array<i64: 128, 32>}, {pipeline_mode = #tpu.pipeline_mode<synchronous>, transform_indices = @transform_4, window_bounds = array<i64: 1, 1>}, {transform_indices = @transform_5, window_bounds = array<i64: 128, 32>}]} {
    %c0 = arith.constant 0 : index
    %c0_0 = arith.constant 0 : index
    %0 = vector.load %arg1[%c0, %c0_0] : memref<128x128xf32, #tpu.memory_space<vmem>>, vector<128x128xf32>
    %1 = arith.truncf %0 : vector<128x128xf32> to vector<128x128xbf16>
    %c0_1 = arith.constant 0 : index
    %c0_2 = arith.constant 0 : index
    %2 = vector.load %arg2[%c0_1, %c0_2] : memref<128x32xbf16, #tpu.memory_space<vmem>>, vector<128x32xbf16>
    %cst = arith.constant dense<0.000000e+00> : vector<128x32xf32>
    %3 = tpu.matmul %1, %2, %cst {dimension_numbers = #tpu.dot_dimension_numbers<[1], [0], [0], [1], [0, 0, 1, 1], [], []>} : vector<128x128xbf16>, vector<128x32xbf16>, vector<128x32xf32> -> vector<128x32xf32>
    %c0_3 = arith.constant 0 : index
    %c0_4 = arith.constant 0 : index
    %4 = vector.load %arg3[%c0_3, %c0_4] : memref<1x32xf32, #tpu.memory_space<vmem>>, vector<1x32xf32>
    %5 = vector.broadcast %4 : vector<1x32xf32> to vector<128x32xf32>
    %6 = arith.addf %3, %5 : vector<128x32xf32>
    %c0_5 = arith.constant 0 : index
    %c0_6 = arith.constant 0 : index
    %7 = vector.load %arg4[%c0_5, %c0_6] : memref<128x32xf32, #tpu.memory_space<vmem>>, vector<128x32xf32>
    %c0_7 = arith.constant 0 : index
    %c0_8 = arith.constant 0 : index
    %8 = vector.load %arg5[%c0_7, %c0_8] : memref<1x1xf32, #tpu.memory_space<vmem>>, vector<1x1xf32>
    %9 = vector.broadcast %8 : vector<1x1xf32> to vector<128x32xf32>
    %10 = arith.mulf %9, %6 : vector<128x32xf32>
    %11 = arith.addf %7, %10 : vector<128x32xf32>
    %c0_9 = arith.constant 0 : index
    %c0_10 = arith.constant 0 : index
    %12 = vector.load %arg6[%c0_9, %c0_10] : memref<128x32xf32, #tpu.memory_space<vmem>>, vector<128x32xf32>
    tpu.vector_store %arg6[%c0_9, %c0_10], %11 {strides = array<i32>} : memref<128x32xf32, #tpu.memory_space<vmem>>, vector<128x32xf32>,
    return
  }
  func.func @transform_0(%arg0: i32) -> (i32, i32) {
    %c0_i32 = arith.constant 0 : i32
    %c0_i32_0 = arith.constant 0 : i32
    return %arg0, %c0_i32 : i32, i32
  }
  func.func @transform_1(%arg0: i32) -> (i32, i32) {
    %c0_i32 = arith.constant 0 : i32
    %c0_i32_0 = arith.constant 0 : i32
    %c0_i32_1 = arith.constant 0 : i32
    return %c0_i32, %c0_i32_0 : i32, i32
  }
  func.func @transform_2(%arg0: i32) -> (i32, i32) {
    %c0_i32 = arith.constant 0 : i32
    %c0_i32_0 = arith.constant 0 : i32
    %c0_i32_1 = arith.constant 0 : i32
    return %c0_i32, %c0_i32_0 : i32, i32
  }
  func.func @transform_3(%arg0: i32) -> (i32, i32) {
    %c0_i32 = arith.constant 0 : i32
    %c0_i32_0 = arith.constant 0 : i32
    return %arg0, %c0_i32 : i32, i32
  }
  func.func @transform_4(%arg0: i32) -> (i32, i32) {
    %c0_i32 = arith.constant 0 : i32
    %c0_i32_0 = arith.constant 0 : i32
    %c0_i32_1 = arith.constant 0 : i32
    return %c0_i32, %c0_i32_0 : i32, i32
  }
  func.func @transform_5(%arg0: i32) -> (i32, i32) {
    %c0_i32 = arith.constant 0 : i32
    %c0_i32_0 = arith.constant 0 : i32
    return %arg0, %c0_i32 : i32, i32
  }
}

module attributes {stable_mosaic.version = 11 : i64} {
  func.func @_ln_geglu_kernel(%arg0: i32, %arg1: memref<128x32xf32, #tpu.memory_space<vmem>>, %arg2: memref<1x32xf32, #tpu.memory_space<vmem>>, %arg3: memref<1x32xf32, #tpu.memory_space<vmem>>, %arg4: memref<32x128xbf16, #tpu.memory_space<vmem>>, %arg5: memref<1x128xf32, #tpu.memory_space<vmem>>, %arg6: memref<32x128xbf16, #tpu.memory_space<vmem>>, %arg7: memref<1x128xf32, #tpu.memory_space<vmem>>, %arg8: memref<128x128xf32, #tpu.memory_space<vmem>>) attributes {dimension_semantics = [#tpu.dimension_semantics<parallel>], iteration_bounds = array<i64: 1>, scalar_prefetch = 0 : i64, scratch_operands = 0 : i64, tpu.core_type = #tpu.core_type<tc>, window_params = [{transform_indices = @transform_0, window_bounds = array<i64: 128, 32>}, {pipeline_mode = #tpu.pipeline_mode<synchronous>, transform_indices = @transform_1, window_bounds = array<i64: 1, 32>}, {pipeline_mode = #tpu.pipeline_mode<synchronous>, transform_indices = @transform_2, window_bounds = array<i64: 1, 32>}, {pipeline_mode = #tpu.pipeline_mode<synchronous>, transform_indices = @transform_3, window_bounds = array<i64: 32, 128>}, {pipeline_mode = #tpu.pipeline_mode<synchronous>, transform_indices = @transform_4, window_bounds = array<i64: 1, 128>}, {pipeline_mode = #tpu.pipeline_mode<synchronous>, transform_indices = @transform_5, window_bounds = array<i64: 32, 128>}, {pipeline_mode = #tpu.pipeline_mode<synchronous>, transform_indices = @transform_6, window_bounds = array<i64: 1, 128>}, {transform_indices = @transform_7, window_bounds = array<i64: 128, 128>}]} {
    %c0 = arith.constant 0 : index
    %c0_0 = arith.constant 0 : index
    %0 = vector.load %arg1[%c0, %c0_0] : memref<128x32xf32, #tpu.memory_space<vmem>>, vector<128x32xf32>
    %cst = arith.constant dense<0.000000e+00> : vector<128xf32>
    %1 = vector.multi_reduction <add>, %0, %cst [1] : vector<128x32xf32> to vector<128xf32>
    %2 = vector.shape_cast %1 : vector<128xf32> to vector<128x1xf32>
    %cst_1 = arith.constant 3.200000e+01 : f32
    %3 = vector.broadcast %cst_1 : f32 to vector<128x1xf32>
    %4 = arith.divf %2, %3 : vector<128x1xf32>
    %5 = vector.broadcast %4 : vector<128x1xf32> to vector<128x32xf32>
    %6 = arith.subf %0, %5 : vector<128x32xf32>
    %7 = arith.mulf %6, %6 : vector<128x32xf32>
    %cst_2 = arith.constant dense<0.000000e+00> : vector<128xf32>
    %8 = vector.multi_reduction <add>, %7, %cst_2 [1] : vector<128x32xf32> to vector<128xf32>
    %9 = vector.shape_cast %8 : vector<128xf32> to vector<128x1xf32>
    %cst_3 = arith.constant 3.200000e+01 : f32
    %10 = vector.broadcast %cst_3 : f32 to vector<128x1xf32>
    %11 = arith.divf %9, %10 : vector<128x1xf32>
    %12 = vector.broadcast %4 : vector<128x1xf32> to vector<128x32xf32>
    %13 = arith.subf %0, %12 : vector<128x32xf32>
    %cst_4 = arith.constant 9.99999974E-6 : f32
    %14 = vector.broadcast %cst_4 : f32 to vector<128x1xf32>
    %15 = arith.addf %11, %14 : vector<128x1xf32>
    %16 = math.rsqrt %15 : vector<128x1xf32>
    %17 = vector.broadcast %16 : vector<128x1xf32> to vector<128x32xf32>
    %18 = arith.mulf %13, %17 : vector<128x32xf32>
    %c0_5 = arith.constant 0 : index
    %c0_6 = arith.constant 0 : index
    %19 = vector.load %arg2[%c0_5, %c0_6] : memref<1x32xf32, #tpu.memory_space<vmem>>, vector<1x32xf32>
    %20 = vector.broadcast %19 : vector<1x32xf32> to vector<128x32xf32>
    %21 = arith.mulf %18, %20 : vector<128x32xf32>
    %c0_7 = arith.constant 0 : index
    %c0_8 = arith.constant 0 : index
    %22 = vector.load %arg3[%c0_7, %c0_8] : memref<1x32xf32, #tpu.memory_space<vmem>>, vector<1x32xf32>
    %23 = vector.broadcast %22 : vector<1x32xf32> to vector<128x32xf32>
    %24 = arith.addf %21, %23 : vector<128x32xf32>
    %25 = arith.truncf %24 : vector<128x32xf32> to vector<128x32xbf16>
    %c0_9 = arith.constant 0 : index
    %c0_10 = arith.constant 0 : index
    %26 = vector.load %arg4[%c0_9, %c0_10] : memref<32x128xbf16, #tpu.memory_space<vmem>>, vector<32x128xbf16>
    %cst_11 = arith.constant dense<0.000000e+00> : vector<128x128xf32>
    %27 = tpu.matmul %25, %26, %cst_11 {dimension_numbers = #tpu.dot_dimension_numbers<[1], [0], [0], [1], [0, 0, 1, 1], [], []>} : vector<128x32xbf16>, vector<32x128xbf16>, vector<128x128xf32> -> vector<128x128xf32>
    %c0_12 = arith.constant 0 : index
    %c0_13 = arith.constant 0 : index
    %28 = vector.load %arg5[%c0_12, %c0_13] : memref<1x128xf32, #tpu.memory_space<vmem>>, vector<1x128xf32>
    %29 = vector.broadcast %28 : vector<1x128xf32> to vector<128x128xf32>
    %30 = arith.addf %27, %29 : vector<128x128xf32>
    %c0_14 = arith.constant 0 : index
    %c0_15 = arith.constant 0 : index
    %31 = vector.load %arg6[%c0_14, %c0_15] : memref<32x128xbf16, #tpu.memory_space<vmem>>, vector<32x128xbf16>
    %cst_16 = arith.constant dense<0.000000e+00> : vector<128x128xf32>
    %32 = tpu.matmul %25, %31, %cst_16 {dimension_numbers = #tpu.dot_dimension_numbers<[1], [0], [0], [1], [0, 0, 1, 1], [], []>} : vector<128x32xbf16>, vector<32x128xbf16>, vector<128x128xf32> -> vector<128x128xf32>
    %c0_17 = arith.constant 0 : index
    %c0_18 = arith.constant 0 : index
    %33 = vector.load %arg7[%c0_17, %c0_18] : memref<1x128xf32, #tpu.memory_space<vmem>>, vector<1x128xf32>
    %34 = vector.broadcast %33 : vector<1x128xf32> to vector<128x128xf32>
    %35 = arith.addf %32, %34 : vector<128x128xf32>
    %cst_19 = arith.constant 5.000000e-01 : f32
    %36 = vector.broadcast %cst_19 : f32 to vector<128x128xf32>
    %37 = arith.mulf %36, %35 : vector<128x128xf32>
    %cst_20 = arith.constant 0.707106769 : f32
    %38 = vector.broadcast %cst_20 : f32 to vector<128x128xf32>
    %39 = arith.mulf %35, %38 : vector<128x128xf32>
    %40 = math.erf %39 : vector<128x128xf32>
    %cst_21 = arith.constant 1.000000e+00 : f32
    %41 = vector.broadcast %cst_21 : f32 to vector<128x128xf32>
    %42 = arith.addf %41, %40 : vector<128x128xf32>
    %43 = arith.mulf %37, %42 : vector<128x128xf32>
    %44 = arith.mulf %30, %43 : vector<128x128xf32>
    %c0_22 = arith.constant 0 : index
    %c0_23 = arith.constant 0 : index
    %45 = vector.load %arg8[%c0_22, %c0_23] : memref<128x128xf32, #tpu.memory_space<vmem>>, vector<128x128xf32>
    tpu.vector_store %arg8[%c0_22, %c0_23], %44 {strides = array<i32>} : memref<128x128xf32, #tpu.memory_space<vmem>>, vector<128x128xf32>,
    return
  }
  func.func @transform_0(%arg0: i32) -> (i32, i32) {
    %c0_i32 = arith.constant 0 : i32
    %c0_i32_0 = arith.constant 0 : i32
    return %arg0, %c0_i32 : i32, i32
  }
  func.func @transform_1(%arg0: i32) -> (i32, i32) {
    %c0_i32 = arith.constant 0 : i32
    %c0_i32_0 = arith.constant 0 : i32
    %c0_i32_1 = arith.constant 0 : i32
    return %c0_i32, %c0_i32_0 : i32, i32
  }
  func.func @transform_2(%arg0: i32) -> (i32, i32) {
    %c0_i32 = arith.constant 0 : i32
    %c0_i32_0 = arith.constant 0 : i32
    %c0_i32_1 = arith.constant 0 : i32
    return %c0_i32, %c0_i32_0 : i32, i32
  }
  func.func @transform_3(%arg0: i32) -> (i32, i32) {
    %c0_i32 = arith.constant 0 : i32
    %c0_i32_0 = arith.constant 0 : i32
    %c0_i32_1 = arith.constant 0 : i32
    return %c0_i32, %c0_i32_0 : i32, i32
  }
  func.func @transform_4(%arg0: i32) -> (i32, i32) {
    %c0_i32 = arith.constant 0 : i32
    %c0_i32_0 = arith.constant 0 : i32
    %c0_i32_1 = arith.constant 0 : i32
    return %c0_i32, %c0_i32_0 : i32, i32
  }
  func.func @transform_5(%arg0: i32) -> (i32, i32) {
    %c0_i32 = arith.constant 0 : i32
    %c0_i32_0 = arith.constant 0 : i32
    %c0_i32_1 = arith.constant 0 : i32
    return %c0_i32, %c0_i32_0 : i32, i32
  }
  func.func @transform_6(%arg0: i32) -> (i32, i32) {
    %c0_i32 = arith.constant 0 : i32
    %c0_i32_0 = arith.constant 0 : i32
    %c0_i32_1 = arith.constant 0 : i32
    return %c0_i32, %c0_i32_0 : i32, i32
  }
  func.func @transform_7(%arg0: i32) -> (i32, i32) {
    %c0_i32 = arith.constant 0 : i32
    %c0_i32_0 = arith.constant 0 : i32
    return %arg0, %c0_i32 : i32, i32
  }
}

module attributes {stable_mosaic.version = 11 : i64} {
  func.func @_ln_mm_kernel(%arg0: i32, %arg1: memref<128x32xf32, #tpu.memory_space<vmem>>, %arg2: memref<1x32xf32, #tpu.memory_space<vmem>>, %arg3: memref<1x32xf32, #tpu.memory_space<vmem>>, %arg4: memref<32x32xbf16, #tpu.memory_space<vmem>>, %arg5: memref<128x32xf32, #tpu.memory_space<vmem>>) attributes {dimension_semantics = [#tpu.dimension_semantics<parallel>], iteration_bounds = array<i64: 1>, scalar_prefetch = 0 : i64, scratch_operands = 0 : i64, tpu.core_type = #tpu.core_type<tc>, window_params = [{transform_indices = @transform_0, window_bounds = array<i64: 128, 32>}, {pipeline_mode = #tpu.pipeline_mode<synchronous>, transform_indices = @transform_1, window_bounds = array<i64: 1, 32>}, {pipeline_mode = #tpu.pipeline_mode<synchronous>, transform_indices = @transform_2, window_bounds = array<i64: 1, 32>}, {pipeline_mode = #tpu.pipeline_mode<synchronous>, transform_indices = @transform_3, window_bounds = array<i64: 32, 32>}, {transform_indices = @transform_4, window_bounds = array<i64: 128, 32>}]} {
    %c0 = arith.constant 0 : index
    %c0_0 = arith.constant 0 : index
    %0 = vector.load %arg1[%c0, %c0_0] : memref<128x32xf32, #tpu.memory_space<vmem>>, vector<128x32xf32>
    %cst = arith.constant dense<0.000000e+00> : vector<128xf32>
    %1 = vector.multi_reduction <add>, %0, %cst [1] : vector<128x32xf32> to vector<128xf32>
    %2 = vector.shape_cast %1 : vector<128xf32> to vector<128x1xf32>
    %cst_1 = arith.constant 3.200000e+01 : f32
    %3 = vector.broadcast %cst_1 : f32 to vector<128x1xf32>
    %4 = arith.divf %2, %3 : vector<128x1xf32>
    %5 = vector.broadcast %4 : vector<128x1xf32> to vector<128x32xf32>
    %6 = arith.subf %0, %5 : vector<128x32xf32>
    %7 = arith.mulf %6, %6 : vector<128x32xf32>
    %cst_2 = arith.constant dense<0.000000e+00> : vector<128xf32>
    %8 = vector.multi_reduction <add>, %7, %cst_2 [1] : vector<128x32xf32> to vector<128xf32>
    %9 = vector.shape_cast %8 : vector<128xf32> to vector<128x1xf32>
    %cst_3 = arith.constant 3.200000e+01 : f32
    %10 = vector.broadcast %cst_3 : f32 to vector<128x1xf32>
    %11 = arith.divf %9, %10 : vector<128x1xf32>
    %12 = vector.broadcast %4 : vector<128x1xf32> to vector<128x32xf32>
    %13 = arith.subf %0, %12 : vector<128x32xf32>
    %cst_4 = arith.constant 9.99999974E-6 : f32
    %14 = vector.broadcast %cst_4 : f32 to vector<128x1xf32>
    %15 = arith.addf %11, %14 : vector<128x1xf32>
    %16 = math.rsqrt %15 : vector<128x1xf32>
    %17 = vector.broadcast %16 : vector<128x1xf32> to vector<128x32xf32>
    %18 = arith.mulf %13, %17 : vector<128x32xf32>
    %c0_5 = arith.constant 0 : index
    %c0_6 = arith.constant 0 : index
    %19 = vector.load %arg2[%c0_5, %c0_6] : memref<1x32xf32, #tpu.memory_space<vmem>>, vector<1x32xf32>
    %20 = vector.broadcast %19 : vector<1x32xf32> to vector<128x32xf32>
    %21 = arith.mulf %18, %20 : vector<128x32xf32>
    %c0_7 = arith.constant 0 : index
    %c0_8 = arith.constant 0 : index
    %22 = vector.load %arg3[%c0_7, %c0_8] : memref<1x32xf32, #tpu.memory_space<vmem>>, vector<1x32xf32>
    %23 = vector.broadcast %22 : vector<1x32xf32> to vector<128x32xf32>
    %24 = arith.addf %21, %23 : vector<128x32xf32>
    %25 = arith.truncf %24 : vector<128x32xf32> to vector<128x32xbf16>
    %c0_9 = arith.constant 0 : index
    %c0_10 = arith.constant 0 : index
    %26 = vector.load %arg4[%c0_9, %c0_10] : memref<32x32xbf16, #tpu.memory_space<vmem>>, vector<32x32xbf16>
    %cst_11 = arith.constant dense<0.000000e+00> : vector<128x32xf32>
    %27 = tpu.matmul %25, %26, %cst_11 {dimension_numbers = #tpu.dot_dimension_numbers<[1], [0], [0], [1], [0, 0, 1, 1], [], []>} : vector<128x32xbf16>, vector<32x32xbf16>, vector<128x32xf32> -> vector<128x32xf32>
    %c0_12 = arith.constant 0 : index
    %c0_13 = arith.constant 0 : index
    %28 = vector.load %arg5[%c0_12, %c0_13] : memref<128x32xf32, #tpu.memory_space<vmem>>, vector<128x32xf32>
    tpu.vector_store %arg5[%c0_12, %c0_13], %27 {strides = array<i32>} : memref<128x32xf32, #tpu.memory_space<vmem>>, vector<128x32xf32>,
    return
  }
  func.func @transform_0(%arg0: i32) -> (i32, i32) {
    %c0_i32 = arith.constant 0 : i32
    %c0_i32_0 = arith.constant 0 : i32
    return %arg0, %c0_i32 : i32, i32
  }
  func.func @transform_1(%arg0: i32) -> (i32, i32) {
    %c0_i32 = arith.constant 0 : i32
    %c0_i32_0 = arith.constant 0 : i32
    %c0_i32_1 = arith.constant 0 : i32
    return %c0_i32, %c0_i32_0 : i32, i32
  }
  func.func @transform_2(%arg0: i32) -> (i32, i32) {
    %c0_i32 = arith.constant 0 : i32
    %c0_i32_0 = arith.constant 0 : i32
    %c0_i32_1 = arith.constant 0 : i32
    return %c0_i32, %c0_i32_0 : i32, i32
  }
  func.func @transform_3(%arg0: i32) -> (i32, i32) {
    %c0_i32 = arith.constant 0 : i32
    %c0_i32_0 = arith.constant 0 : i32
    %c0_i32_1 = arith.constant 0 : i32
    return %c0_i32, %c0_i32_0 : i32, i32
  }
  func.func @transform_4(%arg0: i32) -> (i32, i32) {
    %c0_i32 = arith.constant 0 : i32
    %c0_i32_0 = arith.constant 0 : i32
    return %arg0, %c0_i32 : i32, i32
  }
}

module attributes {stable_mosaic.version = 11 : i64} {
  func.func @_mm_kernel(%arg0: i32, %arg1: memref<16x64xf32, #tpu.memory_space<vmem>>, %arg2: memref<64x64xbf16, #tpu.memory_space<vmem>>, %arg3: memref<16x64xf32, #tpu.memory_space<vmem>>) attributes {dimension_semantics = [#tpu.dimension_semantics<parallel>], iteration_bounds = array<i64: 1>, scalar_prefetch = 0 : i64, scratch_operands = 0 : i64, tpu.core_type = #tpu.core_type<tc>, window_params = [{transform_indices = @transform_0, window_bounds = array<i64: 16, 64>}, {pipeline_mode = #tpu.pipeline_mode<synchronous>, transform_indices = @transform_1, window_bounds = array<i64: 64, 64>}, {transform_indices = @transform_2, window_bounds = array<i64: 16, 64>}]} {
    %c0 = arith.constant 0 : index
    %c0_0 = arith.constant 0 : index
    %0 = vector.load %arg1[%c0, %c0_0] : memref<16x64xf32, #tpu.memory_space<vmem>>, vector<16x64xf32>
    %1 = arith.truncf %0 : vector<16x64xf32> to vector<16x64xbf16>
    %c0_1 = arith.constant 0 : index
    %c0_2 = arith.constant 0 : index
    %2 = vector.load %arg2[%c0_1, %c0_2] : memref<64x64xbf16, #tpu.memory_space<vmem>>, vector<64x64xbf16>
    %cst = arith.constant dense<0.000000e+00> : vector<16x64xf32>
    %3 = tpu.matmul %1, %2, %cst {dimension_numbers = #tpu.dot_dimension_numbers<[1], [0], [0], [1], [0, 0, 1, 1], [], []>} : vector<16x64xbf16>, vector<64x64xbf16>, vector<16x64xf32> -> vector<16x64xf32>
    %c0_3 = arith.constant 0 : index
    %c0_4 = arith.constant 0 : index
    %4 = vector.load %arg3[%c0_3, %c0_4] : memref<16x64xf32, #tpu.memory_space<vmem>>, vector<16x64xf32>
    tpu.vector_store %arg3[%c0_3, %c0_4], %3 {strides = array<i32>} : memref<16x64xf32, #tpu.memory_space<vmem>>, vector<16x64xf32>,
    return
  }
  func.func @transform_0(%arg0: i32) -> (i32, i32) {
    %c0_i32 = arith.constant 0 : i32
    %c0_i32_0 = arith.constant 0 : i32
    return %arg0, %c0_i32 : i32, i32
  }
  func.func @transform_1(%arg0: i32) -> (i32, i32) {
    %c0_i32 = arith.constant 0 : i32
    %c0_i32_0 = arith.constant 0 : i32
    %c0_i32_1 = arith.constant 0 : i32
    return %c0_i32, %c0_i32_0 : i32, i32
  }
  func.func @transform_2(%arg0: i32) -> (i32, i32) {
    %c0_i32 = arith.constant 0 : i32
    %c0_i32_0 = arith.constant 0 : i32
    return %arg0, %c0_i32 : i32, i32
  }
}

module attributes {stable_mosaic.version = 11 : i64} {
  func.func @_flash_attn_kernel(%arg0: i32, %arg1: i32, %arg2: i32, %arg3: memref<1x64x8xf32, #tpu.memory_space<vmem>>, %arg4: memref<1x8x8xf32, #tpu.memory_space<vmem>>, %arg5: memref<1x8x8xf32, #tpu.memory_space<vmem>>, %arg6: memref<1x64x8xf32, #tpu.memory_space<vmem>>, %arg7: memref<64x1xf32, #tpu.memory_space<vmem>>, %arg8: memref<64x1xf32, #tpu.memory_space<vmem>>, %arg9: memref<64x8xf32, #tpu.memory_space<vmem>>) attributes {dimension_semantics = [#tpu.dimension_semantics<parallel>, #tpu.dimension_semantics<parallel>, #tpu.dimension_semantics<arbitrary>], iteration_bounds = array<i64: 8, 1, 1>, scalar_prefetch = 0 : i64, scratch_operands = 3 : i64, tpu.core_type = #tpu.core_type<tc>, window_params = [{transform_indices = @transform_0, window_bounds = array<i64: 1, 64, 8>}, {transform_indices = @transform_1, window_bounds = array<i64: 1, 8, 8>}, {transform_indices = @transform_2, window_bounds = array<i64: 1, 8, 8>}, {transform_indices = @transform_3, window_bounds = array<i64: 1, 64, 8>}]} {
    %c0_i32 = arith.constant 0 : i32
    %0 = arith.cmpi eq, %arg2, %c0_i32 : i32
    %1 = arith.extui %0 : i1 to i32
    %c0_i32_0 = arith.constant 0 : i32
    %2 = arith.cmpi ne, %1, %c0_i32_0 : i32
    scf.if %2 {
      %cst_27 = arith.constant 0xFF800000 : f32
      %41 = vector.broadcast %cst_27 : f32 to vector<64x1xf32>
      %c0_28 = arith.constant 0 : index
      %c0_29 = arith.constant 0 : index
      %42 = vector.load %arg7[%c0_28, %c0_29] : memref<64x1xf32, #tpu.memory_space<vmem>>, vector<64x1xf32>
      tpu.vector_store %arg7[%c0_28, %c0_29], %41 {strides = array<i32>} : memref<64x1xf32, #tpu.memory_space<vmem>>, vector<64x1xf32>,
      %cst_30 = arith.constant 0.000000e+00 : f32
      %43 = vector.broadcast %cst_30 : f32 to vector<64x1xf32>
      %c0_31 = arith.constant 0 : index
      %c0_32 = arith.constant 0 : index
      %44 = vector.load %arg8[%c0_31, %c0_32] : memref<64x1xf32, #tpu.memory_space<vmem>>, vector<64x1xf32>
      tpu.vector_store %arg8[%c0_31, %c0_32], %43 {strides = array<i32>} : memref<64x1xf32, #tpu.memory_space<vmem>>, vector<64x1xf32>,
      %cst_33 = arith.constant 0.000000e+00 : f32
      %45 = vector.broadcast %cst_33 : f32 to vector<64x8xf32>
      %c0_34 = arith.constant 0 : index
      %c0_35 = arith.constant 0 : index
      %46 = vector.load %arg9[%c0_34, %c0_35] : memref<64x8xf32, #tpu.memory_space<vmem>>, vector<64x8xf32>
      tpu.vector_store %arg9[%c0_34, %c0_35], %45 {strides = array<i32>} : memref<64x8xf32, #tpu.memory_space<vmem>>, vector<64x8xf32>,
    } else {
    }
    %c0 = arith.constant 0 : index
    %c0_1 = arith.constant 0 : index
    %c0_2 = arith.constant 0 : index
    %3 = vector.load %arg3[%c0, %c0_1, %c0_2] : memref<1x64x8xf32, #tpu.memory_space<vmem>>, vector<1x64x8xf32>
    %4 = vector.shape_cast %3 : vector<1x64x8xf32> to vector<64x8xf32>
    %cst = arith.constant 0.353553385 : f32
    %5 = vector.broadcast %cst : f32 to vector<64x8xf32>
    %6 = arith.mulf %4, %5 : vector<64x8xf32>
    %7 = arith.truncf %6 : vector<64x8xf32> to vector<64x8xbf16>
    %c0_3 = arith.constant 0 : index
    %c0_4 = arith.constant 0 : index
    %c0_5 = arith.constant 0 : index
    %8 = vector.load %arg4[%c0_3, %c0_4, %c0_5] : memref<1x8x8xf32, #tpu.memory_space<vmem>>, vector<1x8x8xf32>
    %9 = vector.shape_cast %8 : vector<1x8x8xf32> to vector<8x8xf32>
    %10 = arith.truncf %9 : vector<8x8xf32> to vector<8x8xbf16>
    %c0_6 = arith.constant 0 : index
    %c0_7 = arith.constant 0 : index
    %c0_8 = arith.constant 0 : index
    %11 = vector.load %arg5[%c0_6, %c0_7, %c0_8] : memref<1x8x8xf32, #tpu.memory_space<vmem>>, vector<1x8x8xf32>
    %12 = vector.shape_cast %11 : vector<1x8x8xf32> to vector<8x8xf32>
    %13 = arith.truncf %12 : vector<8x8xf32> to vector<8x8xbf16>
    %cst_9 = arith.constant dense<0.000000e+00> : vector<64x8xf32>
    %14 = tpu.matmul %7, %10, %cst_9 {dimension_numbers = #tpu.dot_dimension_numbers<[1], [1], [0], [0], [0, 0, 1, 0], [], []>} : vector<64x8xbf16>, vector<8x8xbf16>, vector<64x8xf32> -> vector<64x8xf32>
    %c0_10 = arith.constant 0 : index
    %c0_11 = arith.constant 0 : index
    %15 = vector.load %arg7[%c0_10, %c0_11] : memref<64x1xf32, #tpu.memory_space<vmem>>, vector<64x1xf32>
    %cst_12 = arith.constant dense<0xFF800000> : vector<64xf32>
    %16 = vector.multi_reduction <maximumf>, %14, %cst_12 [1] : vector<64x8xf32> to vector<64xf32>
    %17 = vector.shape_cast %16 : vector<64xf32> to vector<64x1xf32>
    %18 = arith.maximumf %15, %17 : vector<64x1xf32>
    %19 = arith.subf %15, %18 : vector<64x1xf32>
    %20 = math.exp %19 : vector<64x1xf32>
    %21 = vector.broadcast %18 : vector<64x1xf32> to vector<64x8xf32>
    %22 = arith.subf %14, %21 : vector<64x8xf32>
    %23 = math.exp %22 : vector<64x8xf32>
    %c0_13 = arith.constant 0 : index
    %c0_14 = arith.constant 0 : index
    %24 = vector.load %arg8[%c0_13, %c0_14] : memref<64x1xf32, #tpu.memory_space<vmem>>, vector<64x1xf32>
    %25 = arith.mulf %20, %24 : vector<64x1xf32>
    %cst_15 = arith.constant dense<0.000000e+00> : vector<64xf32>
    %26 = vector.multi_reduction <add>, %23, %cst_15 [1] : vector<64x8xf32> to vector<64xf32>
    %27 = vector.shape_cast %26 : vector<64xf32> to vector<64x1xf32>
    %28 = arith.addf %25, %27 : vector<64x1xf32>
    %c0_16 = arith.constant 0 : index
    %c0_17 = arith.constant 0 : index
    %29 = vector.load %arg8[%c0_16, %c0_17] : memref<64x1xf32, #tpu.memory_space<vmem>>, vector<64x1xf32>
    tpu.vector_store %arg8[%c0_16, %c0_17], %28 {strides = array<i32>} : memref<64x1xf32, #tpu.memory_space<vmem>>, vector<64x1xf32>,
    %c0_18 = arith.constant 0 : index
    %c0_19 = arith.constant 0 : index
    %30 = vector.load %arg9[%c0_18, %c0_19] : memref<64x8xf32, #tpu.memory_space<vmem>>, vector<64x8xf32>
    %31 = vector.broadcast %20 : vector<64x1xf32> to vector<64x8xf32>
    %32 = arith.mulf %31, %30 : vector<64x8xf32>
    %33 = arith.truncf %23 : vector<64x8xf32> to vector<64x8xbf16>
    %cst_20 = arith.constant dense<0.000000e+00> : vector<64x8xf32>
    %34 = tpu.matmul %33, %13, %cst_20 {dimension_numbers = #tpu.dot_dimension_numbers<[1], [0], [0], [1], [0, 0, 1, 1], [], []>} : vector<64x8xbf16>, vector<8x8xbf16>, vector<64x8xf32> -> vector<64x8xf32>
    %35 = arith.addf %32, %34 : vector<64x8xf32>
    %c0_21 = arith.constant 0 : index
    %c0_22 = arith.constant 0 : index
    %36 = vector.load %arg9[%c0_21, %c0_22] : memref<64x8xf32, #tpu.memory_space<vmem>>, vector<64x8xf32>
    tpu.vector_store %arg9[%c0_21, %c0_22], %35 {strides = array<i32>} : memref<64x8xf32, #tpu.memory_space<vmem>>, vector<64x8xf32>,
    %c0_23 = arith.constant 0 : index
    %c0_24 = arith.constant 0 : index
    %37 = vector.load %arg7[%c0_23, %c0_24] : memref<64x1xf32, #tpu.memory_space<vmem>>, vector<64x1xf32>
    tpu.vector_store %arg7[%c0_23, %c0_24], %18 {strides = array<i32>} : memref<64x1xf32, #tpu.memory_space<vmem>>, vector<64x1xf32>,
    %c0_i32_25 = arith.constant 0 : i32
    %38 = arith.cmpi eq, %arg2, %c0_i32_25 : i32
    %39 = arith.extui %38 : i1 to i32
    %c0_i32_26 = arith.constant 0 : i32
    %40 = arith.cmpi ne, %39, %c0_i32_26 : i32
    scf.if %40 {
      %c0_27 = arith.constant 0 : index
      %c0_28 = arith.constant 0 : index
      %41 = vector.load %arg8[%c0_27, %c0_28] : memref<64x1xf32, #tpu.memory_space<vmem>>, vector<64x1xf32>
      %42 = tpu.reciprocal %41 {approx = true} : vector<64x1xf32> -> vector<64x1xf32>
      %c0_29 = arith.constant 0 : index
      %c0_30 = arith.constant 0 : index
      %43 = vector.load %arg9[%c0_29, %c0_30] : memref<64x8xf32, #tpu.memory_space<vmem>>, vector<64x8xf32>
      %44 = vector.broadcast %42 : vector<64x1xf32> to vector<64x8xf32>
      %45 = arith.mulf %43, %44 : vector<64x8xf32>
      %c0_31 = arith.constant 0 : index
      %c0_32 = arith.constant 0 : index
      %c0_33 = arith.constant 0 : index
      %46 = vector.load %arg6[%c0_31, %c0_32, %c0_33] : memref<1x64x8xf32, #tpu.memory_space<vmem>>, vector<1x64x8xf32>
      %47 = vector.shape_cast %46 : vector<1x64x8xf32> to vector<64x8xf32>
      %48 = vector.shape_cast %45 : vector<64x8xf32> to vector<1x64x8xf32>
      tpu.vector_store %arg6[%c0_31, %c0_32, %c0_33], %48 {strides = array<i32>} : memref<1x64x8xf32, #tpu.memory_space<vmem>>, vector<1x64x8xf32>,
    } else {
    }
    return
  }
  func.func @transform_0(%arg0: i32, %arg1: i32, %arg2: i32) -> (i32, i32, i32) {
    %c0_i32 = arith.constant 0 : i32
    %c0_i32_0 = arith.constant 0 : i32
    return %arg0, %arg1, %c0_i32 : i32, i32, i32
  }
  func.func @transform_1(%arg0: i32, %arg1: i32, %arg2: i32) -> (i32, i32, i32) {
    %c0_i32 = arith.constant 0 : i32
    %c0_i32_0 = arith.constant 0 : i32
    return %arg0, %arg2, %c0_i32 : i32, i32, i32
  }
  func.func @transform_2(%arg0: i32, %arg1: i32, %arg2: i32) -> (i32, i32, i32) {
    %c0_i32 = arith.constant 0 : i32
    %c0_i32_0 = arith.constant 0 : i32
    return %arg0, %arg2, %c0_i32 : i32, i32, i32
  }
  func.func @transform_3(%arg0: i32, %arg1: i32, %arg2: i32) -> (i32, i32, i32) {
    %c0_i32 = arith.constant 0 : i32
    %c0_i32_0 = arith.constant 0 : i32
    return %arg0, %arg1, %c0_i32 : i32, i32, i32
  }
}

module attributes {stable_mosaic.version = 11 : i64} {
  func.func @_out_proj_kernel(%arg0: i32, %arg1: memref<128x32xf32, #tpu.memory_space<vmem>>, %arg2: memref<32x32xbf16, #tpu.memory_space<vmem>>, %arg3: memref<1x32xf32, #tpu.memory_space<vmem>>, %arg4: memref<128x32xf32, #tpu.memory_space<vmem>>, %arg5: memref<1x1xf32, #tpu.memory_space<vmem>>, %arg6: memref<128x32xf32, #tpu.memory_space<vmem>>) attributes {dimension_semantics = [#tpu.dimension_semantics<parallel>], iteration_bounds = array<i64: 1>, scalar_prefetch = 0 : i64, scratch_operands = 0 : i64, tpu.core_type = #tpu.core_type<tc>, window_params = [{transform_indices = @transform_0, window_bounds = array<i64: 128, 32>}, {pipeline_mode = #tpu.pipeline_mode<synchronous>, transform_indices = @transform_1, window_bounds = array<i64: 32, 32>}, {pipeline_mode = #tpu.pipeline_mode<synchronous>, transform_indices = @transform_2, window_bounds = array<i64: 1, 32>}, {transform_indices = @transform_3, window_bounds = array<i64: 128, 32>}, {pipeline_mode = #tpu.pipeline_mode<synchronous>, transform_indices = @transform_4, window_bounds = array<i64: 1, 1>}, {transform_indices = @transform_5, window_bounds = array<i64: 128, 32>}]} {
    %c0 = arith.constant 0 : index
    %c0_0 = arith.constant 0 : index
    %0 = vector.load %arg1[%c0, %c0_0] : memref<128x32xf32, #tpu.memory_space<vmem>>, vector<128x32xf32>
    %1 = arith.truncf %0 : vector<128x32xf32> to vector<128x32xbf16>
    %c0_1 = arith.constant 0 : index
    %c0_2 = arith.constant 0 : index
    %2 = vector.load %arg2[%c0_1, %c0_2] : memref<32x32xbf16, #tpu.memory_space<vmem>>, vector<32x32xbf16>
    %cst = arith.constant dense<0.000000e+00> : vector<128x32xf32>
    %3 = tpu.matmul %1, %2, %cst {dimension_numbers = #tpu.dot_dimension_numbers<[1], [0], [0], [1], [0, 0, 1, 1], [], []>} : vector<128x32xbf16>, vector<32x32xbf16>, vector<128x32xf32> -> vector<128x32xf32>
    %c0_3 = arith.constant 0 : index
    %c0_4 = arith.constant 0 : index
    %4 = vector.load %arg3[%c0_3, %c0_4] : memref<1x32xf32, #tpu.memory_space<vmem>>, vector<1x32xf32>
    %5 = vector.broadcast %4 : vector<1x32xf32> to vector<128x32xf32>
    %6 = arith.addf %3, %5 : vector<128x32xf32>
    %c0_5 = arith.constant 0 : index
    %c0_6 = arith.constant 0 : index
    %7 = vector.load %arg4[%c0_5, %c0_6] : memref<128x32xf32, #tpu.memory_space<vmem>>, vector<128x32xf32>
    %c0_7 = arith.constant 0 : index
    %c0_8 = arith.constant 0 : index
    %8 = vector.load %arg5[%c0_7, %c0_8] : memref<1x1xf32, #tpu.memory_space<vmem>>, vector<1x1xf32>
    %9 = vector.broadcast %8 : vector<1x1xf32> to vector<128x32xf32>
    %10 = arith.mulf %9, %6 : vector<128x32xf32>
    %11 = arith.addf %7, %10 : vector<128x32xf32>
    %c0_9 = arith.constant 0 : index
    %c0_10 = arith.constant 0 : index
    %12 = vector.load %arg6[%c0_9, %c0_10] : memref<128x32xf32, #tpu.memory_space<vmem>>, vector<128x32xf32>
    tpu.vector_store %arg6[%c0_9, %c0_10], %11 {strides = array<i32>} : memref<128x32xf32, #tpu.memory_space<vmem>>, vector<128x32xf32>,
    return
  }
  func.func @transform_0(%arg0: i32) -> (i32, i32) {
    %c0_i32 = arith.constant 0 : i32
    %c0_i32_0 = arith.constant 0 : i32
    return %arg0, %c0_i32 : i32, i32
  }
  func.func @transform_1(%arg0: i32) -> (i32, i32) {
    %c0_i32 = arith.constant 0 : i32
    %c0_i32_0 = arith.constant 0 : i32
    %c0_i32_1 = arith.constant 0 : i32
    return %c0_i32, %c0_i32_0 : i32, i32
  }
  func.func @transform_2(%arg0: i32) -> (i32, i32) {
    %c0_i32 = arith.constant 0 : i32
    %c0_i32_0 = arith.constant 0 : i32
    %c0_i32_1 = arith.constant 0 : i32
    return %c0_i32, %c0_i32_0 : i32, i32
  }
  func.func @transform_3(%arg0: i32) -> (i32, i32) {
    %c0_i32 = arith.constant 0 : i32
    %c0_i32_0 = arith.constant 0 : i32
    return %arg0, %c0_i32 : i32, i32
  }
  func.func @transform_4(%arg0: i32) -> (i32, i32) {
    %c0_i32 = arith.constant 0 : i32
    %c0_i32_0 = arith.constant 0 : i32
    %c0_i32_1 = arith.constant 0 : i32
    return %c0_i32, %c0_i32_0 : i32, i32
  }
  func.func @transform_5(%arg0: i32) -> (i32, i32) {
    %c0_i32 = arith.constant 0 : i32
    %c0_i32_0 = arith.constant 0 : i32
    return %arg0, %c0_i32 : i32, i32
  }
}

</mosaic_0001>

<bundles_post_ra>
// kernel: spatial_transformer.17
= control target key start
LH: loop header
LB: loop body
LE: loop exit
PB: predicated region body
PF: predicated region fallthrough
CT: control target
= control target key end

     0   :  { %12 = vsyncpa [#allocation3], 0  ;;  %s1072_s0 = inlined_call_operand.hbm [shape: f32[2,64,32], index: 0, kind: input, shape index: {}]   ;;  %s1073_s1 = inlined_call_operand.vmem [shape: f32[32,32], index: 1, kind: input, shape index: {}]   ;;  %s1074_s2 = inlined_call_operand.vmem [shape: f32[32,32], index: 2, kind: input, shape index: {}]   ;;  %s1075_s3 = inlined_call_operand.vmem [shape: f32[1,32], index: 3, kind: input, shape index: {}]   ;;  %s1076_s4 = inlined_call_operand.vmem [shape: f32[1,32], index: 4, kind: input, shape index: {}]   ;;  %s1077_s5 = inlined_call_operand.vmem [shape: bf16[32,32], index: 5, kind: input, shape index: {}]   ;;  %s1078_s6 = inlined_call_operand.vmem [shape: f32[1,32], index: 6, kind: input, shape index: {}]   ;;  %s1079_s7 = inlined_call_operand.vmem [shape: f32[2,64,32], index: 7, kind: output, shape index: {}]  }
   0x1   :  { %14 = vsyncpa [#allocation3 + $0x1], 0  ;;  %s851_s24 = smov 0   ;;  %s853_s25 = smov 0  }
   0x2   :  { %s855_s26 = smov 0   ;;  %s857_s27 = smov 0  }
   0x3 LB: > { %s870_s28 = sadd.s32 4294967295, %s807_s27   ;;  %s873_s29 = sadd.s32 1, %s807_s27   ;;  %s807_s27 = sphi %s857_s27, %s1086_s27   ;;  %s803_s26 = sphi %s855_s26, %s1085_s26   ;;  %s799_s25 = sphi %s853_s25, %s1084_s25   ;;  %s795_s24 = sphi %s851_s24, %s1083_s24  }
   0x4   : > { %s24_s30 = ssub.s32 %s807_s27, %s873_s29  ;;  %s27_s8 = sadd.s32 1, %s803_s26 }
   0x5   : > { %p25_p0 = scmp.eq.s32.totalorder %s24_s30, 0  ;;  %p34_p1 = scmp.ne.s32.totalorder %s803_s26, %s799_s25 }
   0x6   : > { %p35_p2 = scmp.eq.s32.totalorder %s807_s27, 0  ;;  %p40_p3 = scmp.ne.s32.totalorder %s799_s25, %s795_s24 }
   0x7   : > { %s883_s9 = scalar_select %p25_p0, %s803_s26, %s27_s8  }
   0x8   : > { %p885_p4 = por %p35_p2, %p34_p1  ;;  %p41_p5 = scmp.eq.s32.totalorder %s870_s28, 0 }
   0x9   : > { %p703_p6 = scmp.lt.s32.totalorder %s807_s27, 2  ;;  %s234_s12 = sand.u32 1, %s803_s26  }
   0xa   : > { %p891_p7 = por %p41_p5, %p40_p3  ;;  %s662_s13 = sshll.u32 %s234_s12, 6 }
   0xb   : > { %s687_s14 = sshll.u32 %s807_s27, 6  ;;  %s238_s18 = scalar_lea.vmem [#allocation2], %s662_s13 }
   0xc   : > { %s243_s17 = scalar_lea.hbm %s1072_s0, %s687_s14  ;;  %s246_s19 = sshll.u32 %s238_s18, 4  ;;  %s247_s19 = int_to_ptr.vmem [resolvable:$true] %s246_s19 }
   0xd   : > { %s244_s20 = sshll.u32 %s243_s17, 4  ;;  %p902_p8 = pnand %p703_p6, %p885_p4  ;;  %s245_s20 = int_to_ptr.hbm [resolvable:$true] %s244_s20 }
   0xe   : > { %p665_p9 = scmp.ge.s32.totalorder %s807_s27, 1  ;;  %s235_s22 = scalar_lea.sflag [#allocation3], %s234_s12 }
   0xf   : > { %s743_s23 = sshra.s32 %s245_s20, 4  ;;  %p747_p11 = pneg %p902_p8  ;;  %s744_s23 = int_to_ptr.hbm [resolvable:$true] %s743_s23 }
  0x10   : > { %s745_s24 = scalar_lea.hbm %s744_s23, 64  ;;  %s750_s13 = scalar_lea.hbm %s1072_s0, 128 }
  0x11   : > { %p746_p10 = scmp.ne.s32.totalorder %s744_s23, %s745_s24  ;;  %p751_p0 = scmp.lt.s32.totalorder %s744_s23, %s1072_s0 }
  0x12   : > { %p752_p1 = scmp.lt.s32.totalorder %s750_s13, %s745_s24 }
  0x13   : > { %p748_p12 = pnand %p747_p11, %p746_p10 }
  0x14   : > { %p753_p2 = por %p752_p1, %p751_p0 }
  0x15   : > { %p749_p13 = pneg %p748_p12 }
  0x17   : > { %p754_p3 = pnand %p753_p2, %p749_p13 }
  0x19   : > { %757 = shalt.err (!%p754_p3)
}
  0x1a   : > { %s809_s12 = smov 128   ;;  %s810_s15 = smov 8  }
  0x1b   : > { %702 = dma.hbm_to_vmem [thread:$0]  (!%p902_p8), %s245_s20, 1024, %s247_s19, %s235_s22, %s809_s12, %s809_s12, %s810_s15  }
  0x1c   : > { %p254_p4 = scmp.lt.s32.totalorder %s807_s27, 3 }
  0x1e   : > { %p255_p5 = pnand %p665_p9, %p254_p4 }
  0x1f   : > { %s260_s16 = sand.u32 (!%p255_p5), 1, %s799_s25  }
  0x20   : > { %258 = sbr.rel (%p255_p5) target bundleno = 509 (0x1fd), region = 48  ;;  %s666_s17 = sshll.u32 (!%p255_p5), %s260_s16, 6 }
  0x21   : > { %s261_s18 = scalar_lea.sflag (!%p255_p5), [#allocation3], %s260_s16  ;;  %s921_s23 = scalar_lea.vmem (!%p255_p5), [#allocation2], %s666_s17 }
  0x25   : > { %790 = dma.done.wait (%p891_p7), %s261_s18, 1024  }
  0x26   : > { %792 = vsyncadd (%p891_p7), %s261_s18, 4294966272  ;;  %vm318_vm0 = vcmask 261120   ;;  %v313_v0 = vld [vmem:[%s1073_s1 + $0x18] sm:$0xff]  ;;  %v312_v1 = vld [vmem:[%s1073_s1 + $0x10] sm:$0xff]  ;;  %p296_p6 = scmp.lt.s32.totalorder %s870_s28, 1 }
  0x27   : > { %384 = vmatpush.msra.mxu0 %v313_v0  ;;  %408 = vmatpush.msra.mxu1 %v313_v0  ;;  %v934_v2 = vld [vmem:[%s921_s23] sm:$0xff]  ;;  %v937_v3 = vld [vmem:[%s921_s23 + $0x8] sm:$0xff]  ;;  %v943_v5 = vld [vmem:[%s921_s23 + $0x10] sm:$0xff] }
  0x28   : > { %v311_v4 = vld [vmem:[%s1073_s1 + $0x8] sm:$0xff]  ;;  %v946_v6 = vld [vmem:[%s921_s23 + $0x18] sm:$0xff]  ;;  %v319_v7 = vsel %vm318_vm0, %v934_v2, 0.0  ;;  %v320_v8 = vsel %vm318_vm0, %v937_v3, 0.0  ;;  %v340_v9 = vmul.f32 %v934_v2, %v934_v2  ;;  %v341_v10 = vmul.f32 %v937_v3, %v937_v3  ;;  %v957_v11 = vld [vmem:[%s921_s23 + $0x20] sm:$0xff]  ;;  %s1088_s28 = smov (!%p296_p6, %s870_s28), 1 }
  0x29   : > { %385 = vmatpush.msra.mxu0 %v312_v1  ;;  %409 = vmatpush.msra.mxu1 %v312_v1  ;;  %v321_v12 = vadd.f32 %v320_v8, %v319_v7  ;;  %v322_v13 = vsel %vm318_vm0, %v943_v5, 0.0  ;;  %v310_v14 = vld [vmem:[%s1073_s1] sm:$0xff]  ;;  %v965_v15 = vld [vmem:[%s921_s23 + $0x28] sm:$0xff]  ;;  %v324_v16 = vsel %vm318_vm0, %v946_v6, 0.0  ;;  %v342_v17 = vmul.f32 %v943_v5, %v943_v5  ;;  %v317_v18 = vld [vmem:[%s1074_s2 + $0x18] sm:$0xff]  ;;  %s688_s24 = sshll.u32 %s1088_s28, 6 }
  0x2a   : > { %v343_v20 = vmul.f32 %v946_v6, %v946_v6  ;;  %v348_v21 = vsel %vm318_vm0, %v340_v9, 0.0  ;;  %v316_v22 = vld [vmem:[%s1074_s2 + $0x10] sm:$0xff]  ;;  %v326_v23 = vsel %vm318_vm0, %v957_v11, 0.0  ;;  %v344_v24 = vmul.f32 %v957_v11, %v957_v11  ;;  %446 = vmatpush.msra.mxu2 %v317_v18  ;;  %469 = vmatpush.msra.mxu3 %v317_v18  ;;  %v995_v33 = vld [vmem:[%s921_s23 + $0x38] sm:$0xff]  ;;  %v315_v0 = vld [vmem:[%s1074_s2 + $0x8] sm:$0xff]  ;;  %s300_s14 = scalar_lea.vmem %s1079_s7, %s688_s24 }
  0x2b   : > { %386 = vmatpush.msra.mxu0 %v311_v4  ;;  %410 = vmatpush.msra.mxu1 %v311_v4  ;;  %v323_v19 = vadd.f32 %v322_v13, %v321_v12  ;;  %v349_v25 = vsel %vm318_vm0, %v341_v10, 0.0  ;;  %v986_v26 = vld [vmem:[%s921_s23 + $0x30] sm:$0xff]  ;;  %v351_v29 = vsel %vm318_vm0, %v342_v17, 0.0  ;;  %v328_v30 = vsel %vm318_vm0, %v965_v15, 0.0  ;;  %v314_v1 = vld [vmem:[%s1074_s2] sm:$0xff] }
  0x2c   : > { %v350_v28 = vadd.f32 %v349_v25, %v348_v21  ;;  %v345_v31 = vmul.f32 %v965_v15, %v965_v15  ;;  %v353_v32 = vsel %vm318_vm0, %v343_v20, 0.0  ;;  %447 = vmatpush.msra.mxu2 %v316_v22  ;;  %470 = vmatpush.msra.mxu3 %v316_v22  ;;  %v330_v36 = vsel %vm318_vm0, %v986_v26, 0.0 }
  0x2d   : > { %387 = vmatpush.msra.mxu0 %v310_v14  ;;  %v325_v27 = vadd.f32 %v324_v16, %v323_v19  ;;  %411 = vmatpush.msra.mxu1 %v310_v14  ;;  %v346_v37 = vmul.f32 %v986_v26, %v986_v26  ;;  %v355_v38 = vsel %vm318_vm0, %v344_v24, 0.0  ;;  %v332_v41 = vsel %vm318_vm0, %v995_v33, 0.0  ;;  %v689_v24 = vld [vmem:[%s1077_s5] sm:$0xff] }
  0x2e   : > { %v352_v35 = vadd.f32 %v351_v29, %v350_v28  ;;  %v347_v42 = vmul.f32 %v995_v33, %v995_v33  ;;  %v357_v43 = vsel %vm318_vm0, %v345_v31, 0.0  ;;  %448 = vmatpush.msra.mxu2 %v315_v0  ;;  %471 = vmatpush.msra.mxu3 %v315_v0 }
  0x2f   : > { %v327_v34 = vadd.f32 %v326_v23, %v325_v27  ;;  %v359_v46 = vsel %vm318_vm0, %v346_v37, 0.0  ;;  %v690_v23 = vld [vmem:[%s1077_s5 + $0x8] sm:$0xff] }
  0x30   : > { %v354_v40 = vadd.f32 %v353_v32, %v352_v35  ;;  %v361_v49 = vsel %vm318_vm0, %v347_v42, 0.0  ;;  %449 = vmatpush.msra.mxu2 %v314_v1  ;;  %472 = vmatpush.msra.mxu3 %v314_v1  ;;  %v738_v32 = vld [vmem:[%s1075_s3] ss:$0 sm:$0xff] }
  0x31   : > { %v329_v39 = vadd.f32 %v328_v30, %v327_v34  ;;  %561 = vmatpush.bf16.msrb.mxu0 %v690_v23  ;;  %691 = vmatpush.bf16.msrb.mxu1 %v690_v23 }
  0x32   : > { %v356_v45 = vadd.f32 %v355_v38, %v354_v40  ;;  %692 = vmatpush.bf16.msrb.mxu2 %v690_v23  ;;  %693 = vmatpush.bf16.msrb.mxu3 %v690_v23 }
  0x33   : > { %v331_v44 = vadd.f32 %v330_v36, %v329_v39 }
  0x34   : > { %v358_v48 = vadd.f32 %v357_v43, %v356_v45 }
  0x35   : > { %v333_v47 = vadd.f32 %v332_v41, %v331_v44  ;;  %562 = vmatpush.bf16.msrb.mxu0 %v689_v24  ;;  %694 = vmatpush.bf16.msrb.mxu1 %v689_v24 }
  0x36   : > { %v360_v51 = vadd.f32 %v359_v46, %v358_v48  ;;  %695 = vmatpush.bf16.msrb.mxu2 %v689_v24  ;;  %696 = vmatpush.bf16.msrb.mxu3 %v689_v24 }
  0x37   : > { %v334_v50 = vrot.slane %v333_v47, 4 }
  0x38   : > { %v362_v53 = vadd.f32 %v361_v49, %v360_v51 }
  0x39   : > { %v335_v52 = vadd.f32 %v334_v50, %v333_v47 }
  0x3a   : > { %v363_v55 = vrot.slane %v362_v53, 4 }
  0x3b   : > { %v336_v54 = vrot.slane %v335_v52, 2 }
  0x3c   : > { %v364_v57 = vadd.f32 %v363_v55, %v362_v53 }
  0x3d   : > { %v337_v56 = vadd.f32 %v336_v54, %v335_v52 }
  0x3e   : > { %v365_v59 = vrot.slane %v364_v57, 2 }
  0x3f   : > { %v338_v58 = vrot.slane %v337_v56, 1 }
  0x40   : > { %v366_v61 = vadd.f32 %v365_v59, %v364_v57 }
  0x41   : > { %v339_v60 = vadd.f32 %v338_v58, %v337_v56 }
  0x42   : > { %v367_v62 = vrot.slane %v366_v61, 1 }
  0x43   : > { %669 = vmatmul.msk.f32.vlgmr.msra.gmra.mxu0 %vm318_vm0, %v339_v60 }
  0x44   : > { %v368_v63 = vadd.f32 %v367_v62, %v366_v61  ;;  %v740_v61 = vld [vmem:[%s1078_s6] ss:$0 sm:$0xff] }
  0x46   : > { %670 = vmatmul.msk.f32.vlgmr.msra.gmra.mxu1 %vm318_vm0, %v368_v63 }
  0xc0   : > { %v389_v4 = vpop.f32.mrf.mxu0 }
  0xc1   : > { %v392_v7 = vmul.f32 0.015625, %v389_v4 }
  0xc3   : > { %v417_v8 = vmul.f32 %v392_v7, %v392_v7  ;;  %671 = vmatmul.msk.f32.vlgmr.msra.gmra.mxu2 %vm318_vm0, %v392_v7  ;;  %v413_v9 = vpop.f32.mrf.mxu1 }
  0xc4   : > { %v416_v10 = vmul.f32 0.015625, %v413_v9 }
  0xc6   : > { %v418_v12 = vsub.f32 %v416_v10, %v417_v8 }
  0xc8   : > { %v419_v13 = vmax.f32 %v418_v12, 0.0 }
  0xca   : > { %v420_v14 = vadd.f32 1e-06, %v419_v13 }
  0xcc   : > { %741 = vrsqrt.f32 %v420_v14  ;;  %vm427_vm2 = vweird.f32 %v420_v14 }
  0xd2   : > { %v742_v16 = vpop.eup %741 }
  0xd3   : > { %v422_v17 = vmul.f32 %v742_v16, %v420_v14  ;;  %vm428_vm1 = vweird.f32 %v742_v16 }
  0xd4   : > { %vm429_vm3 = vmor %vm427_vm2, %vm428_vm1 }
  0xd5   : > { %v423_v18 = vmul.f32 %v742_v16, %v422_v17 }
  0xd7   : > { %v424_v19 = vmul.f32 0.5, %v423_v18 }
  0xd9   : > { %v425_v20 = vsub.f32 1.5, %v424_v19 }
  0xdb   : > { %v426_v21 = vmul.f32 %v742_v16, %v425_v20 }
  0xdd   : > { %v430_v22 = vsel %vm429_vm3, %v742_v16, %v426_v21 }
  0xde   : > { %672 = vmatmul.msk.f32.vlgmr.msra.gmra.mxu3 %vm318_vm0, %v430_v22 }
 0x146   : > { %v451_v25 = vpop.f32.mrf.mxu2 }
 0x147   : > { %v477_v27 = vperm.slane %v451_v25, 0 }
 0x149   : > { %v478_v29 = vsub.f32 %v934_v2, %v477_v27  ;;  %v479_v31 = vsub.f32 %v937_v3, %v477_v27  ;;  %v480_v34 = vsub.f32 %v943_v5, %v477_v27  ;;  %v481_v35 = vsub.f32 %v946_v6, %v477_v27  ;;  %v739_v3 = vld [vmem:[%s1076_s4] ss:$0 sm:$0xff] }
 0x14a   : > { %v482_v36 = vsub.f32 %v957_v11, %v477_v27  ;;  %v483_v37 = vsub.f32 %v965_v15, %v477_v27  ;;  %v484_v38 = vsub.f32 %v986_v26, %v477_v27  ;;  %v485_v39 = vsub.f32 %v995_v33, %v477_v27 }
 0x161   : > { %v474_v28 = vpop.f32.mrf.mxu3 }
 0x162   : > { %v486_v30 = vperm.slane %v474_v28, 0 }
 0x164   : > { %v487_v2 = vmul.f32 %v486_v30, %v478_v29  ;;  %v488_v40 = vmul.f32 %v486_v30, %v479_v31  ;;  %v489_v41 = vmul.f32 %v486_v30, %v480_v34  ;;  %v490_v42 = vmul.f32 %v486_v30, %v481_v35 }
 0x165   : > { %v491_v43 = vmul.f32 %v486_v30, %v482_v36  ;;  %v492_v5 = vmul.f32 %v486_v30, %v483_v37  ;;  %v493_v44 = vmul.f32 %v486_v30, %v484_v38  ;;  %v494_v6 = vmul.f32 %v486_v30, %v485_v39 }
 0x166   : > { %v499_v45 = vmul.f32 %v738_v32, %v487_v2  ;;  %v500_v11 = vmul.f32 %v738_v32, %v488_v40  ;;  %v501_v46 = vmul.f32 %v738_v32, %v489_v41  ;;  %v502_v15 = vmul.f32 %v738_v32, %v490_v42 }
 0x167   : > { %v503_v47 = vmul.f32 %v738_v32, %v491_v43  ;;  %v504_v26 = vmul.f32 %v738_v32, %v492_v5  ;;  %v505_v48 = vmul.f32 %v738_v32, %v493_v44  ;;  %v506_v33 = vmul.f32 %v738_v32, %v494_v6 }
 0x168   : > { %v511_v49 = vadd.f32 %v739_v3, %v499_v45  ;;  %v512_v50 = vadd.f32 %v739_v3, %v500_v11  ;;  %v513_v51 = vadd.f32 %v739_v3, %v501_v46  ;;  %v514_v52 = vadd.f32 %v739_v3, %v502_v15 }
 0x169   : > { %v515_v53 = vadd.f32 %v739_v3, %v503_v47  ;;  %v516_v54 = vadd.f32 %v739_v3, %v504_v26  ;;  %v517_v55 = vadd.f32 %v739_v3, %v505_v48  ;;  %v518_v56 = vadd.f32 %v739_v3, %v506_v33 }
 0x16a   : > { %v519_v57 = vpack.c.bf16 %v512_v50, %v511_v49  ;;  %v520_v58 = vpack.c.bf16 %v514_v52, %v513_v51 }
 0x16b   : > { %v521_v59 = vpack.c.bf16 %v516_v54, %v515_v53  ;;  %v522_v60 = vpack.c.bf16 %v518_v56, %v517_v55 }
 0x16c   : > { %681 = vmatmul.msk.bf16.vlgmr.msrb.gmra.mxu0 %vm318_vm0, %v519_v57  ;;  %682 = vmatmul.msk.bf16.vlgmr.msrb.gmra.mxu1 %vm318_vm0, %v520_v58 }
 0x16d   : > { %683 = vmatmul.msk.bf16.vlgmr.msrb.gmra.mxu2 %vm318_vm0, %v521_v59  ;;  %684 = vmatmul.msk.bf16.vlgmr.msrb.gmra.mxu3 %vm318_vm0, %v522_v60 }
 0x1e9   : > { %v564_v62 = vpop.f32.mrf.mxu0  ;;  %v569_v63 = vpop.f32.mrf.mxu1 }
 0x1ea   : > { %v565_v0 = vadd.f32 %v740_v61, %v564_v62  ;;  %v570_v1 = vadd.f32 %v740_v61, %v569_v63 }
 0x1ec   : > { %584 = vst.msk [vmem:[%s300_s14] sm:$0xff] %vm318_vm0, %v565_v0 }
 0x1ed   : > { %586 = vst.msk [vmem:[%s300_s14 + $0x10] sm:$0xff] %vm318_vm0, %v570_v1 }
 0x1f0   : > { %v574_v4 = vpop.f32.mrf.mxu2  ;;  %v579_v7 = vpop.f32.mrf.mxu3 }
 0x1f1   : > { %v575_v8 = vadd.f32 %v740_v61, %v574_v4  ;;  %v580_v9 = vadd.f32 %v740_v61, %v579_v7  ;;  %v566_v10 = vpop.f32.mrf.mxu0  ;;  %v571_v12 = vpop.f32.mrf.mxu1 }
 0x1f2   : > { %v567_v13 = vadd.f32 %v740_v61, %v566_v10  ;;  %v572_v14 = vadd.f32 %v740_v61, %v571_v12 }
 0x1f3   : > { %588 = vst.msk [vmem:[%s300_s14 + $0x20] sm:$0xff] %vm318_vm0, %v575_v8 }
 0x1f4   : > { %590 = vst.msk [vmem:[%s300_s14 + $0x30] sm:$0xff] %vm318_vm0, %v580_v9 }
 0x1f5   : > { %585 = vst.msk [vmem:[%s300_s14 + $0x8] sm:$0xff] %vm318_vm0, %v567_v13 }
 0x1f6   : > { %587 = vst.msk [vmem:[%s300_s14 + $0x18] sm:$0xff] %vm318_vm0, %v572_v14 }
 0x1f8   : > { %v576_v16 = vpop.f32.mrf.mxu2  ;;  %v581_v17 = vpop.f32.mrf.mxu3 }
 0x1f9   : > { %v577_v18 = vadd.f32 %v740_v61, %v576_v16  ;;  %v582_v19 = vadd.f32 %v740_v61, %v581_v17 }
 0x1fb   : > { %589 = vst.msk [vmem:[%s300_s14 + $0x28] sm:$0xff] %vm318_vm0, %v577_v18 }
 0x1fc   : > { %591 = vst.msk [vmem:[%s300_s14 + $0x38] sm:$0xff] %vm318_vm0, %v582_v19 }
 0x1fd PF: > { %p17_p7 = scmp.ge.s32.totalorder %s873_s29, 4   ;;  %s1083_s24 = smov %s799_s25 }
 0x1fe   : > { %s1084_s25 = smov %s803_s26  ;;  %s1085_s26 = smov %s883_s9 }
 0x1ff   : > { %s1086_s27 = smov %s873_s29  ;;  %19 = sbr.rel (!%p17_p7) target bundleno = 3 (0x3), region = 88 }
 0x204   :  { %613 = vsyncpa [#allocation3], 1 }
 0x205   :  { %615 = vsyncpa [#allocation3 + $0x1], 1 }

// kernel: spatial_transformer.18
= control target key start
LH: loop header
LB: loop body
LE: loop exit
PB: predicated region body
PF: predicated region fallthrough
CT: control target
= control target key end

     0   :  { %vm34_vm0 = vcmask 261120   ;;  %v613_v32 = vmov 32.0   ;;  %s1270_s0 = inlined_call_operand.vmem [shape: f32[128,32], index: 0, kind: input, shape index: {}]   ;;  %s1271_s1 = inlined_call_operand.vmem [shape: f32[1,32], index: 1, kind: input, shape index: {}]   ;;  %s1272_s2 = inlined_call_operand.vmem [shape: f32[1,32], index: 2, kind: input, shape index: {}]   ;;  %s1273_s3 = inlined_call_operand.vmem [shape: bf16[32,96], index: 3, kind: input, shape index: {}]   ;;  %s1274_s4 = inlined_call_operand.vmem [shape: f32[128,96], index: 4, kind: output, shape index: {}]  }
   0x1   :  { %v30_v0 = vld [vmem:[%s1270_s0 + $0x60] sm:$0xff]  ;;  %v657_v6 = vld [vmem:[%s1270_s0 + $0x68] sm:$0xff]  ;;  %v688_v14 = vld [vmem:[%s1270_s0 + $0x50] sm:$0xff]  ;;  %579 = vrcp.f32 %v613_v32 }
   0x2   :  { %v26_v1 = vld [vmem:[%s1270_s0 + $0x40] sm:$0xff]  ;;  %v71_v3 = vsel %vm34_vm0, %v30_v0, 0.0  ;;  %v662_v7 = vld [vmem:[%s1270_s0 + $0x48] sm:$0xff]  ;;  %v74_v9 = vsel %vm34_vm0, %v657_v6, 0.0  ;;  %v65_v17 = vsel %vm34_vm0, %v688_v14, 0.0  ;;  %v699_v18 = vld [vmem:[%s1270_s0 + $0x58] sm:$0xff] }
   0x3   :  { %v648_v2 = vld [vmem:[%s1270_s0] sm:$0xff]  ;;  %v59_v4 = vsel %vm34_vm0, %v26_v1, 0.0  ;;  %72 = vadd.xlane.f32.xlu1 %v71_v3  ;;  %v667_v8 = vld [vmem:[%s1270_s0 + $0x8] sm:$0xff]  ;;  %v62_v10 = vsel %vm34_vm0, %v662_v7, 0.0  ;;  %v704_v19 = vld [vmem:[%s1270_s0 + $0x70] sm:$0xff]  ;;  %v68_v21 = vsel %vm34_vm0, %v699_v18, 0.0 }
   0x4   :  { %v35_v5 = vsel %vm34_vm0, %v648_v2, 0.0  ;;  %60 = vadd.xlane.f32.xlu0 %v59_v4  ;;  %v38_v11 = vsel %vm34_vm0, %v667_v8, 0.0  ;;  %v678_v12 = vld [vmem:[%s1270_s0 + $0x20] sm:$0xff]  ;;  %v683_v13 = vld [vmem:[%s1270_s0 + $0x28] sm:$0xff]  ;;  %v709_v20 = vld [vmem:[%s1270_s0 + $0x78] sm:$0xff]  ;;  %v77_v22 = vsel %vm34_vm0, %v704_v19, 0.0 }
   0x5   :  { %36 = vadd.xlane.f32.xlu2 %v35_v5  ;;  %v47_v15 = vsel %vm34_vm0, %v678_v12, 0.0  ;;  %v50_v16 = vsel %vm34_vm0, %v683_v13, 0.0  ;;  %v80_v23 = vsel %vm34_vm0, %v709_v20, 0.0  ;;  %v720_v24 = vld [vmem:[%s1270_s0 + $0x10] sm:$0xff]  ;;  %v725_v25 = vld [vmem:[%s1270_s0 + $0x18] sm:$0xff] }
   0x6   :  { %v730_v26 = vld [vmem:[%s1270_s0 + $0x30] sm:$0xff]  ;;  %v41_v27 = vsel %vm34_vm0, %v720_v24, 0.0  ;;  %v44_v28 = vsel %vm34_vm0, %v725_v25, 0.0  ;;  %v741_v30 = vld [vmem:[%s1270_s0 + $0x38] sm:$0xff] }
   0x7   :  { %v53_v29 = vsel %vm34_vm0, %v730_v26, 0.0  ;;  %v56_v31 = vsel %vm34_vm0, %v741_v30, 0.0  ;;  %v580_v33 = vpop.eup %579 }
   0x8   :  { %v84_v34 = vmul.f32 32.0, %v580_v33  ;;  %vm88_vm1 = vweird.f32 %v580_v33 }
   0xa   :  { %v85_v35 = vsub.f32 1.0, %v84_v34 }
   0xb   :  { %75 = vadd.xlane.f32.xlu1 %v74_v9 }
   0xc   :  { %63 = vadd.xlane.f32.xlu0 %v62_v10  ;;  %v86_v36 = vmul.f32 %v580_v33, %v85_v35 }
   0xd   :  { %39 = vadd.xlane.f32.xlu2 %v38_v11 }
   0xe   :  { %v87_v37 = vadd.f32 %v580_v33, %v86_v36 }
  0x10   :  { %v745_v38 = vsel %vm88_vm1, %v580_v33, %v87_v37 }
  0x13   :  { %51 = vadd.xlane.f32.xlu1 %v50_v16 }
  0x14   :  { %48 = vadd.xlane.f32.xlu0 %v47_v15 }
  0x15   :  { %66 = vadd.xlane.f32.xlu2 %v65_v17 }
  0x1b   :  { %78 = vadd.xlane.f32.xlu1 %v77_v22 }
  0x1c   :  { %69 = vadd.xlane.f32.xlu0 %v68_v21 }
  0x1d   :  { %81 = vadd.xlane.f32.xlu2 %v80_v23 }
  0x23   :  { %45 = vadd.xlane.f32.xlu1 %v44_v28 }
  0x24   :  { %42 = vadd.xlane.f32.xlu0 %v41_v27 }
  0x25   :  { %54 = vadd.xlane.f32.xlu2 %v53_v29 }
  0x2c   :  { %57 = vadd.xlane.f32.xlu0 %v56_v31 }
  0x76   :  { %v73_v39 = vpop.xlane.xlu1 %72 }
  0x77   :  { %v61_v40 = vpop.xlane.xlu0 %60  ;;  %v102_v41 = vmul.f32 %v745_v38, %v73_v39 }
  0x78   :  { %v98_v42 = vmul.f32 %v745_v38, %v61_v40  ;;  %v37_v43 = vpop.xlane.xlu2 %36 }
  0x79   :  { %v749_v44 = vsub.f32 %v30_v0, %v102_v41  ;;  %v90_v56 = vmul.f32 %v745_v38, %v37_v43 }
  0x7a   :  { %v751_v45 = vsub.f32 %v26_v1, %v98_v42 }
  0x7b   :  { %v134_v47 = vmul.f32 %v749_v44, %v749_v44  ;;  %v779_v63 = vsub.f32 %v648_v2, %v90_v56 }
  0x7c   :  { %v130_v46 = vmul.f32 %v751_v45, %v751_v45 }
  0x7d   :  { %v174_v49 = vsel %vm34_vm0, %v134_v47, 0.0  ;;  %v122_v10 = vmul.f32 %v779_v63, %v779_v63 }
  0x7e   :  { %v162_v48 = vsel %vm34_vm0, %v130_v46, 0.0  ;;  %v76_v50 = vpop.xlane.xlu1 %75  ;;  %175 = vadd.xlane.f32.xlu0 %v174_v49 }
  0x7f   :  { %v64_v51 = vpop.xlane.xlu0 %63  ;;  %163 = vadd.xlane.f32.xlu1 %v162_v48  ;;  %v103_v52 = vmul.f32 %v745_v38, %v76_v50 }
  0x80   :  { %v99_v53 = vmul.f32 %v745_v38, %v64_v51  ;;  %v40_v54 = vpop.xlane.xlu2 %39 }
  0x81   :  { %v91_v55 = vmul.f32 %v745_v38, %v40_v54  ;;  %v764_v57 = vsub.f32 %v657_v6, %v103_v52 }
  0x82   :  { %v767_v58 = vsub.f32 %v662_v7, %v99_v53 }
  0x83   :  { %v770_v59 = vsub.f32 %v667_v8, %v91_v55  ;;  %v135_v60 = vmul.f32 %v764_v57, %v764_v57 }
  0x84   :  { %v131_v61 = vmul.f32 %v767_v58, %v767_v58 }
  0x85   :  { %v123_v62 = vmul.f32 %v770_v59, %v770_v59  ;;  %v177_v0 = vsel %vm34_vm0, %v135_v60, 0.0 }
  0x86   :  { %v165_v1 = vsel %vm34_vm0, %v131_v61, 0.0  ;;  %v52_v5 = vpop.xlane.xlu1 %51 }
  0x87   :  { %v49_v3 = vpop.xlane.xlu0 %48  ;;  %178 = vadd.xlane.f32.xlu1 %v177_v0  ;;  %166 = vadd.xlane.f32.xlu2 %v165_v1  ;;  %v141_v4 = vsel %vm34_vm0, %v123_v62, 0.0  ;;  %v95_v8 = vmul.f32 %v745_v38, %v52_v5 }
  0x88   :  { %v94_v6 = vmul.f32 %v745_v38, %v49_v3  ;;  %142 = vadd.xlane.f32.xlu0 %v141_v4  ;;  %v67_v7 = vpop.xlane.xlu2 %66 }
  0x89   :  { %v100_v9 = vmul.f32 %v745_v38, %v67_v7  ;;  %v796_v15 = vsub.f32 %v683_v13, %v95_v8 }
  0x8a   :  { %v788_v2 = vsub.f32 %v678_v12, %v94_v6  ;;  %v138_v12 = vsel %vm34_vm0, %v122_v10, 0.0 }
  0x8b   :  { %v793_v11 = vsub.f32 %v688_v14, %v100_v9  ;;  %v127_v29 = vmul.f32 %v796_v15, %v796_v15 }
  0x8c   :  { %v126_v16 = vmul.f32 %v788_v2, %v788_v2 }
  0x8d   :  { %v132_v17 = vmul.f32 %v793_v11, %v793_v11  ;;  %v153_v36 = vsel %vm34_vm0, %v127_v29, 0.0 }
  0x8e   :  { %v150_v21 = vsel %vm34_vm0, %v126_v16, 0.0  ;;  %v79_v14 = vpop.xlane.xlu1 %78 }
  0x8f   :  { %v70_v22 = vpop.xlane.xlu0 %69  ;;  %151 = vadd.xlane.f32.xlu1 %v150_v21  ;;  %139 = vadd.xlane.f32.xlu2 %v138_v12  ;;  %v168_v23 = vsel %vm34_vm0, %v132_v17, 0.0  ;;  %v104_v28 = vmul.f32 %v745_v38, %v79_v14  ;;  %v568_v17 = vld [vmem:[%s1273_s3] sm:$0xff] }
  0x90   :  { %v101_v27 = vmul.f32 %v745_v38, %v70_v22  ;;  %169 = vadd.xlane.f32.xlu0 %v168_v23  ;;  %v82_v13 = vpop.xlane.xlu2 %81 }
  0x91   :  { %v105_v31 = vmul.f32 %v745_v38, %v82_v13  ;;  %v817_v34 = vsub.f32 %v704_v19, %v104_v28 }
  0x92   :  { %v811_v32 = vsub.f32 %v699_v18, %v101_v27 }
  0x93   :  { %v814_v33 = vsub.f32 %v709_v20, %v105_v31  ;;  %v136_v43 = vmul.f32 %v817_v34, %v817_v34 }
  0x94   :  { %v133_v35 = vmul.f32 %v811_v32, %v811_v32 }
  0x95   :  { %v137_v37 = vmul.f32 %v814_v33, %v814_v33  ;;  %v180_v51 = vsel %vm34_vm0, %v136_v43, 0.0 }
  0x96   :  { %v171_v39 = vsel %vm34_vm0, %v133_v35, 0.0  ;;  %v46_v20 = vpop.xlane.xlu1 %45 }
  0x97   :  { %172 = vadd.xlane.f32.xlu1 %v171_v39  ;;  %v43_v40 = vpop.xlane.xlu0 %42  ;;  %154 = vadd.xlane.f32.xlu2 %v153_v36  ;;  %v183_v18 = vsel %vm34_vm0, %v137_v37, 0.0  ;;  %v93_v42 = vmul.f32 %v745_v38, %v46_v20 }
  0x98   :  { %v92_v41 = vmul.f32 %v745_v38, %v43_v40  ;;  %184 = vadd.xlane.f32.xlu0 %v183_v18  ;;  %v55_v19 = vpop.xlane.xlu2 %54 }
  0x99   :  { %v96_v46 = vmul.f32 %v745_v38, %v55_v19  ;;  %v838_v49 = vsub.f32 %v725_v25, %v93_v42 }
  0x9a   :  { %v832_v47 = vsub.f32 %v720_v24, %v92_v41 }
  0x9b   :  { %v835_v48 = vsub.f32 %v730_v26, %v96_v46  ;;  %v125_v25 = vmul.f32 %v838_v49, %v838_v49 }
  0x9c   :  { %v124_v50 = vmul.f32 %v832_v47, %v832_v47 }
  0x9d   :  { %v128_v52 = vmul.f32 %v835_v48, %v835_v48  ;;  %v147_v60 = vsel %vm34_vm0, %v125_v25, 0.0 }
  0x9e   :  { %v144_v53 = vsel %vm34_vm0, %v124_v50, 0.0 }
  0x9f   :  { %145 = vadd.xlane.f32.xlu1 %v144_v53  ;;  %v58_v54 = vpop.xlane.xlu0 %57  ;;  %181 = vadd.xlane.f32.xlu2 %v180_v51  ;;  %v156_v24 = vsel %vm34_vm0, %v128_v52, 0.0 }
  0xa0   :  { %v97_v26 = vmul.f32 %v745_v38, %v58_v54  ;;  %157 = vadd.xlane.f32.xlu0 %v156_v24 }
  0xa2   :  { %v851_v55 = vsub.f32 %v741_v30, %v97_v26  ;;  %v569_v30 = vld [vmem:[%s1273_s3 + $0x8] sm:$0xff] }
  0xa3   :  { %571 = vmatpush.bf16.msra.mxu2 %v569_v30  ;;  %572 = vmatpush.bf16.msra.mxu3 %v569_v30 }
  0xa4   :  { %v129_v56 = vmul.f32 %v851_v55, %v851_v55  ;;  %488 = vmatpush.bf16.msra.mxu0 %v569_v30  ;;  %570 = vmatpush.bf16.msra.mxu1 %v569_v30 }
  0xa6   :  { %v159_v61 = vsel %vm34_vm0, %v129_v56, 0.0 }
  0xa7   :  { %160 = vadd.xlane.f32.xlu1 %v159_v61  ;;  %148 = vadd.xlane.f32.xlu2 %v147_v60 }
  0xa8   :  { %574 = vmatpush.bf16.msra.mxu2 %v568_v17  ;;  %575 = vmatpush.bf16.msra.mxu3 %v568_v17 }
  0xa9   :  { %489 = vmatpush.bf16.msra.mxu0 %v568_v17  ;;  %573 = vmatpush.bf16.msra.mxu1 %v568_v17 }
  0xf1   :  { %v176_v0 = vpop.xlane.xlu0 %175 }
  0xf2   :  { %v164_v62 = vpop.xlane.xlu1 %163  ;;  %v198_v3 = vmul.f32 %v176_v0, %v745_v38 }
  0xf3   :  { %v194_v1 = vmul.f32 %v164_v62, %v745_v38 }
  0xf4   :  { %v214_v5 = vadd.f32 1e-05, %v198_v3 }
  0xf5   :  { %v210_v4 = vadd.f32 1e-05, %v194_v1 }
  0xf6   :  { %vm344_vm6 = vweird.f32 %v214_v5 }
  0xf7   :  { %581 = vrsqrt.f32 %v210_v4  ;;  %vm304_vm4 = vweird.f32 %v210_v4 }
  0xf8   :  { %583 = vrsqrt.f32 %v214_v5 }
  0xfa   :  { %v179_v6 = vpop.xlane.xlu1 %178  ;;  %v167_v7 = vpop.xlane.xlu2 %166 }
  0xfb   :  { %v199_v8 = vmul.f32 %v179_v6, %v745_v38  ;;  %v143_v9 = vpop.xlane.xlu0 %142  ;;  %v195_v10 = vmul.f32 %v167_v7, %v745_v38 }
  0xfc   :  { %v187_v16 = vmul.f32 %v143_v9, %v745_v38 }
  0xfd   :  { %v868_v21 = vpop.eup %581  ;;  %v870_v12 = vadd.f32 1e-05, %v199_v8  ;;  %v872_v22 = vadd.f32 1e-05, %v195_v10 }
  0xfe   :  { %v874_v23 = vpop.eup %583  ;;  %v299_v14 = vmul.f32 %v868_v21, %v210_v4  ;;  %v877_v27 = vadd.f32 1e-05, %v187_v16  ;;  %vm305_vm2 = vweird.f32 %v868_v21 }
  0xff   :  { %v339_v13 = vmul.f32 %v874_v23, %v214_v5  ;;  %585 = vrsqrt.f32 %v870_v12  ;;  %vm345_vm3 = vweird.f32 %v874_v23  ;;  %vm911_vm5 = vmor %vm304_vm4, %vm305_vm2  ;;  %vm354_vm8 = vweird.f32 %v870_v12 }
 0x100   :  { %v300_v28 = vmul.f32 %v868_v21, %v299_v14  ;;  %587 = vrsqrt.f32 %v877_v27  ;;  %vm918_vm7 = vmor %vm344_vm6, %vm345_vm3  ;;  %vm234_vm9 = vweird.f32 %v877_v27  ;;  %vm314_vm11 = vweird.f32 %v872_v22 }
 0x101   :  { %v340_v29 = vmul.f32 %v874_v23, %v339_v13  ;;  %589 = vrsqrt.f32 %v872_v22 }
 0x102   :  { %v301_v31 = vmul.f32 0.5, %v300_v28  ;;  %v152_v35 = vpop.xlane.xlu1 %151  ;;  %v140_v36 = vpop.xlane.xlu2 %139 }
 0x103   :  { %v341_v37 = vmul.f32 0.5, %v340_v29  ;;  %v190_v39 = vmul.f32 %v152_v35, %v745_v38  ;;  %v170_v40 = vpop.xlane.xlu0 %169  ;;  %v186_v18 = vmul.f32 %v140_v36, %v745_v38 }
 0x104   :  { %v302_v20 = vsub.f32 1.5, %v301_v31  ;;  %v196_v41 = vmul.f32 %v170_v40, %v745_v38  ;;  %v947_v31 = vld [vmem:[%s1271_s1] ss:$0 sm:$0xff] }
 0x105   :  { %v888_v19 = vpop.eup %585  ;;  %v342_v42 = vsub.f32 1.5, %v341_v37  ;;  %v891_v43 = vadd.f32 1e-05, %v190_v39  ;;  %v900_v52 = vadd.f32 1e-05, %v186_v18 }
 0x106   :  { %v893_v46 = vpop.eup %587  ;;  %v349_v50 = vmul.f32 %v888_v19, %v870_v12  ;;  %v898_v51 = vadd.f32 1e-05, %v196_v41  ;;  %v303_v54 = vmul.f32 %v868_v21, %v302_v20  ;;  %vm355_vm12 = vweird.f32 %v888_v19 }
 0x107   :  { %v590_v53 = vpop.eup %589  ;;  %v343_v24 = vmul.f32 %v874_v23, %v342_v42  ;;  %v229_v26 = vmul.f32 %v893_v46, %v877_v27  ;;  %591 = vrsqrt.f32 %v891_v43  ;;  %vm235_vm14 = vweird.f32 %v893_v46  ;;  %vm981_vm2 = vmor %vm354_vm8, %vm355_vm12 }
 0x108   :  { %v350_v25 = vmul.f32 %v888_v19, %v349_v50  ;;  %v309_v56 = vmul.f32 %v590_v53, %v872_v22  ;;  %593 = vrsqrt.f32 %v898_v51  ;;  %v307_v30 = vsel %vm911_vm5, %v868_v21, %v303_v54  ;;  %vm1003_vm5 = vmor %vm234_vm9, %vm235_vm14 }
 0x109   :  { %v230_v61 = vmul.f32 %v893_v46, %v229_v26  ;;  %v347_v5 = vsel %vm918_vm7, %v874_v23, %v343_v24  ;;  %595 = vrsqrt.f32 %v900_v52  ;;  %vm315_vm10 = vweird.f32 %v590_v53 }
 0x10a   :  { %v351_v0 = vmul.f32 0.5, %v350_v25  ;;  %v310_v1 = vmul.f32 %v590_v53, %v309_v56  ;;  %v173_v3 = vpop.xlane.xlu1 %172  ;;  %v155_v4 = vpop.xlane.xlu2 %154  ;;  %v386_v13 = vmul.f32 %v307_v30, %v751_v45  ;;  %v390_v28 = vmul.f32 %v347_v5, %v749_v44  ;;  %vm316_vm13 = vmor %vm314_vm11, %vm315_vm10 }
 0x10b   :  { %v185_v6 = vpop.xlane.xlu0 %184  ;;  %v231_v7 = vmul.f32 0.5, %v230_v61  ;;  %v197_v9 = vmul.f32 %v173_v3, %v745_v38  ;;  %v191_v21 = vmul.f32 %v155_v4, %v745_v38  ;;  %vm264_vm15 = vweird.f32 %v891_v43 }
 0x10c   :  { %v311_v8 = vmul.f32 0.5, %v310_v1  ;;  %v201_v10 = vmul.f32 %v185_v6, %v745_v38  ;;  %v352_v17 = vsub.f32 1.5, %v351_v0  ;;  %vm324_vm1 = vweird.f32 %v898_v51 }
 0x10d   :  { %v932_v16 = vpop.eup %591  ;;  %v942_v29 = vadd.f32 1e-05, %v197_v9  ;;  %v232_v36 = vsub.f32 1.5, %v231_v7  ;;  %v961_v18 = vadd.f32 1e-05, %v191_v21  ;;  %v406_v25 = vmul.f32 %v947_v31, %v386_v13 }
 0x10e   :  { %v312_v14 = vsub.f32 1.5, %v311_v8  ;;  %v259_v23 = vmul.f32 %v932_v16, %v891_v43  ;;  %v949_v35 = vpop.eup %593  ;;  %v952_v40 = vadd.f32 1e-05, %v201_v10  ;;  %v353_v44 = vmul.f32 %v888_v19, %v352_v17 }
 0x10f   :  { %v954_v45 = vpop.eup %595  ;;  %v319_v22 = vmul.f32 %v949_v35, %v898_v51  ;;  %597 = vrsqrt.f32 %v942_v29  ;;  %v986_v56 = vmul.f32 %v893_v46, %v232_v36  ;;  %vm224_vm3 = vweird.f32 %v900_v52 }
 0x110   :  { %v313_v37 = vmul.f32 %v590_v53, %v312_v14  ;;  %v260_v39 = vmul.f32 %v932_v16, %v259_v23  ;;  %v219_v42 = vmul.f32 %v954_v45, %v900_v52  ;;  %599 = vrsqrt.f32 %v952_v40 }
 0x111   :  { %v320_v54 = vmul.f32 %v949_v35, %v319_v22  ;;  %v410_v62 = vmul.f32 %v947_v31, %v390_v28  ;;  %v357_v12 = vsel %vm981_vm2, %v888_v19, %v353_v44  ;;  %601 = vrsqrt.f32 %v961_v18 }
 0x112   :  { %v317_v20 = vsel %vm316_vm13, %v590_v53, %v313_v37  ;;  %v261_v41 = vmul.f32 0.5, %v260_v39  ;;  %v146_v24 = vpop.xlane.xlu1 %145  ;;  %v975_v53 = vld [vmem:[%s1272_s2] ss:$0 sm:$0xff]  ;;  %v220_v60 = vmul.f32 %v954_v45, %v219_v42  ;;  %v182_v61 = vpop.xlane.xlu2 %181  ;;  %vm265_vm4 = vweird.f32 %v932_v16 }
 0x113   :  { %v387_v50 = vmul.f32 %v317_v20, %v767_v58  ;;  %v158_v26 = vpop.xlane.xlu0 %157  ;;  %v321_v1 = vmul.f32 0.5, %v320_v54  ;;  %v188_v4 = vmul.f32 %v146_v24, %v745_v38  ;;  %v200_v6 = vmul.f32 %v182_v61, %v745_v38  ;;  %vm1045_vm9 = vmor %vm264_vm15, %vm265_vm4 }
 0x114   :  { %v262_v0 = vsub.f32 1.5, %v261_v41  ;;  %v221_v3 = vmul.f32 0.5, %v220_v60  ;;  %v192_v30 = vmul.f32 %v158_v26, %v745_v38  ;;  %v426_v8 = vadd.f32 %v975_v53, %v406_v25 }
 0x115   :  { %v322_v19 = vsub.f32 1.5, %v321_v1  ;;  %v407_v7 = vmul.f32 %v947_v31, %v387_v50  ;;  %v391_v9 = vmul.f32 %v357_v12, %v764_v57  ;;  %v237_v10 = vsel %vm1003_vm5, %v893_v46, %v986_v56  ;;  %v1017_v21 = vpop.eup %597 }
 0x116   :  { %v222_v17 = vsub.f32 1.5, %v221_v3  ;;  %v1015_v27 = vadd.f32 1e-05, %v188_v4  ;;  %v1020_v14 = vmul.f32 %v932_v16, %v262_v0  ;;  %vm325_vm6 = vweird.f32 %v949_v35  ;;  %v1026_v57 = vpop.eup %599 }
 0x117   :  { %vm225_vm7 = vweird.f32 %v954_v45  ;;  %v1024_v23 = vadd.f32 1e-05, %v192_v30  ;;  %v329_v28 = vmul.f32 %v1017_v21, %v942_v29  ;;  %v1032_v36 = vadd.f32 1e-05, %v200_v6  ;;  %v1034_v37 = vpop.eup %601  ;;  %vm1074_vm14 = vmor %vm324_vm1, %vm325_vm6 }
 0x118   :  { %v223_v13 = vmul.f32 %v954_v45, %v222_v17  ;;  %603 = vrsqrt.f32 %v1015_v27  ;;  %v323_v39 = vmul.f32 %v949_v35, %v322_v19  ;;  %vm334_vm8 = vweird.f32 %v942_v29  ;;  %vm1063_vm12 = vmor %vm224_vm3, %vm225_vm7 }
 0x119   :  { %v369_v44 = vmul.f32 %v1026_v57, %v952_v40  ;;  %v427_v22 = vadd.f32 %v975_v53, %v407_v7  ;;  %v330_v41 = vmul.f32 %v1017_v21, %v329_v28  ;;  %vm374_vm10 = vweird.f32 %v952_v40 }
 0x11a   :  { %v269_v42 = vmul.f32 %v1034_v37, %v961_v18  ;;  %vm274_vm11 = vweird.f32 %v961_v18  ;;  %v411_v50 = vmul.f32 %v947_v31, %v391_v9  ;;  %v267_v43 = vsel %vm1045_vm9, %v932_v16, %v1020_v14  ;;  %v161_v26 = vpop.xlane.xlu1 %160  ;;  %v149_v60 = vpop.xlane.xlu2 %148 }
 0x11b   :  { %vm335_vm13 = vweird.f32 %v1017_v21  ;;  %v370_v24 = vmul.f32 %v1026_v57, %v369_v44  ;;  %605 = vrsqrt.f32 %v1024_v23  ;;  %v227_v52 = vsel %vm1063_vm12, %v954_v45, %v223_v13 }
 0x11c   :  { %v331_v25 = vmul.f32 0.5, %v330_v41  ;;  %v270_v58 = vmul.f32 %v1034_v37, %v269_v42  ;;  %607 = vrsqrt.f32 %v1032_v36  ;;  %v327_v61 = vsel %vm1074_vm14, %v949_v35, %v323_v39  ;;  %vm1104_vm1 = vmor %vm334_vm8, %vm335_vm13 }
 0x11d   :  { %v371_v12 = vmul.f32 0.5, %v370_v24  ;;  %v438_v51 = vpack.c.bf16 %v427_v22, %v426_v8  ;;  %v430_v0 = vadd.f32 %v975_v53, %v410_v62  ;;  %v431_v45 = vadd.f32 %v975_v53, %v411_v50 }
 0x11e   :  { %v1087_v1 = vpop.eup %603  ;;  %v332_v3 = vsub.f32 1.5, %v331_v25  ;;  %v271_v4 = vmul.f32 0.5, %v270_v58  ;;  %v193_v30 = vmul.f32 %v161_v26, %v745_v38  ;;  %v378_v19 = vmul.f32 %v227_v52, %v779_v63 }
 0x11f   :  { %v372_v6 = vsub.f32 1.5, %v371_v12  ;;  %v239_v7 = vmul.f32 %v1087_v1, %v1015_v27  ;;  %564 = vmatmul.msk.bf16.vlgmr.msra.gmra.mxu2 %vm34_vm0, %v438_v51  ;;  %v189_v35 = vmul.f32 %v149_v60, %v745_v38  ;;  %vm275_vm15 = vweird.f32 %v1034_v37 }
 0x120   :  { %v333_v62 = vmul.f32 %v1017_v21, %v332_v3  ;;  %v272_v8 = vsub.f32 1.5, %v271_v4  ;;  %v440_v9 = vpack.c.bf16 %v431_v45, %v430_v0  ;;  %vm375_vm2 = vweird.f32 %v1026_v57  ;;  %vm276_vm3 = vmor %vm274_vm11, %vm275_vm15 }
 0x121   :  { %v1098_v17 = vpop.eup %605  ;;  %v373_v14 = vmul.f32 %v1026_v57, %v372_v6  ;;  %v240_v38 = vmul.f32 %v1087_v1, %v239_v7  ;;  %v1111_v13 = vadd.f32 1e-05, %v193_v30  ;;  %v1120_v22 = vadd.f32 1e-05, %v189_v35  ;;  %vm1143_vm4 = vmor %vm374_vm10, %vm375_vm2 }
 0x122   :  { %v608_v28 = vpop.eup %607  ;;  %v337_v39 = vsel %vm1104_vm1, %v1017_v21, %v333_v62  ;;  %v273_v44 = vmul.f32 %v1034_v37, %v272_v8  ;;  %v279_v29 = vmul.f32 %v1098_v17, %v1024_v23  ;;  %566 = vmatmul.msk.bf16.vlgmr.msra.gmra.mxu3 %vm34_vm0, %v440_v9  ;;  %v379_v20 = vmul.f32 %v237_v10, %v770_v59 }
 0x123   :  { %v382_v41 = vmul.f32 %v267_v43, %v788_v2  ;;  %v359_v21 = vmul.f32 %v608_v28, %v1032_v36  ;;  %v398_v42 = vmul.f32 %v947_v31, %v378_v19  ;;  %v388_v50 = vmul.f32 %v327_v61, %v793_v11 }
 0x124   :  { %v389_v54 = vmul.f32 %v337_v39, %v811_v32  ;;  %v277_v5 = vsel %vm276_vm3, %v1034_v37, %v273_v44  ;;  %v280_v46 = vmul.f32 %v1098_v17, %v279_v29  ;;  %v241_v18 = vmul.f32 0.5, %v240_v38 }
 0x125   :  { %v383_v2 = vmul.f32 %v277_v5, %v796_v15  ;;  %v360_v56 = vmul.f32 %v608_v28, %v359_v21  ;;  %609 = vrsqrt.f32 %v1111_v13  ;;  %v377_v11 = vsel %vm1143_vm4, %v1026_v57, %v373_v14 }
 0x126   :  { %v281_v32 = vmul.f32 0.5, %v280_v46  ;;  %vm284_vm5 = vweird.f32 %v1024_v23  ;;  %611 = vrsqrt.f32 %v1120_v22  ;;  %vm365_vm6 = vweird.f32 %v608_v28 }
 0x127   :  { %v361_v40 = vmul.f32 0.5, %v360_v56  ;;  %v399_v10 = vmul.f32 %v947_v31, %v379_v20  ;;  %v418_v37 = vadd.f32 %v975_v53, %v398_v42  ;;  %v402_v43 = vmul.f32 %v947_v31, %v382_v41 }
 0x128   :  { %v282_v15 = vsub.f32 1.5, %v281_v32  ;;  %v403_v24 = vmul.f32 %v947_v31, %v383_v2  ;;  %v408_v26 = vmul.f32 %v947_v31, %v388_v50  ;;  %v242_v16 = vsub.f32 1.5, %v241_v18 }
 0x129   :  { %v362_v57 = vsub.f32 1.5, %v361_v40  ;;  %v419_v52 = vadd.f32 %v975_v53, %v399_v10  ;;  %v409_v25 = vmul.f32 %v947_v31, %v389_v54  ;;  %v393_v58 = vmul.f32 %v377_v11, %v814_v33 }
 0x12a   :  { %vm364_vm7 = vweird.f32 %v1032_v36  ;;  %v422_v60 = vadd.f32 %v975_v53, %v402_v43  ;;  %v423_v61 = vadd.f32 %v975_v53, %v403_v24  ;;  %vm285_vm8 = vweird.f32 %v1098_v17 }
 0x12b   :  { %v610_v12 = vpop.eup %609  ;;  %v363_v51 = vmul.f32 %v608_v28, %v362_v57  ;;  %v434_v0 = vpack.c.bf16 %v419_v52, %v418_v37  ;;  %v429_v3 = vadd.f32 %v975_v53, %v409_v25  ;;  %v283_v45 = vmul.f32 %v1098_v17, %v282_v15  ;;  %vm366_vm9 = vmor %vm364_vm7, %vm365_vm6 }
 0x12c   :  { %v612_v4 = vpop.eup %611  ;;  %v289_v33 = vmul.f32 %v610_v12, %v1111_v13  ;;  %v436_v30 = vpack.c.bf16 %v423_v61, %v422_v60  ;;  %v428_v36 = vadd.f32 %v975_v53, %v408_v26  ;;  %v243_v19 = vmul.f32 %v1087_v1, %v242_v16  ;;  %vm286_vm12 = vmor %vm284_vm5, %vm285_vm8 }
 0x12d   :  { %vm245_vm10 = vweird.f32 %v1087_v1  ;;  %v367_v6 = vsel %vm366_vm9, %v608_v28, %v363_v51  ;;  %v249_v7 = vmul.f32 %v612_v4, %v1120_v22  ;;  %560 = vmatmul.msk.bf16.vlgmr.msra.gmra.mxu0 %vm34_vm0, %v434_v0  ;;  %v413_v9 = vmul.f32 %v947_v31, %v393_v58 }
 0x12e   :  { %v392_v35 = vmul.f32 %v367_v6, %v817_v34  ;;  %v290_v62 = vmul.f32 %v610_v12, %v289_v33  ;;  %562 = vmatmul.msk.bf16.vlgmr.msra.gmra.mxu1 %vm34_vm0, %v436_v30  ;;  %v439_v8 = vpack.c.bf16 %v429_v3, %v428_v36  ;;  %vm244_vm11 = vweird.f32 %v1015_v27 }
 0x12f   :  { %v250_v63 = vmul.f32 %v612_v4, %v249_v7  ;;  %vm246_vm13 = vmor %vm244_vm11, %vm245_vm10  ;;  %v287_v14 = vsel %vm286_vm12, %v1098_v17, %v283_v45  ;;  %vm295_vm14 = vweird.f32 %v610_v12  ;;  %v433_v29 = vadd.f32 %v975_v53, %v413_v9 }
 0x130   :  { %v291_v38 = vmul.f32 0.5, %v290_v62  ;;  %565 = vmatmul.msk.bf16.gmra.mxu2 %vm34_vm0, %v439_v8  ;;  %v412_v34 = vmul.f32 %v947_v31, %v392_v35  ;;  %v247_v28 = vsel %vm246_vm13, %v1087_v1, %v243_v19  ;;  %v384_v23 = vmul.f32 %v287_v14, %v835_v48 }
 0x131   :  { %v251_v39 = vmul.f32 0.5, %v250_v63  ;;  %vm255_vm15 = vweird.f32 %v612_v4  ;;  %v380_v17 = vmul.f32 %v247_v28, %v832_v47  ;;  %vm294_vm1 = vweird.f32 %v1111_v13 }
 0x132   :  { %v292_v44 = vsub.f32 1.5, %v291_v38  ;;  %v432_v27 = vadd.f32 %v975_v53, %v412_v34  ;;  %vm296_vm2 = vmor %vm294_vm1, %vm295_vm14  ;;  %vm254_vm3 = vweird.f32 %v1120_v22  ;;  %v404_v48 = vmul.f32 %v947_v31, %v384_v23 }
 0x133   :  { %v252_v20 = vsub.f32 1.5, %v251_v39  ;;  %vm256_vm4 = vmor %vm254_vm3, %vm255_vm15  ;;  %v400_v47 = vmul.f32 %v947_v31, %v380_v17  ;;  %vm531_vm5 = vcmask 785408  }
 0x134   :  { %v293_v41 = vmul.f32 %v610_v12, %v292_v44  ;;  %v441_v21 = vpack.c.bf16 %v433_v29, %v432_v27  ;;  %v424_v59 = vadd.f32 %v975_v53, %v404_v48 }
 0x135   :  { %v253_v42 = vmul.f32 %v612_v4, %v252_v20  ;;  %v420_v2 = vadd.f32 %v975_v53, %v400_v47 }
 0x136   :  { %v297_v1 = vsel %vm296_vm2, %v610_v12, %v293_v41  ;;  %567 = vmatmul.msk.bf16.gmra.mxu3 %vm34_vm0, %v441_v21 }
 0x137   :  { %v385_v50 = vmul.f32 %v297_v1, %v851_v55  ;;  %v257_v54 = vsel %vm256_vm4, %v612_v4, %v253_v42 }
 0x138   :  { %v381_v5 = vmul.f32 %v257_v54, %v838_v49 }
 0x139   :  { %v405_v13 = vmul.f32 %v947_v31, %v385_v50 }
 0x13a   :  { %v401_v46 = vmul.f32 %v947_v31, %v381_v5 }
 0x13b   :  { %v425_v22 = vadd.f32 %v975_v53, %v405_v13 }
 0x13c   :  { %v421_v18 = vadd.f32 %v975_v53, %v401_v46 }
 0x13d   :  { %v437_v55 = vpack.c.bf16 %v425_v22, %v424_v59 }
 0x13e   :  { %v435_v56 = vpack.c.bf16 %v421_v18, %v420_v2 }
 0x13f   :  { %563 = vmatmul.msk.bf16.gmra.mxu1 %vm34_vm0, %v437_v55 }
 0x140   :  { %561 = vmatmul.msk.bf16.gmra.mxu0 %vm34_vm0, %v435_v56 }
 0x1a2   :  { %v511_v49 = vpop.f32.mrf.mxu2 }
 0x1a3   :  { %540 = vst.msk [vmem:[%s1274_s4 + $0x40] sm:$0xff] %vm531_vm5, %v511_v49 }
 0x1a5   :  { %v521_v31 = vpop.f32.mrf.mxu3 }
 0x1a6   :  { %544 = vst.msk [vmem:[%s1274_s4 + $0x60] sm:$0xff] %vm531_vm5, %v521_v31 }
 0x1aa   :  { %v491_v53 = vpop.f32.mrf.mxu0  ;;  %v513_v11 = vpop.f32.mrf.mxu2 }
 0x1ab   :  { %532 = vst.msk [vmem:[%s1274_s4] sm:$0xff] %vm531_vm5, %v491_v53  ;;  %v501_v32 = vpop.f32.mrf.mxu1 }
 0x1ac   :  { %541 = vst.msk [vmem:[%s1274_s4 + $0x48] sm:$0xff] %vm531_vm5, %v513_v11 }
 0x1ad   :  { %v523_v40 = vpop.f32.mrf.mxu3  ;;  %536 = vst.msk [vmem:[%s1274_s4 + $0x20] sm:$0xff] %vm531_vm5, %v501_v32 }
 0x1ae   :  { %545 = vst.msk [vmem:[%s1274_s4 + $0x68] sm:$0xff] %vm531_vm5, %v523_v40 }
 0x1b2   :  { %v493_v10 = vpop.f32.mrf.mxu0 }
 0x1b3   :  { %533 = vst.msk [vmem:[%s1274_s4 + $0x8] sm:$0xff] %vm531_vm5, %v493_v10  ;;  %v516_v37 = vpop.f32.mrf.mxu2  ;;  %v503_v15 = vpop.f32.mrf.mxu1 }
 0x1b4   :  { %542 = vst.msk [vmem:[%s1274_s4 + $0x50] sm:$0xff] %vm531_vm5, %v516_v37 }
 0x1b5   :  { %537 = vst.msk [vmem:[%s1274_s4 + $0x28] sm:$0xff] %vm531_vm5, %v503_v15 }
 0x1b9   :  { %v526_v43 = vpop.f32.mrf.mxu3 }
 0x1ba   :  { %546 = vst.msk [vmem:[%s1274_s4 + $0x70] sm:$0xff] %vm531_vm5, %v526_v43 }
 0x1bb   :  { %v518_v24 = vpop.f32.mrf.mxu2 }
 0x1bc   :  { %543 = vst.msk [vmem:[%s1274_s4 + $0x58] sm:$0xff] %vm531_vm5, %v518_v24  ;;  %v506_v26 = vpop.f32.mrf.mxu1 }
 0x1bd   :  { %v496_v16 = vpop.f32.mrf.mxu0  ;;  %538 = vst.msk [vmem:[%s1274_s4 + $0x30] sm:$0xff] %vm531_vm5, %v506_v26 }
 0x1be   :  { %534 = vst.msk [vmem:[%s1274_s4 + $0x10] sm:$0xff] %vm531_vm5, %v496_v16 }
 0x1c1   :  { %v528_v57 = vpop.f32.mrf.mxu3 }
 0x1c2   :  { %547 = vst.msk [vmem:[%s1274_s4 + $0x78] sm:$0xff] %vm531_vm5, %v528_v57 }
 0x1c4   :  { %v508_v52 = vpop.f32.mrf.mxu1 }
 0x1c5   :  { %v498_v25 = vpop.f32.mrf.mxu0  ;;  %539 = vst.msk [vmem:[%s1274_s4 + $0x38] sm:$0xff] %vm531_vm5, %v508_v52 }
 0x1c6   :  { %535 = vst.msk [vmem:[%s1274_s4 + $0x18] sm:$0xff] %vm531_vm5, %v498_v25 }

// kernel: spatial_transformer.19
= control target key start
LH: loop header
LB: loop body
LE: loop exit
PB: predicated region body
PF: predicated region fallthrough
CT: control target
= control target key end

     0   :  { %s1098_s12 = smov 0   ;;  %s1100_s13 = smov 0   ;;  %s1321_s0 = inlined_call_operand.vmem [shape: f32[8,64,8], index: 0, kind: input, shape index: {}]   ;;  %s1322_s1 = inlined_call_operand.vmem [shape: f32[8,64,8], index: 1, kind: input, shape index: {}]   ;;  %s1323_s2 = inlined_call_operand.vmem [shape: f32[8,64,8], index: 2, kind: input, shape index: {}]   ;;  %s1324_s3 = inlined_call_operand.vmem [shape: f32[8,64,8], index: 3, kind: output, shape index: {}]  }
   0x1   :  { %s1102_s14 = smov 0  }
   0x2 LB: > { %s32_s15 = sadd.s32 1, %s1069_s13  ;;  %p942_p0 = scmp.ge.s32.totalorder %s1073_s14, 1  ;;  %s1073_s14 = sphi %s1102_s14, %s13_s14   ;;  %s1069_s13 = sphi %s1100_s13, %s1326_s13   ;;  %s1065_s12 = sphi %s1098_s12, %s1325_s12  }
   0x3   : > { %p34_p1 = scmp.ge.s32.totalorder %s32_s15, 8  ;;  %p199_p2 = scmp.lt.s32.totalorder %s1073_s14, 9 }
   0x5   : > { %s1328_s15 = smov (%p34_p1, %s32_s15), 0  ;;  %p200_p3 = pnand %p942_p0, %p199_p2 }
   0x6   : > { %p250_p4 = scmp.lt.s32.totalorder (!%p200_p3), %s1065_s12, 7 }
   0x7   : > { %203 = sbr.rel (%p200_p3) target bundleno = 719 (0x2cf), region = 32 }
   0xc   : > { %s1330_s12 = smov (!%p250_p4, %s1065_s12), 7  ;;  %vm311_vm0 = vcmask 64512   ;;  %vm426_vm1 = vcmask 523264   ;;  %vm294_vm2 = vcmask 7168   ;;  %v1075_v38 = vmov -inf  }
   0xd   : > { %s1116_s16 = sshll.u32 %s1330_s12, 6  ;;  %299 = vst.msk [vmem:[#allocation2 + $0x20] sm:$0xff] %vm294_vm2, %v1075_v38  ;;  %v1076_v53 = vmov 0   ;;  %v1077_v54 = vmov 0.0  }
   0xe   : > { %s267_s19 = scalar_lea.vmem %s1322_s1, %s1116_s16  ;;  %s257_s22 = scalar_lea.vmem %s1321_s0, %s1116_s16  ;;  %295 = vst.msk [vmem:[#allocation2] sm:$0xff] %vm294_vm2, %v1075_v38  ;;  %1002 = vset.pattern.permute.xlu1 %v1076_v53  ;;  %1000 = vset.pattern.permute.xlu2 %v1076_v53 }
   0xf   : > { %v346_v0 = vld [vmem:[%s267_s19 + $0x30] sm:$0xff]  ;;  %v347_v1 = vld [vmem:[%s267_s19 + $0x38] sm:$0xff]  ;;  %v344_v3 = vld [vmem:[%s267_s19 + $0x20] sm:$0xff]  ;;  %296 = vst.msk [vmem:[#allocation2 + $0x8] sm:$0xff] %vm294_vm2, %v1075_v38  ;;  %1001 = vset.pattern.permute.xlu0 %v1076_v53  ;;  %s277_s25 = scalar_lea.vmem %s1323_s2, %s1116_s16  ;;  %s1294_s28 = scalar_lea.vmem %s1324_s3, %s1116_s16 }
  0x10   : > { %v351_v2 = vpack.c.bf16 %v347_v1, %v346_v0  ;;  %v345_v4 = vld [vmem:[%s267_s19 + $0x28] sm:$0xff]  ;;  %v342_v8 = vld [vmem:[%s267_s19 + $0x10] sm:$0xff]  ;;  %v343_v9 = vld [vmem:[%s267_s19 + $0x18] sm:$0xff]  ;;  %297 = vst.msk [vmem:[#allocation2 + $0x10] sm:$0xff] %vm294_vm2, %v1075_v38 }
  0x11   : > { %v350_v6 = vpack.c.bf16 %v345_v4, %v344_v3  ;;  %v349_v10 = vpack.c.bf16 %v343_v9, %v342_v8  ;;  %v340_v12 = vld [vmem:[%s267_s19] sm:$0xff]  ;;  %v341_v13 = vld [vmem:[%s267_s19 + $0x8] sm:$0xff]  ;;  %v322_v26 = vld [vmem:[%s257_s22 + $0x10] sm:$0xff]  ;;  %298 = vst.msk [vmem:[#allocation2 + $0x18] sm:$0xff] %vm294_vm2, %v1075_v38 }
  0x12   : > { %v387_v5 = vsel %vm311_vm0, %v351_v2, 0  ;;  %v348_v14 = vpack.c.bf16 %v341_v13, %v340_v12  ;;  %v320_v15 = vld [vmem:[%s257_s22] sm:$0xff]  ;;  %v321_v16 = vld [vmem:[%s257_s22 + $0x8] sm:$0xff]  ;;  %v323_v27 = vld [vmem:[%s257_s22 + $0x18] sm:$0xff]  ;;  %v330_v30 = vmul.f32 0.35355338, %v322_v26 }
  0x13   : > { %393 = vmatpush.bf16.xpose.msra.mxu0 %v387_v5  ;;  %965 = vmatpush.bf16.xpose.msra.mxu2 %v387_v5  ;;  %v384_v7 = vsel %vm311_vm0, %v350_v6, 0  ;;  %v381_v11 = vsel %vm311_vm0, %v349_v10, 0  ;;  %v324_v17 = vld [vmem:[%s257_s22 + $0x20] sm:$0xff]  ;;  %v325_v18 = vld [vmem:[%s257_s22 + $0x28] sm:$0xff]  ;;  %v328_v20 = vmul.f32 0.35355338, %v320_v15 }
  0x14   : > { %v378_v19 = vsel %vm311_vm0, %v348_v14, 0  ;;  %v329_v21 = vmul.f32 0.35355338, %v321_v16  ;;  %v332_v22 = vmul.f32 0.35355338, %v324_v17  ;;  %v326_v28 = vld [vmem:[%s257_s22 + $0x30] sm:$0xff] }
  0x15   : > { %v333_v23 = vmul.f32 0.35355338, %v325_v18  ;;  %v327_v29 = vld [vmem:[%s257_s22 + $0x38] sm:$0xff]  ;;  %v331_v31 = vmul.f32 0.35355338, %v323_v27  ;;  %300 = vst.msk [vmem:[#allocation2 + $0x28] sm:$0xff] %vm294_vm2, %v1075_v38 }
  0x16   : > { %v336_v24 = vpack.c.bf16 %v329_v21, %v328_v20  ;;  %v334_v32 = vmul.f32 0.35355338, %v326_v28  ;;  %v335_v33 = vmul.f32 0.35355338, %v327_v29  ;;  %301 = vst.msk [vmem:[#allocation2 + $0x30] sm:$0xff] %vm294_vm2, %v1075_v38  ;;  %v418_v55 = vld [vmem:[#allocation2] sm:$0xff] }
  0x17   : > { %v338_v25 = vpack.c.bf16 %v333_v23, %v332_v22  ;;  %v337_v34 = vpack.c.bf16 %v331_v31, %v330_v30  ;;  %302 = vst.msk [vmem:[#allocation2 + $0x38] sm:$0xff] %vm294_vm2, %v1075_v38  ;;  %v422_v58 = vld [vmem:[#allocation2 + $0x20] sm:$0xff]  ;;  %v419_v61 = vld [vmem:[#allocation2 + $0x8] sm:$0xff]  ;;  %v420_v63 = vld [vmem:[#allocation2 + $0x10] sm:$0xff] }
  0x18   : > { %v339_v35 = vpack.c.bf16 %v335_v33, %v334_v32  ;;  %313 = vst.msk [vmem:[#allocation4 + $0x8] sm:$0xff] %vm311_vm0, %v1077_v54  ;;  %v421_v9 = vld [vmem:[#allocation2 + $0x18] sm:$0xff]  ;;  %v358_v38 = vld [vmem:[%s277_s25 + $0x30] sm:$0xff] }
  0x19   : > { %303 = vst.msk [vmem:[#allocation3] sm:$0xff] %vm294_vm2, %v1077_v54  ;;  %v355_v53 = vld [vmem:[%s277_s25 + $0x18] sm:$0xff] }
  0x1a   : > { %304 = vst.msk [vmem:[#allocation3 + $0x8] sm:$0xff] %vm294_vm2, %v1077_v54 }
  0x1b   : > { %394 = vmatpush.bf16.xpose.msra.mxu0 %v384_v7  ;;  %966 = vmatpush.bf16.xpose.msra.mxu2 %v384_v7  ;;  %305 = vst.msk [vmem:[#allocation3 + $0x10] sm:$0xff] %vm294_vm2, %v1077_v54 }
  0x1c   : > { %306 = vst.msk [vmem:[#allocation3 + $0x18] sm:$0xff] %vm294_vm2, %v1077_v54  ;;  %v423_v5 = vld [vmem:[#allocation2 + $0x28] sm:$0xff] }
  0x1d   : > { %307 = vst.msk [vmem:[#allocation3 + $0x20] sm:$0xff] %vm294_vm2, %v1077_v54  ;;  %v424_v4 = vld [vmem:[#allocation2 + $0x30] sm:$0xff] }
  0x1e   : > { %308 = vst.msk [vmem:[#allocation3 + $0x28] sm:$0xff] %vm294_vm2, %v1077_v54  ;;  %v1197_v15 = vld [vmem:[#allocation2 + $0x38] sm:$0xff] }
  0x1f   : > { %309 = vst.msk [vmem:[#allocation3 + $0x30] sm:$0xff] %vm294_vm2, %v1077_v54 }
  0x20   : > { %310 = vst.msk [vmem:[#allocation3 + $0x38] sm:$0xff] %vm294_vm2, %v1077_v54 }
  0x21   : > { %312 = vst.msk [vmem:[#allocation4] sm:$0xff] %vm311_vm0, %v1077_v54 }
  0x22   : > { %314 = vst.msk [vmem:[#allocation4 + $0x10] sm:$0xff] %vm311_vm0, %v1077_v54 }
  0x23   : > { %395 = vmatpush.bf16.xpose.msra.mxu0 %v381_v11  ;;  %967 = vmatpush.bf16.xpose.msra.mxu2 %v381_v11  ;;  %315 = vst.msk [vmem:[#allocation4 + $0x18] sm:$0xff] %vm311_vm0, %v1077_v54 }
  0x24   : > { %316 = vst.msk [vmem:[#allocation4 + $0x20] sm:$0xff] %vm311_vm0, %v1077_v54 }
  0x25   : > { %317 = vst.msk [vmem:[#allocation4 + $0x28] sm:$0xff] %vm311_vm0, %v1077_v54 }
  0x26   : > { %318 = vst.msk [vmem:[#allocation4 + $0x30] sm:$0xff] %vm311_vm0, %v1077_v54 }
  0x27   : > { %319 = vst.msk [vmem:[#allocation4 + $0x38] sm:$0xff] %vm311_vm0, %v1077_v54 }
  0x2b   : > { %396 = vmatpush.bf16.xpose.msra.mxu0 %v378_v19  ;;  %968 = vmatpush.bf16.xpose.msra.mxu2 %v378_v19 }
  0x32   : > { %951 = vmatmul.msk.bf16.vlgmr.msra.gmra.mxu0 %vm311_vm0, %v336_v24  ;;  %953 = vmatmul.msk.bf16.vlgmr.msra.gmra.mxu2 %vm311_vm0, %v338_v25 }
  0x42   : > { %952 = vmatmul.msk.bf16.gmra.mxu0 %vm311_vm0, %v337_v34  ;;  %954 = vmatmul.msk.bf16.gmra.mxu2 %vm311_vm0, %v339_v35 }
  0xaf   : > { %v1134_v36 = vpop.f32.mrf.mxu0 }
  0xb0   : > { %v427_v37 = vsel %vm426_vm1, %v1134_v36, -inf }
  0xb1   : > { %428 = vmax.xlane.f32.xlu0 %v427_v37 }
  0xb5   : > { %v1143_v39 = vpop.f32.mrf.mxu2 }
  0xb6   : > { %v439_v40 = vsel %vm426_vm1, %v1143_v39, -inf }
  0xb7   : > { %440 = vmax.xlane.f32.xlu1 %v439_v40  ;;  %v1149_v41 = vpop.f32.mrf.mxu0  ;;  %v359_v40 = vld [vmem:[%s277_s25 + $0x38] sm:$0xff] }
  0xb8   : > { %v430_v43 = vsel %vm426_vm1, %v1149_v41, -inf }
  0xbd   : > { %v1152_v42 = vpop.f32.mrf.mxu2 }
  0xbe   : > { %v442_v48 = vsel %vm426_vm1, %v1152_v42, -inf }
  0xbf   : > { %431 = vmax.xlane.f32.xlu1 %v430_v43  ;;  %v1156_v44 = vpop.f32.mrf.mxu0  ;;  %v363_v43 = vpack.c.bf16 %v359_v40, %v358_v38 }
  0xc0   : > { %v433_v45 = vsel %vm426_vm1, %v1156_v44, -inf }
  0xc1   : > { %434 = vmax.xlane.f32.xlu0 %v433_v45  ;;  %969 = vmatpush.bf16.msra.mxu3 %v363_v43 }
  0xc2   : > { %680 = vmatpush.bf16.msra.mxu1 %v363_v43 }
  0xc5   : > { %v1160_v46 = vpop.f32.mrf.mxu2 }
  0xc6   : > { %v445_v47 = vsel %vm426_vm1, %v1160_v46, -inf }
  0xc7   : > { %446 = vmax.xlane.f32.xlu2 %v445_v47  ;;  %443 = vmax.xlane.f32.xlu1 %v442_v48  ;;  %v1166_v49 = vpop.f32.mrf.mxu0  ;;  %v356_v47 = vld [vmem:[%s277_s25 + $0x20] sm:$0xff]  ;;  %v357_v48 = vld [vmem:[%s277_s25 + $0x28] sm:$0xff] }
  0xc8   : > { %v436_v50 = vsel %vm426_vm1, %v1166_v49, -inf }
  0xc9   : > { %437 = vmax.xlane.f32.xlu0 %v436_v50  ;;  %v362_v50 = vpack.c.bf16 %v357_v48, %v356_v47 }
  0xcb   : > { %970 = vmatpush.bf16.msra.mxu3 %v362_v50  ;;  %681 = vmatpush.bf16.msra.mxu1 %v362_v50 }
  0xcd   : > { %v1170_v51 = vpop.f32.mrf.mxu2 }
  0xce   : > { %v448_v52 = vsel %vm426_vm1, %v1170_v51, -inf }
  0xcf   : > { %449 = vmax.xlane.f32.xlu2 %v448_v52  ;;  %v354_v52 = vld [vmem:[%s277_s25 + $0x10] sm:$0xff] }
  0xd0   : > { %v361_v54 = vpack.c.bf16 %v355_v53, %v354_v52 }
  0xd2   : > { %971 = vmatpush.bf16.msra.mxu3 %v361_v54  ;;  %682 = vmatpush.bf16.msra.mxu1 %v361_v54  ;;  %v549_v54 = vld [vmem:[#allocation3 + $0x10] sm:$0xff] }
 0x124   : > { %v429_v56 = vpop.xlane.xlu0 %428 }
 0x125   : > { %v451_v57 = vmax.f32 %v418_v55, %v429_v56 }
 0x127   : > { %721 = vst.msk [vmem:[#allocation2] sm:$0xff] %vm294_vm2, %v451_v57  ;;  %v459_v21 = vsub.f32 %v418_v55, %v451_v57 }
 0x129   : > { %v467_v23 = vmul.f32 1.442695, %v459_v21 }
 0x12a   : > { %v441_v59 = vpop.xlane.xlu1 %440 }
 0x12b   : > { %v455_v60 = vmax.f32 %v422_v58, %v441_v59 }
 0x12d   : > { %725 = vst.msk [vmem:[#allocation2 + $0x20] sm:$0xff] %vm294_vm2, %v455_v60  ;;  %505 = vperm.xlu1 %1002, %v455_v60   ;;  %v463_v14 = vsub.f32 %v422_v58, %v455_v60  ;;  %v353_v58 = vld [vmem:[%s277_s25 + $0x8] sm:$0xff] }
 0x12f   : > { %v475_v19 = vmul.f32 1.442695, %v463_v14 }
 0x132   : > { %v432_v62 = vpop.xlane.xlu1 %431 }
 0x133   : > { %v452_v0 = vmax.f32 %v419_v61, %v432_v62 }
 0x134   : > { %v435_v1 = vpop.xlane.xlu0 %434 }
 0x135   : > { %722 = vst.msk [vmem:[#allocation2 + $0x8] sm:$0xff] %vm294_vm2, %v452_v0  ;;  %v453_v2 = vmax.f32 %v420_v63, %v435_v1  ;;  %v460_v22 = vsub.f32 %v419_v61, %v452_v0 }
 0x137   : > { %v461_v3 = vsub.f32 %v420_v63, %v453_v2  ;;  %723 = vst.msk [vmem:[#allocation2 + $0x10] sm:$0xff] %vm294_vm2, %v453_v2  ;;  %495 = vperm.xlu2 %1000, %v453_v2   ;;  %v469_v24 = vmul.f32 1.442695, %v460_v22 }
 0x139   : > { %v471_v6 = vmul.f32 1.442695, %v461_v3 }
 0x13a   : > { %v447_v7 = vpop.xlane.xlu2 %446  ;;  %v444_v8 = vpop.xlane.xlu1 %443 }
 0x13b   : > { %v457_v10 = vmax.f32 %v424_v4, %v447_v7  ;;  %v456_v11 = vmax.f32 %v423_v5, %v444_v8  ;;  %1003 = vpow2.f32 %v471_v6 }
 0x13c   : > { %v438_v12 = vpop.xlane.xlu0 %437  ;;  %1005 = vpow2.f32 %v475_v19 }
 0x13d   : > { %727 = vst.msk [vmem:[#allocation2 + $0x30] sm:$0xff] %vm294_vm2, %v457_v10  ;;  %v454_v13 = vmax.f32 %v421_v9, %v438_v12  ;;  %1007 = vpow2.f32 %v467_v23  ;;  %v465_v26 = vsub.f32 %v424_v4, %v457_v10  ;;  %v464_v27 = vsub.f32 %v423_v5, %v456_v11 }
 0x13e   : > { %726 = vst.msk [vmem:[#allocation2 + $0x28] sm:$0xff] %vm294_vm2, %v456_v11  ;;  %1009 = vpow2.f32 %v469_v24 }
 0x13f   : > { %724 = vst.msk [vmem:[#allocation2 + $0x18] sm:$0xff] %vm294_vm2, %v454_v13  ;;  %510 = vperm.xlu2 %1000, %v456_v11   ;;  %500 = vperm.xlu0 %1001, %v454_v13   ;;  %v479_v28 = vmul.f32 1.442695, %v465_v26  ;;  %v477_v30 = vmul.f32 1.442695, %v464_v27  ;;  %v462_v32 = vsub.f32 %v421_v9, %v454_v13 }
 0x141   : > { %v1202_v18 = vpop.eup %1003  ;;  %1011 = vpow2.f32 %v479_v28  ;;  %v473_v33 = vmul.f32 1.442695, %v462_v32 }
 0x142   : > { %v450_v16 = vpop.xlane.xlu2 %449  ;;  %v1210_v25 = vpop.eup %1005  ;;  %1013 = vpow2.f32 %v477_v30 }
 0x143   : > { %v1200_v17 = vmax.f32 %v1197_v15, %v450_v16  ;;  %v1213_v29 = vpop.eup %1007  ;;  %1015 = vpow2.f32 %v473_v33 }
 0x144   : > { %v1216_v31 = vpop.eup %1009 }
 0x145   : > { %v466_v20 = vsub.f32 %v1197_v15, %v1200_v17  ;;  %728 = vst.msk [vmem:[#allocation2 + $0x38] sm:$0xff] %vm294_vm2, %v1200_v17  ;;  %520 = vperm.xlu1 %1002, %v1200_v17   ;;  %v552_v17 = vld [vmem:[#allocation3 + $0x28] sm:$0xff] }
 0x147   : > { %515 = vperm.xlu2 %1000, %v457_v10   ;;  %624 = vperm.xlu0 %1001, %v1202_v18   ;;  %v1219_v34 = vpop.eup %1011 }
 0x148   : > { %v1222_v35 = vpop.eup %1013 }
 0x149   : > { %v1225_v37 = vpop.eup %1015  ;;  %v560_v50 = vmul.f32 %v1222_v35, %v552_v17 }
 0x14d   : > { %490 = vperm.xlu1 %1002, %v452_v0  }
 0x14f   : > { %485 = vperm.xlu2 %1000, %v451_v57   ;;  %634 = vperm.xlu0 %1001, %v1210_v25   ;;  %v352_v57 = vld [vmem:[%s277_s25] sm:$0xff] }
 0x150   : > { %v360_v59 = vpack.c.bf16 %v353_v58, %v352_v57 }
 0x152   : > { %972 = vmatpush.bf16.msra.mxu3 %v360_v59  ;;  %683 = vmatpush.bf16.msra.mxu1 %v360_v59  ;;  %v547_v59 = vld [vmem:[#allocation3] sm:$0xff] }
 0x155   : > { %614 = vperm.xlu1 %1002, %v1213_v29  }
 0x157   : > { %619 = vperm.xlu2 %1000, %v1216_v31  }
 0x15d   : > { %644 = vperm.xlu1 %1002, %v1219_v34  }
 0x15f   : > { %639 = vperm.xlu2 %1000, %v1222_v35  }
 0x165   : > { %629 = vperm.xlu1 %1002, %v1225_v37  }
 0x191   : > { %v496_v45 = vpop.permute.xlu2 %495 }
 0x192   : > { %v525_v60 = vsub.f32 %v1156_v44, %v496_v45 }
 0x194   : > { %v535_v62 = vmul.f32 1.442695, %v525_v60  ;;  %v555_v60 = vmul.f32 %v1213_v29, %v547_v59  ;;  %v554_v29 = vld [vmem:[#allocation3 + $0x38] sm:$0xff]  ;;  %v610_v59 = vld [vmem:[#allocation4 + $0x30] sm:$0xff] }
 0x199   : > { %v511_v55 = vpop.permute.xlu2 %510 }
 0x19a   : > { %v528_v56 = vsub.f32 %v1152_v42, %v511_v55  ;;  %v557_v55 = vmul.f32 %v1202_v18, %v549_v54  ;;  %v609_v54 = vld [vmem:[#allocation4 + $0x28] sm:$0xff] }
 0x19c   : > { %v541_v61 = vmul.f32 1.442695, %v528_v56 }
 0x19e   : > { %1017 = vpow2.f32 %v541_v61 }
 0x19f   : > { %1019 = vpow2.f32 %v535_v62  ;;  %v506_v2 = vpop.permute.xlu1 %505 }
 0x1a0   : > { %v527_v5 = vsub.f32 %v1143_v39, %v506_v2 }
 0x1a1   : > { %v516_v63 = vpop.permute.xlu2 %515 }
 0x1a2   : > { %v539_v7 = vmul.f32 1.442695, %v527_v5  ;;  %v529_v24 = vsub.f32 %v1160_v46, %v516_v63 }
 0x1a4   : > { %v1018_v0 = vpop.eup %1017  ;;  %v543_v27 = vmul.f32 1.442695, %v529_v24 }
 0x1a5   : > { %v578_v1 = vsel %vm426_vm1, %v1018_v0, 0.0  ;;  %v1020_v4 = vpop.eup %1019 }
 0x1a6   : > { %579 = vadd.xlane.f32.xlu1 %v578_v1  ;;  %v569_v44 = vsel %vm426_vm1, %v1020_v4, 0.0 }
 0x1a9   : > { %v486_v3 = vpop.permute.xlu2 %485 }
 0x1aa   : > { %v523_v42 = vsub.f32 %v1134_v36, %v486_v3 }
 0x1ac   : > { %v531_v6 = vmul.f32 1.442695, %v523_v42 }
 0x1ae   : > { %1021 = vpow2.f32 %v531_v6  ;;  %570 = vadd.xlane.f32.xlu1 %v569_v44 }
 0x1af   : > { %1023 = vpow2.f32 %v539_v7 }
 0x1b1   : > { %v501_v8 = vpop.permute.xlu0 %500  ;;  %v620_v35 = vpop.permute.xlu2 %619 }
 0x1b2   : > { %v526_v9 = vsub.f32 %v1166_v49, %v501_v8 }
 0x1b4   : > { %v1022_v10 = vpop.eup %1021  ;;  %v537_v11 = vmul.f32 1.442695, %v526_v9 }
 0x1b5   : > { %v563_v12 = vsel %vm426_vm1, %v1022_v10, 0.0  ;;  %v1024_v39 = vpop.eup %1023 }
 0x1b6   : > { %1025 = vpow2.f32 %v537_v11  ;;  %564 = vadd.xlane.f32.xlu0 %v563_v12  ;;  %v575_v19 = vsel %vm426_vm1, %v1024_v39, 0.0  ;;  %v662_v33 = vpack.c.bf16 %v1018_v0, %v1024_v39  ;;  %v551_v0 = vld [vmem:[#allocation3 + $0x20] sm:$0xff]  ;;  %v606_v11 = vld [vmem:[#allocation4 + $0x10] sm:$0xff] }
 0x1b7   : > { %v521_v13 = vpop.permute.xlu1 %520  ;;  %v559_v1 = vmul.f32 %v1210_v25, %v551_v0  ;;  %v548_v25 = vld [vmem:[#allocation3 + $0x8] sm:$0xff]  ;;  %v611_v0 = vld [vmem:[#allocation4 + $0x38] sm:$0xff] }
 0x1b8   : > { %v530_v36 = vsub.f32 %v1170_v51, %v521_v13  ;;  %v556_v12 = vmul.f32 %v1216_v31, %v548_v25 }
 0x1b9   : > { %v640_v5 = vpop.permute.xlu2 %639 }
 0x1ba   : > { %v545_v14 = vmul.f32 1.442695, %v530_v36 }
 0x1bc   : > { %v1026_v16 = vpop.eup %1025  ;;  %1027 = vpow2.f32 %v545_v14 }
 0x1bd   : > { %v661_v21 = vpack.c.bf16 %v1026_v16, %v1020_v4  ;;  %v572_v43 = vsel %vm426_vm1, %v1026_v16, 0.0 }
 0x1be   : > { %576 = vadd.xlane.f32.xlu0 %v575_v19 }
 0x1bf   : > { %v491_v22 = vpop.permute.xlu1 %490  ;;  %956 = vmatmul.msk.bf16.vlgmr.msra.gmra.mxu3 %vm426_vm1, %v661_v21  ;;  %v553_v21 = vld [vmem:[#allocation3 + $0x30] sm:$0xff] }
 0x1c0   : > { %v524_v49 = vsub.f32 %v1149_v41, %v491_v22  ;;  %v481_v41 = vmul.f32 1.442695, %v466_v20  ;;  %v625_v20 = vpop.permute.xlu0 %624  ;;  %v604_v22 = vld [vmem:[#allocation4] sm:$0xff] }
 0x1c1   : > { %v654_v39 = vmul.f32 %v625_v20, %v606_v11 }
 0x1c2   : > { %v1028_v23 = vpop.eup %1027  ;;  %v533_v26 = vmul.f32 1.442695, %v524_v49  ;;  %v607_v49 = vld [vmem:[#allocation4 + $0x18] sm:$0xff] }
 0x1c3   : > { %v584_v51 = vsel %vm426_vm1, %v1028_v23, 0.0 }
 0x1c4   : > { %1029 = vpow2.f32 %v533_v26 }
 0x1c5   : > { %1031 = vpow2.f32 %v543_v27 }
 0x1c6   : > { %585 = vadd.xlane.f32.xlu0 %v584_v51  ;;  %1033 = vpow2.f32 %v481_v41  ;;  %v550_v41 = vld [vmem:[#allocation3 + $0x18] sm:$0xff] }
 0x1c7   : > { %v1255_v47 = vpop.permute.xlu1 %614 }
 0x1c8   : > { %v1264_v56 = vpop.permute.xlu0 %634  ;;  %v652_v31 = vmul.f32 %v1255_v47, %v604_v22 }
 0x1ca   : > { %v1030_v28 = vpop.eup %1029 }
 0x1cb   : > { %v566_v30 = vsel %vm426_vm1, %v1030_v28, 0.0  ;;  %v660_v32 = vpack.c.bf16 %v1030_v28, %v1022_v10  ;;  %v1032_v46 = vpop.eup %1031 }
 0x1cc   : > { %567 = vadd.xlane.f32.xlu2 %v566_v30  ;;  %v581_v38 = vsel %vm426_vm1, %v1032_v46, 0.0  ;;  %v1034_v40 = vpop.eup %1033  ;;  %v663_v45 = vpack.c.bf16 %v1028_v23, %v1032_v46  ;;  %v561_v23 = vmul.f32 %v1219_v34, %v553_v21  ;;  %v605_v46 = vld [vmem:[#allocation4 + $0x8] sm:$0xff]  ;;  %v558_v34 = vmul.f32 %v1225_v37, %v550_v41 }
 0x1cd   : > { %955 = vmatmul.msk.bf16.vlgmr.msra.gmra.mxu1 %vm426_vm1, %v660_v32  ;;  %v562_v6 = vmul.f32 %v1034_v40, %v554_v29 }
 0x1cf   : > { %957 = vmatmul.msk.bf16.gmra.mxu3 %vm426_vm1, %v662_v33  ;;  %v1257_v48 = vpop.permute.xlu1 %644 }
 0x1d4   : > { %582 = vadd.xlane.f32.xlu2 %v581_v38  ;;  %v608_v38 = vld [vmem:[#allocation4 + $0x20] sm:$0xff] }
 0x1d5   : > { %v656_v17 = vmul.f32 %v1264_v56, %v608_v38 }
 0x1d7   : > { %v1259_v15 = vpop.permute.xlu1 %629 }
 0x1d8   : > { %v655_v51 = vmul.f32 %v1259_v15, %v607_v49  ;;  %v653_v15 = vmul.f32 %v620_v35, %v605_v46 }
 0x1da   : > { %649 = vperm.xlu0 %1001, %v1034_v40  }
 0x1dc   : > { %573 = vadd.xlane.f32.xlu2 %v572_v43 }
 0x1df   : > { %958 = vmatmul.msk.bf16.gmra.mxu3 %vm426_vm1, %v663_v45 }
 0x219   : > { %v580_v52 = vpop.xlane.xlu1 %579 }
 0x21a   : > { %v592_v53 = vadd.f32 %v580_v52, %v560_v50 }
 0x21c   : > { %601 = vst.msk [vmem:[#allocation3 + $0x28] sm:$0xff] %vm294_vm2, %v592_v53 }
 0x221   : > { %v571_v57 = vpop.xlane.xlu1 %570 }
 0x222   : > { %v589_v58 = vadd.f32 %v571_v57, %v557_v55  ;;  %v657_v55 = vmul.f32 %v640_v5, %v609_v54 }
 0x223   : > { %v737_v18 = vld [vmem:[#allocation3 + $0x28] sm:$0xff] }
 0x224   : > { %598 = vst.msk [vmem:[#allocation3 + $0x10] sm:$0xff] %vm294_vm2, %v589_v58 }
 0x229   : > { %v565_v61 = vpop.xlane.xlu0 %564 }
 0x22a   : > { %v587_v62 = vadd.f32 %v565_v61, %v555_v60 }
 0x22b   : > { %v734_v63 = vld [vmem:[#allocation3 + $0x10] sm:$0xff] }
 0x22c   : > { %596 = vst.msk [vmem:[#allocation3] sm:$0xff] %vm294_vm2, %v587_v62  ;;  %1035 = vrcp.f32 %v734_v63  ;;  %v658_v62 = vmul.f32 %v1257_v48, %v610_v59 }
 0x22d   : > { %1037 = vrcp.f32 %v737_v18 }
 0x231   : > { %v577_v2 = vpop.xlane.xlu0 %576 }
 0x232   : > { %v1036_v3 = vpop.eup %1035  ;;  %v591_v4 = vadd.f32 %v577_v2, %v559_v1 }
 0x233   : > { %768 = vperm.xlu0 %1001, %v1036_v3   ;;  %v732_v42 = vld [vmem:[#allocation3] sm:$0xff]  ;;  %v1038_v44 = vpop.eup %1037 }
 0x234   : > { %600 = vst.msk [vmem:[#allocation3 + $0x20] sm:$0xff] %vm294_vm2, %v591_v4  ;;  %1039 = vrcp.f32 %v732_v42 }
 0x239   : > { %v586_v7 = vpop.xlane.xlu0 %585 }
 0x23a   : > { %v1040_v8 = vpop.eup %1039  ;;  %v594_v9 = vadd.f32 %v586_v7, %v562_v6 }
 0x23b   : > { %758 = vperm.xlu2 %1000, %v1040_v8   ;;  %783 = vperm.xlu0 %1001, %v1038_v44   ;;  %v736_v10 = vld [vmem:[#allocation3 + $0x20] sm:$0xff] }
 0x23c   : > { %603 = vst.msk [vmem:[#allocation3 + $0x38] sm:$0xff] %vm294_vm2, %v594_v9  ;;  %1041 = vrcp.f32 %v736_v10 }
 0x23f   : > { %v568_v13 = vpop.xlane.xlu2 %567 }
 0x240   : > { %v588_v36 = vadd.f32 %v568_v13, %v556_v12 }
 0x242   : > { %v1042_v14 = vpop.eup %1041  ;;  %597 = vst.msk [vmem:[#allocation3 + $0x8] sm:$0xff] %vm294_vm2, %v588_v36  ;;  %v690_v16 = vpop.f32.mrf.mxu3 }
 0x243   : > { %v707_v19 = vadd.f32 %v690_v16, %v654_v39  ;;  %778 = vperm.xlu1 %1002, %v1042_v14   ;;  %v739_v43 = vld [vmem:[#allocation3 + $0x38] sm:$0xff] }
 0x245   : > { %715 = vst.msk [vmem:[#allocation4 + $0x10] sm:$0xff] %vm311_vm0, %v707_v19 }
 0x247   : > { %v583_v24 = vpop.xlane.xlu2 %582 }
 0x248   : > { %v593_v26 = vadd.f32 %v583_v24, %v561_v23 }
 0x249   : > { %v733_v27 = vld [vmem:[#allocation3 + $0x8] sm:$0xff] }
 0x24a   : > { %602 = vst.msk [vmem:[#allocation3 + $0x30] sm:$0xff] %vm294_vm2, %v593_v26  ;;  %v685_v28 = vpop.f32.mrf.mxu1  ;;  %v692_v30 = vpop.f32.mrf.mxu3  ;;  %1043 = vrcp.f32 %v733_v27 }
 0x24b   : > { %v705_v32 = vadd.f32 %v685_v28, %v652_v31  ;;  %v708_v33 = vadd.f32 %v692_v30, %v655_v51  ;;  %1045 = vrcp.f32 %v739_v43 }
 0x24c   : > { %v650_v1 = vpop.permute.xlu0 %649  ;;  %v750_v5 = vld [vmem:[#allocation4 + $0x10] sm:$0xff] }
 0x24d   : > { %713 = vst.msk [vmem:[#allocation4] sm:$0xff] %vm311_vm0, %v705_v32  ;;  %v659_v2 = vmul.f32 %v650_v1, %v611_v0 }
 0x24e   : > { %716 = vst.msk [vmem:[#allocation4 + $0x18] sm:$0xff] %vm311_vm0, %v708_v33 }
 0x24f   : > { %v574_v40 = vpop.xlane.xlu2 %573 }
 0x250   : > { %v1044_v45 = vpop.eup %1043  ;;  %v590_v47 = vadd.f32 %v574_v40, %v558_v34 }
 0x251   : > { %763 = vperm.xlu1 %1002, %v1044_v45   ;;  %v1046_v37 = vpop.eup %1045  ;;  %v738_v60 = vld [vmem:[#allocation3 + $0x30] sm:$0xff] }
 0x252   : > { %599 = vst.msk [vmem:[#allocation3 + $0x18] sm:$0xff] %vm294_vm2, %v590_v47  ;;  %v687_v20 = vpop.f32.mrf.mxu1  ;;  %v695_v50 = vpop.f32.mrf.mxu3 }
 0x253   : > { %v706_v52 = vadd.f32 %v687_v20, %v653_v15  ;;  %v709_v53 = vadd.f32 %v695_v50, %v656_v17 }
 0x254   : > { %v748_v48 = vld [vmem:[#allocation4] sm:$0xff] }
 0x255   : > { %714 = vst.msk [vmem:[#allocation4 + $0x8] sm:$0xff] %vm311_vm0, %v706_v52  ;;  %v751_v12 = vld [vmem:[#allocation4 + $0x18] sm:$0xff] }
 0x256   : > { %717 = vst.msk [vmem:[#allocation4 + $0x20] sm:$0xff] %vm311_vm0, %v709_v53 }
 0x259   : > { %793 = vperm.xlu1 %1002, %v1046_v37   ;;  %v735_v57 = vld [vmem:[#allocation3 + $0x18] sm:$0xff] }
 0x25a   : > { %v697_v58 = vpop.f32.mrf.mxu3  ;;  %1047 = vrcp.f32 %v735_v57 }
 0x25b   : > { %v710_v56 = vadd.f32 %v697_v58, %v657_v55  ;;  %1049 = vrcp.f32 %v738_v60 }
 0x25c   : > { %v749_v39 = vld [vmem:[#allocation4 + $0x8] sm:$0xff] }
 0x25d   : > { %718 = vst.msk [vmem:[#allocation4 + $0x28] sm:$0xff] %vm311_vm0, %v710_v56  ;;  %v752_v25 = vld [vmem:[#allocation4 + $0x20] sm:$0xff] }
 0x260   : > { %v1048_v61 = vpop.eup %1047 }
 0x261   : > { %773 = vperm.xlu2 %1000, %v1048_v61   ;;  %v1050_v18 = vpop.eup %1049 }
 0x262   : > { %v700_v63 = vpop.f32.mrf.mxu3 }
 0x263   : > { %v711_v35 = vadd.f32 %v700_v63, %v658_v62 }
 0x264   : > { %v753_v7 = vld [vmem:[#allocation4 + $0x28] sm:$0xff] }
 0x265   : > { %719 = vst.msk [vmem:[#allocation4 + $0x30] sm:$0xff] %vm311_vm0, %v711_v35 }
 0x269   : > { %788 = vperm.xlu2 %1000, %v1050_v18  }
 0x26a   : > { %v702_v3 = vpop.f32.mrf.mxu3 }
 0x26b   : > { %v712_v4 = vadd.f32 %v702_v3, %v659_v2 }
 0x26c   : > { %v754_v16 = vld [vmem:[#allocation4 + $0x30] sm:$0xff] }
 0x26d   : > { %720 = vst.msk [vmem:[#allocation4 + $0x38] sm:$0xff] %vm311_vm0, %v712_v4 }
 0x274   : > { %v755_v49 = vld [vmem:[#allocation4 + $0x38] sm:$0xff] }
 0x295   : > { %v759_v42 = vpop.permute.xlu2 %758 }
 0x296   : > { %v796_v29 = vmul.f32 %v759_v42, %v748_v48 }
 0x298   : > { %804 = vst.msk [vmem:[%s1294_s28] sm:$0xff] %vm311_vm0, %v796_v29 }
 0x2a5   : > { %v769_v6 = vpop.permute.xlu0 %768 }
 0x2a6   : > { %v798_v44 = vmul.f32 %v769_v6, %v750_v5 }
 0x2a8   : > { %806 = vst.msk [vmem:[%s1294_s28 + $0x10] sm:$0xff] %vm311_vm0, %v798_v44 }
 0x2ad   : > { %v784_v8 = vpop.permute.xlu0 %783 }
 0x2ae   : > { %v801_v9 = vmul.f32 %v784_v8, %v753_v7 }
 0x2b0   : > { %809 = vst.msk [vmem:[%s1294_s28 + $0x28] sm:$0xff] %vm311_vm0, %v801_v9 }
 0x2b5   : > { %v779_v10 = vpop.permute.xlu1 %778 }
 0x2b6   : > { %v800_v11 = vmul.f32 %v779_v10, %v752_v25 }
 0x2b8   : > { %808 = vst.msk [vmem:[%s1294_s28 + $0x20] sm:$0xff] %vm311_vm0, %v800_v11 }
 0x2bb   : > { %v774_v13 = vpop.permute.xlu2 %773 }
 0x2bc   : > { %v799_v36 = vmul.f32 %v774_v13, %v751_v12 }
 0x2be   : > { %807 = vst.msk [vmem:[%s1294_s28 + $0x18] sm:$0xff] %vm311_vm0, %v799_v36 }
 0x2c3   : > { %v764_v14 = vpop.permute.xlu1 %763  ;;  %v789_v19 = vpop.permute.xlu2 %788 }
 0x2c4   : > { %v797_v21 = vmul.f32 %v764_v14, %v749_v39  ;;  %v802_v22 = vmul.f32 %v789_v19, %v754_v16 }
 0x2c6   : > { %805 = vst.msk [vmem:[%s1294_s28 + $0x8] sm:$0xff] %vm311_vm0, %v797_v21 }
 0x2c7   : > { %810 = vst.msk [vmem:[%s1294_s28 + $0x30] sm:$0xff] %vm311_vm0, %v802_v22 }
 0x2cb   : > { %v794_v23 = vpop.permute.xlu1 %793 }
 0x2cc   : > { %v803_v24 = vmul.f32 %v794_v23, %v755_v49 }
 0x2ce   : > { %811 = vst.msk [vmem:[%s1294_s28 + $0x38] sm:$0xff] %vm311_vm0, %v803_v24 }
 0x2cf PF: > { %s13_s14 = sadd.s32 1, %s1073_s14   ;;  %s1325_s12 = smov %s1069_s13 }
 0x2d0   : > { %p10_p5 = scmp.ge.s32.totalorder %s13_s14, 10   ;;  %s1326_s13 = smov %s1328_s15 }
 0x2d2   :  { %12 = sbr.rel (!%p10_p5) target bundleno = 2 (0x2), region = 76 }

// kernel: spatial_transformer.21
= control target key start
LH: loop header
LB: loop body
LE: loop exit
PB: predicated region body
PF: predicated region fallthrough
CT: control target
= control target key end

     0   :  { %vm53_vm0 = vcmask 523264   ;;  %vm70_vm1 = vcmask 261120   ;;  %s139_s1 = inlined_call_operand.vmem [shape: bf16[64,32], index: 1, kind: input, shape index: {}]   ;;  %s140_s2 = inlined_call_operand.vmem [shape: f32[1,32], index: 2, kind: input, shape index: {}]   ;;  %s141_s0 = inlined_call_operand.vmem [shape: f32[8,64], index: 0, kind: input, shape index: {}]   ;;  %s142_s3 = inlined_call_operand.vmem [shape: f32[8,32], index: 3, kind: output, shape index: {}]  }
   0x1   :  { %v96_v0 = vld [vmem:[%s139_s1 + $0x18] sm:$0xff]  ;;  %v95_v1 = vld [vmem:[%s139_s1 + $0x10] sm:$0xff]  ;;  %v94_v2 = vld [vmem:[%s139_s1 + $0x8] sm:$0xff] }
   0x2   :  { %61 = vmatpush.bf16.msra.mxu0 %v96_v0  ;;  %v93_v3 = vld [vmem:[%s139_s1] sm:$0xff] }
   0x3   :  { %v15_v4 = vld [vmem:[%s141_s0] sm:$0xff] }
   0x4   :  { %v16_v5 = vpack.c.bf16 %v15_v4, %v15_v4  ;;  %v97_v6 = vld [vmem:[%s140_s2] ss:$0 sm:$0xff] }
   0x6   :  { %62 = vmatpush.bf16.msra.mxu0 %v95_v1 }
   0xa   :  { %63 = vmatpush.bf16.msra.mxu0 %v94_v2 }
   0xe   :  { %64 = vmatpush.bf16.msra.mxu0 %v93_v3 }
  0x11   :  { %92 = vmatmul.msk.bf16.vlgmr.msra.gmra.mxu0 %vm53_vm0, %v16_v5 }
  0x8e   :  { %v66_v7 = vpop.f32.mrf.mxu0 }
  0x8f   :  { %v67_v8 = vadd.f32 %v97_v6, %v66_v7 }
  0x91   :  { %71 = vst.msk [vmem:[%s142_s3] sm:$0xff] %vm70_vm1, %v67_v8 }
  0x96   :  { %v68_v9 = vpop.f32.mrf.mxu0 }

// kernel: spatial_transformer.20
= control target key start
LH: loop header
LB: loop body
LE: loop exit
PB: predicated region body
PF: predicated region fallthrough
CT: control target
= control target key end

     0   :  { %v244_v1 = vmov 0   ;;  %vm67_vm0 = vcmask 261120   ;;  %s491_s1 = inlined_call_operand.vmem [shape: bf16[32,32], index: 1, kind: input, shape index: {}]   ;;  %s492_s0 = inlined_call_operand.vmem [shape: f32[128,32], index: 0, kind: input, shape index: {}]   ;;  %s493_s4 = inlined_call_operand.<no memory space> [shape: f32[1,1], index: 4, kind: input, shape index: {}]   ;;  %s494_s2 = inlined_call_operand.vmem [shape: f32[1,32], index: 2, kind: input, shape index: {}]   ;;  %s495_s3 = inlined_call_operand.vmem [shape: f32[128,32], index: 3, kind: input, shape index: {}]   ;;  %s496_s5 = inlined_call_operand.vmem [shape: f32[128,32], index: 5, kind: output, shape index: {}]  }
   0x1   :  { %v233_v0 = vld [vmem:[%s491_s1 + $0x8] sm:$0xff]  ;;  %241 = vset.pattern.permute.xlu0 %v244_v1  ;;  %v10_v2 = vstv %s493_s4  ;;  %v232_v3 = vld [vmem:[%s491_s1] sm:$0xff]  ;;  %v25_v17 = vld [vmem:[%s492_s0 + $0x10] sm:$0xff] }
   0x2   :  { %v23_v4 = vld [vmem:[%s492_s0] sm:$0xff]  ;;  %v24_v5 = vld [vmem:[%s492_s0 + $0x8] sm:$0xff]  ;;  %11 = vst [vmem:[#allocation2] sm:$0x1] %v10_v2  ;;  %98 = vmatpush.bf16.msra.mxu0 %v233_v0  ;;  %234 = vmatpush.bf16.msra.mxu1 %v233_v0  ;;  %v26_v18 = vld [vmem:[%s492_s0 + $0x18] sm:$0xff] }
   0x3   :  { %v27_v6 = vld [vmem:[%s492_s0 + $0x20] sm:$0xff]  ;;  %v28_v7 = vld [vmem:[%s492_s0 + $0x28] sm:$0xff]  ;;  %235 = vmatpush.bf16.msra.mxu2 %v233_v0  ;;  %236 = vmatpush.bf16.msra.mxu3 %v233_v0  ;;  %v39_v12 = vpack.c.bf16 %v24_v5, %v23_v4  ;;  %v29_v19 = vld [vmem:[%s492_s0 + $0x30] sm:$0xff]  ;;  %v40_v25 = vpack.c.bf16 %v26_v18, %v25_v17 }
   0x4   :  { %v31_v8 = vld [vmem:[%s492_s0 + $0x40] sm:$0xff]  ;;  %v32_v9 = vld [vmem:[%s492_s0 + $0x48] sm:$0xff]  ;;  %v41_v13 = vpack.c.bf16 %v28_v7, %v27_v6  ;;  %v30_v20 = vld [vmem:[%s492_s0 + $0x38] sm:$0xff] }
   0x5   :  { %v35_v10 = vld [vmem:[%s492_s0 + $0x60] sm:$0xff]  ;;  %v36_v11 = vld [vmem:[%s492_s0 + $0x68] sm:$0xff]  ;;  %v43_v14 = vpack.c.bf16 %v32_v9, %v31_v8  ;;  %v33_v21 = vld [vmem:[%s492_s0 + $0x50] sm:$0xff]  ;;  %v42_v26 = vpack.c.bf16 %v30_v20, %v29_v19 }
   0x6   :  { %99 = vmatpush.bf16.msra.mxu0 %v232_v3  ;;  %237 = vmatpush.bf16.msra.mxu1 %v232_v3  ;;  %v45_v15 = vpack.c.bf16 %v36_v11, %v35_v10  ;;  %v34_v22 = vld [vmem:[%s492_s0 + $0x58] sm:$0xff]  ;;  %v37_v23 = vld [vmem:[%s492_s0 + $0x70] sm:$0xff]  ;;  %v343_v29 = vld [vmem:[%s494_s2] ss:$0 sm:$0xff] }
   0x7   :  { %238 = vmatpush.bf16.msra.mxu2 %v232_v3  ;;  %239 = vmatpush.bf16.msra.mxu3 %v232_v3  ;;  %v38_v24 = vld [vmem:[%s492_s0 + $0x78] sm:$0xff]  ;;  %v44_v27 = vpack.c.bf16 %v34_v22, %v33_v21  ;;  %v141_v35 = vld [vmem:[%s495_s3] sm:$0xff]  ;;  %v142_v53 = vld [vmem:[%s495_s3 + $0x8] sm:$0xff] }
   0x8   :  { %v46_v28 = vpack.c.bf16 %v38_v24, %v37_v23  ;;  %v145_v36 = vld [vmem:[%s495_s3 + $0x20] sm:$0xff]  ;;  %v146_v54 = vld [vmem:[%s495_s3 + $0x28] sm:$0xff]  ;;  %v143_v9 = vld [vmem:[%s495_s3 + $0x10] sm:$0xff] }
   0x9   :  { %v242_v16 = vld [vmem:[#allocation2] ss:$0 sm:$0xff]  ;;  %224 = vmatmul.msk.bf16.vlgmr.msra.gmra.mxu0 %vm67_vm0, %v39_v12  ;;  %226 = vmatmul.msk.bf16.vlgmr.msra.gmra.mxu1 %vm67_vm0, %v41_v13  ;;  %v150_v3 = vld [vmem:[%s495_s3 + $0x48] sm:$0xff]  ;;  %v147_v10 = vld [vmem:[%s495_s3 + $0x30] sm:$0xff] }
   0xa   :  { %228 = vmatmul.msk.bf16.vlgmr.msra.gmra.mxu2 %vm67_vm0, %v43_v14  ;;  %230 = vmatmul.msk.bf16.vlgmr.msra.gmra.mxu3 %vm67_vm0, %v45_v15  ;;  %v149_v47 = vld [vmem:[%s495_s3 + $0x40] sm:$0xff]  ;;  %v154_v4 = vld [vmem:[%s495_s3 + $0x68] sm:$0xff]  ;;  %v151_v23 = vld [vmem:[%s495_s3 + $0x50] sm:$0xff] }
   0xb   :  { %161 = vperm.xlu0 %241, %v242_v16   ;;  %v153_v48 = vld [vmem:[%s495_s3 + $0x60] sm:$0xff]  ;;  %v155_v24 = vld [vmem:[%s495_s3 + $0x70] sm:$0xff] }
  0x19   :  { %225 = vmatmul.msk.bf16.gmra.mxu0 %vm67_vm0, %v40_v25  ;;  %227 = vmatmul.msk.bf16.gmra.mxu1 %vm67_vm0, %v42_v26 }
  0x1a   :  { %229 = vmatmul.msk.bf16.gmra.mxu2 %vm67_vm0, %v44_v27  ;;  %231 = vmatmul.msk.bf16.gmra.mxu3 %vm67_vm0, %v46_v28 }
  0x7d   :  { %v345_v30 = vpop.permute.xlu0 %161 }
  0x86   :  { %v101_v31 = vpop.f32.mrf.mxu0  ;;  %v111_v32 = vpop.f32.mrf.mxu1 }
  0x87   :  { %v102_v33 = vadd.f32 %v343_v29, %v101_v31  ;;  %v112_v34 = vadd.f32 %v343_v29, %v111_v32  ;;  %v144_v31 = vld [vmem:[%s495_s3 + $0x18] sm:$0xff] }
  0x88   :  { %v148_v32 = vld [vmem:[%s495_s3 + $0x38] sm:$0xff] }
  0x89   :  { %v164_v37 = vmul.f32 %v345_v30, %v102_v33  ;;  %v168_v38 = vmul.f32 %v345_v30, %v112_v34 }
  0x8b   :  { %v180_v39 = vadd.f32 %v164_v37, %v141_v35  ;;  %v184_v40 = vadd.f32 %v168_v38, %v145_v36 }
  0x8d   :  { %v121_v41 = vpop.f32.mrf.mxu2  ;;  %v131_v42 = vpop.f32.mrf.mxu3  ;;  %196 = vst.msk [vmem:[%s496_s5] sm:$0xff] %vm67_vm0, %v180_v39 }
  0x8e   :  { %v122_v43 = vadd.f32 %v343_v29, %v121_v41  ;;  %v132_v44 = vadd.f32 %v343_v29, %v131_v42  ;;  %200 = vst.msk [vmem:[%s496_s5 + $0x20] sm:$0xff] %vm67_vm0, %v184_v40  ;;  %v103_v45 = vpop.f32.mrf.mxu0  ;;  %v113_v46 = vpop.f32.mrf.mxu1 }
  0x8f   :  { %v104_v49 = vadd.f32 %v343_v29, %v103_v45  ;;  %v114_v50 = vadd.f32 %v343_v29, %v113_v46 }
  0x90   :  { %v172_v51 = vmul.f32 %v345_v30, %v122_v43  ;;  %v176_v52 = vmul.f32 %v345_v30, %v132_v44  ;;  %v152_v43 = vld [vmem:[%s495_s3 + $0x58] sm:$0xff] }
  0x91   :  { %v165_v55 = vmul.f32 %v345_v30, %v104_v49  ;;  %v169_v56 = vmul.f32 %v345_v30, %v114_v50  ;;  %v156_v44 = vld [vmem:[%s495_s3 + $0x78] sm:$0xff] }
  0x92   :  { %v188_v57 = vadd.f32 %v172_v51, %v149_v47  ;;  %v192_v58 = vadd.f32 %v176_v52, %v153_v48 }
  0x93   :  { %v181_v59 = vadd.f32 %v165_v55, %v142_v53  ;;  %v185_v60 = vadd.f32 %v169_v56, %v146_v54 }
  0x94   :  { %204 = vst.msk [vmem:[%s496_s5 + $0x40] sm:$0xff] %vm67_vm0, %v188_v57 }
  0x95   :  { %208 = vst.msk [vmem:[%s496_s5 + $0x60] sm:$0xff] %vm67_vm0, %v192_v58  ;;  %v123_v61 = vpop.f32.mrf.mxu2  ;;  %v133_v62 = vpop.f32.mrf.mxu3 }
  0x96   :  { %197 = vst.msk [vmem:[%s496_s5 + $0x8] sm:$0xff] %vm67_vm0, %v181_v59  ;;  %v124_v63 = vadd.f32 %v343_v29, %v123_v61  ;;  %v134_v0 = vadd.f32 %v343_v29, %v133_v62  ;;  %v106_v1 = vpop.f32.mrf.mxu0  ;;  %v116_v2 = vpop.f32.mrf.mxu1 }
  0x97   :  { %201 = vst.msk [vmem:[%s496_s5 + $0x28] sm:$0xff] %vm67_vm0, %v185_v60  ;;  %v107_v5 = vadd.f32 %v343_v29, %v106_v1  ;;  %v117_v6 = vadd.f32 %v343_v29, %v116_v2 }
  0x98   :  { %v173_v7 = vmul.f32 %v345_v30, %v124_v63  ;;  %v177_v8 = vmul.f32 %v345_v30, %v134_v0 }
  0x99   :  { %v166_v11 = vmul.f32 %v345_v30, %v107_v5  ;;  %v170_v12 = vmul.f32 %v345_v30, %v117_v6 }
  0x9a   :  { %v189_v13 = vadd.f32 %v173_v7, %v150_v3  ;;  %v193_v14 = vadd.f32 %v177_v8, %v154_v4 }
  0x9b   :  { %v182_v15 = vadd.f32 %v166_v11, %v143_v9  ;;  %v186_v16 = vadd.f32 %v170_v12, %v147_v10 }
  0x9c   :  { %205 = vst.msk [vmem:[%s496_s5 + $0x48] sm:$0xff] %vm67_vm0, %v189_v13 }
  0x9d   :  { %209 = vst.msk [vmem:[%s496_s5 + $0x68] sm:$0xff] %vm67_vm0, %v193_v14  ;;  %v126_v17 = vpop.f32.mrf.mxu2  ;;  %v136_v18 = vpop.f32.mrf.mxu3 }
  0x9e   :  { %198 = vst.msk [vmem:[%s496_s5 + $0x10] sm:$0xff] %vm67_vm0, %v182_v15  ;;  %v127_v19 = vadd.f32 %v343_v29, %v126_v17  ;;  %v137_v20 = vadd.f32 %v343_v29, %v136_v18  ;;  %v108_v21 = vpop.f32.mrf.mxu0  ;;  %v118_v22 = vpop.f32.mrf.mxu1 }
  0x9f   :  { %202 = vst.msk [vmem:[%s496_s5 + $0x30] sm:$0xff] %vm67_vm0, %v186_v16  ;;  %v109_v25 = vadd.f32 %v343_v29, %v108_v21  ;;  %v119_v26 = vadd.f32 %v343_v29, %v118_v22 }
  0xa0   :  { %v174_v27 = vmul.f32 %v345_v30, %v127_v19  ;;  %v178_v28 = vmul.f32 %v345_v30, %v137_v20 }
  0xa1   :  { %v167_v33 = vmul.f32 %v345_v30, %v109_v25  ;;  %v171_v34 = vmul.f32 %v345_v30, %v119_v26 }
  0xa2   :  { %v190_v35 = vadd.f32 %v174_v27, %v151_v23  ;;  %v194_v36 = vadd.f32 %v178_v28, %v155_v24 }
  0xa3   :  { %v183_v37 = vadd.f32 %v167_v33, %v144_v31  ;;  %v187_v38 = vadd.f32 %v171_v34, %v148_v32 }
  0xa4   :  { %206 = vst.msk [vmem:[%s496_s5 + $0x50] sm:$0xff] %vm67_vm0, %v190_v35 }
  0xa5   :  { %210 = vst.msk [vmem:[%s496_s5 + $0x70] sm:$0xff] %vm67_vm0, %v194_v36  ;;  %v128_v39 = vpop.f32.mrf.mxu2  ;;  %v138_v40 = vpop.f32.mrf.mxu3 }
  0xa6   :  { %199 = vst.msk [vmem:[%s496_s5 + $0x18] sm:$0xff] %vm67_vm0, %v183_v37  ;;  %v129_v41 = vadd.f32 %v343_v29, %v128_v39  ;;  %v139_v42 = vadd.f32 %v343_v29, %v138_v40 }
  0xa7   :  { %203 = vst.msk [vmem:[%s496_s5 + $0x38] sm:$0xff] %vm67_vm0, %v187_v38 }
  0xa8   :  { %v175_v45 = vmul.f32 %v345_v30, %v129_v41  ;;  %v179_v46 = vmul.f32 %v345_v30, %v139_v42 }
  0xaa   :  { %v191_v47 = vadd.f32 %v175_v45, %v152_v43  ;;  %v195_v48 = vadd.f32 %v179_v46, %v156_v44 }
  0xac   :  { %207 = vst.msk [vmem:[%s496_s5 + $0x58] sm:$0xff] %vm67_vm0, %v191_v47 }
  0xad   :  { %211 = vst.msk [vmem:[%s496_s5 + $0x78] sm:$0xff] %vm67_vm0, %v195_v48 }

// kernel: spatial_transformer.22
= control target key start
LH: loop header
LB: loop body
LE: loop exit
PB: predicated region body
PF: predicated region fallthrough
CT: control target
= control target key end

     0   :  { %vm35_vm0 = vcmask 261120   ;;  %v650_v34 = vmov 32.0   ;;  %s1356_s0 = inlined_call_operand.vmem [shape: f32[136,32], index: 0, kind: input, shape index: {}]   ;;  %s1357_s1 = inlined_call_operand.vmem [shape: f32[1,32], index: 1, kind: input, shape index: {}]   ;;  %s1358_s2 = inlined_call_operand.vmem [shape: f32[1,32], index: 2, kind: input, shape index: {}]   ;;  %s1359_s3 = inlined_call_operand.vmem [shape: bf16[32,96], index: 3, kind: input, shape index: {}]   ;;  %s1360_s4 = inlined_call_operand.vmem [shape: f32[136,96], index: 4, kind: output, shape index: {}]  }
   0x1   :  { %v679_v0 = vld [vmem:[%s1356_s0 + $0x70] sm:$0xff]  ;;  %v684_v1 = vld [vmem:[%s1356_s0 + $0x60] sm:$0xff]  ;;  %v700_v6 = vld [vmem:[%s1356_s0 + $0x78] sm:$0xff]  ;;  %614 = vrcp.f32 %v650_v34 }
   0x2   :  { %v689_v2 = vld [vmem:[%s1356_s0 + $0x20] sm:$0xff]  ;;  %v78_v3 = vsel %vm35_vm0, %v679_v0, 0.0  ;;  %v72_v4 = vsel %vm35_vm0, %v684_v1, 0.0  ;;  %v705_v7 = vld [vmem:[%s1356_s0 + $0x68] sm:$0xff]  ;;  %v81_v9 = vsel %vm35_vm0, %v700_v6, 0.0  ;;  %v721_v12 = vld [vmem:[%s1356_s0 + $0x30] sm:$0xff] }
   0x3   :  { %v48_v5 = vsel %vm35_vm0, %v689_v2, 0.0  ;;  %79 = vadd.xlane.f32.xlu2 %v78_v3  ;;  %73 = vadd.xlane.f32.xlu0 %v72_v4  ;;  %v710_v8 = vld [vmem:[%s1356_s0 + $0x28] sm:$0xff]  ;;  %v75_v10 = vsel %vm35_vm0, %v705_v7, 0.0  ;;  %v726_v13 = vld [vmem:[%s1356_s0] sm:$0xff]  ;;  %v54_v15 = vsel %vm35_vm0, %v721_v12, 0.0  ;;  %v742_v18 = vld [vmem:[%s1356_s0 + $0x58] sm:$0xff] }
   0x4   :  { %49 = vadd.xlane.f32.xlu1 %v48_v5  ;;  %v51_v11 = vsel %vm35_vm0, %v710_v8, 0.0  ;;  %v731_v14 = vld [vmem:[%s1356_s0 + $0x8] sm:$0xff]  ;;  %v36_v16 = vsel %vm35_vm0, %v726_v13, 0.0  ;;  %v747_v19 = vld [vmem:[%s1356_s0 + $0x38] sm:$0xff]  ;;  %v752_v20 = vld [vmem:[%s1356_s0 + $0x50] sm:$0xff]  ;;  %v69_v21 = vsel %vm35_vm0, %v742_v18, 0.0 }
   0x5   :  { %v39_v17 = vsel %vm35_vm0, %v731_v14, 0.0  ;;  %v57_v22 = vsel %vm35_vm0, %v747_v19, 0.0  ;;  %v66_v23 = vsel %vm35_vm0, %v752_v20, 0.0  ;;  %v763_v24 = vld [vmem:[%s1356_s0 + $0x18] sm:$0xff]  ;;  %v768_v25 = vld [vmem:[%s1356_s0 + $0x80] sm:$0xff]  ;;  %v773_v26 = vld [vmem:[%s1356_s0 + $0x10] sm:$0xff] }
   0x6   :  { %v45_v27 = vsel %vm35_vm0, %v763_v24, 0.0  ;;  %v84_v28 = vsel %vm35_vm0, %v768_v25, 0.0  ;;  %v42_v29 = vsel %vm35_vm0, %v773_v26, 0.0  ;;  %v784_v30 = vld [vmem:[%s1356_s0 + $0x40] sm:$0xff]  ;;  %v789_v31 = vld [vmem:[%s1356_s0 + $0x48] sm:$0xff] }
   0x7   :  { %v60_v32 = vsel %vm35_vm0, %v784_v30, 0.0  ;;  %v63_v33 = vsel %vm35_vm0, %v789_v31, 0.0  ;;  %v615_v35 = vpop.eup %614 }
   0x8   :  { %v88_v36 = vmul.f32 32.0, %v615_v35  ;;  %vm92_vm1 = vweird.f32 %v615_v35 }
   0xa   :  { %v89_v37 = vsub.f32 1.0, %v88_v36 }
   0xb   :  { %82 = vadd.xlane.f32.xlu2 %v81_v9  ;;  %76 = vadd.xlane.f32.xlu0 %v75_v10 }
   0xc   :  { %52 = vadd.xlane.f32.xlu1 %v51_v11  ;;  %v90_v38 = vmul.f32 %v615_v35, %v89_v37 }
   0xe   :  { %v91_v39 = vadd.f32 %v615_v35, %v90_v38 }
  0x10   :  { %v795_v40 = vsel %vm92_vm1, %v615_v35, %v91_v39 }
  0x13   :  { %55 = vadd.xlane.f32.xlu2 %v54_v15  ;;  %37 = vadd.xlane.f32.xlu0 %v36_v16 }
  0x14   :  { %40 = vadd.xlane.f32.xlu1 %v39_v17 }
  0x1b   :  { %70 = vadd.xlane.f32.xlu2 %v69_v21  ;;  %58 = vadd.xlane.f32.xlu0 %v57_v22 }
  0x1c   :  { %67 = vadd.xlane.f32.xlu1 %v66_v23 }
  0x23   :  { %46 = vadd.xlane.f32.xlu2 %v45_v27  ;;  %85 = vadd.xlane.f32.xlu0 %v84_v28 }
  0x24   :  { %43 = vadd.xlane.f32.xlu1 %v42_v29 }
  0x2b   :  { %61 = vadd.xlane.f32.xlu0 %v60_v32 }
  0x2c   :  { %64 = vadd.xlane.f32.xlu1 %v63_v33 }
  0x76   :  { %v80_v41 = vpop.xlane.xlu2 %79  ;;  %v74_v42 = vpop.xlane.xlu0 %73 }
  0x77   :  { %v106_v43 = vmul.f32 %v795_v40, %v74_v42  ;;  %v50_v44 = vpop.xlane.xlu1 %49  ;;  %v108_v54 = vmul.f32 %v795_v40, %v80_v41 }
  0x78   :  { %v98_v45 = vmul.f32 %v795_v40, %v50_v44 }
  0x79   :  { %v800_v46 = vsub.f32 %v684_v1, %v106_v43  ;;  %v825_v62 = vsub.f32 %v679_v0, %v108_v54 }
  0x7a   :  { %v803_v47 = vsub.f32 %v689_v2, %v98_v45 }
  0x7b   :  { %v140_v48 = vmul.f32 %v800_v46, %v800_v46  ;;  %v142_v10 = vmul.f32 %v825_v62, %v825_v62 }
  0x7c   :  { %v132_v49 = vmul.f32 %v803_v47, %v803_v47 }
  0x7d   :  { %v181_v50 = vsel %vm35_vm0, %v140_v48, 0.0  ;;  %v187_v22 = vsel %vm35_vm0, %v142_v10, 0.0 }
  0x7e   :  { %v83_v51 = vpop.xlane.xlu2 %82  ;;  %v77_v52 = vpop.xlane.xlu0 %76  ;;  %182 = vadd.xlane.f32.xlu2 %v181_v50  ;;  %v157_v53 = vsel %vm35_vm0, %v132_v49, 0.0 }
  0x7f   :  { %v109_v55 = vmul.f32 %v795_v40, %v83_v51  ;;  %v107_v56 = vmul.f32 %v795_v40, %v77_v52  ;;  %v53_v57 = vpop.xlane.xlu1 %52  ;;  %158 = vadd.xlane.f32.xlu1 %v157_v53 }
  0x80   :  { %v99_v58 = vmul.f32 %v795_v40, %v53_v57 }
  0x81   :  { %v816_v59 = vsub.f32 %v700_v6, %v109_v55  ;;  %v819_v60 = vsub.f32 %v705_v7, %v107_v56 }
  0x82   :  { %v822_v61 = vsub.f32 %v710_v8, %v99_v58 }
  0x83   :  { %v143_v63 = vmul.f32 %v816_v59, %v816_v59  ;;  %v141_v1 = vmul.f32 %v819_v60, %v819_v60 }
  0x84   :  { %v133_v2 = vmul.f32 %v822_v61, %v822_v61 }
  0x85   :  { %v190_v3 = vsel %vm35_vm0, %v143_v63, 0.0  ;;  %v184_v4 = vsel %vm35_vm0, %v141_v1, 0.0 }
  0x86   :  { %v56_v5 = vpop.xlane.xlu2 %55  ;;  %v160_v6 = vsel %vm35_vm0, %v133_v2, 0.0  ;;  %185 = vadd.xlane.f32.xlu0 %v184_v4  ;;  %v38_v7 = vpop.xlane.xlu0 %37 }
  0x87   :  { %v100_v0 = vmul.f32 %v795_v40, %v56_v5  ;;  %161 = vadd.xlane.f32.xlu2 %v160_v6  ;;  %191 = vadd.xlane.f32.xlu1 %v190_v3  ;;  %v94_v8 = vmul.f32 %v795_v40, %v38_v7  ;;  %v41_v9 = vpop.xlane.xlu1 %40 }
  0x88   :  { %v95_v11 = vmul.f32 %v795_v40, %v41_v9 }
  0x89   :  { %v842_v15 = vsub.f32 %v721_v12, %v100_v0  ;;  %v845_v16 = vsub.f32 %v726_v13, %v94_v8 }
  0x8a   :  { %v850_v21 = vsub.f32 %v731_v14, %v95_v11  ;;  %v604_v11 = vld [vmem:[%s1359_s3 + $0x8] sm:$0xff] }
  0x8b   :  { %v134_v17 = vmul.f32 %v842_v15, %v842_v15  ;;  %v128_v23 = vmul.f32 %v845_v16, %v845_v16  ;;  %605 = vmatpush.bf16.msra.mxu1 %v604_v11  ;;  %607 = vmatpush.bf16.msra.mxu3 %v604_v11 }
  0x8c   :  { %v129_v33 = vmul.f32 %v850_v21, %v850_v21  ;;  %517 = vmatpush.bf16.msra.mxu0 %v604_v11  ;;  %606 = vmatpush.bf16.msra.mxu2 %v604_v11 }
  0x8d   :  { %v163_v27 = vsel %vm35_vm0, %v134_v17, 0.0  ;;  %v145_v28 = vsel %vm35_vm0, %v128_v23, 0.0 }
  0x8e   :  { %v71_v12 = vpop.xlane.xlu2 %70  ;;  %188 = vadd.xlane.f32.xlu0 %v187_v22  ;;  %v59_v29 = vpop.xlane.xlu0 %58  ;;  %v148_v39 = vsel %vm35_vm0, %v129_v33, 0.0 }
  0x8f   :  { %v105_v13 = vmul.f32 %v795_v40, %v71_v12  ;;  %164 = vadd.xlane.f32.xlu1 %v163_v27  ;;  %146 = vadd.xlane.f32.xlu2 %v145_v28  ;;  %v101_v32 = vmul.f32 %v795_v40, %v59_v29  ;;  %v68_v14 = vpop.xlane.xlu1 %67 }
  0x90   :  { %v104_v34 = vmul.f32 %v795_v40, %v68_v14 }
  0x91   :  { %v863_v35 = vsub.f32 %v742_v18, %v105_v13  ;;  %v866_v36 = vsub.f32 %v747_v19, %v101_v32  ;;  %v603_v32 = vld [vmem:[%s1359_s3] sm:$0xff] }
  0x92   :  { %v871_v38 = vsub.f32 %v752_v20, %v104_v34  ;;  %608 = vmatpush.bf16.msra.mxu1 %v603_v32  ;;  %610 = vmatpush.bf16.msra.mxu3 %v603_v32 }
  0x93   :  { %v139_v37 = vmul.f32 %v863_v35, %v863_v35  ;;  %v135_v41 = vmul.f32 %v866_v36, %v866_v36  ;;  %518 = vmatpush.bf16.msra.mxu0 %v603_v32  ;;  %609 = vmatpush.bf16.msra.mxu2 %v603_v32 }
  0x94   :  { %v138_v48 = vmul.f32 %v871_v38, %v871_v38 }
  0x95   :  { %v178_v42 = vsel %vm35_vm0, %v139_v37, 0.0  ;;  %v166_v43 = vsel %vm35_vm0, %v135_v41, 0.0 }
  0x96   :  { %v47_v18 = vpop.xlane.xlu2 %46  ;;  %149 = vadd.xlane.f32.xlu0 %v148_v39  ;;  %v86_v44 = vpop.xlane.xlu0 %85  ;;  %v175_v54 = vsel %vm35_vm0, %v138_v48, 0.0 }
  0x97   :  { %v97_v19 = vmul.f32 %v795_v40, %v47_v18  ;;  %179 = vadd.xlane.f32.xlu1 %v178_v42  ;;  %167 = vadd.xlane.f32.xlu2 %v166_v43  ;;  %v110_v45 = vmul.f32 %v795_v40, %v86_v44  ;;  %v44_v20 = vpop.xlane.xlu1 %43 }
  0x98   :  { %v96_v49 = vmul.f32 %v795_v40, %v44_v20 }
  0x99   :  { %v884_v50 = vsub.f32 %v763_v24, %v97_v19  ;;  %v887_v51 = vsub.f32 %v768_v25, %v110_v45 }
  0x9a   :  { %v892_v53 = vsub.f32 %v773_v26, %v96_v49 }
  0x9b   :  { %v131_v52 = vmul.f32 %v884_v50, %v884_v50  ;;  %v144_v55 = vmul.f32 %v887_v51, %v887_v51 }
  0x9c   :  { %v130_v26 = vmul.f32 %v892_v53, %v892_v53 }
  0x9d   :  { %v154_v56 = vsel %vm35_vm0, %v131_v52, 0.0  ;;  %v193_v57 = vsel %vm35_vm0, %v144_v55, 0.0 }
  0x9e   :  { %176 = vadd.xlane.f32.xlu0 %v175_v54  ;;  %v62_v24 = vpop.xlane.xlu0 %61  ;;  %v151_v3 = vsel %vm35_vm0, %v130_v26, 0.0 }
  0x9f   :  { %155 = vadd.xlane.f32.xlu1 %v154_v56  ;;  %194 = vadd.xlane.f32.xlu2 %v193_v57  ;;  %v102_v25 = vmul.f32 %v795_v40, %v62_v24  ;;  %v65_v58 = vpop.xlane.xlu1 %64 }
  0xa0   :  { %v103_v63 = vmul.f32 %v795_v40, %v65_v58 }
  0xa1   :  { %v904_v1 = vsub.f32 %v784_v30, %v102_v25 }
  0xa2   :  { %v907_v2 = vsub.f32 %v789_v31, %v103_v63 }
  0xa3   :  { %v136_v4 = vmul.f32 %v904_v1, %v904_v1 }
  0xa4   :  { %v137_v6 = vmul.f32 %v907_v2, %v907_v2 }
  0xa5   :  { %v169_v5 = vsel %vm35_vm0, %v136_v4, 0.0 }
  0xa6   :  { %152 = vadd.xlane.f32.xlu0 %v151_v3  ;;  %v172_v7 = vsel %vm35_vm0, %v137_v6, 0.0 }
  0xa7   :  { %170 = vadd.xlane.f32.xlu2 %v169_v5 }
  0xae   :  { %173 = vadd.xlane.f32.xlu0 %v172_v7 }
  0xf1   :  { %v183_v30 = vpop.xlane.xlu2 %182 }
  0xf2   :  { %v208_v0 = vmul.f32 %v183_v30, %v795_v40  ;;  %v159_v31 = vpop.xlane.xlu1 %158 }
  0xf3   :  { %v200_v8 = vmul.f32 %v159_v31, %v795_v40 }
  0xf4   :  { %v225_v9 = vadd.f32 1e-05, %v208_v0 }
  0xf5   :  { %v217_v10 = vadd.f32 1e-05, %v200_v8 }
  0xf6   :  { %616 = vrsqrt.f32 %v225_v9  ;;  %vm356_vm6 = vweird.f32 %v225_v9 }
  0xf7   :  { %618 = vrsqrt.f32 %v217_v10  ;;  %vm276_vm2 = vweird.f32 %v217_v10 }
  0xf9   :  { %v186_v17 = vpop.xlane.xlu0 %185 }
  0xfa   :  { %v162_v22 = vpop.xlane.xlu2 %161  ;;  %v192_v23 = vpop.xlane.xlu1 %191  ;;  %v209_v27 = vmul.f32 %v186_v17, %v795_v40 }
  0xfb   :  { %v201_v28 = vmul.f32 %v162_v22, %v795_v40  ;;  %v211_v12 = vmul.f32 %v192_v23, %v795_v40 }
  0xfc   :  { %v924_v29 = vpop.eup %616  ;;  %v926_v13 = vadd.f32 1e-05, %v209_v27  ;;  %v982_v27 = vld [vmem:[%s1357_s1] ss:$0 sm:$0xff] }
  0xfd   :  { %v619_v14 = vpop.eup %618  ;;  %v351_v33 = vmul.f32 %v924_v29, %v225_v9  ;;  %v932_v34 = vadd.f32 1e-05, %v201_v28  ;;  %v934_v37 = vadd.f32 1e-05, %v211_v12  ;;  %vm357_vm4 = vweird.f32 %v924_v29 }
  0xfe   :  { %v271_v39 = vmul.f32 %v619_v14, %v217_v10  ;;  %620 = vrsqrt.f32 %v926_v13  ;;  %vm277_vm3 = vweird.f32 %v619_v14  ;;  %vm968_vm7 = vmor %vm356_vm6, %vm357_vm4  ;;  %vm366_vm8 = vweird.f32 %v926_v13 }
  0xff   :  { %v352_v41 = vmul.f32 %v924_v29, %v351_v33  ;;  %622 = vrsqrt.f32 %v932_v34  ;;  %vm278_vm5 = vmor %vm276_vm2, %vm277_vm3  ;;  %vm286_vm9 = vweird.f32 %v932_v34  ;;  %vm386_vm10 = vweird.f32 %v934_v37 }
 0x100   :  { %v272_v42 = vmul.f32 %v619_v14, %v271_v39  ;;  %624 = vrsqrt.f32 %v934_v37 }
 0x101   :  { %v353_v43 = vmul.f32 0.5, %v352_v41  ;;  %v189_v18 = vpop.xlane.xlu0 %188 }
 0x102   :  { %v273_v44 = vmul.f32 0.5, %v272_v42  ;;  %v165_v19 = vpop.xlane.xlu1 %164  ;;  %v147_v45 = vpop.xlane.xlu2 %146  ;;  %v210_v52 = vmul.f32 %v189_v18, %v795_v40 }
 0x103   :  { %v354_v20 = vsub.f32 1.5, %v353_v43  ;;  %v202_v48 = vmul.f32 %v165_v19, %v795_v40  ;;  %v196_v49 = vmul.f32 %v147_v45, %v795_v40 }
 0x104   :  { %v943_v54 = vpop.eup %620  ;;  %v274_v55 = vsub.f32 1.5, %v273_v44  ;;  %v962_v6 = vadd.f32 1e-05, %v210_v52  ;;  %v1002_v44 = vld [vmem:[%s1358_s2] ss:$0 sm:$0xff] }
 0x105   :  { %v945_v56 = vpop.eup %622  ;;  %v361_v57 = vmul.f32 %v943_v54, %v926_v13  ;;  %v950_v24 = vadd.f32 1e-05, %v202_v48  ;;  %v355_v58 = vmul.f32 %v924_v29, %v354_v20  ;;  %v957_v3 = vadd.f32 1e-05, %v196_v49 }
 0x106   :  { %v952_v25 = vpop.eup %624  ;;  %v275_v26 = vmul.f32 %v619_v14, %v274_v55  ;;  %v281_v63 = vmul.f32 %v945_v56, %v932_v34  ;;  %vm367_vm11 = vweird.f32 %v943_v54  ;;  %vm287_vm12 = vweird.f32 %v945_v56 }
 0x107   :  { %v381_v4 = vmul.f32 %v952_v25, %v934_v37  ;;  %v362_v5 = vmul.f32 %v943_v54, %v361_v57  ;;  %626 = vrsqrt.f32 %v950_v24  ;;  %v359_v9 = vsel %vm968_vm7, %v924_v29, %v355_v58  ;;  %vm1014_vm14 = vmor %vm366_vm8, %vm367_vm11 }
 0x108   :  { %v279_v7 = vsel %vm278_vm5, %v619_v14, %v275_v26  ;;  %v282_v30 = vmul.f32 %v945_v56, %v281_v63  ;;  %628 = vrsqrt.f32 %v957_v3  ;;  %v412_v42 = vmul.f32 %v359_v9, %v800_v46  ;;  %vm1025_vm15 = vmor %vm286_vm9, %vm287_vm12 }
 0x109   :  { %v382_v31 = vmul.f32 %v952_v25, %v381_v4  ;;  %v363_v8 = vmul.f32 0.5, %v362_v5  ;;  %v150_v10 = vpop.xlane.xlu0 %149  ;;  %v404_v11 = vmul.f32 %v279_v7, %v803_v47  ;;  %630 = vrsqrt.f32 %v962_v6 }
 0x10a   :  { %v283_v17 = vmul.f32 0.5, %v282_v30  ;;  %v180_v22 = vpop.xlane.xlu1 %179  ;;  %v168_v23 = vpop.xlane.xlu2 %167  ;;  %v197_v29 = vmul.f32 %v150_v10, %v795_v40  ;;  %vm387_vm13 = vweird.f32 %v952_v25  ;;  %vm296_vm1 = vweird.f32 %v950_v24 }
 0x10b   :  { %v383_v28 = vmul.f32 0.5, %v382_v31  ;;  %v364_v12 = vsub.f32 1.5, %v363_v8  ;;  %v207_v32 = vmul.f32 %v180_v22, %v795_v40  ;;  %v203_v47 = vmul.f32 %v168_v23, %v795_v40  ;;  %vm1036_vm2 = vmor %vm386_vm10, %vm387_vm13 }
 0x10c   :  { %v284_v14 = vsub.f32 1.5, %v283_v17  ;;  %v425_v18 = vmul.f32 %v982_v27, %v404_v11  ;;  %v1019_v49 = vadd.f32 1e-05, %v197_v29  ;;  %v1049_v0 = vmul.f32 %v982_v27, %v412_v42 }
 0x10d   :  { %v384_v33 = vsub.f32 1.5, %v383_v28  ;;  %v991_v39 = vadd.f32 1e-05, %v207_v32  ;;  %v993_v41 = vpop.eup %626  ;;  %v365_v43 = vmul.f32 %v943_v54, %v364_v12  ;;  %v1008_v20 = vadd.f32 1e-05, %v203_v47 }
 0x10e   :  { %v285_v19 = vmul.f32 %v945_v56, %v284_v14  ;;  %v291_v45 = vmul.f32 %v993_v41, %v950_v24  ;;  %v1010_v46 = vpop.eup %628  ;;  %v1046_v30 = vadd.f32 %v1002_v44, %v425_v18  ;;  %vm236_vm3 = vweird.f32 %v957_v3 }
 0x10f   :  { %632 = vrsqrt.f32 %v991_v39  ;;  %v1021_v52 = vpop.eup %630  ;;  %v385_v57 = vmul.f32 %v952_v25, %v384_v33  ;;  %v231_v58 = vmul.f32 %v1010_v46, %v957_v3  ;;  %v369_v34 = vsel %vm1014_vm14, %v943_v54, %v365_v43 }
 0x110   :  { %v292_v13 = vmul.f32 %v993_v41, %v291_v45  ;;  %v371_v4 = vmul.f32 %v1021_v52, %v962_v6  ;;  %v289_v37 = vsel %vm1025_vm15, %v945_v56, %v285_v19  ;;  %634 = vrsqrt.f32 %v1008_v20 }
 0x111   :  { %v177_v26 = vpop.xlane.xlu0 %176  ;;  %v232_v8 = vmul.f32 %v1010_v46, %v231_v58  ;;  %vm297_vm4 = vweird.f32 %v993_v41  ;;  %636 = vrsqrt.f32 %v1019_v49  ;;  %v389_v9 = vsel %vm1036_vm2, %v952_v25, %v385_v57 }
 0x112   :  { %v156_v5 = vpop.xlane.xlu1 %155  ;;  %v195_v7 = vpop.xlane.xlu2 %194  ;;  %v293_v31 = vmul.f32 0.5, %v292_v13  ;;  %v372_v54 = vmul.f32 %v1021_v52, %v371_v4  ;;  %v405_v23 = vmul.f32 %v289_v37, %v822_v61  ;;  %v206_v32 = vmul.f32 %v177_v26, %v795_v40  ;;  %vm1096_vm9 = vmor %vm296_vm1, %vm297_vm4 }
 0x113   :  { %v199_v10 = vmul.f32 %v156_v5, %v795_v40  ;;  %v233_v11 = vmul.f32 0.5, %v232_v8  ;;  %v212_v17 = vmul.f32 %v195_v7, %v795_v40  ;;  %v413_v14 = vmul.f32 %v369_v34, %v819_v60 }
 0x114   :  { %v294_v56 = vsub.f32 1.5, %v293_v31  ;;  %v373_v28 = vmul.f32 0.5, %v372_v54  ;;  %vm376_vm5 = vweird.f32 %v962_v6  ;;  %vm346_vm6 = vweird.f32 %v991_v39 }
 0x115   :  { %v1065_v22 = vpop.eup %632  ;;  %v1068_v12 = vadd.f32 1e-05, %v199_v10  ;;  %v234_v47 = vsub.f32 1.5, %v233_v11  ;;  %v1077_v29 = vmul.f32 %v389_v9, %v816_v59  ;;  %vm237_vm7 = vweird.f32 %v1010_v46 }
 0x116   :  { %v341_v25 = vmul.f32 %v1065_v22, %v991_v39  ;;  %v1081_v61 = vadd.f32 1e-05, %v212_v17  ;;  %v1083_v33 = vpop.eup %634  ;;  %v1086_v60 = vmul.f32 %v993_v41, %v294_v56  ;;  %v374_v42 = vsub.f32 1.5, %v373_v28  ;;  %vm1127_vm14 = vmor %vm236_vm3, %vm237_vm7 }
 0x117   :  { %638 = vrsqrt.f32 %v1068_v12  ;;  %vm377_vm8 = vweird.f32 %v1021_v52  ;;  %v1090_v19 = vpop.eup %636  ;;  %v301_v45 = vmul.f32 %v1083_v33, %v1008_v20  ;;  %vm306_vm10 = vweird.f32 %v1008_v20 }
 0x118   :  { %v342_v43 = vmul.f32 %v1065_v22, %v341_v25  ;;  %v1103_v48 = vadd.f32 1e-05, %v206_v32  ;;  %v426_v55 = vmul.f32 %v982_v27, %v405_v23  ;;  %v235_v57 = vmul.f32 %v1010_v46, %v234_v47  ;;  %vm1143_vm1 = vmor %vm376_vm5, %vm377_vm8 }
 0x119   :  { %v153_v18 = vpop.xlane.xlu0 %152  ;;  %v241_v58 = vmul.f32 %v1090_v19, %v1019_v49  ;;  %vm246_vm11 = vweird.f32 %v1019_v49  ;;  %vm347_vm12 = vweird.f32 %v1065_v22  ;;  %v302_v24 = vmul.f32 %v1083_v33, %v301_v45 }
 0x11a   :  { %v343_v13 = vmul.f32 0.5, %v342_v43  ;;  %640 = vrsqrt.f32 %v1081_v61  ;;  %v434_v26 = vmul.f32 %v982_v27, %v413_v14  ;;  %v299_v63 = vsel %vm1096_vm9, %v993_v41, %v1086_v60  ;;  %v171_v8 = vpop.xlane.xlu2 %170  ;;  %vm1164_vm3 = vmor %vm346_vm6, %vm347_vm12 }
 0x11b   :  { %v375_v34 = vmul.f32 %v1021_v52, %v374_v42  ;;  %vm307_vm13 = vweird.f32 %v1083_v33  ;;  %v242_v4 = vmul.f32 %v1090_v19, %v241_v58  ;;  %v303_v31 = vmul.f32 0.5, %v302_v24 }
 0x11c   :  { %v344_v37 = vsub.f32 1.5, %v343_v13  ;;  %642 = vrsqrt.f32 %v1103_v48  ;;  %v447_v41 = vadd.f32 %v1002_v44, %v426_v55  ;;  %v239_v54 = vsel %vm1127_vm14, %v1010_v46, %v235_v57  ;;  %vm1176_vm4 = vmor %vm306_vm10, %vm307_vm13 }
 0x11d   :  { %v1121_v5 = vpop.eup %638  ;;  %v243_v10 = vmul.f32 0.5, %v242_v4  ;;  %vm247_vm15 = vweird.f32 %v1090_v19  ;;  %v304_v56 = vsub.f32 1.5, %v303_v31  ;;  %v454_v46 = vadd.f32 %v1002_v44, %v1049_v0 }
 0x11e   :  { %v261_v3 = vmul.f32 %v1121_v5, %v1068_v12  ;;  %v461_v11 = vpack.c.bf16 %v447_v41, %v1046_v30  ;;  %v455_v17 = vadd.f32 %v1002_v44, %v434_v26  ;;  %v379_v23 = vsel %vm1143_vm1, %v1021_v52, %v375_v34  ;;  %vm248_vm5 = vmor %vm246_vm11, %vm247_vm15 }
 0x11f   :  { %v244_v28 = vsub.f32 1.5, %v243_v10  ;;  %vm266_vm2 = vweird.f32 %v1068_v12  ;;  %v204_v6 = vmul.f32 %v171_v8, %v795_v40  ;;  %v345_v30 = vmul.f32 %v1065_v22, %v344_v37 }
 0x120   :  { %v262_v32 = vmul.f32 %v1121_v5, %v261_v3  ;;  %v1157_v47 = vpop.eup %640  ;;  %v305_v52 = vmul.f32 %v1083_v33, %v304_v56  ;;  %596 = vmatmul.msk.bf16.vlgmr.msra.gmra.mxu1 %vm35_vm0, %v461_v11  ;;  %v465_v25 = vpack.c.bf16 %v455_v17, %v454_v46  ;;  %v198_v60 = vmul.f32 %v153_v18, %v795_v40 }
 0x121   :  { %v174_v14 = vpop.xlane.xlu0 %173  ;;  %v400_v42 = vmul.f32 %v239_v54, %v845_v16  ;;  %v245_v39 = vmul.f32 %v1090_v19, %v244_v28  ;;  %v391_v45 = vmul.f32 %v1157_v47, %v1081_v61  ;;  %v1191_v16 = vadd.f32 1e-05, %v204_v6 }
 0x122   :  { %v263_v59 = vmul.f32 0.5, %v262_v32  ;;  %v643_v55 = vpop.eup %642  ;;  %v309_v18 = vsel %vm1176_vm4, %v1083_v33, %v305_v52  ;;  %600 = vmatmul.msk.bf16.vlgmr.msra.gmra.mxu3 %vm35_vm0, %v465_v25  ;;  %v1193_v20 = vadd.f32 1e-05, %v198_v60  ;;  %v205_v57 = vmul.f32 %v174_v14, %v795_v40 }
 0x123   :  { %v406_v13 = vmul.f32 %v299_v63, %v842_v15  ;;  %v414_v58 = vmul.f32 %v379_v23, %v825_v62  ;;  %v249_v24 = vsel %vm248_vm5, %v1090_v19, %v245_v39  ;;  %v392_v33 = vmul.f32 %v1157_v47, %v391_v45 }
 0x124   :  { %v349_v49 = vsel %vm1164_vm3, %v1065_v22, %v345_v30  ;;  %v401_v26 = vmul.f32 %v249_v24, %v850_v21  ;;  %v331_v34 = vmul.f32 %v643_v55, %v1103_v48  ;;  %644 = vrsqrt.f32 %v1191_v16 }
 0x125   :  { %v407_v40 = vmul.f32 %v309_v18, %v866_v36  ;;  %v264_v4 = vsub.f32 1.5, %v263_v59  ;;  %v393_v15 = vmul.f32 0.5, %v392_v33  ;;  %646 = vrsqrt.f32 %v1193_v20 }
 0x126   :  { %vm396_vm6 = vweird.f32 %v1081_v61  ;;  %v332_v62 = vmul.f32 %v643_v55, %v331_v34  ;;  %v1209_v19 = vadd.f32 1e-05, %v205_v57  ;;  %v421_v63 = vmul.f32 %v982_v27, %v400_v42 }
 0x127   :  { %vm267_vm7 = vweird.f32 %v1121_v5  ;;  %v394_v21 = vsub.f32 1.5, %v393_v15  ;;  %vm336_vm8 = vweird.f32 %v1103_v48  ;;  %v422_v22 = vmul.f32 %v982_v27, %v401_v26 }
 0x128   :  { %v411_v36 = vmul.f32 %v349_v49, %v863_v35  ;;  %v333_v7 = vmul.f32 0.5, %v332_v62  ;;  %648 = vrsqrt.f32 %v1209_v19  ;;  %v427_v37 = vmul.f32 %v982_v27, %v406_v13  ;;  %vm1224_vm9 = vmor %vm266_vm2, %vm267_vm7 }
 0x129   :  { %v265_v31 = vmul.f32 %v1121_v5, %v264_v4  ;;  %v442_v41 = vadd.f32 %v1002_v44, %v421_v63  ;;  %v443_v8 = vadd.f32 %v1002_v44, %v422_v22  ;;  %v428_v54 = vmul.f32 %v982_v27, %v407_v40 }
 0x12a   :  { %v645_v10 = vpop.eup %644  ;;  %v334_v35 = vsub.f32 1.5, %v333_v7  ;;  %vm337_vm10 = vweird.f32 %v643_v55  ;;  %v435_v9 = vmul.f32 %v982_v27, %v414_v58  ;;  %v436_v56 = vmul.f32 %v982_v27, %v1077_v29 }
 0x12b   :  { %v647_v11 = vpop.eup %646  ;;  %v395_v46 = vmul.f32 %v1157_v47, %v394_v21  ;;  %vm397_vm11 = vweird.f32 %v1157_v47  ;;  %v311_v17 = vmul.f32 %v645_v10, %v1191_v16  ;;  %v459_v23 = vpack.c.bf16 %v443_v8, %v442_v41  ;;  %vm338_vm12 = vmor %vm336_vm8, %vm337_vm10 }
 0x12c   :  { %v335_v12 = vmul.f32 %v643_v55, %v334_v35  ;;  %v251_v28 = vmul.f32 %v647_v11, %v1193_v20  ;;  %v448_v32 = vadd.f32 %v1002_v44, %v427_v37  ;;  %v449_v6 = vadd.f32 %v1002_v44, %v428_v54  ;;  %vm1249_vm13 = vmor %vm396_vm6, %vm397_vm11 }
 0x12d   :  { %v269_v14 = vsel %vm1224_vm9, %v1121_v5, %v265_v31  ;;  %v312_v29 = vmul.f32 %v645_v10, %v311_v17  ;;  %594 = vmatmul.msk.bf16.vlgmr.msra.gmra.mxu0 %vm35_vm0, %v459_v23  ;;  %v456_v30 = vadd.f32 %v1002_v44, %v435_v9  ;;  %v457_v42 = vadd.f32 %v1002_v44, %v436_v56 }
 0x12e   :  { %v649_v0 = vpop.eup %648  ;;  %v339_v52 = vsel %vm338_vm12, %v643_v55, %v335_v12  ;;  %v252_v25 = vmul.f32 %v647_v11, %v251_v28  ;;  %v462_v60 = vpack.c.bf16 %v449_v6, %v448_v32  ;;  %v432_v59 = vmul.f32 %v982_v27, %v411_v36 }
 0x12f   :  { %v410_v48 = vmul.f32 %v339_v52, %v871_v38  ;;  %v313_v43 = vmul.f32 0.5, %v312_v29  ;;  %v321_v39 = vmul.f32 %v649_v0, %v1209_v19  ;;  %v399_v45 = vsel %vm1249_vm13, %v1157_v47, %v395_v46 }
 0x130   :  { %vm316_vm14 = vweird.f32 %v1191_v16  ;;  %v253_v55 = vmul.f32 0.5, %v252_v25  ;;  %597 = vmatmul.msk.bf16.gmra.mxu1 %vm35_vm0, %v462_v60  ;;  %v466_v61 = vpack.c.bf16 %v457_v42, %v456_v30  ;;  %vm317_vm15 = vweird.f32 %v645_v10 }
 0x131   :  { %v314_v18 = vsub.f32 1.5, %v313_v43  ;;  %v322_v57 = vmul.f32 %v649_v0, %v321_v39  ;;  %v431_v38 = vmul.f32 %v982_v27, %v410_v48  ;;  %v403_v13 = vmul.f32 %v269_v14, %v884_v50  ;;  %vm318_vm2 = vmor %vm316_vm14, %vm317_vm15 }
 0x132   :  { %v254_v58 = vsub.f32 1.5, %v253_v55  ;;  %vm257_vm1 = vweird.f32 %v647_v11  ;;  %601 = vmatmul.msk.bf16.gmra.mxu3 %vm35_vm0, %v466_v61  ;;  %v453_v49 = vadd.f32 %v1002_v44, %v432_v59  ;;  %vm256_vm3 = vweird.f32 %v1193_v20 }
 0x133   :  { %v315_v24 = vmul.f32 %v645_v10, %v314_v18  ;;  %v323_v33 = vmul.f32 0.5, %v322_v57  ;;  %v452_v47 = vadd.f32 %v1002_v44, %v431_v38  ;;  %v416_v34 = vmul.f32 %v399_v45, %v887_v51  ;;  %vm258_vm4 = vmor %vm256_vm3, %vm257_vm1 }
 0x134   :  { %v255_v26 = vmul.f32 %v647_v11, %v254_v58  ;;  %vm327_vm5 = vweird.f32 %v649_v0  ;;  %vm326_vm6 = vweird.f32 %v1209_v19  ;;  %v424_v16 = vmul.f32 %v982_v27, %v403_v13 }
 0x135   :  { %v319_v40 = vsel %vm318_vm2, %v645_v10, %v315_v24  ;;  %v324_v50 = vsub.f32 1.5, %v323_v33  ;;  %v464_v4 = vpack.c.bf16 %v453_v49, %v452_v47  ;;  %vm328_vm7 = vmor %vm326_vm6, %vm327_vm5  ;;  %v437_v51 = vmul.f32 %v982_v27, %v416_v34 }
 0x136   :  { %v408_v15 = vmul.f32 %v319_v40, %v904_v1  ;;  %v259_v62 = vsel %vm258_vm4, %v647_v11, %v255_v26  ;;  %vm564_vm8 = vcmask 785408  }
 0x137   :  { %v402_v63 = vmul.f32 %v259_v62, %v892_v53  ;;  %v325_v21 = vmul.f32 %v649_v0, %v324_v50  ;;  %599 = vmatmul.msk.bf16.vlgmr.msra.gmra.mxu2 %vm35_vm0, %v464_v4  ;;  %v445_v53 = vadd.f32 %v1002_v44, %v424_v16  ;;  %v458_v19 = vadd.f32 %v1002_v44, %v437_v51 }
 0x138   :  { %v429_v1 = vmul.f32 %v982_v27, %v408_v15 }
 0x139   :  { %v329_v20 = vsel %vm328_vm7, %v649_v0, %v325_v21  ;;  %v423_v22 = vmul.f32 %v982_v27, %v402_v63  ;;  %v467_v54 = vpack.c.bf16 %v458_v19, %v458_v19 }
 0x13a   :  { %v409_v36 = vmul.f32 %v329_v20, %v907_v2  ;;  %v450_v41 = vadd.f32 %v1002_v44, %v429_v1 }
 0x13b   :  { %v444_v7 = vadd.f32 %v1002_v44, %v423_v22 }
 0x13c   :  { %v430_v37 = vmul.f32 %v982_v27, %v409_v36 }
 0x13d   :  { %v460_v31 = vpack.c.bf16 %v445_v53, %v444_v7 }
 0x13e   :  { %v451_v8 = vadd.f32 %v1002_v44, %v430_v37 }
 0x13f   :  { %595 = vmatmul.msk.bf16.gmra.mxu0 %vm35_vm0, %v460_v31 }
 0x140   :  { %v463_v10 = vpack.c.bf16 %v451_v8, %v450_v41 }
 0x142   :  { %602 = vmatmul.msk.bf16.gmra.mxu3 %vm35_vm0, %v467_v54  ;;  %598 = vmatmul.msk.bf16.gmra.mxu1 %vm35_vm0, %v463_v10 }
 0x19d   :  { %v530_v2 = vpop.f32.mrf.mxu1 }
 0x19e   :  { %569 = vst.msk [vmem:[%s1360_s4 + $0x20] sm:$0xff] %vm564_vm8, %v530_v2 }
 0x1a5   :  { %v550_v27 = vpop.f32.mrf.mxu3  ;;  %v532_v3 = vpop.f32.mrf.mxu1 }
 0x1a6   :  { %577 = vst.msk [vmem:[%s1360_s4 + $0x60] sm:$0xff] %vm564_vm8, %v550_v27 }
 0x1a7   :  { %570 = vst.msk [vmem:[%s1360_s4 + $0x28] sm:$0xff] %vm564_vm8, %v532_v3 }
 0x1aa   :  { %v520_v44 = vpop.f32.mrf.mxu0 }
 0x1ab   :  { %565 = vst.msk [vmem:[%s1360_s4] sm:$0xff] %vm564_vm8, %v520_v44 }
 0x1ad   :  { %v552_v35 = vpop.f32.mrf.mxu3  ;;  %v535_v9 = vpop.f32.mrf.mxu1 }
 0x1ae   :  { %578 = vst.msk [vmem:[%s1360_s4 + $0x68] sm:$0xff] %vm564_vm8, %v552_v35 }
 0x1af   :  { %571 = vst.msk [vmem:[%s1360_s4 + $0x30] sm:$0xff] %vm564_vm8, %v535_v9 }
 0x1b2   :  { %v522_v56 = vpop.f32.mrf.mxu0 }
 0x1b3   :  { %566 = vst.msk [vmem:[%s1360_s4 + $0x8] sm:$0xff] %vm564_vm8, %v522_v56 }
 0x1b5   :  { %v555_v11 = vpop.f32.mrf.mxu3  ;;  %v537_v46 = vpop.f32.mrf.mxu1 }
 0x1b6   :  { %579 = vst.msk [vmem:[%s1360_s4 + $0x70] sm:$0xff] %vm564_vm8, %v555_v11 }
 0x1b7   :  { %572 = vst.msk [vmem:[%s1360_s4 + $0x38] sm:$0xff] %vm564_vm8, %v537_v46 }
 0x1ba   :  { %v545_v17 = vpop.f32.mrf.mxu2 }
 0x1bb   :  { %575 = vst.msk [vmem:[%s1360_s4 + $0x50] sm:$0xff] %vm564_vm8, %v545_v17 }
 0x1bc   :  { %v525_v23 = vpop.f32.mrf.mxu0 }
 0x1bd   :  { %v557_v12 = vpop.f32.mrf.mxu3  ;;  %567 = vst.msk [vmem:[%s1360_s4 + $0x10] sm:$0xff] %vm564_vm8, %v525_v23 }
 0x1be   :  { %580 = vst.msk [vmem:[%s1360_s4 + $0x78] sm:$0xff] %vm564_vm8, %v557_v12 }
 0x1bf   :  { %v540_v28 = vpop.f32.mrf.mxu1 }
 0x1c0   :  { %573 = vst.msk [vmem:[%s1360_s4 + $0x40] sm:$0xff] %vm564_vm8, %v540_v28 }
 0x1c2   :  { %v547_v32 = vpop.f32.mrf.mxu2 }
 0x1c3   :  { %576 = vst.msk [vmem:[%s1360_s4 + $0x58] sm:$0xff] %vm564_vm8, %v547_v32 }
 0x1c4   :  { %v527_v6 = vpop.f32.mrf.mxu0 }
 0x1c5   :  { %v560_v14 = vpop.f32.mrf.mxu3  ;;  %568 = vst.msk [vmem:[%s1360_s4 + $0x18] sm:$0xff] %vm564_vm8, %v527_v6 }
 0x1c6   :  { %581 = vst.msk [vmem:[%s1360_s4 + $0x80] sm:$0xff] %vm564_vm8, %v560_v14 }
 0x1c7   :  { %v542_v29 = vpop.f32.mrf.mxu1 }
 0x1c8   :  { %574 = vst.msk [vmem:[%s1360_s4 + $0x48] sm:$0xff] %vm564_vm8, %v542_v29 }
 0x1cd   :  { %v562_v30 = vpop.f32.mrf.mxu3 }

// kernel: spatial_transformer.23
= control target key start
LH: loop header
LB: loop body
LE: loop exit
PB: predicated region body
PF: predicated region fallthrough
CT: control target
= control target key end

     0   :  { %s1191_s12 = smov 0   ;;  %s1193_s13 = smov 0   ;;  %s1439_s0 = inlined_call_operand.vmem [shape: f32[8,72,8], index: 0, kind: input, shape index: {}]   ;;  %s1440_s1 = inlined_call_operand.vmem [shape: f32[8,72,8], index: 1, kind: input, shape index: {}]   ;;  %s1441_s2 = inlined_call_operand.vmem [shape: f32[8,72,8], index: 2, kind: input, shape index: {}]   ;;  %s1442_s3 = inlined_call_operand.vmem [shape: f32[8,72,8], index: 3, kind: output, shape index: {}]  }
   0x1   :  { %s1195_s14 = smov 0  }
   0x2 LB: > { %s32_s15 = sadd.s32 1, %s1162_s13  ;;  %p1032_p0 = scmp.ge.s32.totalorder %s1166_s14, 1  ;;  %s1166_s14 = sphi %s1195_s14, %s13_s14   ;;  %s1162_s13 = sphi %s1193_s13, %s1444_s13   ;;  %s1158_s12 = sphi %s1191_s12, %s1443_s12  }
   0x3   : > { %p34_p1 = scmp.ge.s32.totalorder %s32_s15, 8  ;;  %p199_p2 = scmp.lt.s32.totalorder %s1166_s14, 9 }
   0x5   : > { %s1446_s15 = smov (%p34_p1, %s32_s15), 0  ;;  %p200_p3 = pnand %p1032_p0, %p199_p2 }
   0x6   : > { %p250_p4 = scmp.lt.s32.totalorder (!%p200_p3), %s1158_s12, 7 }
   0x7   : > { %203 = sbr.rel (%p200_p3) target bundleno = 755 (0x2f3), region = 32 }
   0xc   : > { %s1448_s12 = smov (!%p250_p4, %s1158_s12), 7  ;;  %vm313_vm0 = vcmask 64512   ;;  %v439_v42 = vlaneseq  ;;  %vm462_vm2 = vcmask 588800   ;;  %vm294_vm3 = vcmask 7168  }
   0xd   : > { %s1209_s16 = smul.u32 72, %s1448_s12  ;;  %v1168_v61 = vmov -inf   ;;  %vm745_vm4 = vcmask 1043456  }
   0xe   : > { %v440_v44 = vand.u32 127, %v439_v42  ;;  %299 = vst.msk [vmem:[#allocation2 + $0x20] sm:$0xff] %vm294_vm3, %v1168_v61 }
   0xf   : > { %s267_s19 = scalar_lea.vmem %s1440_s1, %s1209_s16  ;;  %s257_s22 = scalar_lea.vmem %s1439_s0, %s1209_s16  ;;  %295 = vst.msk [vmem:[#allocation2] sm:$0xff] %vm294_vm3, %v1168_v61 }
  0x10   : > { %v354_v0 = vld [vmem:[%s267_s19 + $0x40] sm:$0xff]  ;;  %v352_v2 = vld [vmem:[%s267_s19 + $0x30] sm:$0xff]  ;;  %v353_v3 = vld [vmem:[%s267_s19 + $0x38] sm:$0xff]  ;;  %vm443_vm1 = vcmp.lt.s32.totalorder %v440_v44, 68  ;;  %296 = vst.msk [vmem:[#allocation2 + $0x8] sm:$0xff] %vm294_vm3, %v1168_v61  ;;  %s277_s25 = scalar_lea.vmem %s1441_s2, %s1209_s16  ;;  %s1410_s28 = scalar_lea.vmem %s1442_s3, %s1209_s16 }
  0x11   : > { %v359_v1 = vpack.c.bf16 %v354_v0, %v354_v0  ;;  %v358_v5 = vpack.c.bf16 %v353_v3, %v352_v2  ;;  %v350_v7 = vld [vmem:[%s267_s19 + $0x20] sm:$0xff]  ;;  %v351_v8 = vld [vmem:[%s267_s19 + $0x28] sm:$0xff]  ;;  %v348_v11 = vld [vmem:[%s267_s19 + $0x10] sm:$0xff]  ;;  %297 = vst.msk [vmem:[#allocation2 + $0x10] sm:$0xff] %vm294_vm3, %v1168_v61 }
  0x12   : > { %v357_v9 = vpack.c.bf16 %v351_v8, %v350_v7  ;;  %v349_v12 = vld [vmem:[%s267_s19 + $0x18] sm:$0xff]  ;;  %v346_v15 = vld [vmem:[%s267_s19] sm:$0xff]  ;;  %v347_v16 = vld [vmem:[%s267_s19 + $0x8] sm:$0xff]  ;;  %298 = vst.msk [vmem:[#allocation2 + $0x18] sm:$0xff] %vm294_vm3, %v1168_v61 }
  0x13   : > { %v403_v4 = vsel %vm313_vm0, %v359_v1, 0  ;;  %v400_v6 = vsel %vm313_vm0, %v358_v5, 0  ;;  %v356_v13 = vpack.c.bf16 %v349_v12, %v348_v11  ;;  %v355_v17 = vpack.c.bf16 %v347_v16, %v346_v15  ;;  %v323_v18 = vld [vmem:[%s257_s22] sm:$0xff]  ;;  %v324_v19 = vld [vmem:[%s257_s22 + $0x8] sm:$0xff]  ;;  %v325_v29 = vld [vmem:[%s257_s22 + $0x10] sm:$0xff]  ;;  %300 = vst.msk [vmem:[#allocation2 + $0x28] sm:$0xff] %vm294_vm3, %v1168_v61 }
  0x14   : > { %408 = vmatpush.bf16.xpose.msra.mxu0 %v403_v4  ;;  %1049 = vmatpush.bf16.xpose.msra.mxu2 %v403_v4  ;;  %v397_v10 = vsel %vm313_vm0, %v357_v9, 0  ;;  %v327_v20 = vld [vmem:[%s257_s22 + $0x20] sm:$0xff]  ;;  %v328_v21 = vld [vmem:[%s257_s22 + $0x28] sm:$0xff]  ;;  %v332_v23 = vmul.f32 0.35355338, %v323_v18  ;;  %v326_v30 = vld [vmem:[%s257_s22 + $0x18] sm:$0xff] }
  0x15   : > { %v394_v14 = vsel %vm313_vm0, %v356_v13, 0  ;;  %v391_v22 = vsel %vm313_vm0, %v355_v17, 0  ;;  %v333_v24 = vmul.f32 0.35355338, %v324_v19  ;;  %v336_v25 = vmul.f32 0.35355338, %v327_v20 }
  0x16   : > { %v337_v26 = vmul.f32 0.35355338, %v328_v21  ;;  %v329_v31 = vld [vmem:[%s257_s22 + $0x30] sm:$0xff]  ;;  %v330_v32 = vld [vmem:[%s257_s22 + $0x38] sm:$0xff]  ;;  %v334_v33 = vmul.f32 0.35355338, %v325_v29 }
  0x17   : > { %v341_v27 = vpack.c.bf16 %v333_v24, %v332_v23  ;;  %v335_v34 = vmul.f32 0.35355338, %v326_v30  ;;  %v338_v35 = vmul.f32 0.35355338, %v329_v31  ;;  %v339_v36 = vmul.f32 0.35355338, %v330_v32 }
  0x18   : > { %v343_v28 = vpack.c.bf16 %v337_v26, %v336_v25  ;;  %v331_v39 = vld [vmem:[%s257_s22 + $0x40] sm:$0xff]  ;;  %301 = vst.msk [vmem:[#allocation2 + $0x30] sm:$0xff] %vm294_vm3, %v1168_v61  ;;  %v1169_v9 = vmov 0   ;;  %v455_v16 = vld [vmem:[#allocation2 + $0x10] sm:$0xff] }
  0x19   : > { %v342_v37 = vpack.c.bf16 %v335_v34, %v334_v33  ;;  %v344_v38 = vpack.c.bf16 %v339_v36, %v338_v35  ;;  %v340_v40 = vmul.f32 0.35355338, %v331_v39  ;;  %302 = vst.msk [vmem:[#allocation2 + $0x38] sm:$0xff] %vm294_vm3, %v1168_v61  ;;  %1089 = vset.pattern.permute.xlu2 %v1169_v9  ;;  %1087 = vset.pattern.permute.xlu0 %v1169_v9  ;;  %v457_v11 = vld [vmem:[#allocation2 + $0x20] sm:$0xff]  ;;  %v454_v34 = vld [vmem:[#allocation2 + $0x8] sm:$0xff] }
  0x1a   : > { %303 = vst.msk [vmem:[#allocation2 + $0x40] sm:$0xff] %vm294_vm3, %v1168_v61  ;;  %1088 = vset.pattern.permute.xlu1 %v1169_v9  ;;  %v453_v29 = vld [vmem:[#allocation2] sm:$0xff] }
  0x1b   : > { %v345_v41 = vpack.c.bf16 %v340_v40, %v340_v40 }
  0x1c   : > { %409 = vmatpush.bf16.xpose.msra.mxu0 %v400_v6  ;;  %1050 = vmatpush.bf16.xpose.msra.mxu2 %v400_v6 }
  0x1f   : > { %v459_v20 = vld [vmem:[#allocation2 + $0x30] sm:$0xff] }
  0x20   : > { %v460_v26 = vld [vmem:[#allocation2 + $0x38] sm:$0xff] }
  0x21   : > { %v461_v42 = vld [vmem:[#allocation2 + $0x40] sm:$0xff] }
  0x24   : > { %410 = vmatpush.bf16.xpose.msra.mxu0 %v397_v10  ;;  %1051 = vmatpush.bf16.xpose.msra.mxu2 %v397_v10  ;;  %v1170_v10 = vmov 0.0  }
  0x25   : > { %315 = vst.msk [vmem:[#allocation4 + $0x8] sm:$0xff] %vm313_vm0, %v1170_v10 }
  0x26   : > { %304 = vst.msk [vmem:[#allocation3] sm:$0xff] %vm294_vm3, %v1170_v10 }
  0x27   : > { %305 = vst.msk [vmem:[#allocation3 + $0x8] sm:$0xff] %vm294_vm3, %v1170_v10 }
  0x28   : > { %306 = vst.msk [vmem:[#allocation3 + $0x10] sm:$0xff] %vm294_vm3, %v1170_v10 }
  0x29   : > { %307 = vst.msk [vmem:[#allocation3 + $0x18] sm:$0xff] %vm294_vm3, %v1170_v10 }
  0x2a   : > { %308 = vst.msk [vmem:[#allocation3 + $0x20] sm:$0xff] %vm294_vm3, %v1170_v10 }
  0x2b   : > { %309 = vst.msk [vmem:[#allocation3 + $0x28] sm:$0xff] %vm294_vm3, %v1170_v10 }
  0x2c   : > { %411 = vmatpush.bf16.xpose.msra.mxu0 %v394_v14  ;;  %1052 = vmatpush.bf16.xpose.msra.mxu2 %v394_v14  ;;  %310 = vst.msk [vmem:[#allocation3 + $0x30] sm:$0xff] %vm294_vm3, %v1170_v10  ;;  %v458_v14 = vld [vmem:[#allocation2 + $0x28] sm:$0xff] }
  0x2d   : > { %311 = vst.msk [vmem:[#allocation3 + $0x38] sm:$0xff] %vm294_vm3, %v1170_v10 }
  0x2e   : > { %312 = vst.msk [vmem:[#allocation3 + $0x40] sm:$0xff] %vm294_vm3, %v1170_v10 }
  0x2f   : > { %314 = vst.msk [vmem:[#allocation4] sm:$0xff] %vm313_vm0, %v1170_v10 }
  0x30   : > { %316 = vst.msk [vmem:[#allocation4 + $0x10] sm:$0xff] %vm313_vm0, %v1170_v10 }
  0x31   : > { %317 = vst.msk [vmem:[#allocation4 + $0x18] sm:$0xff] %vm313_vm0, %v1170_v10 }
  0x32   : > { %318 = vst.msk [vmem:[#allocation4 + $0x20] sm:$0xff] %vm313_vm0, %v1170_v10 }
  0x33   : > { %319 = vst.msk [vmem:[#allocation4 + $0x28] sm:$0xff] %vm313_vm0, %v1170_v10 }
  0x34   : > { %412 = vmatpush.bf16.xpose.msra.mxu0 %v391_v22  ;;  %1053 = vmatpush.bf16.xpose.msra.mxu2 %v391_v22  ;;  %320 = vst.msk [vmem:[#allocation4 + $0x30] sm:$0xff] %vm313_vm0, %v1170_v10  ;;  %v456_v22 = vld [vmem:[#allocation2 + $0x18] sm:$0xff] }
  0x35   : > { %321 = vst.msk [vmem:[#allocation4 + $0x38] sm:$0xff] %vm313_vm0, %v1170_v10 }
  0x36   : > { %322 = vst.msk [vmem:[#allocation4 + $0x40] sm:$0xff] %vm313_vm0, %v1170_v10  ;;  %v368_v10 = vld [vmem:[%s277_s25 + $0x40] sm:$0xff] }
  0x3b   : > { %1037 = vmatmul.msk.bf16.vlgmr.msra.gmra.mxu0 %vm313_vm0, %v341_v27  ;;  %1039 = vmatmul.msk.bf16.vlgmr.msra.gmra.mxu2 %vm313_vm0, %v343_v28 }
  0x4b   : > { %1038 = vmatmul.msk.bf16.gmra.mxu0 %vm313_vm0, %v342_v37  ;;  %1040 = vmatmul.msk.bf16.gmra.mxu2 %vm313_vm0, %v344_v38 }
  0x5b   : > { %1041 = vmatmul.msk.bf16.gmra.mxu2 %vm313_vm0, %v345_v41 }
  0xb8   : > { %v414_v43 = vpop.f32.mrf.mxu0 }
  0xb9   : > { %v1269_v1 = vsel %vm443_vm1, %v414_v43, -inf }
  0xba   : > { %v463_v3 = vsel %vm462_vm2, %v1269_v1, -inf }
  0xbe   : > { %v424_v45 = vpop.f32.mrf.mxu2 }
  0xbf   : > { %v1230_v46 = vsel %vm443_vm1, %v424_v45, -inf }
  0xc0   : > { %v416_v47 = vpop.f32.mrf.mxu0  ;;  %v475_v48 = vsel %vm462_vm2, %v1230_v46, -inf }
  0xc1   : > { %476 = vmax.xlane.f32.xlu1 %v475_v48  ;;  %v1274_v4 = vsel %vm443_vm1, %v416_v47, -inf }
  0xc2   : > { %v466_v6 = vsel %vm462_vm2, %v1274_v4, -inf }
  0xc6   : > { %v426_v49 = vpop.f32.mrf.mxu2 }
  0xc7   : > { %v1235_v50 = vsel %vm443_vm1, %v426_v49, -inf }
  0xc8   : > { %v419_v51 = vpop.f32.mrf.mxu0  ;;  %v478_v52 = vsel %vm462_vm2, %v1235_v50, -inf }
  0xc9   : > { %v1240_v53 = vsel %vm443_vm1, %v419_v51, -inf  ;;  %479 = vmax.xlane.f32.xlu1 %v478_v52 }
  0xca   : > { %v469_v54 = vsel %vm462_vm2, %v1240_v53, -inf }
  0xcb   : > { %470 = vmax.xlane.f32.xlu0 %v469_v54 }
  0xce   : > { %v429_v55 = vpop.f32.mrf.mxu2 }
  0xcf   : > { %v1245_v56 = vsel %vm443_vm1, %v429_v55, -inf }
  0xd0   : > { %v421_v57 = vpop.f32.mrf.mxu0  ;;  %v481_v58 = vsel %vm462_vm2, %v1245_v56, -inf }
  0xd1   : > { %v1250_v59 = vsel %vm443_vm1, %v421_v57, -inf  ;;  %482 = vmax.xlane.f32.xlu2 %v481_v58 }
  0xd2   : > { %v472_v60 = vsel %vm462_vm2, %v1250_v59, -inf }
  0xd3   : > { %473 = vmax.xlane.f32.xlu0 %v472_v60 }
  0xd6   : > { %v431_v62 = vpop.f32.mrf.mxu2 }
  0xd7   : > { %v1260_v63 = vsel %vm443_vm1, %v431_v62, -inf }
  0xd8   : > { %v484_v0 = vsel %vm462_vm2, %v1260_v63, -inf }
  0xd9   : > { %485 = vmax.xlane.f32.xlu2 %v484_v0 }
  0xde   : > { %v434_v2 = vpop.f32.mrf.mxu2 }
  0xdf   : > { %v1279_v7 = vsel %vm443_vm1, %v434_v2, -inf }
  0xe0   : > { %v487_v8 = vsel %vm462_vm2, %v1279_v7, -inf }
  0xe1   : > { %464 = vmax.xlane.f32.xlu2 %v463_v3 }
  0xe6   : > { %v436_v5 = vpop.f32.mrf.mxu2 }
  0xe9   : > { %467 = vmax.xlane.f32.xlu2 %v466_v6 }
  0xf1   : > { %488 = vmax.xlane.f32.xlu2 %v487_v8 }
 0x134   : > { %v477_v12 = vpop.xlane.xlu1 %476 }
 0x135   : > { %v494_v13 = vmax.f32 %v457_v11, %v477_v12  ;;  %v373_v12 = vpack.c.bf16 %v368_v10, %v368_v10 }
 0x137   : > { %804 = vst.msk [vmem:[#allocation2 + $0x20] sm:$0xff] %vm294_vm3, %v494_v13  ;;  %548 = vperm.xlu2 %1089, %v494_v13   ;;  %v503_v39 = vsub.f32 %v457_v11, %v494_v13  ;;  %v747_v13 = vsel %vm745_vm4, %v373_v12, 0 }
 0x138   : > { %1054 = vmatpush.bf16.msra.mxu3 %v747_v13  ;;  %752 = vmatpush.bf16.msra.mxu1 %v747_v13 }
 0x139   : > { %v516_v43 = vmul.f32 1.442695, %v503_v39 }
 0x13c   : > { %v480_v15 = vpop.xlane.xlu1 %479 }
 0x13d   : > { %v495_v17 = vmax.f32 %v458_v14, %v480_v15  ;;  %v366_v15 = vld [vmem:[%s277_s25 + $0x30] sm:$0xff] }
 0x13e   : > { %v471_v18 = vpop.xlane.xlu0 %470 }
 0x13f   : > { %805 = vst.msk [vmem:[#allocation2 + $0x28] sm:$0xff] %vm294_vm3, %v495_v17  ;;  %v492_v19 = vmax.f32 %v455_v16, %v471_v18  ;;  %v504_v51 = vsub.f32 %v458_v14, %v495_v17 }
 0x141   : > { %802 = vst.msk [vmem:[#allocation2 + $0x10] sm:$0xff] %vm294_vm3, %v492_v19  ;;  %538 = vperm.xlu0 %1087, %v492_v19   ;;  %v501_v32 = vsub.f32 %v455_v16, %v492_v19  ;;  %v518_v57 = vmul.f32 1.442695, %v504_v51  ;;  %v367_v16 = vld [vmem:[%s277_s25 + $0x38] sm:$0xff]  ;;  %v364_v19 = vld [vmem:[%s277_s25 + $0x20] sm:$0xff] }
 0x143   : > { %v512_v35 = vmul.f32 1.442695, %v501_v32 }
 0x144   : > { %v483_v21 = vpop.xlane.xlu2 %482 }
 0x145   : > { %v496_v23 = vmax.f32 %v459_v20, %v483_v21  ;;  %1090 = vpow2.f32 %v512_v35 }
 0x146   : > { %v474_v24 = vpop.xlane.xlu0 %473 }
 0x147   : > { %806 = vst.msk [vmem:[#allocation2 + $0x30] sm:$0xff] %vm294_vm3, %v496_v23  ;;  %v493_v25 = vmax.f32 %v456_v22, %v474_v24  ;;  %v505_v55 = vsub.f32 %v459_v20, %v496_v23  ;;  %v365_v20 = vld [vmem:[%s277_s25 + $0x28] sm:$0xff] }
 0x148   : > { %v371_v21 = vpack.c.bf16 %v365_v20, %v364_v19 }
 0x149   : > { %803 = vst.msk [vmem:[#allocation2 + $0x18] sm:$0xff] %vm294_vm3, %v493_v25  ;;  %543 = vperm.xlu1 %1088, %v493_v25   ;;  %v502_v41 = vsub.f32 %v456_v22, %v493_v25  ;;  %v520_v62 = vmul.f32 1.442695, %v505_v55  ;;  %v362_v22 = vld [vmem:[%s277_s25 + $0x10] sm:$0xff]  ;;  %v360_v25 = vld [vmem:[%s277_s25] sm:$0xff] }
 0x14b   : > { %v1309_v48 = vpop.eup %1090  ;;  %v514_v49 = vmul.f32 1.442695, %v502_v41 }
 0x14c   : > { %v486_v27 = vpop.xlane.xlu2 %485 }
 0x14d   : > { %v497_v28 = vmax.f32 %v460_v26, %v486_v27 }
 0x14f   : > { %807 = vst.msk [vmem:[#allocation2 + $0x38] sm:$0xff] %vm294_vm3, %v497_v28  ;;  %563 = vperm.xlu0 %1087, %v497_v28   ;;  %v506_v54 = vsub.f32 %v460_v26, %v497_v28  ;;  %v361_v26 = vld [vmem:[%s277_s25 + $0x8] sm:$0xff] }
 0x150   : > { %v369_v27 = vpack.c.bf16 %v361_v26, %v360_v25 }
 0x151   : > { %553 = vperm.xlu1 %1088, %v495_v17   ;;  %v522_v58 = vmul.f32 1.442695, %v506_v54  ;;  %v372_v17 = vpack.c.bf16 %v367_v16, %v366_v15 }
 0x153   : > { %1055 = vmatpush.bf16.msra.mxu3 %v372_v17  ;;  %753 = vmatpush.bf16.msra.mxu1 %v372_v17 }
 0x154   : > { %v465_v30 = vpop.xlane.xlu2 %464 }
 0x155   : > { %v490_v31 = vmax.f32 %v453_v29, %v465_v30 }
 0x157   : > { %800 = vst.msk [vmem:[#allocation2] sm:$0xff] %vm294_vm3, %v490_v31  ;;  %v499_v33 = vsub.f32 %v453_v29, %v490_v31  ;;  %1056 = vmatpush.bf16.msra.mxu3 %v371_v21  ;;  %754 = vmatpush.bf16.msra.mxu1 %v371_v21 }
 0x159   : > { %558 = vperm.xlu1 %1088, %v496_v23   ;;  %v508_v38 = vmul.f32 1.442695, %v499_v33  ;;  %v363_v23 = vld [vmem:[%s277_s25 + $0x18] sm:$0xff] }
 0x15a   : > { %v370_v24 = vpack.c.bf16 %v363_v23, %v362_v22  ;;  %v602_v23 = vld [vmem:[#allocation3 + $0x20] sm:$0xff] }
 0x15b   : > { %1092 = vpow2.f32 %v508_v38 }
 0x15c   : > { %v468_v36 = vpop.xlane.xlu2 %467  ;;  %1094 = vpow2.f32 %v516_v43  ;;  %1057 = vmatpush.bf16.msra.mxu3 %v370_v24  ;;  %755 = vmatpush.bf16.msra.mxu1 %v370_v24 }
 0x15d   : > { %v491_v37 = vmax.f32 %v454_v34, %v468_v36 }
 0x15f   : > { %801 = vst.msk [vmem:[#allocation2 + $0x8] sm:$0xff] %vm294_vm3, %v491_v37  ;;  %533 = vperm.xlu0 %1087, %v491_v37   ;;  %v500_v40 = vsub.f32 %v454_v34, %v491_v37 }
 0x160   : > { %1058 = vmatpush.bf16.msra.mxu3 %v369_v27  ;;  %756 = vmatpush.bf16.msra.mxu1 %v369_v27 }
 0x161   : > { %528 = vperm.xlu1 %1088, %v490_v31   ;;  %v510_v44 = vmul.f32 1.442695, %v500_v40  ;;  %v1313_v52 = vpop.eup %1092 }
 0x162   : > { %v1316_v60 = vpop.eup %1094 }
 0x163   : > { %1096 = vpow2.f32 %v510_v44  ;;  %v611_v24 = vmul.f32 %v1316_v60, %v602_v23 }
 0x164   : > { %v489_v45 = vpop.xlane.xlu2 %488  ;;  %1098 = vpow2.f32 %v514_v49 }
 0x165   : > { %v498_v47 = vmax.f32 %v461_v42, %v489_v45  ;;  %1100 = vpow2.f32 %v518_v57 }
 0x166   : > { %1102 = vpow2.f32 %v522_v58 }
 0x167   : > { %808 = vst.msk [vmem:[#allocation2 + $0x40] sm:$0xff] %vm294_vm3, %v498_v47  ;;  %568 = vperm.xlu2 %1089, %v498_v47   ;;  %683 = vperm.xlu0 %1087, %v1309_v48   ;;  %v507_v0 = vsub.f32 %v461_v42, %v498_v47  ;;  %1104 = vpow2.f32 %v520_v62 }
 0x169   : > { %673 = vperm.xlu1 %1088, %v1313_v52   ;;  %v1318_v61 = vpop.eup %1096  ;;  %v524_v3 = vmul.f32 1.442695, %v507_v0 }
 0x16a   : > { %v1322_v2 = vpop.eup %1098 }
 0x16b   : > { %v1325_v5 = vpop.eup %1100  ;;  %1106 = vpow2.f32 %v524_v3 }
 0x16c   : > { %v1327_v6 = vpop.eup %1102 }
 0x16d   : > { %v1331_v8 = vpop.eup %1104 }
 0x16f   : > { %678 = vperm.xlu2 %1089, %v1318_v61   ;;  %693 = vperm.xlu0 %1087, %v1316_v60  }
 0x171   : > { %688 = vperm.xlu1 %1088, %v1322_v2   ;;  %v1334_v9 = vpop.eup %1106 }
 0x177   : > { %698 = vperm.xlu2 %1089, %v1325_v5   ;;  %708 = vperm.xlu0 %1087, %v1327_v6  }
 0x179   : > { %703 = vperm.xlu1 %1088, %v1331_v8  }
 0x17f   : > { %713 = vperm.xlu2 %1089, %v1334_v9  }
 0x191   : > { %v549_v11 = vpop.permute.xlu2 %548 }
 0x192   : > { %v575_v14 = vsub.f32 %v1230_v46, %v549_v11 }
 0x194   : > { %v588_v18 = vmul.f32 1.442695, %v575_v14 }
 0x196   : > { %1108 = vpow2.f32 %v588_v18 }
 0x19c   : > { %v1109_v46 = vpop.eup %1108 }
 0x19d   : > { %v628_v28 = vsel %vm462_vm2, %v1109_v46, 0.0 }
 0x1a8   : > { %629 = vadd.xlane.f32.xlu2 %v628_v28  ;;  %v600_v28 = vld [vmem:[#allocation3 + $0x10] sm:$0xff] }
 0x1b3   : > { %v539_v29 = vpop.permute.xlu0 %538 }
 0x1b4   : > { %v573_v30 = vsub.f32 %v1240_v53, %v539_v29  ;;  %v609_v29 = vmul.f32 %v1309_v48, %v600_v28 }
 0x1b6   : > { %v584_v31 = vmul.f32 1.442695, %v573_v30 }
 0x1b8   : > { %1110 = vpow2.f32 %v584_v31 }
 0x1bb   : > { %v544_v32 = vpop.permute.xlu1 %543 }
 0x1bc   : > { %v574_v33 = vsub.f32 %v1250_v59, %v544_v32 }
 0x1be   : > { %v1111_v34 = vpop.eup %1110  ;;  %v586_v35 = vmul.f32 1.442695, %v574_v33 }
 0x1bf   : > { %v622_v36 = vsel %vm462_vm2, %v1111_v34, 0.0 }
 0x1c0   : > { %1112 = vpow2.f32 %v586_v35  ;;  %623 = vadd.xlane.f32.xlu2 %v622_v36 }
 0x1c1   : > { %v564_v37 = vpop.permute.xlu0 %563  ;;  %v569_v62 = vpop.permute.xlu2 %568 }
 0x1c2   : > { %v578_v38 = vsub.f32 %v1260_v63, %v564_v37  ;;  %v579_v10 = vsub.f32 %v1279_v7, %v569_v62  ;;  %v666_v62 = vld [vmem:[#allocation4 + $0x20] sm:$0xff] }
 0x1c3   : > { %v554_v39 = vpop.permute.xlu1 %553 }
 0x1c4   : > { %v594_v40 = vmul.f32 1.442695, %v578_v38  ;;  %v576_v42 = vsub.f32 %v1235_v50, %v554_v39  ;;  %v664_v39 = vld [vmem:[#allocation4 + $0x10] sm:$0xff] }
 0x1c6   : > { %v1113_v41 = vpop.eup %1112  ;;  %1114 = vpow2.f32 %v594_v40  ;;  %v590_v43 = vmul.f32 1.442695, %v576_v42 }
 0x1c7   : > { %v726_v53 = vpack.c.bf16 %v1113_v41, %v1111_v34  ;;  %v625_v18 = vsel %vm462_vm2, %v1113_v41, 0.0  ;;  %v605_v34 = vld [vmem:[#allocation3 + $0x38] sm:$0xff] }
 0x1c8   : > { %1116 = vpow2.f32 %v590_v43  ;;  %v614_v36 = vmul.f32 %v1327_v6, %v605_v34  ;;  %v599_v43 = vld [vmem:[#allocation3 + $0x8] sm:$0xff] }
 0x1c9   : > { %1043 = vmatmul.msk.bf16.vlgmr.msra.gmra.mxu3 %vm462_vm2, %v726_v53  ;;  %v1364_v20 = vpop.permute.xlu2 %678 }
 0x1cb   : > { %v559_v59 = vpop.permute.xlu1 %558 }
 0x1cc   : > { %v1115_v44 = vpop.eup %1114  ;;  %v577_v50 = vsub.f32 %v1245_v56, %v559_v59  ;;  %v596_v56 = vmul.f32 1.442695, %v579_v10  ;;  %v598_v59 = vld [vmem:[#allocation3] sm:$0xff] }
 0x1cd   : > { %v637_v45 = vsel %vm462_vm2, %v1115_v44, 0.0 }
 0x1ce   : > { %638 = vadd.xlane.f32.xlu2 %v637_v45  ;;  %v1117_v51 = vpop.eup %1116  ;;  %v592_v0 = vmul.f32 1.442695, %v577_v50  ;;  %v608_v45 = vmul.f32 %v1318_v61, %v599_v43 }
 0x1cf   : > { %v727_v58 = vpack.c.bf16 %v1117_v51, %v1109_v46  ;;  %v631_v14 = vsel %vm462_vm2, %v1117_v51, 0.0 }
 0x1d1   : > { %v534_v47 = vpop.permute.xlu0 %533  ;;  %v1366_v21 = vpop.permute.xlu2 %698 }
 0x1d2   : > { %v572_v49 = vsub.f32 %v1274_v4, %v534_v47 }
 0x1d3   : > { %v529_v63 = vpop.permute.xlu1 %528 }
 0x1d4   : > { %v582_v54 = vmul.f32 1.442695, %v572_v49  ;;  %v571_v55 = vsub.f32 %v1269_v1, %v529_v63  ;;  %v607_v49 = vmul.f32 %v1313_v52, %v598_v59 }
 0x1d6   : > { %1118 = vpow2.f32 %v582_v54  ;;  %v580_v57 = vmul.f32 1.442695, %v571_v55 }
 0x1d8   : > { %1120 = vpow2.f32 %v580_v57  ;;  %v603_v57 = vld [vmem:[#allocation3 + $0x28] sm:$0xff] }
 0x1d9   : > { %1044 = vmatmul.msk.bf16.gmra.mxu3 %vm462_vm2, %v727_v58  ;;  %1122 = vpow2.f32 %v592_v0  ;;  %v1368_v22 = vpop.permute.xlu2 %713  ;;  %v684_v32 = vpop.permute.xlu0 %683  ;;  %v604_v58 = vld [vmem:[#allocation3 + $0x30] sm:$0xff]  ;;  %v612_v61 = vmul.f32 %v1325_v5, %v603_v57 }
 0x1da   : > { %1124 = vpow2.f32 %v596_v56  ;;  %v718_v41 = vmul.f32 %v684_v32, %v664_v39  ;;  %v613_v52 = vmul.f32 %v1331_v8, %v604_v58  ;;  %v601_v8 = vld [vmem:[#allocation3 + $0x18] sm:$0xff] }
 0x1db   : > { %v674_v33 = vpop.permute.xlu1 %673 }
 0x1dc   : > { %v1119_v3 = vpop.eup %1118 }
 0x1dd   : > { %v619_v4 = vsel %vm462_vm2, %v1119_v3, 0.0 }
 0x1de   : > { %v1121_v11 = vpop.eup %1120  ;;  %620 = vadd.xlane.f32.xlu0 %v619_v4 }
 0x1df   : > { %v616_v1 = vsel %vm462_vm2, %v1121_v11, 0.0  ;;  %v725_v12 = vpack.c.bf16 %v1119_v3, %v1121_v11  ;;  %v1123_v13 = vpop.eup %1122  ;;  %v662_v3 = vld [vmem:[#allocation4] sm:$0xff] }
 0x1e0   : > { %617 = vadd.xlane.f32.xlu1 %v616_v1  ;;  %v634_v15 = vsel %vm462_vm2, %v1123_v13, 0.0  ;;  %v728_v7 = vpack.c.bf16 %v1115_v44, %v1123_v13  ;;  %v1125_v16 = vpop.eup %1124  ;;  %v665_v44 = vld [vmem:[#allocation4 + $0x18] sm:$0xff]  ;;  %v716_v13 = vmul.f32 %v674_v33, %v662_v3 }
 0x1e1   : > { %1042 = vmatmul.msk.bf16.vlgmr.msra.gmra.mxu1 %vm462_vm2, %v725_v12  ;;  %v640_v17 = vsel %vm462_vm2, %v1125_v16, 0.0  ;;  %v729_v19 = vpack.c.bf16 %v1125_v16, %v1125_v16  ;;  %v694_v35 = vpop.permute.xlu0 %693 }
 0x1e2   : > { %v720_v4 = vmul.f32 %v694_v35, %v666_v62 }
 0x1e3   : > { %v689_v60 = vpop.permute.xlu1 %688 }
 0x1e4   : > { %v719_v63 = vmul.f32 %v689_v60, %v665_v44 }
 0x1e6   : > { %632 = vadd.xlane.f32.xlu0 %v631_v14 }
 0x1e8   : > { %635 = vadd.xlane.f32.xlu1 %v634_v15  ;;  %v606_v15 = vld [vmem:[#allocation3 + $0x40] sm:$0xff] }
 0x1e9   : > { %1045 = vmatmul.msk.bf16.gmra.mxu3 %vm462_vm2, %v728_v7  ;;  %v1376_v40 = vpop.permute.xlu0 %708 }
 0x1eb   : > { %v1378_v48 = vpop.permute.xlu1 %703 }
 0x1ee   : > { %641 = vadd.xlane.f32.xlu0 %v640_v17  ;;  %v667_v17 = vld [vmem:[#allocation4 + $0x28] sm:$0xff] }
 0x1f0   : > { %626 = vadd.xlane.f32.xlu1 %v625_v18  ;;  %v615_v18 = vmul.f32 %v1334_v9, %v606_v15 }
 0x1f9   : > { %1046 = vmatmul.msk.bf16.gmra.mxu3 %vm462_vm2, %v729_v19 }
 0x21b   : > { %v630_v46 = vpop.xlane.xlu2 %629 }
 0x21c   : > { %v647_v25 = vadd.f32 %v630_v46, %v611_v24  ;;  %v663_v46 = vld [vmem:[#allocation4 + $0x8] sm:$0xff] }
 0x21d   : > { %v717_v32 = vmul.f32 %v1364_v20, %v663_v46 }
 0x21e   : > { %657 = vst.msk [vmem:[#allocation3 + $0x20] sm:$0xff] %vm294_vm3, %v647_v25 }
 0x225   : > { %v816_v26 = vld [vmem:[#allocation3 + $0x20] sm:$0xff] }
 0x226   : > { %1126 = vrcp.f32 %v816_v26  ;;  %v610_v26 = vmul.f32 %v1322_v2, %v601_v8 }
 0x22c   : > { %v1127_v27 = vpop.eup %1126 }
 0x22d   : > { %861 = vperm.xlu0 %1087, %v1127_v27   ;;  %v721_v27 = vmul.f32 %v1366_v21, %v667_v17  ;;  %v668_v21 = vld [vmem:[#allocation4 + $0x30] sm:$0xff] }
 0x233   : > { %v624_v30 = vpop.xlane.xlu2 %623 }
 0x234   : > { %v645_v31 = vadd.f32 %v624_v30, %v609_v29 }
 0x236   : > { %655 = vst.msk [vmem:[#allocation3 + $0x10] sm:$0xff] %vm294_vm3, %v645_v31 }
 0x23d   : > { %v814_v60 = vld [vmem:[#allocation3 + $0x10] sm:$0xff] }
 0x241   : > { %v639_v37 = vpop.xlane.xlu2 %638 }
 0x242   : > { %v650_v38 = vadd.f32 %v639_v37, %v614_v36  ;;  %v722_v37 = vmul.f32 %v1378_v48, %v668_v21 }
 0x244   : > { %660 = vst.msk [vmem:[#allocation3 + $0x38] sm:$0xff] %vm294_vm3, %v650_v38 }
 0x24b   : > { %v819_v19 = vld [vmem:[#allocation3 + $0x38] sm:$0xff] }
 0x24c   : > { %v763_v42 = vpop.f32.mrf.mxu3 }
 0x24d   : > { %v784_v53 = vadd.f32 %v763_v42, %v718_v41  ;;  %v669_v41 = vld [vmem:[#allocation4 + $0x38] sm:$0xff] }
 0x24e   : > { %v723_v43 = vmul.f32 %v1376_v40, %v669_v41 }
 0x24f   : > { %793 = vst.msk [vmem:[#allocation4 + $0x10] sm:$0xff] %vm313_vm0, %v784_v53 }
 0x251   : > { %v621_v6 = vpop.xlane.xlu0 %620 }
 0x252   : > { %v644_v47 = vadd.f32 %v621_v6, %v608_v45  ;;  %v670_v6 = vld [vmem:[#allocation4 + $0x40] sm:$0xff] }
 0x253   : > { %v618_v51 = vpop.xlane.xlu1 %617 }
 0x254   : > { %654 = vst.msk [vmem:[#allocation3 + $0x8] sm:$0xff] %vm294_vm3, %v644_v47  ;;  %v643_v54 = vadd.f32 %v618_v51, %v607_v49  ;;  %v765_v55 = vpop.f32.mrf.mxu3  ;;  %v724_v49 = vmul.f32 %v1368_v22, %v670_v6 }
 0x255   : > { %v785_v50 = vadd.f32 %v765_v55, %v719_v63 }
 0x256   : > { %653 = vst.msk [vmem:[#allocation3] sm:$0xff] %vm294_vm3, %v643_v54 }
 0x257   : > { %794 = vst.msk [vmem:[#allocation4 + $0x18] sm:$0xff] %vm313_vm0, %v785_v50 }
 0x259   : > { %v633_v0 = vpop.xlane.xlu0 %632 }
 0x25a   : > { %v648_v10 = vadd.f32 %v633_v0, %v612_v61  ;;  %v832_v61 = vld [vmem:[#allocation4 + $0x10] sm:$0xff] }
 0x25b   : > { %v636_v11 = vpop.xlane.xlu1 %635  ;;  %v813_v1 = vld [vmem:[#allocation3 + $0x8] sm:$0xff] }
 0x25c   : > { %658 = vst.msk [vmem:[#allocation3 + $0x28] sm:$0xff] %vm294_vm3, %v648_v10  ;;  %v649_v12 = vadd.f32 %v636_v11, %v613_v52  ;;  %v768_v56 = vpop.f32.mrf.mxu3  ;;  %1128 = vrcp.f32 %v813_v1 }
 0x25d   : > { %v786_v14 = vadd.f32 %v768_v56, %v720_v4  ;;  %v812_v7 = vld [vmem:[#allocation3] sm:$0xff] }
 0x25e   : > { %659 = vst.msk [vmem:[#allocation3 + $0x30] sm:$0xff] %vm294_vm3, %v649_v12  ;;  %v758_v5 = vpop.f32.mrf.mxu1  ;;  %1130 = vrcp.f32 %v812_v7  ;;  %v833_v8 = vld [vmem:[#allocation4 + $0x18] sm:$0xff] }
 0x25f   : > { %795 = vst.msk [vmem:[#allocation4 + $0x20] sm:$0xff] %vm313_vm0, %v786_v14  ;;  %v782_v16 = vadd.f32 %v758_v5, %v716_v13  ;;  %1132 = vrcp.f32 %v819_v19 }
 0x261   : > { %791 = vst.msk [vmem:[#allocation4] sm:$0xff] %vm313_vm0, %v782_v16  ;;  %v642_v23 = vpop.xlane.xlu0 %641 }
 0x262   : > { %v1129_v24 = vpop.eup %1128  ;;  %v651_v25 = vadd.f32 %v642_v23, %v615_v18 }
 0x263   : > { %v627_v28 = vpop.xlane.xlu1 %626  ;;  %846 = vperm.xlu0 %1087, %v1129_v24   ;;  %v817_v29 = vld [vmem:[#allocation3 + $0x28] sm:$0xff] }
 0x264   : > { %v1131_v30 = vpop.eup %1130  ;;  %661 = vst.msk [vmem:[#allocation3 + $0x40] sm:$0xff] %vm294_vm3, %v651_v25  ;;  %v646_v31 = vadd.f32 %v627_v28, %v610_v26  ;;  %v770_v9 = vpop.f32.mrf.mxu3  ;;  %1134 = vrcp.f32 %v817_v29 }
 0x265   : > { %v787_v33 = vadd.f32 %v770_v9, %v721_v27  ;;  %841 = vperm.xlu1 %1088, %v1131_v30   ;;  %v1133_v35 = vpop.eup %1132  ;;  %1136 = vrcp.f32 %v814_v60  ;;  %v818_v59 = vld [vmem:[#allocation3 + $0x30] sm:$0xff] }
 0x266   : > { %656 = vst.msk [vmem:[#allocation3 + $0x18] sm:$0xff] %vm294_vm3, %v646_v31  ;;  %v760_v34 = vpop.f32.mrf.mxu1  ;;  %v834_v55 = vld [vmem:[#allocation4 + $0x20] sm:$0xff] }
 0x267   : > { %796 = vst.msk [vmem:[#allocation4 + $0x28] sm:$0xff] %vm313_vm0, %v787_v33  ;;  %v783_v2 = vadd.f32 %v760_v34, %v717_v32 }
 0x268   : > { %v830_v13 = vld [vmem:[#allocation4] sm:$0xff] }
 0x269   : > { %792 = vst.msk [vmem:[#allocation4 + $0x8] sm:$0xff] %vm313_vm0, %v783_v2 }
 0x26a   : > { %v1135_v36 = vpop.eup %1134 }
 0x26b   : > { %876 = vperm.xlu0 %1087, %v1133_v35   ;;  %866 = vperm.xlu2 %1089, %v1135_v36   ;;  %v820_v42 = vld [vmem:[#allocation3 + $0x40] sm:$0xff]  ;;  %v1137_v53 = vpop.eup %1136 }
 0x26c   : > { %v773_v38 = vpop.f32.mrf.mxu3 }
 0x26d   : > { %v788_v20 = vadd.f32 %v773_v38, %v722_v37  ;;  %v815_v39 = vld [vmem:[#allocation3 + $0x18] sm:$0xff] }
 0x26e   : > { %1138 = vrcp.f32 %v815_v39  ;;  %v835_v22 = vld [vmem:[#allocation4 + $0x28] sm:$0xff] }
 0x26f   : > { %797 = vst.msk [vmem:[#allocation4 + $0x30] sm:$0xff] %vm313_vm0, %v788_v20  ;;  %1140 = vrcp.f32 %v820_v42 }
 0x270   : > { %1142 = vrcp.f32 %v818_v59  ;;  %v831_v4 = vld [vmem:[#allocation4 + $0x8] sm:$0xff] }
 0x273   : > { %851 = vperm.xlu2 %1089, %v1137_v53  }
 0x274   : > { %v1139_v44 = vpop.eup %1138  ;;  %v775_v45 = vpop.f32.mrf.mxu3 }
 0x275   : > { %v789_v48 = vadd.f32 %v775_v45, %v723_v43  ;;  %856 = vperm.xlu1 %1088, %v1139_v44   ;;  %v1141_v47 = vpop.eup %1140 }
 0x276   : > { %v1143_v63 = vpop.eup %1142  ;;  %v836_v19 = vld [vmem:[#allocation4 + $0x30] sm:$0xff] }
 0x277   : > { %798 = vst.msk [vmem:[#allocation4 + $0x38] sm:$0xff] %vm313_vm0, %v789_v48 }
 0x27b   : > { %881 = vperm.xlu2 %1089, %v1141_v47  }
 0x27c   : > { %v778_v51 = vpop.f32.mrf.mxu3 }
 0x27d   : > { %v790_v54 = vadd.f32 %v778_v51, %v724_v49  ;;  %871 = vperm.xlu1 %1088, %v1143_v63  }
 0x27e   : > { %v837_v15 = vld [vmem:[#allocation4 + $0x38] sm:$0xff] }
 0x27f   : > { %799 = vst.msk [vmem:[#allocation4 + $0x40] sm:$0xff] %vm313_vm0, %v790_v54 }
 0x284   : > { %v780_v40 = vpop.f32.mrf.mxu3 }
 0x286   : > { %v838_v10 = vld [vmem:[#allocation4 + $0x40] sm:$0xff] }
 0x29f   : > { %v862_v50 = vpop.permute.xlu0 %861 }
 0x2a0   : > { %v888_v57 = vmul.f32 %v862_v50, %v834_v55 }
 0x2a2   : > { %897 = vst.msk [vmem:[%s1410_s28 + $0x20] sm:$0xff] %vm313_vm0, %v888_v57 }
 0x2c5   : > { %v867_v58 = vpop.permute.xlu2 %866 }
 0x2c6   : > { %v889_v62 = vmul.f32 %v867_v58, %v835_v22 }
 0x2c8   : > { %898 = vst.msk [vmem:[%s1410_s28 + $0x28] sm:$0xff] %vm313_vm0, %v889_v62 }
 0x2cd   : > { %v852_v0 = vpop.permute.xlu2 %851 }
 0x2ce   : > { %v886_v3 = vmul.f32 %v852_v0, %v832_v61 }
 0x2d0   : > { %895 = vst.msk [vmem:[%s1410_s28 + $0x10] sm:$0xff] %vm313_vm0, %v886_v3 }
 0x2d5   : > { %v882_v52 = vpop.permute.xlu2 %881  ;;  %v847_v11 = vpop.permute.xlu0 %846 }
 0x2d6   : > { %v892_v1 = vmul.f32 %v882_v52, %v838_v10  ;;  %v885_v12 = vmul.f32 %v847_v11, %v831_v4 }
 0x2d7   : > { %v842_v56 = vpop.permute.xlu1 %841 }
 0x2d8   : > { %901 = vst.msk [vmem:[%s1410_s28 + $0x40] sm:$0xff] %vm313_vm0, %v892_v1  ;;  %v884_v14 = vmul.f32 %v842_v56, %v830_v13 }
 0x2d9   : > { %894 = vst.msk [vmem:[%s1410_s28 + $0x8] sm:$0xff] %vm313_vm0, %v885_v12 }
 0x2da   : > { %893 = vst.msk [vmem:[%s1410_s28] sm:$0xff] %vm313_vm0, %v884_v14 }
 0x2dd   : > { %v877_v7 = vpop.permute.xlu0 %876 }
 0x2de   : > { %v891_v5 = vmul.f32 %v877_v7, %v837_v15 }
 0x2e0   : > { %900 = vst.msk [vmem:[%s1410_s28 + $0x38] sm:$0xff] %vm313_vm0, %v891_v5 }
 0x2e7   : > { %v857_v16 = vpop.permute.xlu1 %856 }
 0x2e8   : > { %v887_v17 = vmul.f32 %v857_v16, %v833_v8 }
 0x2ea   : > { %896 = vst.msk [vmem:[%s1410_s28 + $0x18] sm:$0xff] %vm313_vm0, %v887_v17 }
 0x2ef   : > { %v872_v18 = vpop.permute.xlu1 %871 }
 0x2f0   : > { %v890_v23 = vmul.f32 %v872_v18, %v836_v19 }
 0x2f2   : > { %899 = vst.msk [vmem:[%s1410_s28 + $0x30] sm:$0xff] %vm313_vm0, %v890_v23 }
 0x2f3 PF: > { %s13_s14 = sadd.s32 1, %s1166_s14   ;;  %s1443_s12 = smov %s1162_s13 }
 0x2f4   : > { %p10_p5 = scmp.ge.s32.totalorder %s13_s14, 10   ;;  %s1444_s13 = smov %s1446_s15 }
 0x2f6   :  { %12 = sbr.rel (!%p10_p5) target bundleno = 2 (0x2), region = 76 }

// kernel: spatial_transformer.26
= control target key start
LH: loop header
LB: loop body
LE: loop exit
PB: predicated region body
PF: predicated region fallthrough
CT: control target
= control target key end

     0   :  { %v307_v8 = vmov 0   ;;  %vm218_vm0 = vcmask 261120   ;;  %s564_s1 = inlined_call_operand.vmem [shape: bf16[128,32], index: 1, kind: input, shape index: {}]   ;;  %s565_s2 = inlined_call_operand.vmem [shape: f32[1,32], index: 2, kind: input, shape index: {}]   ;;  %s566_s4 = inlined_call_operand.<no memory space> [shape: f32[1,1], index: 4, kind: input, shape index: {}]   ;;  %s567_s0 = inlined_call_operand.vmem [shape: f32[128,128], index: 0, kind: input, shape index: {}]   ;;  %s568_s3 = inlined_call_operand.vmem [shape: f32[128,32], index: 3, kind: input, shape index: {}]   ;;  %s569_s5 = inlined_call_operand.vmem [shape: f32[128,32], index: 5, kind: output, shape index: {}]  }
   0x1   :  { %v278_v0 = vld [vmem:[%s564_s1 + $0x38] sm:$0xff]  ;;  %v277_v1 = vld [vmem:[%s564_s1 + $0x30] sm:$0xff]  ;;  %v276_v2 = vld [vmem:[%s564_s1 + $0x28] sm:$0xff]  ;;  %v10_v4 = vstv %s566_s4  ;;  %304 = vset.pattern.permute.xlu0 %v307_v8 }
   0x2   :  { %114 = vmatpush.bf16.msra.mxu0 %v278_v0  ;;  %279 = vmatpush.bf16.msra.mxu1 %v278_v0  ;;  %v275_v3 = vld [vmem:[%s564_s1 + $0x20] sm:$0xff]  ;;  %11 = vst [vmem:[#allocation2] sm:$0x1] %v10_v4  ;;  %v274_v5 = vld [vmem:[%s564_s1 + $0x18] sm:$0xff]  ;;  %v273_v6 = vld [vmem:[%s564_s1 + $0x10] sm:$0xff] }
   0x3   :  { %280 = vmatpush.bf16.msra.mxu2 %v278_v0  ;;  %281 = vmatpush.bf16.msra.mxu3 %v278_v0  ;;  %v272_v9 = vld [vmem:[%s564_s1 + $0x8] sm:$0xff]  ;;  %v271_v10 = vld [vmem:[%s564_s1] sm:$0xff]  ;;  %v24_v23 = vld [vmem:[%s567_s0 + $0x10] sm:$0xff] }
   0x4   :  { %v22_v11 = vld [vmem:[%s567_s0] sm:$0xff]  ;;  %v23_v12 = vld [vmem:[%s567_s0 + $0x8] sm:$0xff]  ;;  %v25_v24 = vld [vmem:[%s567_s0 + $0x18] sm:$0xff] }
   0x5   :  { %v26_v13 = vld [vmem:[%s567_s0 + $0x20] sm:$0xff]  ;;  %v27_v14 = vld [vmem:[%s567_s0 + $0x28] sm:$0xff]  ;;  %v38_v19 = vpack.c.bf16 %v23_v12, %v22_v11  ;;  %v28_v25 = vld [vmem:[%s567_s0 + $0x30] sm:$0xff]  ;;  %v39_v31 = vpack.c.bf16 %v25_v24, %v24_v23 }
   0x6   :  { %115 = vmatpush.bf16.msra.mxu0 %v277_v1  ;;  %282 = vmatpush.bf16.msra.mxu1 %v277_v1  ;;  %v30_v15 = vld [vmem:[%s567_s0 + $0x40] sm:$0xff]  ;;  %v31_v16 = vld [vmem:[%s567_s0 + $0x48] sm:$0xff]  ;;  %v40_v20 = vpack.c.bf16 %v27_v14, %v26_v13  ;;  %v29_v26 = vld [vmem:[%s567_s0 + $0x38] sm:$0xff] }
   0x7   :  { %283 = vmatpush.bf16.msra.mxu2 %v277_v1  ;;  %284 = vmatpush.bf16.msra.mxu3 %v277_v1  ;;  %v34_v17 = vld [vmem:[%s567_s0 + $0x60] sm:$0xff]  ;;  %v35_v18 = vld [vmem:[%s567_s0 + $0x68] sm:$0xff]  ;;  %v42_v21 = vpack.c.bf16 %v31_v16, %v30_v15  ;;  %v32_v27 = vld [vmem:[%s567_s0 + $0x50] sm:$0xff]  ;;  %v41_v32 = vpack.c.bf16 %v29_v26, %v28_v25 }
   0x8   :  { %v44_v22 = vpack.c.bf16 %v35_v18, %v34_v17  ;;  %v33_v28 = vld [vmem:[%s567_s0 + $0x58] sm:$0xff]  ;;  %v36_v29 = vld [vmem:[%s567_s0 + $0x70] sm:$0xff]  ;;  %v416_v35 = vld [vmem:[%s565_s2] ss:$0 sm:$0xff] }
   0x9   :  { %v305_v7 = vld [vmem:[#allocation2] ss:$0 sm:$0xff]  ;;  %v37_v30 = vld [vmem:[%s567_s0 + $0x78] sm:$0xff]  ;;  %v43_v33 = vpack.c.bf16 %v33_v28, %v32_v27  ;;  %v164_v59 = vld [vmem:[%s568_s3 + $0x8] sm:$0xff] }
   0xa   :  { %116 = vmatpush.bf16.msra.mxu0 %v276_v2  ;;  %285 = vmatpush.bf16.msra.mxu1 %v276_v2  ;;  %v45_v34 = vpack.c.bf16 %v37_v30, %v36_v29  ;;  %v163_v41 = vld [vmem:[%s568_s3] sm:$0xff]  ;;  %v168_v60 = vld [vmem:[%s568_s3 + $0x28] sm:$0xff]  ;;  %v165_v15 = vld [vmem:[%s568_s3 + $0x10] sm:$0xff] }
   0xb   :  { %286 = vmatpush.bf16.msra.mxu2 %v276_v2  ;;  %287 = vmatpush.bf16.msra.mxu3 %v276_v2  ;;  %v167_v42 = vld [vmem:[%s568_s3 + $0x20] sm:$0xff]  ;;  %v169_v16 = vld [vmem:[%s568_s3 + $0x30] sm:$0xff] }
   0xc   :  { %183 = vperm.xlu0 %304, %v305_v7   ;;  %v171_v53 = vld [vmem:[%s568_s3 + $0x40] sm:$0xff]  ;;  %v173_v29 = vld [vmem:[%s568_s3 + $0x50] sm:$0xff] }
   0xd   :  { %v175_v54 = vld [vmem:[%s568_s3 + $0x60] sm:$0xff]  ;;  %v177_v30 = vld [vmem:[%s568_s3 + $0x70] sm:$0xff] }
   0xe   :  { %117 = vmatpush.bf16.msra.mxu0 %v275_v3  ;;  %288 = vmatpush.bf16.msra.mxu1 %v275_v3 }
   0xf   :  { %289 = vmatpush.bf16.msra.mxu2 %v275_v3  ;;  %290 = vmatpush.bf16.msra.mxu3 %v275_v3 }
  0x12   :  { %118 = vmatpush.bf16.msra.mxu0 %v274_v5  ;;  %291 = vmatpush.bf16.msra.mxu1 %v274_v5 }
  0x13   :  { %292 = vmatpush.bf16.msra.mxu2 %v274_v5  ;;  %293 = vmatpush.bf16.msra.mxu3 %v274_v5 }
  0x16   :  { %119 = vmatpush.bf16.msra.mxu0 %v273_v6  ;;  %294 = vmatpush.bf16.msra.mxu1 %v273_v6 }
  0x17   :  { %295 = vmatpush.bf16.msra.mxu2 %v273_v6  ;;  %296 = vmatpush.bf16.msra.mxu3 %v273_v6 }
  0x1a   :  { %120 = vmatpush.bf16.msra.mxu0 %v272_v9  ;;  %297 = vmatpush.bf16.msra.mxu1 %v272_v9 }
  0x1b   :  { %298 = vmatpush.bf16.msra.mxu2 %v272_v9  ;;  %299 = vmatpush.bf16.msra.mxu3 %v272_v9  ;;  %v172_v9 = vld [vmem:[%s568_s3 + $0x48] sm:$0xff] }
  0x1e   :  { %121 = vmatpush.bf16.msra.mxu0 %v271_v10  ;;  %300 = vmatpush.bf16.msra.mxu1 %v271_v10 }
  0x1f   :  { %301 = vmatpush.bf16.msra.mxu2 %v271_v10  ;;  %302 = vmatpush.bf16.msra.mxu3 %v271_v10  ;;  %v176_v10 = vld [vmem:[%s568_s3 + $0x68] sm:$0xff] }
  0x21   :  { %122 = vmatmul.bf16.vlgmr.msra.gmra.mxu0 %v38_v19  ;;  %132 = vmatmul.bf16.vlgmr.msra.gmra.mxu1 %v40_v20 }
  0x22   :  { %142 = vmatmul.bf16.vlgmr.msra.gmra.mxu2 %v42_v21  ;;  %152 = vmatmul.bf16.vlgmr.msra.gmra.mxu3 %v44_v22 }
  0x31   :  { %127 = vmatmul.bf16.gmra.mxu0 %v39_v31  ;;  %137 = vmatmul.bf16.gmra.mxu1 %v41_v32 }
  0x32   :  { %147 = vmatmul.bf16.gmra.mxu2 %v43_v33  ;;  %157 = vmatmul.bf16.gmra.mxu3 %v45_v34 }
  0x7e   :  { %v418_v36 = vpop.permute.xlu0 %183 }
  0x9e   :  { %v123_v37 = vpop.f32.mrf.mxu0  ;;  %v133_v38 = vpop.f32.mrf.mxu1 }
  0x9f   :  { %v124_v39 = vadd.f32 %v416_v35, %v123_v37  ;;  %v134_v40 = vadd.f32 %v416_v35, %v133_v38  ;;  %v166_v37 = vld [vmem:[%s568_s3 + $0x18] sm:$0xff] }
  0xa0   :  { %v170_v38 = vld [vmem:[%s568_s3 + $0x38] sm:$0xff] }
  0xa1   :  { %v186_v43 = vmul.f32 %v418_v36, %v124_v39  ;;  %v190_v44 = vmul.f32 %v418_v36, %v134_v40 }
  0xa3   :  { %v202_v45 = vadd.f32 %v186_v43, %v163_v41  ;;  %v206_v46 = vadd.f32 %v190_v44, %v167_v42 }
  0xa5   :  { %v143_v47 = vpop.f32.mrf.mxu2  ;;  %v153_v48 = vpop.f32.mrf.mxu3  ;;  %219 = vst.msk [vmem:[%s569_s5] sm:$0xff] %vm218_vm0, %v202_v45 }
  0xa6   :  { %v144_v49 = vadd.f32 %v416_v35, %v143_v47  ;;  %v154_v50 = vadd.f32 %v416_v35, %v153_v48  ;;  %223 = vst.msk [vmem:[%s569_s5 + $0x20] sm:$0xff] %vm218_vm0, %v206_v46  ;;  %v125_v51 = vpop.f32.mrf.mxu0  ;;  %v135_v52 = vpop.f32.mrf.mxu1 }
  0xa7   :  { %v126_v55 = vadd.f32 %v416_v35, %v125_v51  ;;  %v136_v56 = vadd.f32 %v416_v35, %v135_v52 }
  0xa8   :  { %v194_v57 = vmul.f32 %v418_v36, %v144_v49  ;;  %v198_v58 = vmul.f32 %v418_v36, %v154_v50  ;;  %v174_v49 = vld [vmem:[%s568_s3 + $0x58] sm:$0xff] }
  0xa9   :  { %v187_v61 = vmul.f32 %v418_v36, %v126_v55  ;;  %v191_v62 = vmul.f32 %v418_v36, %v136_v56  ;;  %v178_v50 = vld [vmem:[%s568_s3 + $0x78] sm:$0xff] }
  0xaa   :  { %v210_v63 = vadd.f32 %v194_v57, %v171_v53  ;;  %v214_v0 = vadd.f32 %v198_v58, %v175_v54 }
  0xab   :  { %v203_v1 = vadd.f32 %v187_v61, %v164_v59  ;;  %v207_v2 = vadd.f32 %v191_v62, %v168_v60 }
  0xac   :  { %227 = vst.msk [vmem:[%s569_s5 + $0x40] sm:$0xff] %vm218_vm0, %v210_v63 }
  0xad   :  { %231 = vst.msk [vmem:[%s569_s5 + $0x60] sm:$0xff] %vm218_vm0, %v214_v0  ;;  %v145_v3 = vpop.f32.mrf.mxu2  ;;  %v155_v4 = vpop.f32.mrf.mxu3 }
  0xae   :  { %220 = vst.msk [vmem:[%s569_s5 + $0x8] sm:$0xff] %vm218_vm0, %v203_v1  ;;  %v146_v5 = vadd.f32 %v416_v35, %v145_v3  ;;  %v156_v6 = vadd.f32 %v416_v35, %v155_v4  ;;  %v128_v7 = vpop.f32.mrf.mxu0  ;;  %v138_v8 = vpop.f32.mrf.mxu1 }
  0xaf   :  { %224 = vst.msk [vmem:[%s569_s5 + $0x28] sm:$0xff] %vm218_vm0, %v207_v2  ;;  %v129_v11 = vadd.f32 %v416_v35, %v128_v7  ;;  %v139_v12 = vadd.f32 %v416_v35, %v138_v8 }
  0xb0   :  { %v195_v13 = vmul.f32 %v418_v36, %v146_v5  ;;  %v199_v14 = vmul.f32 %v418_v36, %v156_v6 }
  0xb1   :  { %v188_v17 = vmul.f32 %v418_v36, %v129_v11  ;;  %v192_v18 = vmul.f32 %v418_v36, %v139_v12 }
  0xb2   :  { %v211_v19 = vadd.f32 %v195_v13, %v172_v9  ;;  %v215_v20 = vadd.f32 %v199_v14, %v176_v10 }
  0xb3   :  { %v204_v21 = vadd.f32 %v188_v17, %v165_v15  ;;  %v208_v22 = vadd.f32 %v192_v18, %v169_v16 }
  0xb4   :  { %228 = vst.msk [vmem:[%s569_s5 + $0x48] sm:$0xff] %vm218_vm0, %v211_v19 }
  0xb5   :  { %232 = vst.msk [vmem:[%s569_s5 + $0x68] sm:$0xff] %vm218_vm0, %v215_v20  ;;  %v148_v23 = vpop.f32.mrf.mxu2  ;;  %v158_v24 = vpop.f32.mrf.mxu3 }
  0xb6   :  { %221 = vst.msk [vmem:[%s569_s5 + $0x10] sm:$0xff] %vm218_vm0, %v204_v21  ;;  %v149_v25 = vadd.f32 %v416_v35, %v148_v23  ;;  %v159_v26 = vadd.f32 %v416_v35, %v158_v24  ;;  %v130_v27 = vpop.f32.mrf.mxu0  ;;  %v140_v28 = vpop.f32.mrf.mxu1 }
  0xb7   :  { %225 = vst.msk [vmem:[%s569_s5 + $0x30] sm:$0xff] %vm218_vm0, %v208_v22  ;;  %v131_v31 = vadd.f32 %v416_v35, %v130_v27  ;;  %v141_v32 = vadd.f32 %v416_v35, %v140_v28 }
  0xb8   :  { %v196_v33 = vmul.f32 %v418_v36, %v149_v25  ;;  %v200_v34 = vmul.f32 %v418_v36, %v159_v26 }
  0xb9   :  { %v189_v39 = vmul.f32 %v418_v36, %v131_v31  ;;  %v193_v40 = vmul.f32 %v418_v36, %v141_v32 }
  0xba   :  { %v212_v41 = vadd.f32 %v196_v33, %v173_v29  ;;  %v216_v42 = vadd.f32 %v200_v34, %v177_v30 }
  0xbb   :  { %v205_v43 = vadd.f32 %v189_v39, %v166_v37  ;;  %v209_v44 = vadd.f32 %v193_v40, %v170_v38 }
  0xbc   :  { %229 = vst.msk [vmem:[%s569_s5 + $0x50] sm:$0xff] %vm218_vm0, %v212_v41 }
  0xbd   :  { %233 = vst.msk [vmem:[%s569_s5 + $0x70] sm:$0xff] %vm218_vm0, %v216_v42  ;;  %v150_v45 = vpop.f32.mrf.mxu2  ;;  %v160_v46 = vpop.f32.mrf.mxu3 }
  0xbe   :  { %222 = vst.msk [vmem:[%s569_s5 + $0x18] sm:$0xff] %vm218_vm0, %v205_v43  ;;  %v151_v47 = vadd.f32 %v416_v35, %v150_v45  ;;  %v161_v48 = vadd.f32 %v416_v35, %v160_v46 }
  0xbf   :  { %226 = vst.msk [vmem:[%s569_s5 + $0x38] sm:$0xff] %vm218_vm0, %v209_v44 }
  0xc0   :  { %v197_v51 = vmul.f32 %v418_v36, %v151_v47  ;;  %v201_v52 = vmul.f32 %v418_v36, %v161_v48 }
  0xc2   :  { %v213_v53 = vadd.f32 %v197_v51, %v174_v49  ;;  %v217_v54 = vadd.f32 %v201_v52, %v178_v50 }
  0xc4   :  { %230 = vst.msk [vmem:[%s569_s5 + $0x58] sm:$0xff] %vm218_vm0, %v213_v53 }
  0xc5   :  { %234 = vst.msk [vmem:[%s569_s5 + $0x78] sm:$0xff] %vm218_vm0, %v217_v54 }

// kernel: spatial_transformer.27
= control target key start
LH: loop header
LB: loop body
LE: loop exit
PB: predicated region body
PF: predicated region fallthrough
CT: control target
= control target key end

     0   :  { %vm34_vm0 = vcmask 261120   ;;  %v612_v32 = vmov 32.0   ;;  %s1269_s0 = inlined_call_operand.vmem [shape: f32[128,32], index: 0, kind: input, shape index: {}]   ;;  %s1270_s1 = inlined_call_operand.vmem [shape: f32[1,32], index: 1, kind: input, shape index: {}]   ;;  %s1271_s2 = inlined_call_operand.vmem [shape: f32[1,32], index: 2, kind: input, shape index: {}]   ;;  %s1272_s3 = inlined_call_operand.vmem [shape: bf16[32,32], index: 3, kind: input, shape index: {}]   ;;  %s1273_s4 = inlined_call_operand.vmem [shape: f32[128,32], index: 4, kind: output, shape index: {}]  }
   0x1   :  { %v30_v0 = vld [vmem:[%s1269_s0 + $0x60] sm:$0xff]  ;;  %v656_v6 = vld [vmem:[%s1269_s0 + $0x68] sm:$0xff]  ;;  %v687_v14 = vld [vmem:[%s1269_s0 + $0x50] sm:$0xff]  ;;  %578 = vrcp.f32 %v612_v32 }
   0x2   :  { %v26_v1 = vld [vmem:[%s1269_s0 + $0x40] sm:$0xff]  ;;  %v71_v3 = vsel %vm34_vm0, %v30_v0, 0.0  ;;  %v661_v7 = vld [vmem:[%s1269_s0 + $0x48] sm:$0xff]  ;;  %v74_v9 = vsel %vm34_vm0, %v656_v6, 0.0  ;;  %v65_v17 = vsel %vm34_vm0, %v687_v14, 0.0  ;;  %v698_v18 = vld [vmem:[%s1269_s0 + $0x58] sm:$0xff] }
   0x3   :  { %v647_v2 = vld [vmem:[%s1269_s0] sm:$0xff]  ;;  %v59_v4 = vsel %vm34_vm0, %v26_v1, 0.0  ;;  %72 = vadd.xlane.f32.xlu1 %v71_v3  ;;  %v666_v8 = vld [vmem:[%s1269_s0 + $0x8] sm:$0xff]  ;;  %v62_v10 = vsel %vm34_vm0, %v661_v7, 0.0  ;;  %v703_v19 = vld [vmem:[%s1269_s0 + $0x70] sm:$0xff]  ;;  %v68_v21 = vsel %vm34_vm0, %v698_v18, 0.0 }
   0x4   :  { %v35_v5 = vsel %vm34_vm0, %v647_v2, 0.0  ;;  %60 = vadd.xlane.f32.xlu0 %v59_v4  ;;  %v38_v11 = vsel %vm34_vm0, %v666_v8, 0.0  ;;  %v677_v12 = vld [vmem:[%s1269_s0 + $0x20] sm:$0xff]  ;;  %v682_v13 = vld [vmem:[%s1269_s0 + $0x28] sm:$0xff]  ;;  %v708_v20 = vld [vmem:[%s1269_s0 + $0x78] sm:$0xff]  ;;  %v77_v22 = vsel %vm34_vm0, %v703_v19, 0.0 }
   0x5   :  { %36 = vadd.xlane.f32.xlu2 %v35_v5  ;;  %v47_v15 = vsel %vm34_vm0, %v677_v12, 0.0  ;;  %v50_v16 = vsel %vm34_vm0, %v682_v13, 0.0  ;;  %v80_v23 = vsel %vm34_vm0, %v708_v20, 0.0  ;;  %v719_v24 = vld [vmem:[%s1269_s0 + $0x10] sm:$0xff]  ;;  %v724_v25 = vld [vmem:[%s1269_s0 + $0x18] sm:$0xff] }
   0x6   :  { %v729_v26 = vld [vmem:[%s1269_s0 + $0x30] sm:$0xff]  ;;  %v41_v27 = vsel %vm34_vm0, %v719_v24, 0.0  ;;  %v44_v28 = vsel %vm34_vm0, %v724_v25, 0.0  ;;  %v740_v30 = vld [vmem:[%s1269_s0 + $0x38] sm:$0xff] }
   0x7   :  { %v53_v29 = vsel %vm34_vm0, %v729_v26, 0.0  ;;  %v56_v31 = vsel %vm34_vm0, %v740_v30, 0.0  ;;  %v579_v33 = vpop.eup %578 }
   0x8   :  { %v84_v34 = vmul.f32 32.0, %v579_v33  ;;  %vm88_vm1 = vweird.f32 %v579_v33 }
   0xa   :  { %v85_v35 = vsub.f32 1.0, %v84_v34 }
   0xb   :  { %75 = vadd.xlane.f32.xlu1 %v74_v9 }
   0xc   :  { %63 = vadd.xlane.f32.xlu0 %v62_v10  ;;  %v86_v36 = vmul.f32 %v579_v33, %v85_v35 }
   0xd   :  { %39 = vadd.xlane.f32.xlu2 %v38_v11 }
   0xe   :  { %v87_v37 = vadd.f32 %v579_v33, %v86_v36 }
  0x10   :  { %v744_v38 = vsel %vm88_vm1, %v579_v33, %v87_v37 }
  0x13   :  { %51 = vadd.xlane.f32.xlu1 %v50_v16 }
  0x14   :  { %48 = vadd.xlane.f32.xlu0 %v47_v15 }
  0x15   :  { %66 = vadd.xlane.f32.xlu2 %v65_v17 }
  0x1b   :  { %78 = vadd.xlane.f32.xlu1 %v77_v22 }
  0x1c   :  { %69 = vadd.xlane.f32.xlu0 %v68_v21 }
  0x1d   :  { %81 = vadd.xlane.f32.xlu2 %v80_v23 }
  0x23   :  { %45 = vadd.xlane.f32.xlu1 %v44_v28 }
  0x24   :  { %42 = vadd.xlane.f32.xlu0 %v41_v27 }
  0x25   :  { %54 = vadd.xlane.f32.xlu2 %v53_v29 }
  0x2c   :  { %57 = vadd.xlane.f32.xlu0 %v56_v31 }
  0x76   :  { %v73_v39 = vpop.xlane.xlu1 %72 }
  0x77   :  { %v61_v40 = vpop.xlane.xlu0 %60  ;;  %v102_v41 = vmul.f32 %v744_v38, %v73_v39 }
  0x78   :  { %v98_v42 = vmul.f32 %v744_v38, %v61_v40  ;;  %v37_v43 = vpop.xlane.xlu2 %36 }
  0x79   :  { %v748_v44 = vsub.f32 %v30_v0, %v102_v41  ;;  %v90_v56 = vmul.f32 %v744_v38, %v37_v43 }
  0x7a   :  { %v750_v45 = vsub.f32 %v26_v1, %v98_v42 }
  0x7b   :  { %v134_v47 = vmul.f32 %v748_v44, %v748_v44  ;;  %v778_v63 = vsub.f32 %v647_v2, %v90_v56 }
  0x7c   :  { %v130_v46 = vmul.f32 %v750_v45, %v750_v45 }
  0x7d   :  { %v174_v49 = vsel %vm34_vm0, %v134_v47, 0.0  ;;  %v122_v10 = vmul.f32 %v778_v63, %v778_v63 }
  0x7e   :  { %v162_v48 = vsel %vm34_vm0, %v130_v46, 0.0  ;;  %v76_v50 = vpop.xlane.xlu1 %75  ;;  %175 = vadd.xlane.f32.xlu0 %v174_v49 }
  0x7f   :  { %v64_v51 = vpop.xlane.xlu0 %63  ;;  %163 = vadd.xlane.f32.xlu1 %v162_v48  ;;  %v103_v52 = vmul.f32 %v744_v38, %v76_v50 }
  0x80   :  { %v99_v53 = vmul.f32 %v744_v38, %v64_v51  ;;  %v40_v54 = vpop.xlane.xlu2 %39 }
  0x81   :  { %v91_v55 = vmul.f32 %v744_v38, %v40_v54  ;;  %v763_v57 = vsub.f32 %v656_v6, %v103_v52 }
  0x82   :  { %v766_v58 = vsub.f32 %v661_v7, %v99_v53 }
  0x83   :  { %v769_v59 = vsub.f32 %v666_v8, %v91_v55  ;;  %v135_v60 = vmul.f32 %v763_v57, %v763_v57 }
  0x84   :  { %v131_v61 = vmul.f32 %v766_v58, %v766_v58 }
  0x85   :  { %v123_v62 = vmul.f32 %v769_v59, %v769_v59  ;;  %v177_v0 = vsel %vm34_vm0, %v135_v60, 0.0 }
  0x86   :  { %v165_v1 = vsel %vm34_vm0, %v131_v61, 0.0  ;;  %v52_v5 = vpop.xlane.xlu1 %51 }
  0x87   :  { %v49_v3 = vpop.xlane.xlu0 %48  ;;  %178 = vadd.xlane.f32.xlu1 %v177_v0  ;;  %166 = vadd.xlane.f32.xlu2 %v165_v1  ;;  %v141_v4 = vsel %vm34_vm0, %v123_v62, 0.0  ;;  %v95_v8 = vmul.f32 %v744_v38, %v52_v5 }
  0x88   :  { %v94_v6 = vmul.f32 %v744_v38, %v49_v3  ;;  %142 = vadd.xlane.f32.xlu0 %v141_v4  ;;  %v67_v7 = vpop.xlane.xlu2 %66 }
  0x89   :  { %v100_v9 = vmul.f32 %v744_v38, %v67_v7  ;;  %v795_v15 = vsub.f32 %v682_v13, %v95_v8 }
  0x8a   :  { %v787_v2 = vsub.f32 %v677_v12, %v94_v6  ;;  %v138_v12 = vsel %vm34_vm0, %v122_v10, 0.0 }
  0x8b   :  { %v792_v11 = vsub.f32 %v687_v14, %v100_v9  ;;  %v127_v29 = vmul.f32 %v795_v15, %v795_v15 }
  0x8c   :  { %v126_v16 = vmul.f32 %v787_v2, %v787_v2 }
  0x8d   :  { %v132_v17 = vmul.f32 %v792_v11, %v792_v11  ;;  %v153_v36 = vsel %vm34_vm0, %v127_v29, 0.0 }
  0x8e   :  { %v150_v21 = vsel %vm34_vm0, %v126_v16, 0.0  ;;  %v79_v14 = vpop.xlane.xlu1 %78 }
  0x8f   :  { %v70_v22 = vpop.xlane.xlu0 %69  ;;  %151 = vadd.xlane.f32.xlu1 %v150_v21  ;;  %139 = vadd.xlane.f32.xlu2 %v138_v12  ;;  %v168_v23 = vsel %vm34_vm0, %v132_v17, 0.0  ;;  %v104_v28 = vmul.f32 %v744_v38, %v79_v14  ;;  %v567_v17 = vld [vmem:[%s1272_s3] sm:$0xff] }
  0x90   :  { %v101_v27 = vmul.f32 %v744_v38, %v70_v22  ;;  %169 = vadd.xlane.f32.xlu0 %v168_v23  ;;  %v82_v13 = vpop.xlane.xlu2 %81 }
  0x91   :  { %v105_v31 = vmul.f32 %v744_v38, %v82_v13  ;;  %v816_v34 = vsub.f32 %v703_v19, %v104_v28 }
  0x92   :  { %v810_v32 = vsub.f32 %v698_v18, %v101_v27 }
  0x93   :  { %v813_v33 = vsub.f32 %v708_v20, %v105_v31  ;;  %v136_v43 = vmul.f32 %v816_v34, %v816_v34 }
  0x94   :  { %v133_v35 = vmul.f32 %v810_v32, %v810_v32 }
  0x95   :  { %v137_v37 = vmul.f32 %v813_v33, %v813_v33  ;;  %v180_v51 = vsel %vm34_vm0, %v136_v43, 0.0 }
  0x96   :  { %v171_v39 = vsel %vm34_vm0, %v133_v35, 0.0  ;;  %v46_v20 = vpop.xlane.xlu1 %45 }
  0x97   :  { %172 = vadd.xlane.f32.xlu1 %v171_v39  ;;  %v43_v40 = vpop.xlane.xlu0 %42  ;;  %154 = vadd.xlane.f32.xlu2 %v153_v36  ;;  %v183_v18 = vsel %vm34_vm0, %v137_v37, 0.0  ;;  %v93_v42 = vmul.f32 %v744_v38, %v46_v20 }
  0x98   :  { %v92_v41 = vmul.f32 %v744_v38, %v43_v40  ;;  %184 = vadd.xlane.f32.xlu0 %v183_v18  ;;  %v55_v19 = vpop.xlane.xlu2 %54 }
  0x99   :  { %v96_v46 = vmul.f32 %v744_v38, %v55_v19  ;;  %v837_v49 = vsub.f32 %v724_v25, %v93_v42 }
  0x9a   :  { %v831_v47 = vsub.f32 %v719_v24, %v92_v41 }
  0x9b   :  { %v834_v48 = vsub.f32 %v729_v26, %v96_v46  ;;  %v125_v25 = vmul.f32 %v837_v49, %v837_v49 }
  0x9c   :  { %v124_v50 = vmul.f32 %v831_v47, %v831_v47 }
  0x9d   :  { %v128_v52 = vmul.f32 %v834_v48, %v834_v48  ;;  %v147_v60 = vsel %vm34_vm0, %v125_v25, 0.0 }
  0x9e   :  { %v144_v53 = vsel %vm34_vm0, %v124_v50, 0.0 }
  0x9f   :  { %145 = vadd.xlane.f32.xlu1 %v144_v53  ;;  %v58_v54 = vpop.xlane.xlu0 %57  ;;  %181 = vadd.xlane.f32.xlu2 %v180_v51  ;;  %v156_v24 = vsel %vm34_vm0, %v128_v52, 0.0 }
  0xa0   :  { %v97_v26 = vmul.f32 %v744_v38, %v58_v54  ;;  %157 = vadd.xlane.f32.xlu0 %v156_v24 }
  0xa2   :  { %v850_v55 = vsub.f32 %v740_v30, %v97_v26  ;;  %v568_v30 = vld [vmem:[%s1272_s3 + $0x8] sm:$0xff] }
  0xa3   :  { %570 = vmatpush.bf16.msra.mxu2 %v568_v30  ;;  %571 = vmatpush.bf16.msra.mxu3 %v568_v30 }
  0xa4   :  { %v129_v56 = vmul.f32 %v850_v55, %v850_v55  ;;  %488 = vmatpush.bf16.msra.mxu0 %v568_v30  ;;  %569 = vmatpush.bf16.msra.mxu1 %v568_v30 }
  0xa6   :  { %v159_v61 = vsel %vm34_vm0, %v129_v56, 0.0 }
  0xa7   :  { %160 = vadd.xlane.f32.xlu1 %v159_v61  ;;  %148 = vadd.xlane.f32.xlu2 %v147_v60 }
  0xa8   :  { %573 = vmatpush.bf16.msra.mxu2 %v567_v17  ;;  %574 = vmatpush.bf16.msra.mxu3 %v567_v17 }
  0xa9   :  { %489 = vmatpush.bf16.msra.mxu0 %v567_v17  ;;  %572 = vmatpush.bf16.msra.mxu1 %v567_v17 }
  0xf1   :  { %v176_v0 = vpop.xlane.xlu0 %175 }
  0xf2   :  { %v164_v62 = vpop.xlane.xlu1 %163  ;;  %v198_v3 = vmul.f32 %v176_v0, %v744_v38 }
  0xf3   :  { %v194_v1 = vmul.f32 %v164_v62, %v744_v38 }
  0xf4   :  { %v214_v5 = vadd.f32 1e-05, %v198_v3 }
  0xf5   :  { %v210_v4 = vadd.f32 1e-05, %v194_v1 }
  0xf6   :  { %vm344_vm6 = vweird.f32 %v214_v5 }
  0xf7   :  { %580 = vrsqrt.f32 %v210_v4  ;;  %vm304_vm4 = vweird.f32 %v210_v4 }
  0xf8   :  { %582 = vrsqrt.f32 %v214_v5 }
  0xfa   :  { %v179_v6 = vpop.xlane.xlu1 %178  ;;  %v167_v7 = vpop.xlane.xlu2 %166 }
  0xfb   :  { %v199_v8 = vmul.f32 %v179_v6, %v744_v38  ;;  %v143_v9 = vpop.xlane.xlu0 %142  ;;  %v195_v10 = vmul.f32 %v167_v7, %v744_v38 }
  0xfc   :  { %v187_v16 = vmul.f32 %v143_v9, %v744_v38 }
  0xfd   :  { %v867_v21 = vpop.eup %580  ;;  %v869_v12 = vadd.f32 1e-05, %v199_v8  ;;  %v871_v22 = vadd.f32 1e-05, %v195_v10 }
  0xfe   :  { %v873_v23 = vpop.eup %582  ;;  %v299_v14 = vmul.f32 %v867_v21, %v210_v4  ;;  %v876_v27 = vadd.f32 1e-05, %v187_v16  ;;  %vm305_vm2 = vweird.f32 %v867_v21 }
  0xff   :  { %v339_v13 = vmul.f32 %v873_v23, %v214_v5  ;;  %584 = vrsqrt.f32 %v869_v12  ;;  %vm345_vm3 = vweird.f32 %v873_v23  ;;  %vm910_vm5 = vmor %vm304_vm4, %vm305_vm2  ;;  %vm354_vm8 = vweird.f32 %v869_v12 }
 0x100   :  { %v300_v28 = vmul.f32 %v867_v21, %v299_v14  ;;  %586 = vrsqrt.f32 %v876_v27  ;;  %vm917_vm7 = vmor %vm344_vm6, %vm345_vm3  ;;  %vm234_vm9 = vweird.f32 %v876_v27  ;;  %vm314_vm11 = vweird.f32 %v871_v22 }
 0x101   :  { %v340_v29 = vmul.f32 %v873_v23, %v339_v13  ;;  %588 = vrsqrt.f32 %v871_v22 }
 0x102   :  { %v301_v31 = vmul.f32 0.5, %v300_v28  ;;  %v152_v35 = vpop.xlane.xlu1 %151  ;;  %v140_v36 = vpop.xlane.xlu2 %139 }
 0x103   :  { %v341_v37 = vmul.f32 0.5, %v340_v29  ;;  %v190_v39 = vmul.f32 %v152_v35, %v744_v38  ;;  %v170_v40 = vpop.xlane.xlu0 %169  ;;  %v186_v18 = vmul.f32 %v140_v36, %v744_v38 }
 0x104   :  { %v302_v20 = vsub.f32 1.5, %v301_v31  ;;  %v196_v41 = vmul.f32 %v170_v40, %v744_v38  ;;  %v946_v31 = vld [vmem:[%s1270_s1] ss:$0 sm:$0xff] }
 0x105   :  { %v887_v19 = vpop.eup %584  ;;  %v342_v42 = vsub.f32 1.5, %v341_v37  ;;  %v890_v43 = vadd.f32 1e-05, %v190_v39  ;;  %v899_v52 = vadd.f32 1e-05, %v186_v18 }
 0x106   :  { %v892_v46 = vpop.eup %586  ;;  %v349_v50 = vmul.f32 %v887_v19, %v869_v12  ;;  %v897_v51 = vadd.f32 1e-05, %v196_v41  ;;  %v303_v54 = vmul.f32 %v867_v21, %v302_v20  ;;  %vm355_vm12 = vweird.f32 %v887_v19 }
 0x107   :  { %v589_v53 = vpop.eup %588  ;;  %v343_v24 = vmul.f32 %v873_v23, %v342_v42  ;;  %v229_v26 = vmul.f32 %v892_v46, %v876_v27  ;;  %590 = vrsqrt.f32 %v890_v43  ;;  %vm235_vm14 = vweird.f32 %v892_v46  ;;  %vm980_vm2 = vmor %vm354_vm8, %vm355_vm12 }
 0x108   :  { %v350_v25 = vmul.f32 %v887_v19, %v349_v50  ;;  %v309_v56 = vmul.f32 %v589_v53, %v871_v22  ;;  %592 = vrsqrt.f32 %v897_v51  ;;  %v307_v30 = vsel %vm910_vm5, %v867_v21, %v303_v54  ;;  %vm1002_vm5 = vmor %vm234_vm9, %vm235_vm14 }
 0x109   :  { %v230_v61 = vmul.f32 %v892_v46, %v229_v26  ;;  %v347_v5 = vsel %vm917_vm7, %v873_v23, %v343_v24  ;;  %594 = vrsqrt.f32 %v899_v52  ;;  %vm315_vm10 = vweird.f32 %v589_v53 }
 0x10a   :  { %v351_v0 = vmul.f32 0.5, %v350_v25  ;;  %v310_v1 = vmul.f32 %v589_v53, %v309_v56  ;;  %v173_v3 = vpop.xlane.xlu1 %172  ;;  %v155_v4 = vpop.xlane.xlu2 %154  ;;  %v386_v13 = vmul.f32 %v307_v30, %v750_v45  ;;  %v390_v28 = vmul.f32 %v347_v5, %v748_v44  ;;  %vm316_vm13 = vmor %vm314_vm11, %vm315_vm10 }
 0x10b   :  { %v185_v6 = vpop.xlane.xlu0 %184  ;;  %v231_v7 = vmul.f32 0.5, %v230_v61  ;;  %v197_v9 = vmul.f32 %v173_v3, %v744_v38  ;;  %v191_v21 = vmul.f32 %v155_v4, %v744_v38  ;;  %vm264_vm15 = vweird.f32 %v890_v43 }
 0x10c   :  { %v311_v8 = vmul.f32 0.5, %v310_v1  ;;  %v201_v10 = vmul.f32 %v185_v6, %v744_v38  ;;  %v352_v17 = vsub.f32 1.5, %v351_v0  ;;  %vm324_vm1 = vweird.f32 %v897_v51 }
 0x10d   :  { %v931_v16 = vpop.eup %590  ;;  %v941_v29 = vadd.f32 1e-05, %v197_v9  ;;  %v232_v36 = vsub.f32 1.5, %v231_v7  ;;  %v960_v18 = vadd.f32 1e-05, %v191_v21  ;;  %v406_v25 = vmul.f32 %v946_v31, %v386_v13 }
 0x10e   :  { %v312_v14 = vsub.f32 1.5, %v311_v8  ;;  %v259_v23 = vmul.f32 %v931_v16, %v890_v43  ;;  %v948_v35 = vpop.eup %592  ;;  %v951_v40 = vadd.f32 1e-05, %v201_v10  ;;  %v353_v44 = vmul.f32 %v887_v19, %v352_v17 }
 0x10f   :  { %v953_v45 = vpop.eup %594  ;;  %v319_v22 = vmul.f32 %v948_v35, %v897_v51  ;;  %596 = vrsqrt.f32 %v941_v29  ;;  %v985_v56 = vmul.f32 %v892_v46, %v232_v36  ;;  %vm224_vm3 = vweird.f32 %v899_v52 }
 0x110   :  { %v313_v37 = vmul.f32 %v589_v53, %v312_v14  ;;  %v260_v39 = vmul.f32 %v931_v16, %v259_v23  ;;  %v219_v42 = vmul.f32 %v953_v45, %v899_v52  ;;  %598 = vrsqrt.f32 %v951_v40 }
 0x111   :  { %v320_v54 = vmul.f32 %v948_v35, %v319_v22  ;;  %v410_v62 = vmul.f32 %v946_v31, %v390_v28  ;;  %v357_v12 = vsel %vm980_vm2, %v887_v19, %v353_v44  ;;  %600 = vrsqrt.f32 %v960_v18 }
 0x112   :  { %v317_v20 = vsel %vm316_vm13, %v589_v53, %v313_v37  ;;  %v261_v41 = vmul.f32 0.5, %v260_v39  ;;  %v146_v24 = vpop.xlane.xlu1 %145  ;;  %v974_v53 = vld [vmem:[%s1271_s2] ss:$0 sm:$0xff]  ;;  %v220_v60 = vmul.f32 %v953_v45, %v219_v42  ;;  %v182_v61 = vpop.xlane.xlu2 %181  ;;  %vm265_vm4 = vweird.f32 %v931_v16 }
 0x113   :  { %v387_v50 = vmul.f32 %v317_v20, %v766_v58  ;;  %v158_v26 = vpop.xlane.xlu0 %157  ;;  %v321_v1 = vmul.f32 0.5, %v320_v54  ;;  %v188_v4 = vmul.f32 %v146_v24, %v744_v38  ;;  %v200_v6 = vmul.f32 %v182_v61, %v744_v38  ;;  %vm1044_vm9 = vmor %vm264_vm15, %vm265_vm4 }
 0x114   :  { %v262_v0 = vsub.f32 1.5, %v261_v41  ;;  %v221_v3 = vmul.f32 0.5, %v220_v60  ;;  %v192_v30 = vmul.f32 %v158_v26, %v744_v38  ;;  %v426_v8 = vadd.f32 %v974_v53, %v406_v25 }
 0x115   :  { %v322_v19 = vsub.f32 1.5, %v321_v1  ;;  %v407_v7 = vmul.f32 %v946_v31, %v387_v50  ;;  %v391_v9 = vmul.f32 %v357_v12, %v763_v57  ;;  %v237_v10 = vsel %vm1002_vm5, %v892_v46, %v985_v56  ;;  %v1016_v21 = vpop.eup %596 }
 0x116   :  { %v222_v17 = vsub.f32 1.5, %v221_v3  ;;  %v1014_v27 = vadd.f32 1e-05, %v188_v4  ;;  %v1019_v14 = vmul.f32 %v931_v16, %v262_v0  ;;  %vm325_vm6 = vweird.f32 %v948_v35  ;;  %v1025_v57 = vpop.eup %598 }
 0x117   :  { %vm225_vm7 = vweird.f32 %v953_v45  ;;  %v1023_v23 = vadd.f32 1e-05, %v192_v30  ;;  %v329_v28 = vmul.f32 %v1016_v21, %v941_v29  ;;  %v1031_v36 = vadd.f32 1e-05, %v200_v6  ;;  %v1033_v37 = vpop.eup %600  ;;  %vm1073_vm14 = vmor %vm324_vm1, %vm325_vm6 }
 0x118   :  { %v223_v13 = vmul.f32 %v953_v45, %v222_v17  ;;  %602 = vrsqrt.f32 %v1014_v27  ;;  %v323_v39 = vmul.f32 %v948_v35, %v322_v19  ;;  %vm334_vm8 = vweird.f32 %v941_v29  ;;  %vm1062_vm12 = vmor %vm224_vm3, %vm225_vm7 }
 0x119   :  { %v369_v44 = vmul.f32 %v1025_v57, %v951_v40  ;;  %v427_v22 = vadd.f32 %v974_v53, %v407_v7  ;;  %v330_v41 = vmul.f32 %v1016_v21, %v329_v28  ;;  %vm374_vm10 = vweird.f32 %v951_v40 }
 0x11a   :  { %v269_v42 = vmul.f32 %v1033_v37, %v960_v18  ;;  %vm274_vm11 = vweird.f32 %v960_v18  ;;  %v411_v50 = vmul.f32 %v946_v31, %v391_v9  ;;  %v267_v43 = vsel %vm1044_vm9, %v931_v16, %v1019_v14  ;;  %v161_v26 = vpop.xlane.xlu1 %160  ;;  %v149_v60 = vpop.xlane.xlu2 %148 }
 0x11b   :  { %vm335_vm13 = vweird.f32 %v1016_v21  ;;  %v370_v24 = vmul.f32 %v1025_v57, %v369_v44  ;;  %604 = vrsqrt.f32 %v1023_v23  ;;  %v227_v52 = vsel %vm1062_vm12, %v953_v45, %v223_v13 }
 0x11c   :  { %v331_v25 = vmul.f32 0.5, %v330_v41  ;;  %v270_v58 = vmul.f32 %v1033_v37, %v269_v42  ;;  %606 = vrsqrt.f32 %v1031_v36  ;;  %v327_v61 = vsel %vm1073_vm14, %v948_v35, %v323_v39  ;;  %vm1103_vm1 = vmor %vm334_vm8, %vm335_vm13 }
 0x11d   :  { %v371_v12 = vmul.f32 0.5, %v370_v24  ;;  %v438_v51 = vpack.c.bf16 %v427_v22, %v426_v8  ;;  %v430_v0 = vadd.f32 %v974_v53, %v410_v62  ;;  %v431_v45 = vadd.f32 %v974_v53, %v411_v50 }
 0x11e   :  { %v1086_v1 = vpop.eup %602  ;;  %v332_v3 = vsub.f32 1.5, %v331_v25  ;;  %v271_v4 = vmul.f32 0.5, %v270_v58  ;;  %v193_v30 = vmul.f32 %v161_v26, %v744_v38  ;;  %v378_v19 = vmul.f32 %v227_v52, %v778_v63 }
 0x11f   :  { %v372_v6 = vsub.f32 1.5, %v371_v12  ;;  %v239_v7 = vmul.f32 %v1086_v1, %v1014_v27  ;;  %563 = vmatmul.msk.bf16.vlgmr.msra.gmra.mxu2 %vm34_vm0, %v438_v51  ;;  %v189_v35 = vmul.f32 %v149_v60, %v744_v38  ;;  %vm275_vm15 = vweird.f32 %v1033_v37 }
 0x120   :  { %v333_v62 = vmul.f32 %v1016_v21, %v332_v3  ;;  %v272_v8 = vsub.f32 1.5, %v271_v4  ;;  %v440_v9 = vpack.c.bf16 %v431_v45, %v430_v0  ;;  %vm375_vm2 = vweird.f32 %v1025_v57  ;;  %vm276_vm3 = vmor %vm274_vm11, %vm275_vm15 }
 0x121   :  { %v1097_v17 = vpop.eup %604  ;;  %v373_v14 = vmul.f32 %v1025_v57, %v372_v6  ;;  %v240_v38 = vmul.f32 %v1086_v1, %v239_v7  ;;  %v1110_v13 = vadd.f32 1e-05, %v193_v30  ;;  %v1119_v22 = vadd.f32 1e-05, %v189_v35  ;;  %vm1142_vm4 = vmor %vm374_vm10, %vm375_vm2 }
 0x122   :  { %v607_v28 = vpop.eup %606  ;;  %v337_v39 = vsel %vm1103_vm1, %v1016_v21, %v333_v62  ;;  %v273_v44 = vmul.f32 %v1033_v37, %v272_v8  ;;  %v279_v29 = vmul.f32 %v1097_v17, %v1023_v23  ;;  %565 = vmatmul.msk.bf16.vlgmr.msra.gmra.mxu3 %vm34_vm0, %v440_v9  ;;  %v379_v20 = vmul.f32 %v237_v10, %v769_v59 }
 0x123   :  { %v382_v41 = vmul.f32 %v267_v43, %v787_v2  ;;  %v359_v21 = vmul.f32 %v607_v28, %v1031_v36  ;;  %v398_v42 = vmul.f32 %v946_v31, %v378_v19  ;;  %v388_v50 = vmul.f32 %v327_v61, %v792_v11 }
 0x124   :  { %v389_v54 = vmul.f32 %v337_v39, %v810_v32  ;;  %v277_v5 = vsel %vm276_vm3, %v1033_v37, %v273_v44  ;;  %v280_v46 = vmul.f32 %v1097_v17, %v279_v29  ;;  %v241_v18 = vmul.f32 0.5, %v240_v38 }
 0x125   :  { %v383_v2 = vmul.f32 %v277_v5, %v795_v15  ;;  %v360_v56 = vmul.f32 %v607_v28, %v359_v21  ;;  %608 = vrsqrt.f32 %v1110_v13  ;;  %v377_v11 = vsel %vm1142_vm4, %v1025_v57, %v373_v14 }
 0x126   :  { %v281_v32 = vmul.f32 0.5, %v280_v46  ;;  %vm284_vm5 = vweird.f32 %v1023_v23  ;;  %610 = vrsqrt.f32 %v1119_v22  ;;  %vm365_vm6 = vweird.f32 %v607_v28 }
 0x127   :  { %v361_v40 = vmul.f32 0.5, %v360_v56  ;;  %v399_v10 = vmul.f32 %v946_v31, %v379_v20  ;;  %v418_v37 = vadd.f32 %v974_v53, %v398_v42  ;;  %v402_v43 = vmul.f32 %v946_v31, %v382_v41 }
 0x128   :  { %v282_v15 = vsub.f32 1.5, %v281_v32  ;;  %v403_v24 = vmul.f32 %v946_v31, %v383_v2  ;;  %v408_v26 = vmul.f32 %v946_v31, %v388_v50  ;;  %v242_v16 = vsub.f32 1.5, %v241_v18 }
 0x129   :  { %v362_v57 = vsub.f32 1.5, %v361_v40  ;;  %v419_v52 = vadd.f32 %v974_v53, %v399_v10  ;;  %v409_v25 = vmul.f32 %v946_v31, %v389_v54  ;;  %v393_v58 = vmul.f32 %v377_v11, %v813_v33 }
 0x12a   :  { %vm364_vm7 = vweird.f32 %v1031_v36  ;;  %v422_v60 = vadd.f32 %v974_v53, %v402_v43  ;;  %v423_v61 = vadd.f32 %v974_v53, %v403_v24  ;;  %vm285_vm8 = vweird.f32 %v1097_v17 }
 0x12b   :  { %v609_v12 = vpop.eup %608  ;;  %v363_v51 = vmul.f32 %v607_v28, %v362_v57  ;;  %v434_v0 = vpack.c.bf16 %v419_v52, %v418_v37  ;;  %v429_v3 = vadd.f32 %v974_v53, %v409_v25  ;;  %v283_v45 = vmul.f32 %v1097_v17, %v282_v15  ;;  %vm366_vm9 = vmor %vm364_vm7, %vm365_vm6 }
 0x12c   :  { %v611_v4 = vpop.eup %610  ;;  %v289_v33 = vmul.f32 %v609_v12, %v1110_v13  ;;  %v436_v30 = vpack.c.bf16 %v423_v61, %v422_v60  ;;  %v428_v36 = vadd.f32 %v974_v53, %v408_v26  ;;  %v243_v19 = vmul.f32 %v1086_v1, %v242_v16  ;;  %vm286_vm12 = vmor %vm284_vm5, %vm285_vm8 }
 0x12d   :  { %vm245_vm10 = vweird.f32 %v1086_v1  ;;  %v367_v6 = vsel %vm366_vm9, %v607_v28, %v363_v51  ;;  %v249_v7 = vmul.f32 %v611_v4, %v1119_v22  ;;  %559 = vmatmul.msk.bf16.vlgmr.msra.gmra.mxu0 %vm34_vm0, %v434_v0  ;;  %v413_v9 = vmul.f32 %v946_v31, %v393_v58 }
 0x12e   :  { %v392_v35 = vmul.f32 %v367_v6, %v816_v34  ;;  %v290_v62 = vmul.f32 %v609_v12, %v289_v33  ;;  %561 = vmatmul.msk.bf16.vlgmr.msra.gmra.mxu1 %vm34_vm0, %v436_v30  ;;  %v439_v8 = vpack.c.bf16 %v429_v3, %v428_v36  ;;  %vm244_vm11 = vweird.f32 %v1014_v27 }
 0x12f   :  { %v250_v63 = vmul.f32 %v611_v4, %v249_v7  ;;  %vm246_vm13 = vmor %vm244_vm11, %vm245_vm10  ;;  %v287_v14 = vsel %vm286_vm12, %v1097_v17, %v283_v45  ;;  %vm295_vm14 = vweird.f32 %v609_v12  ;;  %v433_v29 = vadd.f32 %v974_v53, %v413_v9 }
 0x130   :  { %v291_v38 = vmul.f32 0.5, %v290_v62  ;;  %564 = vmatmul.msk.bf16.gmra.mxu2 %vm34_vm0, %v439_v8  ;;  %v412_v34 = vmul.f32 %v946_v31, %v392_v35  ;;  %v247_v28 = vsel %vm246_vm13, %v1086_v1, %v243_v19  ;;  %v384_v23 = vmul.f32 %v287_v14, %v834_v48 }
 0x131   :  { %v251_v39 = vmul.f32 0.5, %v250_v63  ;;  %vm255_vm15 = vweird.f32 %v611_v4  ;;  %v380_v17 = vmul.f32 %v247_v28, %v831_v47  ;;  %vm294_vm1 = vweird.f32 %v1110_v13 }
 0x132   :  { %v292_v44 = vsub.f32 1.5, %v291_v38  ;;  %v432_v27 = vadd.f32 %v974_v53, %v412_v34  ;;  %vm296_vm2 = vmor %vm294_vm1, %vm295_vm14  ;;  %vm254_vm3 = vweird.f32 %v1119_v22  ;;  %v404_v48 = vmul.f32 %v946_v31, %v384_v23 }
 0x133   :  { %v252_v20 = vsub.f32 1.5, %v251_v39  ;;  %vm256_vm4 = vmor %vm254_vm3, %vm255_vm15  ;;  %v400_v47 = vmul.f32 %v946_v31, %v380_v17 }
 0x134   :  { %v293_v41 = vmul.f32 %v609_v12, %v292_v44  ;;  %v441_v21 = vpack.c.bf16 %v433_v29, %v432_v27  ;;  %v424_v59 = vadd.f32 %v974_v53, %v404_v48 }
 0x135   :  { %v253_v42 = vmul.f32 %v611_v4, %v252_v20  ;;  %v420_v2 = vadd.f32 %v974_v53, %v400_v47 }
 0x136   :  { %v297_v1 = vsel %vm296_vm2, %v609_v12, %v293_v41  ;;  %566 = vmatmul.msk.bf16.gmra.mxu3 %vm34_vm0, %v441_v21 }
 0x137   :  { %v385_v50 = vmul.f32 %v297_v1, %v850_v55  ;;  %v257_v54 = vsel %vm256_vm4, %v611_v4, %v253_v42 }
 0x138   :  { %v381_v5 = vmul.f32 %v257_v54, %v837_v49 }
 0x139   :  { %v405_v13 = vmul.f32 %v946_v31, %v385_v50 }
 0x13a   :  { %v401_v46 = vmul.f32 %v946_v31, %v381_v5 }
 0x13b   :  { %v425_v22 = vadd.f32 %v974_v53, %v405_v13 }
 0x13c   :  { %v421_v18 = vadd.f32 %v974_v53, %v401_v46 }
 0x13d   :  { %v437_v55 = vpack.c.bf16 %v425_v22, %v424_v59 }
 0x13e   :  { %v435_v56 = vpack.c.bf16 %v421_v18, %v420_v2 }
 0x13f   :  { %562 = vmatmul.msk.bf16.gmra.mxu1 %vm34_vm0, %v437_v55 }
 0x140   :  { %560 = vmatmul.msk.bf16.gmra.mxu0 %vm34_vm0, %v435_v56 }
 0x1a2   :  { %v511_v49 = vpop.f32.mrf.mxu2 }
 0x1a3   :  { %539 = vst.msk [vmem:[%s1273_s4 + $0x40] sm:$0xff] %vm34_vm0, %v511_v49 }
 0x1a5   :  { %v521_v31 = vpop.f32.mrf.mxu3 }
 0x1a6   :  { %543 = vst.msk [vmem:[%s1273_s4 + $0x60] sm:$0xff] %vm34_vm0, %v521_v31 }
 0x1aa   :  { %v491_v11 = vpop.f32.mrf.mxu0  ;;  %v513_v53 = vpop.f32.mrf.mxu2 }
 0x1ab   :  { %531 = vst.msk [vmem:[%s1273_s4] sm:$0xff] %vm34_vm0, %v491_v11  ;;  %v501_v32 = vpop.f32.mrf.mxu1 }
 0x1ac   :  { %540 = vst.msk [vmem:[%s1273_s4 + $0x48] sm:$0xff] %vm34_vm0, %v513_v53 }
 0x1ad   :  { %v523_v40 = vpop.f32.mrf.mxu3  ;;  %535 = vst.msk [vmem:[%s1273_s4 + $0x20] sm:$0xff] %vm34_vm0, %v501_v32 }
 0x1ae   :  { %544 = vst.msk [vmem:[%s1273_s4 + $0x68] sm:$0xff] %vm34_vm0, %v523_v40 }
 0x1b2   :  { %v493_v10 = vpop.f32.mrf.mxu0 }
 0x1b3   :  { %532 = vst.msk [vmem:[%s1273_s4 + $0x8] sm:$0xff] %vm34_vm0, %v493_v10  ;;  %v516_v37 = vpop.f32.mrf.mxu2  ;;  %v503_v15 = vpop.f32.mrf.mxu1 }
 0x1b4   :  { %541 = vst.msk [vmem:[%s1273_s4 + $0x50] sm:$0xff] %vm34_vm0, %v516_v37 }
 0x1b5   :  { %536 = vst.msk [vmem:[%s1273_s4 + $0x28] sm:$0xff] %vm34_vm0, %v503_v15 }
 0x1b9   :  { %v526_v43 = vpop.f32.mrf.mxu3 }
 0x1ba   :  { %545 = vst.msk [vmem:[%s1273_s4 + $0x70] sm:$0xff] %vm34_vm0, %v526_v43 }
 0x1bb   :  { %v518_v24 = vpop.f32.mrf.mxu2 }
 0x1bc   :  { %542 = vst.msk [vmem:[%s1273_s4 + $0x58] sm:$0xff] %vm34_vm0, %v518_v24  ;;  %v506_v26 = vpop.f32.mrf.mxu1 }
 0x1bd   :  { %v496_v16 = vpop.f32.mrf.mxu0  ;;  %537 = vst.msk [vmem:[%s1273_s4 + $0x30] sm:$0xff] %vm34_vm0, %v506_v26 }
 0x1be   :  { %533 = vst.msk [vmem:[%s1273_s4 + $0x10] sm:$0xff] %vm34_vm0, %v496_v16 }
 0x1c1   :  { %v528_v57 = vpop.f32.mrf.mxu3 }
 0x1c2   :  { %546 = vst.msk [vmem:[%s1273_s4 + $0x78] sm:$0xff] %vm34_vm0, %v528_v57 }
 0x1c4   :  { %v508_v52 = vpop.f32.mrf.mxu1 }
 0x1c5   :  { %v498_v25 = vpop.f32.mrf.mxu0  ;;  %538 = vst.msk [vmem:[%s1273_s4 + $0x38] sm:$0xff] %vm34_vm0, %v508_v52 }
 0x1c6   :  { %534 = vst.msk [vmem:[%s1273_s4 + $0x18] sm:$0xff] %vm34_vm0, %v498_v25 }

// kernel: spatial_transformer.25
= control target key start
LH: loop header
LB: loop body
LE: loop exit
PB: predicated region body
PF: predicated region fallthrough
CT: control target
= control target key end

     0   :  { %vm43_vm0 = vcmask 261120   ;;  %v1482_v28 = vmov 32.0   ;;  %s2640_s0 = inlined_call_operand.vmem [shape: f32[128,32], index: 0, kind: input, shape index: {}]   ;;  %s2641_s1 = inlined_call_operand.vmem [shape: f32[1,32], index: 1, kind: input, shape index: {}]   ;;  %s2642_s2 = inlined_call_operand.vmem [shape: f32[1,32], index: 2, kind: input, shape index: {}]   ;;  %s2643_s3 = inlined_call_operand.vmem [shape: bf16[32,128], index: 3, kind: input, shape index: {}]   ;;  %s2644_s5 = inlined_call_operand.vmem [shape: bf16[32,128], index: 5, kind: input, shape index: {}]   ;;  %s2645_s4 = inlined_call_operand.vmem [shape: f32[1,128], index: 4, kind: input, shape index: {}]   ;;  %s2646_s6 = inlined_call_operand.vmem [shape: f32[1,128], index: 6, kind: input, shape index: {}]   ;;  %s2647_s7 = inlined_call_operand.vmem [shape: f32[128,128], index: 7, kind: output, shape index: {}]  }
   0x1   :  { %v35_v0 = vld [vmem:[%s2640_s0 + $0x40] sm:$0xff]  ;;  %v1534_v2 = vld [vmem:[%s2640_s0 + $0x50] sm:$0xff]  ;;  %v36_v6 = vld [vmem:[%s2640_s0 + $0x48] sm:$0xff]  ;;  %1414 = vrcp.f32 %v1482_v28 }
   0x2   :  { %v1529_v1 = vld [vmem:[%s2640_s0] sm:$0xff]  ;;  %v68_v3 = vsel %vm43_vm0, %v35_v0, 0.0  ;;  %v74_v5 = vsel %vm43_vm0, %v1534_v2, 0.0  ;;  %v28_v7 = vld [vmem:[%s2640_s0 + $0x8] sm:$0xff]  ;;  %v38_v8 = vld [vmem:[%s2640_s0 + $0x58] sm:$0xff]  ;;  %v71_v9 = vsel %vm43_vm0, %v36_v6, 0.0 }
   0x3   :  { %v44_v4 = vsel %vm43_vm0, %v1529_v1, 0.0  ;;  %69 = vadd.xlane.f32.xlu0 %v68_v3  ;;  %75 = vadd.xlane.f32.xlu2 %v74_v5  ;;  %v47_v10 = vsel %vm43_vm0, %v28_v7, 0.0  ;;  %v77_v11 = vsel %vm43_vm0, %v38_v8, 0.0  ;;  %v1556_v12 = vld [vmem:[%s2640_s0 + $0x10] sm:$0xff]  ;;  %v1561_v13 = vld [vmem:[%s2640_s0 + $0x18] sm:$0xff]  ;;  %v1566_v14 = vld [vmem:[%s2640_s0 + $0x60] sm:$0xff] }
   0x4   :  { %45 = vadd.xlane.f32.xlu1 %v44_v4  ;;  %v50_v15 = vsel %vm43_vm0, %v1556_v12, 0.0  ;;  %v53_v16 = vsel %vm43_vm0, %v1561_v13, 0.0  ;;  %v80_v17 = vsel %vm43_vm0, %v1566_v14, 0.0  ;;  %v1577_v18 = vld [vmem:[%s2640_s0 + $0x68] sm:$0xff]  ;;  %v1582_v19 = vld [vmem:[%s2640_s0 + $0x20] sm:$0xff]  ;;  %v1598_v24 = vld [vmem:[%s2640_s0 + $0x78] sm:$0xff] }
   0x5   :  { %v1587_v20 = vld [vmem:[%s2640_s0 + $0x28] sm:$0xff]  ;;  %v83_v21 = vsel %vm43_vm0, %v1577_v18, 0.0  ;;  %v56_v22 = vsel %vm43_vm0, %v1582_v19, 0.0  ;;  %v1603_v25 = vld [vmem:[%s2640_s0 + $0x70] sm:$0xff]  ;;  %v89_v26 = vsel %vm43_vm0, %v1598_v24, 0.0 }
   0x6   :  { %v59_v23 = vsel %vm43_vm0, %v1587_v20, 0.0  ;;  %v86_v27 = vsel %vm43_vm0, %v1603_v25, 0.0  ;;  %v1623_v48 = vld [vmem:[%s2640_s0 + $0x30] sm:$0xff] }
   0x7   :  { %v1415_v29 = vpop.eup %1414  ;;  %v62_v53 = vsel %vm43_vm0, %v1623_v48, 0.0 }
   0x8   :  { %v93_v30 = vmul.f32 32.0, %v1415_v29  ;;  %vm97_vm1 = vweird.f32 %v1415_v29 }
   0xa   :  { %v94_v31 = vsub.f32 1.0, %v93_v30 }
   0xb   :  { %72 = vadd.xlane.f32.xlu0 %v71_v9  ;;  %78 = vadd.xlane.f32.xlu2 %v77_v11 }
   0xc   :  { %48 = vadd.xlane.f32.xlu1 %v47_v10  ;;  %v95_v32 = vmul.f32 %v1415_v29, %v94_v31 }
   0xe   :  { %v96_v33 = vadd.f32 %v1415_v29, %v95_v32 }
  0x10   :  { %v1609_v34 = vsel %vm97_vm1, %v1415_v29, %v96_v33 }
  0x13   :  { %51 = vadd.xlane.f32.xlu0 %v50_v15  ;;  %81 = vadd.xlane.f32.xlu2 %v80_v17 }
  0x14   :  { %54 = vadd.xlane.f32.xlu1 %v53_v16 }
  0x1b   :  { %84 = vadd.xlane.f32.xlu0 %v83_v21  ;;  %60 = vadd.xlane.f32.xlu2 %v59_v23  ;;  %v1671_v21 = vld [vmem:[%s2640_s0 + $0x38] sm:$0xff] }
  0x1c   :  { %57 = vadd.xlane.f32.xlu1 %v56_v22  ;;  %v65_v28 = vsel %vm43_vm0, %v1671_v21, 0.0 }
  0x23   :  { %90 = vadd.xlane.f32.xlu0 %v89_v26  ;;  %87 = vadd.xlane.f32.xlu2 %v86_v27 }
  0x76   :  { %v70_v35 = vpop.xlane.xlu0 %69  ;;  %v76_v38 = vpop.xlane.xlu2 %75 }
  0x77   :  { %v46_v36 = vpop.xlane.xlu1 %45  ;;  %v107_v37 = vmul.f32 %v1609_v34, %v70_v35  ;;  %v109_v49 = vmul.f32 %v1609_v34, %v76_v38 }
  0x78   :  { %v99_v44 = vmul.f32 %v1609_v34, %v46_v36 }
  0x79   :  { %v1612_v39 = vsub.f32 %v35_v0, %v107_v37  ;;  %v1643_v58 = vsub.f32 %v1534_v2, %v109_v49 }
  0x7a   :  { %v1634_v54 = vsub.f32 %v1529_v1, %v99_v44 }
  0x7b   :  { %v139_v40 = vmul.f32 %v1612_v39, %v1612_v39  ;;  %v141_v2 = vmul.f32 %v1643_v58, %v1643_v58 }
  0x7c   :  { %v131_v1 = vmul.f32 %v1634_v54, %v1634_v54 }
  0x7d   :  { %v171_v41 = vsel %vm43_vm0, %v139_v40, 0.0 }
  0x7e   :  { %v73_v42 = vpop.xlane.xlu0 %72  ;;  %172 = vadd.xlane.f32.xlu0 %v171_v41  ;;  %v79_v47 = vpop.xlane.xlu2 %78 }
  0x7f   :  { %v49_v43 = vpop.xlane.xlu1 %48  ;;  %v108_v45 = vmul.f32 %v1609_v34, %v73_v42  ;;  %v110_v50 = vmul.f32 %v1609_v34, %v79_v47 }
  0x80   :  { %v100_v46 = vmul.f32 %v1609_v34, %v49_v43 }
  0x81   :  { %v1627_v51 = vsub.f32 %v36_v6, %v108_v45  ;;  %v1636_v55 = vsub.f32 %v38_v8, %v110_v50  ;;  %v177_v8 = vsel %vm43_vm0, %v141_v2, 0.0 }
  0x82   :  { %v1629_v52 = vsub.f32 %v28_v7, %v100_v46  ;;  %v147_v7 = vsel %vm43_vm0, %v131_v1, 0.0 }
  0x83   :  { %v140_v56 = vmul.f32 %v1627_v51, %v1627_v51  ;;  %v142_v0 = vmul.f32 %v1636_v55, %v1636_v55 }
  0x84   :  { %v132_v57 = vmul.f32 %v1629_v52, %v1629_v52 }
  0x85   :  { %v174_v59 = vsel %vm43_vm0, %v140_v56, 0.0  ;;  %v180_v6 = vsel %vm43_vm0, %v142_v0, 0.0 }
  0x86   :  { %v150_v60 = vsel %vm43_vm0, %v132_v57, 0.0  ;;  %63 = vadd.xlane.f32.xlu0 %v62_v53  ;;  %175 = vadd.xlane.f32.xlu1 %v174_v59  ;;  %v52_v61 = vpop.xlane.xlu0 %51  ;;  %v82_v63 = vpop.xlane.xlu2 %81  ;;  %v1404_v53 = vld [vmem:[%s2644_s5 + $0x8] sm:$0xff]  ;;  %v1401_v57 = vld [vmem:[%s2643_s3] sm:$0xff] }
  0x87   :  { %v55_v62 = vpop.xlane.xlu1 %54  ;;  %151 = vadd.xlane.f32.xlu2 %v150_v60  ;;  %v111_v3 = vmul.f32 %v1609_v34, %v82_v63  ;;  %v101_v15 = vmul.f32 %v1609_v34, %v52_v61  ;;  %1407 = vmatpush.bf16.msra.mxu3 %v1404_v53  ;;  %v1403_v59 = vld [vmem:[%s2644_s5] sm:$0xff] }
  0x88   :  { %v102_v4 = vmul.f32 %v1609_v34, %v55_v62  ;;  %570 = vmatpush.bf16.msra.mxu1 %v1404_v53 }
  0x89   :  { %v1656_v5 = vsub.f32 %v1566_v14, %v111_v3  ;;  %v1677_v23 = vsub.f32 %v1556_v12, %v101_v15 }
  0x8a   :  { %v1662_v9 = vsub.f32 %v1561_v13, %v102_v4 }
  0x8b   :  { %v143_v14 = vmul.f32 %v1656_v5, %v1656_v5  ;;  %1408 = vmatpush.bf16.msra.mxu3 %v1403_v59 }
  0x8c   :  { %v134_v13 = vmul.f32 %v1662_v9, %v1662_v9  ;;  %571 = vmatpush.bf16.msra.mxu1 %v1403_v59 }
  0x8d   :  { %v183_v27 = vsel %vm43_vm0, %v143_v14, 0.0 }
  0x8e   :  { %181 = vadd.xlane.f32.xlu0 %v180_v6  ;;  %148 = vadd.xlane.f32.xlu1 %v147_v7  ;;  %v85_v10 = vpop.xlane.xlu0 %84  ;;  %v61_v16 = vpop.xlane.xlu2 %60  ;;  %v156_v29 = vsel %vm43_vm0, %v134_v13, 0.0 }
  0x8f   :  { %v58_v11 = vpop.xlane.xlu1 %57  ;;  %178 = vadd.xlane.f32.xlu2 %v177_v8  ;;  %v104_v17 = vmul.f32 %v1609_v34, %v61_v16  ;;  %v112_v32 = vmul.f32 %v1609_v34, %v85_v10 }
  0x90   :  { %v103_v22 = vmul.f32 %v1609_v34, %v58_v11 }
  0x91   :  { %v1680_v26 = vsub.f32 %v1587_v20, %v104_v17  ;;  %v133_v20 = vmul.f32 %v1677_v23, %v1677_v23 }
  0x92   :  { %v1687_v30 = vsub.f32 %v1582_v19, %v103_v22  ;;  %v1698_v19 = vsub.f32 %v1577_v18, %v112_v32 }
  0x93   :  { %v136_v12 = vmul.f32 %v1680_v26, %v1680_v26  ;;  %v153_v37 = vsel %vm43_vm0, %v133_v20, 0.0 }
  0x94   :  { %v135_v35 = vmul.f32 %v1687_v30, %v1687_v30  ;;  %v144_v43 = vmul.f32 %v1698_v19, %v1698_v19 }
  0x95   :  { %v162_v36 = vsel %vm43_vm0, %v136_v12, 0.0 }
  0x96   :  { %184 = vadd.xlane.f32.xlu0 %v183_v27  ;;  %66 = vadd.xlane.f32.xlu1 %v65_v28  ;;  %v91_v31 = vpop.xlane.xlu0 %90  ;;  %v159_v40 = vsel %vm43_vm0, %v135_v35, 0.0  ;;  %v88_v41 = vpop.xlane.xlu2 %87 }
  0x97   :  { %157 = vadd.xlane.f32.xlu2 %v156_v29  ;;  %v114_v33 = vmul.f32 %v1609_v34, %v91_v31  ;;  %v113_v42 = vmul.f32 %v1609_v34, %v88_v41 }
  0x99   :  { %v1703_v38 = vsub.f32 %v1598_v24, %v114_v33  ;;  %v1712_v44 = vsub.f32 %v1603_v25, %v113_v42  ;;  %v186_v24 = vsel %vm43_vm0, %v144_v43, 0.0  ;;  %v1402_v25 = vld [vmem:[%s2643_s3 + $0x8] sm:$0xff] }
  0x9a   :  { %1405 = vmatpush.bf16.msra.mxu2 %v1402_v25  ;;  %501 = vmatpush.bf16.msra.mxu0 %v1402_v25 }
  0x9b   :  { %v146_v18 = vmul.f32 %v1703_v38, %v1703_v38  ;;  %v145_v46 = vmul.f32 %v1712_v44, %v1712_v44 }
  0x9d   :  { %v192_v45 = vsel %vm43_vm0, %v146_v18, 0.0  ;;  %v189_v47 = vsel %vm43_vm0, %v145_v46, 0.0 }
  0x9e   :  { %163 = vadd.xlane.f32.xlu0 %v162_v36  ;;  %154 = vadd.xlane.f32.xlu1 %v153_v37 }
  0x9f   :  { %160 = vadd.xlane.f32.xlu2 %v159_v40  ;;  %1406 = vmatpush.bf16.msra.mxu2 %v1401_v57 }
  0xa0   :  { %502 = vmatpush.bf16.msra.mxu0 %v1401_v57 }
  0xa6   :  { %187 = vadd.xlane.f32.xlu1 %v186_v24 }
  0xa7   :  { %193 = vadd.xlane.f32.xlu2 %v192_v45 }
  0xae   :  { %190 = vadd.xlane.f32.xlu1 %v189_v47 }
  0xf1   :  { %v173_v49 = vpop.xlane.xlu0 %172 }
  0xf2   :  { %v203_v50 = vmul.f32 %v173_v49, %v1609_v34 }
  0xf4   :  { %v1726_v56 = vadd.f32 1e-05, %v203_v50 }
  0xf6   :  { %1416 = vrsqrt.f32 %v1726_v56  ;;  %vm313_vm3 = vweird.f32 %v1726_v56 }
  0xf9   :  { %v64_v60 = vpop.xlane.xlu0 %63  ;;  %v176_v61 = vpop.xlane.xlu1 %175 }
  0xfa   :  { %v105_v62 = vmul.f32 %v1609_v34, %v64_v60  ;;  %v152_v63 = vpop.xlane.xlu2 %151  ;;  %v204_v0 = vmul.f32 %v176_v61, %v1609_v34 }
  0xfb   :  { %v196_v1 = vmul.f32 %v152_v63, %v1609_v34 }
  0xfc   :  { %v1738_v3 = vpop.eup %1416  ;;  %v1741_v2 = vsub.f32 %v1623_v48, %v105_v62  ;;  %v220_v4 = vadd.f32 1e-05, %v204_v0 }
  0xfd   :  { %v308_v6 = vmul.f32 %v1738_v3, %v1726_v56  ;;  %v1745_v7 = vadd.f32 1e-05, %v196_v1  ;;  %vm314_vm2 = vweird.f32 %v1738_v3 }
  0xfe   :  { %1418 = vrsqrt.f32 %v220_v4  ;;  %v137_v8 = vmul.f32 %v1741_v2, %v1741_v2  ;;  %vm323_vm4 = vweird.f32 %v220_v4  ;;  %vm1793_vm6 = vmor %vm313_vm3, %vm314_vm2 }
  0xff   :  { %v309_v10 = vmul.f32 %v1738_v3, %v308_v6  ;;  %1420 = vrsqrt.f32 %v1745_v7  ;;  %vm243_vm7 = vweird.f32 %v1745_v7 }
 0x100   :  { %v165_v11 = vsel %vm43_vm0, %v137_v8, 0.0 }
 0x101   :  { %166 = vadd.xlane.f32.xlu0 %v165_v11  ;;  %v182_v15 = vpop.xlane.xlu0 %181  ;;  %v149_v48 = vpop.xlane.xlu1 %148  ;;  %v310_v13 = vmul.f32 0.5, %v309_v10 }
 0x102   :  { %v206_v16 = vmul.f32 %v182_v15, %v1609_v34  ;;  %v179_v14 = vpop.xlane.xlu2 %178  ;;  %v195_v17 = vmul.f32 %v149_v48, %v1609_v34 }
 0x103   :  { %v205_v22 = vmul.f32 %v179_v14, %v1609_v34  ;;  %v311_v33 = vsub.f32 1.5, %v310_v13 }
 0x104   :  { %v1755_v27 = vpop.eup %1418  ;;  %v1757_v28 = vadd.f32 1e-05, %v206_v16  ;;  %v1759_v29 = vadd.f32 1e-05, %v195_v17 }
 0x105   :  { %v1761_v31 = vpop.eup %1420  ;;  %v318_v32 = vmul.f32 %v1755_v27, %v220_v4  ;;  %v1764_v12 = vadd.f32 1e-05, %v205_v22  ;;  %v312_v45 = vmul.f32 %v1738_v3, %v311_v33  ;;  %vm324_vm5 = vweird.f32 %v1755_v27 }
 0x106   :  { %v238_v20 = vmul.f32 %v1761_v31, %v1745_v7  ;;  %1422 = vrsqrt.f32 %v1757_v28  ;;  %vm244_vm8 = vweird.f32 %v1761_v31  ;;  %vm1808_vm9 = vmor %vm323_vm4, %vm324_vm5  ;;  %vm343_vm10 = vweird.f32 %v1757_v28 }
 0x107   :  { %v319_v35 = vmul.f32 %v1755_v27, %v318_v32  ;;  %1424 = vrsqrt.f32 %v1764_v12  ;;  %v316_v0 = vsel %vm1793_vm6, %v1738_v3, %v312_v45  ;;  %vm333_vm11 = vweird.f32 %v1764_v12  ;;  %vm1830_vm12 = vmor %vm243_vm7, %vm244_vm8  ;;  %v1840_v32 = vld [vmem:[%s2641_s1] ss:$0 sm:$0xff] }
 0x108   :  { %v239_v36 = vmul.f32 %v1761_v31, %v238_v20  ;;  %1426 = vrsqrt.f32 %v1759_v29  ;;  %v395_v16 = vmul.f32 %v316_v0, %v1612_v39  ;;  %vm233_vm13 = vweird.f32 %v1759_v29 }
 0x109   :  { %v320_v37 = vmul.f32 0.5, %v319_v35  ;;  %v185_v40 = vpop.xlane.xlu0 %184  ;;  %v67_v41 = vpop.xlane.xlu1 %66 }
 0x10a   :  { %v240_v42 = vmul.f32 0.5, %v239_v36  ;;  %v207_v43 = vmul.f32 %v185_v40, %v1609_v34  ;;  %v158_v18 = vpop.xlane.xlu2 %157  ;;  %v106_v24 = vmul.f32 %v1609_v34, %v67_v41 }
 0x10b   :  { %v321_v46 = vsub.f32 1.5, %v320_v37  ;;  %v198_v47 = vmul.f32 %v158_v18, %v1609_v34  ;;  %v415_v18 = vmul.f32 %v1840_v32, %v395_v16 }
 0x10c   :  { %v1778_v49 = vpop.eup %1422  ;;  %v1782_v50 = vadd.f32 1e-05, %v207_v43  ;;  %v241_v53 = vsub.f32 1.5, %v240_v42  ;;  %v1802_v63 = vsub.f32 %v1671_v21, %v106_v24 }
 0x10d   :  { %v1784_v25 = vpop.eup %1424  ;;  %v322_v57 = vmul.f32 %v1755_v27, %v321_v46  ;;  %v338_v59 = vmul.f32 %v1778_v49, %v1757_v28  ;;  %v1789_v60 = vadd.f32 1e-05, %v198_v47  ;;  %vm344_vm15 = vweird.f32 %v1778_v49  ;;  %v1870_v47 = vld [vmem:[%s2642_s2] ss:$0 sm:$0xff] }
 0x10e   :  { %v1791_v61 = vpop.eup %1426  ;;  %v328_v56 = vmul.f32 %v1784_v25, %v1764_v12  ;;  %1428 = vrsqrt.f32 %v1782_v50  ;;  %v242_v3 = vmul.f32 %v1761_v31, %v241_v53  ;;  %vm334_vm1 = vweird.f32 %v1784_v25  ;;  %vm1882_vm3 = vmor %vm343_vm10, %vm344_vm15 }
 0x10f   :  { %v339_v6 = vmul.f32 %v1778_v49, %v338_v59  ;;  %v228_v8 = vmul.f32 %v1791_v61, %v1759_v29  ;;  %v326_v21 = vsel %vm1808_vm9, %v1755_v27, %v322_v57  ;;  %1430 = vrsqrt.f32 %v1789_v60  ;;  %vm1891_vm4 = vmor %vm333_vm11, %vm334_vm1 }
 0x110   :  { %v329_v10 = vmul.f32 %v1784_v25, %v328_v56  ;;  %v138_v27 = vmul.f32 %v1802_v63, %v1802_v63  ;;  %v396_v39 = vmul.f32 %v326_v21, %v1627_v51  ;;  %vm234_vm14 = vweird.f32 %v1791_v61 }
 0x111   :  { %v340_v4 = vmul.f32 0.5, %v339_v6  ;;  %v229_v11 = vmul.f32 %v1791_v61, %v228_v8  ;;  %v164_v15 = vpop.xlane.xlu0 %163  ;;  %v155_v48 = vpop.xlane.xlu1 %154  ;;  %v246_v37 = vsel %vm1830_vm12, %v1761_v31, %v242_v3  ;;  %vm235_vm2 = vmor %vm233_vm13, %vm234_vm14  ;;  %vm263_vm5 = vweird.f32 %v1789_v60 }
 0x112   :  { %v330_v17 = vmul.f32 0.5, %v329_v10  ;;  %v200_v13 = vmul.f32 %v164_v15, %v1609_v34  ;;  %v161_v22 = vpop.xlane.xlu2 %160  ;;  %v197_v33 = vmul.f32 %v155_v48, %v1609_v34  ;;  %v168_v36 = vsel %vm43_vm0, %v138_v27, 0.0 }
 0x113   :  { %v230_v20 = vmul.f32 0.5, %v229_v11  ;;  %v199_v7 = vmul.f32 %v161_v22, %v1609_v34  ;;  %v341_v40 = vsub.f32 1.5, %v340_v4  ;;  %169 = vadd.xlane.f32.xlu1 %v168_v36  ;;  %v416_v46 = vmul.f32 %v1840_v32, %v396_v39 }
 0x114   :  { %v1847_v35 = vadd.f32 1e-05, %v200_v13  ;;  %v331_v41 = vsub.f32 1.5, %v330_v17  ;;  %v1853_v42 = vpop.eup %1428  ;;  %v1864_v45 = vadd.f32 1e-05, %v197_v33  ;;  %v388_v53 = vmul.f32 %v246_v37, %v1629_v52 }
 0x115   :  { %v231_v51 = vsub.f32 1.5, %v230_v20  ;;  %v1857_v43 = vadd.f32 1e-05, %v199_v7  ;;  %v1860_v24 = vpop.eup %1430  ;;  %v342_v59 = vmul.f32 %v1778_v49, %v341_v40  ;;  %v348_v28 = vmul.f32 %v1853_v42, %v1782_v50 }
 0x116   :  { %1432 = vrsqrt.f32 %v1847_v35  ;;  %v258_v57 = vmul.f32 %v1860_v24, %v1789_v60  ;;  %v332_v56 = vmul.f32 %v1784_v25, %v331_v41  ;;  %v436_v21 = vadd.f32 %v1870_v47, %v416_v46 }
 0x117   :  { %v232_v31 = vmul.f32 %v1791_v61, %v231_v51  ;;  %1434 = vrsqrt.f32 %v1857_v43  ;;  %v346_v11 = vsel %vm1882_vm3, %v1778_v49, %v342_v59  ;;  %v349_v16 = vmul.f32 %v1853_v42, %v348_v28 }
 0x118   :  { %v259_v6 = vmul.f32 %v1860_v24, %v258_v57  ;;  %1436 = vrsqrt.f32 %v1864_v45  ;;  %v336_v15 = vsel %vm1891_vm4, %v1784_v25, %v332_v56  ;;  %v408_v13 = vmul.f32 %v1840_v32, %v388_v53 }
 0x119   :  { %v236_v52 = vsel %vm235_vm2, %v1791_v61, %v232_v31  ;;  %v188_v0 = vpop.xlane.xlu1 %187  ;;  %v435_v61 = vadd.f32 %v1870_v47, %v415_v18  ;;  %vm264_vm6 = vweird.f32 %v1860_v24  ;;  %v397_v39 = vmul.f32 %v336_v15, %v1643_v58 }
 0x11a   :  { %v387_v1 = vmul.f32 %v236_v52, %v1634_v54  ;;  %v194_v8 = vpop.xlane.xlu2 %193  ;;  %v260_v3 = vmul.f32 0.5, %v259_v6  ;;  %v208_v4 = vmul.f32 %v188_v0, %v1609_v34  ;;  %v398_v33 = vmul.f32 %v346_v11, %v1636_v55  ;;  %vm1938_vm7 = vmor %vm263_vm5, %vm264_vm6 }
 0x11b   :  { %v210_v12 = vmul.f32 %v194_v8, %v1609_v34  ;;  %v447_v48 = vpack.c.bf16 %v436_v21, %v435_v61  ;;  %v350_v41 = vmul.f32 0.5, %v349_v16  ;;  %v428_v58 = vadd.f32 %v1870_v47, %v408_v13 }
 0x11c   :  { %v1903_v10 = vpop.eup %1432  ;;  %v407_v54 = vmul.f32 %v1840_v32, %v387_v1  ;;  %v261_v14 = vsub.f32 1.5, %v260_v3  ;;  %v1914_v17 = vadd.f32 1e-05, %v208_v4  ;;  %vm253_vm8 = vweird.f32 %v1864_v45 }
 0x11d   :  { %v1917_v22 = vpop.eup %1434  ;;  %v278_v49 = vmul.f32 %v1903_v10, %v1847_v35  ;;  %1365 = vmatmul.msk.bf16.vlgmr.msra.gmra.mxu2 %vm43_vm0, %v447_v48  ;;  %1381 = vmatmul.msk.bf16.vlgmr.msra.gmra.mxu3 %vm43_vm0, %v447_v48  ;;  %v1925_v25 = vadd.f32 1e-05, %v210_v12  ;;  %v417_v53 = vmul.f32 %v1840_v32, %v397_v39  ;;  %v418_v62 = vmul.f32 %v1840_v32, %v398_v33 }
 0x11e   :  { %v1437_v27 = vpop.eup %1436  ;;  %v268_v20 = vmul.f32 %v1917_v22, %v1857_v43  ;;  %v427_v7 = vadd.f32 %v1870_v47, %v407_v54  ;;  %v262_v36 = vmul.f32 %v1860_v24, %v261_v14  ;;  %1438 = vrsqrt.f32 %v1914_v17 }
 0x11f   :  { %v248_v37 = vmul.f32 %v1437_v27, %v1864_v45  ;;  %v279_v55 = vmul.f32 %v1903_v10, %v278_v49  ;;  %1440 = vrsqrt.f32 %v1925_v25  ;;  %vm254_vm9 = vweird.f32 %v1437_v27 }
 0x120   :  { %v269_v31 = vmul.f32 %v1917_v22, %v268_v20  ;;  %v443_v46 = vpack.c.bf16 %v428_v58, %v427_v7  ;;  %v266_v57 = vsel %vm1938_vm7, %v1860_v24, %v262_v36  ;;  %v351_v56 = vsub.f32 1.5, %v350_v41  ;;  %vm255_vm12 = vmor %vm253_vm8, %vm254_vm9 }
 0x121   :  { %v191_v40 = vpop.xlane.xlu1 %190  ;;  %v249_v18 = vmul.f32 %v1437_v27, %v248_v37  ;;  %vm353_vm10 = vweird.f32 %v1782_v50  ;;  %v280_v0 = vmul.f32 0.5, %v279_v55  ;;  %vm354_vm11 = vweird.f32 %v1853_v42 }
 0x122   :  { %v209_v60 = vmul.f32 %v191_v40, %v1609_v34  ;;  %1361 = vmatmul.msk.bf16.vlgmr.msra.gmra.mxu0 %vm43_vm0, %v443_v46  ;;  %1377 = vmatmul.msk.bf16.vlgmr.msra.gmra.mxu1 %vm43_vm0, %v443_v46  ;;  %v390_v24 = vmul.f32 %v266_v57, %v1662_v9  ;;  %v270_v28 = vmul.f32 0.5, %v269_v31  ;;  %v437_v6 = vadd.f32 %v1870_v47, %v417_v53  ;;  %vm1972_vm13 = vmor %vm353_vm10, %vm354_vm11 }
 0x123   :  { %v250_v59 = vmul.f32 0.5, %v249_v18  ;;  %v438_v12 = vadd.f32 %v1870_v47, %v418_v62  ;;  %v352_v3 = vmul.f32 %v1853_v42, %v351_v56  ;;  %v281_v45 = vsub.f32 1.5, %v280_v0 }
 0x124   :  { %v1956_v52 = vadd.f32 1e-05, %v209_v60  ;;  %v1439_v1 = vpop.eup %1438  ;;  %vm363_vm14 = vweird.f32 %v1914_v17  ;;  %v410_v48 = vmul.f32 %v1840_v32, %v390_v24  ;;  %v271_v16 = vsub.f32 1.5, %v270_v28 }
 0x125   :  { %v251_v29 = vsub.f32 1.5, %v250_v59  ;;  %v1964_v8 = vpop.eup %1440  ;;  %v358_v21 = vmul.f32 %v1439_v1, %v1914_v17  ;;  %vm364_vm15 = vweird.f32 %v1439_v1  ;;  %v448_v50 = vpack.c.bf16 %v438_v12, %v437_v6 }
 0x126   :  { %1442 = vrsqrt.f32 %v1956_v52  ;;  %v378_v15 = vmul.f32 %v1964_v8, %v1925_v25  ;;  %v356_v13 = vsel %vm1972_vm13, %v1853_v42, %v352_v3  ;;  %vm283_vm1 = vweird.f32 %v1847_v35  ;;  %vm365_vm5 = vmor %vm363_vm14, %vm364_vm15 }
 0x127   :  { %v252_v61 = vmul.f32 %v1437_v27, %v251_v29  ;;  %v359_v54 = vmul.f32 %v1439_v1, %v358_v21  ;;  %vm284_vm2 = vweird.f32 %v1903_v10  ;;  %vm273_vm3 = vweird.f32 %v1857_v43 }
 0x128   :  { %vm274_vm4 = vweird.f32 %v1917_v22  ;;  %v379_v42 = vmul.f32 %v1964_v8, %v378_v15  ;;  %v430_v33 = vadd.f32 %v1870_v47, %v410_v48  ;;  %v399_v43 = vmul.f32 %v356_v13, %v1656_v5  ;;  %vm2003_vm6 = vmor %vm283_vm1, %vm284_vm2 }
 0x129   :  { %v256_v4 = vsel %vm255_vm12, %v1437_v27, %v252_v61  ;;  %v360_v14 = vmul.f32 0.5, %v359_v54  ;;  %v282_v27 = vmul.f32 %v1903_v10, %v281_v45  ;;  %v272_v37 = vmul.f32 %v1917_v22, %v271_v16  ;;  %vm2008_vm7 = vmor %vm273_vm3, %vm274_vm4 }
 0x12a   :  { %v389_v11 = vmul.f32 %v256_v4, %v1677_v23  ;;  %v380_v55 = vmul.f32 0.5, %v379_v42  ;;  %v419_v46 = vmul.f32 %v1840_v32, %v399_v43  ;;  %vm373_vm8 = vweird.f32 %v1956_v52  ;;  %v2055_v43 = vld [vmem:[%s2646_s6] ss:$0 sm:$0xff] }
 0x12b   :  { %v361_v39 = vsub.f32 1.5, %v360_v14  ;;  %v286_v5 = vsel %vm2003_vm6, %v1903_v10, %v282_v27  ;;  %v276_v31 = vsel %vm2008_vm7, %v1917_v22, %v272_v37  ;;  %vm383_vm10 = vweird.f32 %v1925_v25 }
 0x12c   :  { %v409_v23 = vmul.f32 %v1840_v32, %v389_v11  ;;  %v1443_v49 = vpop.eup %1442  ;;  %v392_v57 = vmul.f32 %v286_v5, %v1680_v26  ;;  %v381_v10 = vsub.f32 1.5, %v380_v55  ;;  %v439_v22 = vadd.f32 %v1870_v47, %v419_v46 }
 0x12d   :  { %1366 = vmatmul.msk.bf16.gmra.mxu2 %vm43_vm0, %v448_v50  ;;  %1382 = vmatmul.msk.bf16.gmra.mxu3 %vm43_vm0, %v448_v50  ;;  %v368_v20 = vmul.f32 %v1443_v49, %v1956_v52  ;;  %v362_v17 = vmul.f32 %v1439_v1, %v361_v39  ;;  %vm374_vm9 = vweird.f32 %v1443_v49  ;;  %vm384_vm11 = vweird.f32 %v1964_v8 }
 0x12e   :  { %v429_v7 = vadd.f32 %v1870_v47, %v409_v23  ;;  %vm375_vm12 = vmor %vm373_vm8, %vm374_vm9  ;;  %v382_v0 = vmul.f32 %v1964_v8, %v381_v10  ;;  %v412_v52 = vmul.f32 %v1840_v32, %v392_v57 }
 0x12f   :  { %v369_v41 = vmul.f32 %v1443_v49, %v368_v20  ;;  %v366_v58 = vsel %vm365_vm5, %v1439_v1, %v362_v17  ;;  %vm385_vm13 = vmor %vm383_vm10, %vm384_vm11 }
 0x130   :  { %v444_v51 = vpack.c.bf16 %v430_v33, %v429_v7  ;;  %v400_v35 = vmul.f32 %v366_v58, %v1698_v19  ;;  %v391_v19 = vmul.f32 %v276_v31, %v1687_v30  ;;  %v386_v29 = vsel %vm385_vm13, %v1964_v8, %v382_v0 }
 0x131   :  { %v370_v18 = vmul.f32 0.5, %v369_v41  ;;  %v432_v1 = vadd.f32 %v1870_v47, %v412_v52  ;;  %v402_v28 = vmul.f32 %v386_v29, %v1703_v38 }
 0x132   :  { %1362 = vmatmul.msk.bf16.gmra.mxu0 %vm43_vm0, %v444_v51  ;;  %1378 = vmatmul.msk.bf16.gmra.mxu1 %vm43_vm0, %v444_v51  ;;  %v420_v53 = vmul.f32 %v1840_v32, %v400_v35  ;;  %v411_v26 = vmul.f32 %v1840_v32, %v391_v19 }
 0x133   :  { %v371_v60 = vsub.f32 1.5, %v370_v18  ;;  %v422_v21 = vmul.f32 %v1840_v32, %v402_v28 }
 0x134   :  { %v440_v59 = vadd.f32 %v1870_v47, %v420_v53  ;;  %v431_v25 = vadd.f32 %v1870_v47, %v411_v26 }
 0x135   :  { %v372_v62 = vmul.f32 %v1443_v49, %v371_v60  ;;  %v442_v8 = vadd.f32 %v1870_v47, %v422_v21 }
 0x136   :  { %v449_v56 = vpack.c.bf16 %v440_v59, %v439_v22  ;;  %v445_v6 = vpack.c.bf16 %v432_v1, %v431_v25 }
 0x137   :  { %v376_v30 = vsel %vm375_vm12, %v1443_v49, %v372_v62 }
 0x138   :  { %v401_v24 = vmul.f32 %v376_v30, %v1712_v44 }
 0x13a   :  { %v421_v61 = vmul.f32 %v1840_v32, %v401_v24 }
 0x13c   :  { %v441_v12 = vadd.f32 %v1870_v47, %v421_v61 }
 0x13d   :  { %1367 = vmatmul.msk.bf16.gmra.mxu2 %vm43_vm0, %v449_v56  ;;  %1383 = vmatmul.msk.bf16.gmra.mxu3 %vm43_vm0, %v449_v56 }
 0x13e   :  { %v450_v3 = vpack.c.bf16 %v442_v8, %v441_v12 }
 0x142   :  { %1363 = vmatmul.msk.bf16.gmra.mxu0 %vm43_vm0, %v445_v6  ;;  %1379 = vmatmul.msk.bf16.gmra.mxu1 %vm43_vm0, %v445_v6 }
 0x14d   :  { %1368 = vmatmul.msk.bf16.gmra.mxu2 %vm43_vm0, %v450_v3  ;;  %1384 = vmatmul.msk.bf16.gmra.mxu3 %vm43_vm0, %v450_v3 }
 0x174   :  { %v167_v44 = vpop.xlane.xlu0 %166 }
 0x175   :  { %v201_v38 = vmul.f32 %v167_v44, %v1609_v34 }
 0x177   :  { %v217_v9 = vadd.f32 1e-05, %v201_v38 }
 0x179   :  { %1444 = vrsqrt.f32 %v217_v9  ;;  %vm293_vm14 = vweird.f32 %v217_v9 }
 0x17f   :  { %v1445_v45 = vpop.eup %1444 }
 0x180   :  { %v288_v4 = vmul.f32 %v1445_v45, %v217_v9  ;;  %vm294_vm15 = vweird.f32 %v1445_v45 }
 0x181   :  { %vm295_vm1 = vmor %vm293_vm14, %vm294_vm15 }
 0x182   :  { %v289_v54 = vmul.f32 %v1445_v45, %v288_v4 }
 0x184   :  { %v290_v16 = vmul.f32 0.5, %v289_v54 }
 0x186   :  { %v170_v11 = vpop.xlane.xlu1 %169  ;;  %v291_v14 = vsub.f32 1.5, %v290_v16 }
 0x187   :  { %v202_v15 = vmul.f32 %v170_v11, %v1609_v34 }
 0x188   :  { %v292_v13 = vmul.f32 %v1445_v45, %v291_v14 }
 0x189   :  { %v218_v48 = vadd.f32 1e-05, %v202_v15 }
 0x18a   :  { %v296_v27 = vsel %vm295_vm1, %v1445_v45, %v292_v13 }
 0x18b   :  { %1446 = vrsqrt.f32 %v218_v48  ;;  %v393_v20 = vmul.f32 %v296_v27, %v1741_v2  ;;  %vm303_vm3 = vweird.f32 %v218_v48 }
 0x18d   :  { %v413_v36 = vmul.f32 %v1840_v32, %v393_v20 }
 0x18f   :  { %v433_v41 = vadd.f32 %v1870_v47, %v413_v36 }
 0x191   :  { %v1447_v50 = vpop.eup %1446 }
 0x192   :  { %v298_v23 = vmul.f32 %v1447_v50, %v218_v48  ;;  %vm304_vm2 = vweird.f32 %v1447_v50 }
 0x193   :  { %vm305_vm4 = vmor %vm303_vm3, %vm304_vm2 }
 0x194   :  { %v299_v49 = vmul.f32 %v1447_v50, %v298_v23 }
 0x196   :  { %v300_v39 = vmul.f32 0.5, %v299_v49 }
 0x198   :  { %v301_v42 = vsub.f32 1.5, %v300_v39 }
 0x19a   :  { %v302_v7 = vmul.f32 %v1447_v50, %v301_v42 }
 0x19c   :  { %v306_v34 = vsel %vm305_vm4, %v1447_v50, %v302_v7 }
 0x19d   :  { %v394_v33 = vmul.f32 %v306_v34, %v1802_v63 }
 0x19f   :  { %v414_v37 = vmul.f32 %v1840_v32, %v394_v33  ;;  %v573_v2 = vpop.f32.mrf.mxu1 }
 0x1a0   :  { %v593_v17 = vpop.f32.mrf.mxu3  ;;  %v2065_v63 = vadd.f32 %v2055_v43, %v573_v2 }
 0x1a1   :  { %v2060_v40 = vadd.f32 %v2055_v43, %v593_v17  ;;  %v434_v51 = vadd.f32 %v1870_v47, %v414_v37 }
 0x1a2   :  { %v2071_v55 = vmul.f32 0.70710677, %v2065_v63 }
 0x1a3   :  { %v2068_v58 = vmul.f32 0.70710677, %v2060_v40  ;;  %v446_v5 = vpack.c.bf16 %v434_v51, %v433_v41  ;;  %v2119_v51 = vld [vmem:[%s2645_s4] ss:$0 sm:$0xff] }
 0x1a4   :  { %v645_v47 = vmul.f32 %v2071_v55, %v2071_v55 }
 0x1a5   :  { %v965_v32 = vmul.f32 %v2068_v58, %v2068_v58  ;;  %1364 = vmatmul.msk.bf16.gmra.mxu0 %vm43_vm0, %v446_v5  ;;  %1380 = vmatmul.msk.bf16.gmra.mxu1 %vm43_vm0, %v446_v5 }
 0x1a6   :  { %v2079_v18 = vmin.f32 %v645_v47, 16.0 }
 0x1a7   :  { %v966_v35 = vmin.f32 %v965_v32, 16.0  ;;  %v575_v57 = vpop.f32.mrf.mxu1 }
 0x1a8   :  { %v595_v31 = vpop.f32.mrf.mxu3  ;;  %v647_v19 = vmul.f32 2.1237322e-06, %v2079_v18  ;;  %v658_v10 = vmul.f32 3.8918573e-05, %v2079_v18  ;;  %v2087_v59 = vadd.f32 %v2055_v43, %v575_v57 }
 0x1a9   :  { %v967_v46 = vmul.f32 2.1237322e-06, %v966_v35  ;;  %v978_v60 = vmul.f32 3.8918573e-05, %v966_v35  ;;  %v2082_v53 = vadd.f32 %v2055_v43, %v595_v31 }
 0x1aa   :  { %v648_v56 = vadd.f32 0.00028619796, %v647_v19  ;;  %v659_v0 = vadd.f32 0.001143296, %v658_v10  ;;  %v2093_v29 = vmul.f32 0.70710677, %v2087_v59 }
 0x1ab   :  { %v968_v22 = vadd.f32 0.00028619796, %v967_v46  ;;  %v979_v62 = vadd.f32 0.001143296, %v978_v60  ;;  %v2090_v26 = vmul.f32 0.70710677, %v2082_v53  ;;  %v524_v46 = vpop.f32.mrf.mxu2 }
 0x1ac   :  { %v649_v25 = vmul.f32 %v648_v56, %v2079_v18  ;;  %v660_v1 = vmul.f32 %v659_v0, %v2079_v18  ;;  %v685_v61 = vmul.f32 %v2093_v29, %v2093_v29 }
 0x1ad   :  { %v969_v52 = vmul.f32 %v968_v22, %v966_v35  ;;  %v980_v30 = vmul.f32 %v979_v62, %v966_v35  ;;  %v1005_v24 = vmul.f32 %v2090_v26, %v2090_v26  ;;  %v504_v22 = vpop.f32.mrf.mxu0 }
 0x1ae   :  { %v650_v21 = vadd.f32 0.0036580483, %v649_v25  ;;  %v661_v12 = vadd.f32 0.014752088, %v660_v1  ;;  %v2103_v38 = vmin.f32 %v685_v61, 16.0  ;;  %v2131_v25 = vadd.f32 %v2119_v51, %v524_v46 }
 0x1af   :  { %v970_v28 = vadd.f32 0.0036580483, %v969_v52  ;;  %v981_v6 = vadd.f32 0.014752088, %v980_v30  ;;  %v2101_v8 = vmin.f32 %v1005_v24, 16.0 }
 0x1b0   :  { %v651_v9 = vmul.f32 %v650_v21, %v2079_v18  ;;  %v662_v45 = vmul.f32 %v661_v12, %v2079_v18  ;;  %v687_v48 = vmul.f32 2.1237322e-06, %v2103_v38  ;;  %v698_v7 = vmul.f32 3.8918573e-05, %v2103_v38  ;;  %v598_v56 = vpop.f32.mrf.mxu3 }
 0x1b1   :  { %v971_v3 = vmul.f32 %v970_v28, %v966_v35  ;;  %v982_v44 = vmul.f32 %v981_v6, %v966_v35  ;;  %v1007_v4 = vmul.f32 2.1237322e-06, %v2101_v8  ;;  %v1018_v54 = vmul.f32 3.8918573e-05, %v2101_v8  ;;  %v578_v28 = vpop.f32.mrf.mxu1 }
 0x1b2   :  { %v652_v16 = vadd.f32 0.05243302, %v651_v9  ;;  %v663_v14 = vadd.f32 0.112945676, %v662_v45  ;;  %v688_v27 = vadd.f32 0.00028619796, %v687_v48  ;;  %v2143_v61 = vadd.f32 %v2055_v43, %v598_v56 }
 0x1b3   :  { %v972_v11 = vadd.f32 0.05243302, %v971_v3  ;;  %v983_v15 = vadd.f32 0.112945676, %v982_v44  ;;  %v1008_v50 = vadd.f32 0.00028619796, %v1007_v4  ;;  %v2154_v4 = vadd.f32 %v2055_v43, %v578_v28 }
 0x1b4   :  { %v1019_v49 = vadd.f32 0.001143296, %v1018_v54  ;;  %v653_v39 = vmul.f32 %v652_v16, %v2079_v18  ;;  %v664_v42 = vmul.f32 %v663_v14, %v2079_v18  ;;  %v689_v37 = vmul.f32 %v688_v27, %v2103_v38 }
 0x1b5   :  { %v973_v13 = vmul.f32 %v972_v11, %v966_v35  ;;  %v984_v23 = vmul.f32 %v983_v15, %v966_v35  ;;  %v1009_v20 = vmul.f32 %v1008_v50, %v2101_v8  ;;  %v699_v19 = vadd.f32 0.001143296, %v698_v7 }
 0x1b6   :  { %v1020_v36 = vmul.f32 %v1019_v49, %v2101_v8  ;;  %v654_v17 = vadd.f32 0.18741608, %v653_v39  ;;  %v665_v2 = vadd.f32 0.4994258, %v664_v42  ;;  %v690_v31 = vadd.f32 0.0036580483, %v689_v37 }
 0x1b7   :  { %v974_v34 = vadd.f32 0.18741608, %v973_v13  ;;  %v985_v33 = vadd.f32 0.4994258, %v984_v23  ;;  %v1010_v41 = vadd.f32 0.0036580483, %v1009_v20  ;;  %v700_v24 = vmul.f32 %v699_v19, %v2103_v38 }
 0x1b8   :  { %v1021_v47 = vadd.f32 0.014752088, %v1020_v36  ;;  %v666_v60 = vmul.f32 %v665_v2, %v2079_v18  ;;  %v655_v62 = vmul.f32 %v654_v17, %v2079_v18  ;;  %v2136_v6 = vmul.f32 0.5, %v2060_v40 }
 0x1b9   :  { %v975_v5 = vmul.f32 %v974_v34, %v966_v35  ;;  %v986_v32 = vmul.f32 %v985_v33, %v966_v35  ;;  %v1011_v57 = vmul.f32 %v1010_v41, %v2101_v8  ;;  %v691_v35 = vmul.f32 %v690_v31, %v2103_v38 }
 0x1ba   :  { %v2126_v0 = vadd.f32 1.0, %v666_v60  ;;  %v1022_v30 = vmul.f32 %v1021_v47, %v2101_v8  ;;  %v2139_v18 = vadd.f32 %v2119_v51, %v504_v22  ;;  %v2146_v21 = vmul.f32 0.5, %v2065_v63 }
 0x1bb   :  { %v2123_v10 = vadd.f32 1.0, %v986_v32  ;;  %v1012_v52 = vadd.f32 0.05243302, %v1011_v57  ;;  %v976_v1 = vadd.f32 1.1283791, %v975_v5  ;;  %v2149_v3 = vmul.f32 0.5, %v2082_v53 }
 0x1bc   :  { %v656_v12 = vadd.f32 1.1283791, %v655_v62  ;;  %v1023_v9 = vadd.f32 0.112945676, %v1022_v30  ;;  %v692_v45 = vadd.f32 0.05243302, %v691_v35  ;;  %vm673_vm5 = vweird.f32 %v2126_v0 }
 0x1bd   :  { %1448 = vrcp.f32 %v2123_v10  ;;  %v1013_v44 = vmul.f32 %v1012_v52, %v2101_v8  ;;  %v997_v40 = vand.u32 2147483647, %v2123_v10  ;;  %v977_v54 = vmul.f32 %v976_v1, %v2068_v58 }
 0x1be   :  { %1450 = vrcp.f32 %v2126_v0  ;;  %v999_v11 = vand.u32 2147483648, %v2123_v10  ;;  %v701_v63 = vadd.f32 0.014752088, %v700_v24  ;;  %vm993_vm0 = vweird.f32 %v2123_v10 }
 0x1bf   :  { %v1014_v15 = vadd.f32 0.18741608, %v1013_v44  ;;  %v1024_v53 = vmul.f32 %v1023_v9, %v2101_v8  ;;  %v693_v48 = vmul.f32 %v692_v45, %v2103_v38  ;;  %v2162_v16 = vmul.f32 0.70710677, %v2143_v61 }
 0x1c0   :  { %v657_v50 = vmul.f32 %v656_v12, %v2071_v55  ;;  %v702_v13 = vmul.f32 %v701_v63, %v2103_v38  ;;  %vm2169_vm6 = vcmp.eq.f32.partialorder %v997_v40, 8.507059e+37  ;;  %v677_v39 = vand.u32 2147483647, %v2126_v0  ;;  %v600_v40 = vpop.f32.mrf.mxu3 }
 0x1c1   :  { %v1015_v58 = vmul.f32 %v1014_v15, %v2101_v8  ;;  %v1025_v42 = vadd.f32 0.4994258, %v1024_v53  ;;  %v1000_v20 = vor.u32 1.1754944e-38, %v999_v11  ;;  %v679_v55 = vand.u32 2147483648, %v2126_v0 }
 0x1c2   :  { %v703_v34 = vadd.f32 0.112945676, %v702_v13  ;;  %v694_v37 = vadd.f32 0.18741608, %v693_v48  ;;  %v1045_v17 = vmul.f32 %v2162_v16, %v2162_v16  ;;  %v2181_v32 = vmul.f32 0.70710677, %v2154_v4 }
 0x1c3   :  { %v1449_v14 = vpop.eup %1448  ;;  %v1026_v36 = vmul.f32 %v1025_v42, %v2101_v8  ;;  %v1016_v41 = vadd.f32 1.1283791, %v1015_v58  ;;  %vm2187_vm9 = vcmp.eq.f32.partialorder %v677_v39, 8.507059e+37  ;;  %v680_v22 = vor.u32 1.1754944e-38, %v679_v55 }
 0x1c4   :  { %v1451_v23 = vpop.eup %1450  ;;  %v989_v49 = vmul.f32 %v1449_v14, %v2123_v10  ;;  %v704_v5 = vmul.f32 %v703_v34, %v2103_v38  ;;  %vm994_vm7 = vweird.f32 %v1449_v14  ;;  %v2185_v46 = vmin.f32 %v1045_v17, 16.0 }
 0x1c5   :  { %v669_v7 = vmul.f32 %v1451_v23, %v2126_v0  ;;  %v2183_v31 = vadd.f32 1.0, %v1026_v36  ;;  %vm674_vm8 = vweird.f32 %v1451_v23  ;;  %v695_v62 = vmul.f32 %v694_v37, %v2103_v38  ;;  %vm995_vm10 = vmor %vm993_vm0, %vm994_vm7 }
 0x1c6   :  { %v990_v33 = vsub.f32 1.0, %v989_v49  ;;  %v705_v57 = vadd.f32 0.4994258, %v704_v5  ;;  %v2196_v52 = vmul.f32 %v1016_v41, %v2090_v26  ;;  %v725_v35 = vmul.f32 %v2181_v32, %v2181_v32  ;;  %vm675_vm11 = vmor %vm673_vm5, %vm674_vm8 }
 0x1c7   :  { %v670_v2 = vsub.f32 1.0, %v669_v7  ;;  %1452 = vrcp.f32 %v2183_v31  ;;  %v1037_v24 = vand.u32 2147483647, %v2183_v31  ;;  %v1047_v28 = vmul.f32 2.1237322e-06, %v2185_v46 }
 0x1c8   :  { %v991_v47 = vmul.f32 %v1449_v14, %v990_v33  ;;  %v706_v30 = vmul.f32 %v705_v57, %v2103_v38  ;;  %v1058_v10 = vmul.f32 3.8918573e-05, %v2185_v46  ;;  %v1039_v44 = vand.u32 2147483648, %v2183_v31 }
 0x1c9   :  { %v671_v60 = vmul.f32 %v1451_v23, %v670_v2  ;;  %v1048_v45 = vadd.f32 0.00028619796, %v1047_v28  ;;  %v2213_v63 = vadd.f32 1.1283791, %v695_v62  ;;  %v2216_v53 = vmin.f32 %v725_v35, 16.0 }
 0x1ca   :  { %v992_v19 = vadd.f32 %v1449_v14, %v991_v47  ;;  %v2209_v38 = vadd.f32 1.0, %v706_v30  ;;  %v1059_v11 = vadd.f32 0.001143296, %v1058_v10  ;;  %vm1033_vm12 = vweird.f32 %v2183_v31 }
 0x1cb   :  { %v672_v56 = vadd.f32 %v1451_v23, %v671_v60  ;;  %v1049_v58 = vmul.f32 %v1048_v45, %v2185_v46  ;;  %vm2225_vm13 = vcmp.eq.f32.partialorder %v1037_v24, 8.507059e+37  ;;  %v1040_v39 = vor.u32 1.1754944e-38, %v1039_v44 }
 0x1cc   :  { %v996_v1 = vsel %vm995_vm10, %v1449_v14, %v992_v19  ;;  %1454 = vrcp.f32 %v2209_v38  ;;  %v1060_v13 = vmul.f32 %v1059_v11, %v2185_v46  ;;  %v727_v34 = vmul.f32 2.1237322e-06, %v2216_v53 }
 0x1cd   :  { %v1001_v12 = vsel %vm2169_vm6, %v1000_v20, %v996_v1  ;;  %v676_v26 = vsel %vm675_vm11, %v1451_v23, %v672_v56  ;;  %v1453_v48 = vpop.eup %1452  ;;  %v1050_v42 = vadd.f32 0.0036580483, %v1049_v58  ;;  %v738_v33 = vmul.f32 3.8918573e-05, %v2216_v53 }
 0x1ce   :  { %v1002_v9 = vmul.f32 %v1001_v12, %v977_v54  ;;  %v681_v0 = vsel %vm2187_vm9, %v680_v22, %v676_v26  ;;  %v2221_v54 = vadd.f32 %v2055_v43, %v600_v40  ;;  %v1029_v49 = vmul.f32 %v1453_v48, %v2183_v31 }
 0x1cf   :  { %v682_v15 = vmul.f32 %v681_v0, %v657_v50  ;;  %v1061_v20 = vadd.f32 0.014752088, %v1060_v13  ;;  %vm1034_vm14 = vweird.f32 %v1453_v48  ;;  %vm713_vm15 = vweird.f32 %v2209_v38 }
 0x1d0   :  { %v1393_v14 = vclamps-f32 %v1002_v9, 1.0  ;;  %v1030_v55 = vsub.f32 1.0, %v1029_v49  ;;  %v1051_v37 = vmul.f32 %v1050_v42, %v2185_v46  ;;  %v728_v47 = vadd.f32 0.00028619796, %v727_v34  ;;  %vm1035_vm1 = vmor %vm1033_vm12, %vm1034_vm14 }
 0x1d1   :  { %v1385_v23 = vclamps-f32 %v682_v15, 1.0  ;;  %v1062_v17 = vmul.f32 %v1061_v20, %v2185_v46  ;;  %v739_v60 = vadd.f32 0.001143296, %v738_v33  ;;  %v719_v19 = vand.u32 2147483648, %v2209_v38 }
 0x1d2   :  { %v1293_v27 = vadd.f32 1.0, %v1393_v14  ;;  %v1455_v2 = vpop.eup %1454  ;;  %v1031_v5 = vmul.f32 %v1453_v48, %v1030_v55  ;;  %v729_v30 = vmul.f32 %v728_v47, %v2216_v53  ;;  %v2250_v1 = vmul.f32 0.70710677, %v2221_v54 }
 0x1d3   :  { %v1285_v7 = vadd.f32 1.0, %v1385_v23  ;;  %v709_v57 = vmul.f32 %v1455_v2, %v2209_v38  ;;  %v1063_v56 = vadd.f32 0.112945676, %v1062_v17  ;;  %v740_v35 = vmul.f32 %v739_v60, %v2216_v53 }
 0x1d4   :  { %v1309_v36 = vmul.f32 %v1293_v27, %v2136_v6  ;;  %v1052_v6 = vadd.f32 0.05243302, %v1051_v37  ;;  %v1032_v62 = vadd.f32 %v1453_v48, %v1031_v5  ;;  %v717_v28 = vand.u32 2147483647, %v2209_v38  ;;  %v506_v38 = vpop.f32.mrf.mxu0 }
 0x1d5   :  { %v1301_v41 = vmul.f32 %v1285_v7, %v2146_v21  ;;  %v1064_v10 = vmul.f32 %v1063_v56, %v2185_v46  ;;  %v730_v31 = vadd.f32 0.0036580483, %v729_v30  ;;  %vm714_vm2 = vweird.f32 %v1455_v2 }
 0x1d6   :  { %v1325_v8 = vmul.f32 %v1309_v36, %v2131_v25  ;;  %v710_v25 = vsub.f32 1.0, %v709_v57  ;;  %v1053_v21 = vmul.f32 %v1052_v6, %v2185_v46  ;;  %v1036_v24 = vsel %vm1035_vm1, %v1453_v48, %v1032_v62  ;;  %vm715_vm3 = vmor %vm713_vm15, %vm714_vm2  ;;  %v603_v62 = vpop.f32.mrf.mxu3 }
 0x1d7   :  { %v1317_v22 = vmul.f32 %v1301_v41, %v2139_v18  ;;  %v526_v18 = vpop.f32.mrf.mxu2  ;;  %v1041_v12 = vsel %vm2225_vm13, %v1040_v39, %v1036_v24  ;;  %v741_v44 = vadd.f32 0.014752088, %v740_v35  ;;  %v1065_v9 = vadd.f32 0.4994258, %v1064_v10  ;;  %v580_v39 = vpop.f32.mrf.mxu1 }
 0x1d8   :  { %1341 = vst [vmem:[%s2647_s7 + $0x40] sm:$0xff] %v1325_v8  ;;  %v711_v26 = vmul.f32 %v1455_v2, %v710_v25  ;;  %v1042_v40 = vmul.f32 %v1041_v12, %v2196_v52  ;;  %v731_v0 = vmul.f32 %v730_v31, %v2216_v53  ;;  %v1085_v45 = vmul.f32 %v2250_v1, %v2250_v1 }
 0x1d9   :  { %1333 = vst [vmem:[%s2647_s7] sm:$0xff] %v1317_v22  ;;  %v720_v15 = vor.u32 1.1754944e-38, %v719_v19  ;;  %v1054_v48 = vadd.f32 0.18741608, %v1053_v21  ;;  %v742_v14 = vmul.f32 %v741_v44, %v2216_v53  ;;  %v1066_v13 = vmul.f32 %v1065_v9, %v2185_v46 }
 0x1da   :  { %v712_v11 = vadd.f32 %v1455_v2, %v711_v26  ;;  %v1394_v58 = vclamps-f32 %v1042_v40, 1.0  ;;  %v732_v23 = vadd.f32 0.05243302, %v731_v0  ;;  %v2267_v49 = vmin.f32 %v1085_v45, 16.0 }
 0x1db   :  { %v697_v52 = vmul.f32 %v2213_v63, %v2093_v29  ;;  %vm718_vm4 = vcmp.eq.f32.partialorder %v717_v28, 8.507059e+37  ;;  %v743_v27 = vadd.f32 0.112945676, %v742_v14  ;;  %v2271_v7 = vadd.f32 1.0, %v1066_v13 }
 0x1dc   :  { %v716_v50 = vsel %vm715_vm3, %v1455_v2, %v712_v11  ;;  %v1294_v42 = vadd.f32 1.0, %v1394_v58  ;;  %v733_v55 = vmul.f32 %v732_v23, %v2216_v53  ;;  %v1055_v33 = vmul.f32 %v1054_v48, %v2185_v46 }
 0x1dd   :  { %v721_v20 = vsel %vm718_vm4, %v720_v15, %v716_v50  ;;  %v744_v36 = vmul.f32 %v743_v27, %v2216_v53  ;;  %v1087_v37 = vmul.f32 2.1237322e-06, %v2267_v49  ;;  %v527_v29 = vadd.f32 %v2119_v51, %v526_v18 }
 0x1de   :  { %v722_v34 = vmul.f32 %v721_v20, %v697_v52  ;;  %v1310_v63 = vmul.f32 %v1294_v42, %v2149_v3  ;;  %1456 = vrcp.f32 %v2271_v7  ;;  %v2281_v17 = vadd.f32 %v2055_v43, %v580_v39 }
 0x1df   :  { %v734_v41 = vadd.f32 0.18741608, %v733_v55  ;;  %v745_v5 = vadd.f32 0.4994258, %v744_v36  ;;  %v507_v60 = vadd.f32 %v2119_v51, %v506_v38  ;;  %v529_v46 = vpop.f32.mrf.mxu2  ;;  %v1088_v8 = vadd.f32 0.00028619796, %v1087_v37  ;;  %v583_v13 = vpop.f32.mrf.mxu1 }
 0x1e0   :  { %v1386_v2 = vclamps-f32 %v722_v34, 1.0  ;;  %v1326_v47 = vmul.f32 %v1310_v63, %v527_v29  ;;  %v1098_v57 = vmul.f32 3.8918573e-05, %v2267_v49  ;;  %v614_v19 = vmul.f32 0.5, %v2087_v59 }
 0x1e1   :  { %v1056_v22 = vadd.f32 1.1283791, %v1055_v33  ;;  %v746_v3 = vmul.f32 %v745_v5, %v2216_v53  ;;  %v735_v56 = vmul.f32 %v734_v41, %v2216_v53  ;;  %v1089_v30 = vmul.f32 %v1088_v8, %v2267_v49 }
 0x1e2   :  { %v1286_v6 = vadd.f32 1.0, %v1386_v2  ;;  %1342 = vst [vmem:[%s2647_s7 + $0x48] sm:$0xff] %v1326_v47  ;;  %v1099_v25 = vadd.f32 0.001143296, %v1098_v57  ;;  %v2293_v21 = vmul.f32 0.70710677, %v2281_v17  ;;  %v2296_v59 = vadd.f32 %v2119_v51, %v529_v46 }
 0x1e3   :  { %v1077_v18 = vand.u32 2147483647, %v2271_v7  ;;  %v2299_v24 = vadd.f32 1.0, %v746_v3  ;;  %v1090_v10 = vadd.f32 0.0036580483, %v1089_v30  ;;  %v2305_v12 = vadd.f32 %v2055_v43, %v603_v62 }
 0x1e4   :  { %v1302_v35 = vmul.f32 %v1286_v6, %v614_v19  ;;  %v1457_v28 = vpop.eup %1456  ;;  %v1100_v31 = vmul.f32 %v1099_v25, %v2267_v49  ;;  %v765_v53 = vmul.f32 %v2293_v21, %v2293_v21  ;;  %v2308_v44 = vmul.f32 0.5, %v2143_v61  ;;  %v509_v19 = vpop.f32.mrf.mxu0 }
 0x1e5   :  { %v1057_v40 = vmul.f32 %v1056_v22, %v2162_v16  ;;  %v1069_v9 = vmul.f32 %v1457_v28, %v2271_v7  ;;  %vm1073_vm0 = vweird.f32 %v2271_v7  ;;  %v1079_v0 = vand.u32 2147483648, %v2271_v7 }
 0x1e6   :  { %v1318_v26 = vmul.f32 %v1302_v35, %v507_v60  ;;  %v736_v45 = vadd.f32 1.1283791, %v735_v56  ;;  %1458 = vrcp.f32 %v2299_v24  ;;  %v1091_v15 = vmul.f32 %v1090_v10, %v2267_v49 }
 0x1e7   :  { %v1070_v11 = vsub.f32 1.0, %v1069_v9  ;;  %v1101_v61 = vadd.f32 0.014752088, %v1100_v31  ;;  %v2319_v48 = vmin.f32 %v765_v53, 16.0  ;;  %vm1074_vm5 = vweird.f32 %v1457_v28 }
 0x1e8   :  { %1334 = vst [vmem:[%s2647_s7 + $0x8] sm:$0xff] %v1318_v26  ;;  %vm2321_vm6 = vcmp.eq.f32.partialorder %v1077_v18, 8.507059e+37  ;;  %v757_v14 = vand.u32 2147483647, %v2299_v24  ;;  %v2327_v58 = vmul.f32 0.70710677, %v2305_v12  ;;  %v737_v42 = vmul.f32 %v736_v45, %v2181_v32  ;;  %vm1075_vm7 = vmor %vm1073_vm0, %vm1074_vm5 }
 0x1e9   :  { %v1071_v23 = vmul.f32 %v1457_v28, %v1070_v11  ;;  %v1092_v52 = vadd.f32 0.05243302, %v1091_v15  ;;  %v1102_v50 = vmul.f32 %v1101_v61, %v2267_v49  ;;  %v767_v27 = vmul.f32 2.1237322e-06, %v2319_v48 }
 0x1ea   :  { %v1080_v39 = vor.u32 1.1754944e-38, %v1079_v0  ;;  %v778_v20 = vmul.f32 3.8918573e-05, %v2319_v48  ;;  %v1125_v55 = vmul.f32 %v2327_v58, %v2327_v58  ;;  %v2336_v36 = vadd.f32 %v2055_v43, %v583_v13 }
 0x1eb   :  { %v1072_v38 = vadd.f32 %v1457_v28, %v1071_v23  ;;  %v1103_v34 = vadd.f32 0.112945676, %v1102_v50  ;;  %v768_v33 = vadd.f32 0.00028619796, %v767_v27  ;;  %vm753_vm8 = vweird.f32 %v2299_v24 }
 0x1ec   :  { %v1459_v37 = vpop.eup %1458  ;;  %v759_v32 = vand.u32 2147483648, %v2299_v24  ;;  %v779_v29 = vadd.f32 0.001143296, %v778_v20  ;;  %v2343_v63 = vmin.f32 %v1125_v55, 16.0  ;;  %vm2346_vm9 = vcmp.eq.f32.partialorder %v757_v14, 8.507059e+37 }
 0x1ed   :  { %v1076_v2 = vsel %vm1075_vm7, %v1457_v28, %v1072_v38  ;;  %v749_v41 = vmul.f32 %v1459_v37, %v2299_v24  ;;  %v1093_v47 = vmul.f32 %v1092_v52, %v2267_v49  ;;  %v1104_v60 = vmul.f32 %v1103_v34, %v2267_v49  ;;  %v531_v24 = vpop.f32.mrf.mxu2 }
 0x1ee   :  { %v1081_v7 = vsel %vm2321_vm6, %v1080_v39, %v1076_v2  ;;  %v769_v46 = vmul.f32 %v768_v33, %v2319_v48  ;;  %v780_v8 = vmul.f32 %v779_v29, %v2319_v48  ;;  %v1127_v22 = vmul.f32 2.1237322e-06, %v2343_v63 }
 0x1ef   :  { %v1082_v57 = vmul.f32 %v1081_v7, %v1057_v40  ;;  %v750_v6 = vsub.f32 1.0, %v749_v41  ;;  %v2358_v3 = vmul.f32 0.70710677, %v2336_v36  ;;  %vm754_vm10 = vweird.f32 %v1459_v37 }
 0x1f0   :  { %v1105_v62 = vadd.f32 0.4994258, %v1104_v60  ;;  %v770_v56 = vadd.f32 0.0036580483, %v769_v46  ;;  %v781_v30 = vadd.f32 0.014752088, %v780_v8  ;;  %vm755_vm11 = vmor %vm753_vm8, %vm754_vm10  ;;  %v510_v33 = vadd.f32 %v2119_v51, %v509_v19  ;;  %v605_v46 = vpop.f32.mrf.mxu3 }
 0x1f1   :  { %v1395_v25 = vclamps-f32 %v1082_v57, 1.0  ;;  %v751_v35 = vmul.f32 %v1459_v37, %v750_v6  ;;  %v1094_v18 = vadd.f32 0.18741608, %v1093_v47  ;;  %v1128_v28 = vadd.f32 0.00028619796, %v1127_v22 }
 0x1f2   :  { %v1106_v10 = vmul.f32 %v1105_v62, %v2267_v49  ;;  %v771_v31 = vmul.f32 %v770_v56, %v2319_v48  ;;  %v782_v53 = vmul.f32 %v781_v30, %v2319_v48  ;;  %v1138_v26 = vmul.f32 3.8918573e-05, %v2343_v63 }
 0x1f3   :  { %v1295_v40 = vadd.f32 1.0, %v1395_v25  ;;  %v752_v9 = vadd.f32 %v1459_v37, %v751_v35  ;;  %v1129_v0 = vmul.f32 %v1128_v28, %v2343_v63  ;;  %v805_v45 = vmul.f32 %v2358_v3, %v2358_v3 }
 0x1f4   :  { %v760_v11 = vor.u32 1.1754944e-38, %v759_v32  ;;  %v2370_v15 = vadd.f32 1.0, %v1106_v10  ;;  %v772_v61 = vadd.f32 0.05243302, %v771_v31  ;;  %v783_v16 = vadd.f32 0.112945676, %v782_v53  ;;  %v585_v53 = vpop.f32.mrf.mxu1 }
 0x1f5   :  { %v1311_v14 = vmul.f32 %v1295_v40, %v2308_v44  ;;  %v756_v13 = vsel %vm755_vm11, %v1459_v37, %v752_v9  ;;  %v1130_v23 = vadd.f32 0.0036580483, %v1129_v0  ;;  %v1139_v52 = vadd.f32 0.001143296, %v1138_v26 }
 0x1f6   :  { %v761_v50 = vsel %vm2346_vm9, %v760_v11, %v756_v13  ;;  %1460 = vrcp.f32 %v2370_v15  ;;  %v773_v20 = vmul.f32 %v772_v61, %v2319_v48  ;;  %v2378_v55 = vmin.f32 %v805_v45, 16.0 }
 0x1f7   :  { %v1327_v27 = vmul.f32 %v1311_v14, %v2296_v59  ;;  %v762_v39 = vmul.f32 %v761_v50, %v737_v42  ;;  %v784_v38 = vmul.f32 %v783_v16, %v2319_v48  ;;  %v1131_v44 = vmul.f32 %v1130_v23, %v2343_v63  ;;  %v511_v42 = vpop.f32.mrf.mxu0 }
 0x1f8   :  { %v1140_v34 = vmul.f32 %v1139_v52, %v2343_v63  ;;  %v1095_v59 = vmul.f32 %v1094_v18, %v2267_v49  ;;  %v615_v32 = vmul.f32 0.5, %v2154_v4  ;;  %v2390_v29 = vadd.f32 %v2119_v51, %v531_v24 }
 0x1f9   :  { %1343 = vst [vmem:[%s2647_s7 + $0x50] sm:$0xff] %v1327_v27  ;;  %v1387_v37 = vclamps-f32 %v762_v39, 1.0  ;;  %v785_v2 = vadd.f32 0.4994258, %v784_v38  ;;  %v2393_v47 = vmul.f32 0.5, %v2221_v54  ;;  %v2397_v57 = vadd.f32 %v2119_v51, %v511_v42 }
 0x1fa   :  { %v1141_v41 = vadd.f32 0.014752088, %v1140_v34  ;;  %v774_v7 = vadd.f32 0.18741608, %v773_v20  ;;  %v807_v60 = vmul.f32 2.1237322e-06, %v2378_v55  ;;  %v2409_v35 = vadd.f32 %v2055_v43, %v605_v46 }
 0x1fb   :  { %v1287_v5 = vadd.f32 1.0, %v1387_v37  ;;  %v786_v49 = vmul.f32 %v785_v2, %v2319_v48  ;;  %v1132_v4 = vadd.f32 0.05243302, %v1131_v44  ;;  %v1096_v22 = vadd.f32 1.1283791, %v1095_v59 }
 0x1fc   :  { %v1461_v8 = vpop.eup %1460  ;;  %v1142_v19 = vmul.f32 %v1141_v41, %v2343_v63  ;;  %v2403_v54 = vmul.f32 0.5, %v2281_v17  ;;  %v818_v25 = vmul.f32 3.8918573e-05, %v2378_v55  ;;  %v775_v10 = vmul.f32 %v774_v7, %v2319_v48 }
 0x1fd   :  { %v1303_v6 = vmul.f32 %v1287_v5, %v615_v32  ;;  %v1109_v62 = vmul.f32 %v1461_v8, %v2370_v15  ;;  %v2405_v56 = vadd.f32 1.0, %v786_v49  ;;  %v808_v31 = vadd.f32 0.00028619796, %v807_v60 }
 0x1fe   :  { %v1143_v30 = vadd.f32 0.112945676, %v1142_v19  ;;  %v1117_v26 = vand.u32 2147483647, %v2370_v15  ;;  %v1119_v40 = vand.u32 2147483648, %v2370_v15  ;;  %v1133_v17 = vmul.f32 %v1132_v4, %v2343_v63 }
 0x1ff   :  { %v1319_v18 = vmul.f32 %v1303_v6, %v510_v33  ;;  %v1110_v28 = vsub.f32 1.0, %v1109_v62  ;;  %1462 = vrcp.f32 %v2405_v56  ;;  %vm1114_vm12 = vweird.f32 %v1461_v8 }
 0x200   :  { %v1144_v0 = vmul.f32 %v1143_v30, %v2343_v63  ;;  %v809_v48 = vmul.f32 %v808_v31, %v2378_v55  ;;  %v1097_v45 = vmul.f32 %v1096_v22, %v2250_v1  ;;  %v819_v11 = vadd.f32 0.001143296, %v818_v25 }
 0x201   :  { %1335 = vst [vmem:[%s2647_s7 + $0x10] sm:$0xff] %v1319_v18  ;;  %v1111_v9 = vmul.f32 %v1461_v8, %v1110_v28  ;;  %v2423_v61 = vmul.f32 0.70710677, %v2409_v35  ;;  %v2426_v16 = vadd.f32 %v2055_v43, %v585_v53  ;;  %vm1113_vm13 = vweird.f32 %v2370_v15 }
 0x202   :  { %v776_v13 = vadd.f32 1.1283791, %v775_v10  ;;  %v1145_v23 = vadd.f32 0.4994258, %v1144_v0  ;;  %vm1115_vm14 = vmor %vm1113_vm13, %vm1114_vm12  ;;  %v1120_v52 = vor.u32 1.1754944e-38, %v1119_v40  ;;  %v820_v27 = vmul.f32 %v819_v11, %v2378_v55 }
 0x203   :  { %v1112_v14 = vadd.f32 %v1461_v8, %v1111_v9  ;;  %v810_v50 = vadd.f32 0.0036580483, %v809_v48  ;;  %v1165_v1 = vmul.f32 %v2423_v61, %v2423_v61  ;;  %vm1118_vm15 = vcmp.eq.f32.partialorder %v1117_v26, 8.507059e+37 }
 0x204   :  { %v1134_v24 = vadd.f32 0.18741608, %v1133_v17  ;;  %v1146_v20 = vmul.f32 %v1145_v23, %v2343_v63  ;;  %v821_v34 = vadd.f32 0.014752088, %v820_v27  ;;  %v2436_v15 = vmul.f32 0.70710677, %v2426_v16 }
 0x205   :  { %v1116_v39 = vsel %vm1115_vm14, %v1461_v8, %v1112_v14  ;;  %v1463_v38 = vpop.eup %1462  ;;  %v2433_v33 = vmin.f32 %v1165_v1, 16.0  ;;  %v777_v59 = vmul.f32 %v776_v13, %v2293_v21  ;;  %v811_v2 = vmul.f32 %v810_v50, %v2378_v55 }
 0x206   :  { %v1121_v44 = vsel %vm1118_vm15, %v1120_v52, %v1116_v39  ;;  %v789_v42 = vmul.f32 %v1463_v38, %v2405_v56  ;;  %v2440_v32 = vadd.f32 1.0, %v1146_v20  ;;  %v822_v41 = vmul.f32 %v821_v34, %v2378_v55 }
 0x207   :  { %v1122_v37 = vmul.f32 %v1121_v44, %v1097_v45  ;;  %v1167_v5 = vmul.f32 2.1237322e-06, %v2433_v33  ;;  %v1178_v7 = vmul.f32 3.8918573e-05, %v2433_v33  ;;  %v797_v8 = vand.u32 2147483647, %v2405_v56 }
 0x208   :  { %v790_v46 = vsub.f32 1.0, %v789_v42  ;;  %1464 = vrcp.f32 %v2440_v32  ;;  %vm794_vm1 = vweird.f32 %v1463_v38  ;;  %v799_v21 = vand.u32 2147483648, %v2405_v56 }
 0x209   :  { %v1396_v60 = vclamps-f32 %v1122_v37, 1.0  ;;  %v823_v49 = vadd.f32 0.112945676, %v822_v41  ;;  %v845_v4 = vmul.f32 %v2436_v15, %v2436_v15  ;;  %v1168_v22 = vadd.f32 0.00028619796, %v1167_v5 }
 0x20a   :  { %v791_v6 = vmul.f32 %v1463_v38, %v790_v46  ;;  %v1179_v62 = vadd.f32 0.001143296, %v1178_v7  ;;  %vm793_vm2 = vweird.f32 %v2405_v56  ;;  %v1135_v30 = vmul.f32 %v1134_v24, %v2343_v63  ;;  %v608_v24 = vpop.f32.mrf.mxu3 }
 0x20b   :  { %v1296_v19 = vadd.f32 1.0, %v1396_v60  ;;  %v812_v25 = vadd.f32 0.05243302, %v811_v2  ;;  %v824_v18 = vmul.f32 %v823_v49, %v2378_v55  ;;  %v1169_v31 = vmul.f32 %v1168_v22, %v2433_v33  ;;  %vm795_vm3 = vmor %vm793_vm2, %vm794_vm1 }
 0x20c   :  { %v792_v10 = vadd.f32 %v1463_v38, %v791_v6  ;;  %v1180_v53 = vmul.f32 %v1179_v62, %v2433_v33  ;;  %vm798_vm4 = vcmp.eq.f32.partialorder %v797_v8, 8.507059e+37  ;;  %v800_v26 = vor.u32 1.1754944e-38, %v799_v21 }
 0x20d   :  { %v1312_v28 = vmul.f32 %v1296_v19, %v2393_v47  ;;  %v825_v40 = vadd.f32 0.4994258, %v824_v18  ;;  %v2458_v17 = vmin.f32 %v845_v4, 16.0  ;;  %v1170_v0 = vadd.f32 0.0036580483, %v1169_v31  ;;  %v534_v19 = vpop.f32.mrf.mxu2 }
 0x20e   :  { %v1465_v56 = vpop.eup %1464  ;;  %v796_v9 = vsel %vm795_vm3, %v1463_v38, %v792_v10  ;;  %v1181_v48 = vadd.f32 0.014752088, %v1180_v53  ;;  %v1136_v47 = vadd.f32 1.1283791, %v1135_v30  ;;  %v1159_v14 = vand.u32 2147483648, %v2440_v32 }
 0x20f   :  { %v1328_v63 = vmul.f32 %v1312_v28, %v2390_v29  ;;  %v801_v45 = vsel %vm798_vm4, %v800_v26, %v796_v9  ;;  %v1149_v11 = vmul.f32 %v1465_v56, %v2440_v32  ;;  %v813_v23 = vmul.f32 %v812_v25, %v2378_v55 }
 0x210   :  { %v802_v13 = vmul.f32 %v801_v45, %v777_v59  ;;  %v826_v52 = vmul.f32 %v825_v40, %v2378_v55  ;;  %v1182_v29 = vmul.f32 %v1181_v48, %v2433_v33  ;;  %v1171_v27 = vmul.f32 %v1170_v0, %v2433_v33 }
 0x211   :  { %1344 = vst [vmem:[%s2647_s7 + $0x58] sm:$0xff] %v1328_v63  ;;  %v1150_v50 = vsub.f32 1.0, %v1149_v11  ;;  %v847_v1 = vmul.f32 2.1237322e-06, %v2458_v17  ;;  %v858_v39 = vmul.f32 3.8918573e-05, %v2458_v17  ;;  %vm1154_vm0 = vweird.f32 %v1465_v56 }
 0x212   :  { %v1388_v20 = vclamps-f32 %v802_v13, 1.0  ;;  %v1157_v38 = vand.u32 2147483647, %v2440_v32  ;;  %v2473_v44 = vadd.f32 1.0, %v826_v52  ;;  %v1183_v34 = vadd.f32 0.112945676, %v1182_v29  ;;  %v610_v63 = vpop.f32.mrf.mxu3 }
 0x213   :  { %v1151_v37 = vmul.f32 %v1465_v56, %v1150_v50  ;;  %v848_v59 = vadd.f32 0.00028619796, %v847_v1  ;;  %v859_v42 = vadd.f32 0.001143296, %v858_v39  ;;  %vm1153_vm5 = vweird.f32 %v2440_v32 }
 0x214   :  { %v1288_v2 = vadd.f32 1.0, %v1388_v20  ;;  %v1160_v41 = vor.u32 1.1754944e-38, %v1159_v14  ;;  %1466 = vrcp.f32 %v2473_v44  ;;  %v814_v7 = vadd.f32 0.18741608, %v813_v23  ;;  %vm1155_vm6 = vmor %vm1153_vm5, %vm1154_vm0  ;;  %v2510_v23 = vld [vmem:[%s2646_s6] ss:$0 sm:$0xff] }
 0x215   :  { %v1152_v5 = vadd.f32 %v1465_v56, %v1151_v37  ;;  %v1172_v60 = vadd.f32 0.05243302, %v1171_v27  ;;  %v1184_v46 = vmul.f32 %v1183_v34, %v2433_v33  ;;  %v849_v21 = vmul.f32 %v848_v59, %v2458_v17 }
 0x216   :  { %v1304_v8 = vmul.f32 %v1288_v2, %v2403_v54  ;;  %v860_v49 = vmul.f32 %v859_v42, %v2458_v17  ;;  %v2482_v4 = vadd.f32 %v2055_v43, %v608_v24  ;;  %v1137_v32 = vmul.f32 %v1136_v47, %v2327_v58 }
 0x217   :  { %v1156_v6 = vsel %vm1155_vm6, %v1465_v56, %v1152_v5  ;;  %vm1158_vm7 = vcmp.eq.f32.partialorder %v1157_v38, 8.507059e+37  ;;  %v1185_v22 = vadd.f32 0.4994258, %v1184_v46  ;;  %v850_v25 = vadd.f32 0.0036580483, %v849_v21 }
 0x218   :  { %v1320_v62 = vmul.f32 %v1304_v8, %v2397_v57  ;;  %v1161_v30 = vsel %vm1158_vm7, %v1160_v41, %v1156_v6  ;;  %v861_v18 = vadd.f32 0.014752088, %v860_v49  ;;  %v815_v28 = vmul.f32 %v814_v7, %v2378_v55  ;;  %v514_v7 = vpop.f32.mrf.mxu0 }
 0x219   :  { %v1162_v54 = vmul.f32 %v1161_v30, %v1137_v32  ;;  %v1173_v10 = vmul.f32 %v1172_v60, %v2433_v33  ;;  %v1186_v31 = vmul.f32 %v1185_v22, %v2433_v33  ;;  %v535_v58 = vadd.f32 %v2119_v51, %v534_v19 }
 0x21a   :  { %v1467_v43 = vpop.eup %1466  ;;  %1336 = vst [vmem:[%s2647_s7 + $0x18] sm:$0xff] %v1320_v62  ;;  %v862_v53 = vmul.f32 %v861_v18, %v2458_v17  ;;  %v2495_v57 = vmul.f32 0.70710677, %v2482_v4  ;;  %v625_v26 = vmul.f32 0.5, %v2305_v12  ;;  %v851_v56 = vmul.f32 %v850_v25, %v2458_v17 }
 0x21b   :  { %v1397_v40 = vclamps-f32 %v1162_v54, 1.0  ;;  %v829_v55 = vmul.f32 %v1467_v43, %v2473_v44  ;;  %v839_v9 = vand.u32 2147483648, %v2473_v44  ;;  %v2501_v0 = vadd.f32 1.0, %v1186_v31 }
 0x21c   :  { %v863_v48 = vadd.f32 0.112945676, %v862_v53  ;;  %v1205_v45 = vmul.f32 %v2495_v57, %v2495_v57  ;;  %v816_v11 = vadd.f32 1.1283791, %v815_v28  ;;  %v1174_v13 = vadd.f32 0.18741608, %v1173_v10 }
 0x21d   :  { %v1297_v47 = vadd.f32 1.0, %v1397_v40  ;;  %v830_v14 = vsub.f32 1.0, %v829_v55  ;;  %vm834_vm8 = vweird.f32 %v1467_v43  ;;  %v837_v12 = vand.u32 2147483647, %v2473_v44 }
 0x21e   :  { %1468 = vrcp.f32 %v2501_v0  ;;  %v2513_v52 = vadd.f32 %v2510_v23, %v610_v63  ;;  %v852_v27 = vadd.f32 0.05243302, %v851_v56  ;;  %v864_v1 = vmul.f32 %v863_v48, %v2458_v17 }
 0x21f   :  { %v1313_v29 = vmul.f32 %v1297_v47, %v625_v26  ;;  %v831_v50 = vmul.f32 %v1467_v43, %v830_v14  ;;  %vm833_vm9 = vweird.f32 %v2473_v44  ;;  %v840_v39 = vor.u32 1.1754944e-38, %v839_v9 }
 0x220   :  { %v2517_v24 = vmin.f32 %v1205_v45, 16.0  ;;  %v1175_v34 = vmul.f32 %v1174_v13, %v2433_v33  ;;  %v865_v37 = vadd.f32 0.4994258, %v864_v1  ;;  %v817_v59 = vmul.f32 %v816_v11, %v2358_v3  ;;  %vm835_vm10 = vmor %vm833_vm9, %vm834_vm8 }
 0x221   :  { %v1329_v20 = vmul.f32 %v1313_v29, %v535_v58  ;;  %v832_v38 = vadd.f32 %v1467_v43, %v831_v50  ;;  %v2525_v41 = vmul.f32 0.70710677, %v2513_v52  ;;  %vm838_vm11 = vcmp.eq.f32.partialorder %v837_v12, 8.507059e+37 }
 0x222   :  { %v1207_v42 = vmul.f32 2.1237322e-06, %v2517_v24  ;;  %v1218_v2 = vmul.f32 3.8918573e-05, %v2517_v24  ;;  %v853_v33 = vmul.f32 %v852_v27, %v2458_v17  ;;  %v866_v5 = vmul.f32 %v865_v37, %v2458_v17 }
 0x223   :  { %1345 = vst [vmem:[%s2647_s7 + $0x60] sm:$0xff] %v1329_v20  ;;  %v836_v44 = vsel %vm835_vm10, %v1467_v43, %v832_v38  ;;  %v1245_v21 = vmul.f32 %v2525_v41, %v2525_v41  ;;  %v1176_v19 = vadd.f32 1.1283791, %v1175_v34  ;;  %v515_v25 = vadd.f32 %v2119_v51, %v514_v7  ;;  %v536_v34 = vpop.f32.mrf.mxu2 }
 0x224   :  { %v1469_v3 = vpop.eup %1468  ;;  %v841_v60 = vsel %vm838_vm11, %v840_v39, %v836_v44  ;;  %v1208_v46 = vadd.f32 0.00028619796, %v1207_v42  ;;  %v1219_v8 = vadd.f32 0.001143296, %v1218_v2  ;;  %v2535_v6 = vadd.f32 1.0, %v866_v5 }
 0x225   :  { %v842_v49 = vmul.f32 %v841_v60, %v817_v59  ;;  %v1189_v32 = vmul.f32 %v1469_v3, %v2501_v0  ;;  %v2539_v30 = vmin.f32 %v1245_v21, 16.0  ;;  %v617_v18 = vmul.f32 0.5, %v2336_v36 }
 0x226   :  { %v1209_v22 = vmul.f32 %v1208_v46, %v2517_v24  ;;  %v1220_v62 = vmul.f32 %v1219_v8, %v2517_v24  ;;  %v1197_v10 = vand.u32 2147483647, %v2501_v0  ;;  %v1199_v31 = vand.u32 2147483648, %v2501_v0 }
 0x227   :  { %v1389_v54 = vclamps-f32 %v842_v49, 1.0  ;;  %v1190_v28 = vsub.f32 1.0, %v1189_v32  ;;  %v854_v43 = vadd.f32 0.18741608, %v853_v33  ;;  %1470 = vrcp.f32 %v2535_v6 }
 0x228   :  { %vm1194_vm12 = vweird.f32 %v1469_v3  ;;  %v1221_v26 = vadd.f32 0.014752088, %v1220_v62  ;;  %v1177_v40 = vmul.f32 %v1176_v19, %v2423_v61  ;;  %v1210_v55 = vadd.f32 0.0036580483, %v1209_v22 }
 0x229   :  { %v1289_v58 = vadd.f32 1.0, %v1389_v54  ;;  %v1191_v53 = vmul.f32 %v1469_v3, %v1190_v28  ;;  %v1247_v51 = vmul.f32 2.1237322e-06, %v2539_v30  ;;  %v1258_v36 = vmul.f32 3.8918573e-05, %v2539_v30 }
 0x22a   :  { %vm1193_vm13 = vweird.f32 %v2501_v0  ;;  %v1222_v9 = vmul.f32 %v1221_v26, %v2517_v24  ;;  %vm1198_vm15 = vcmp.eq.f32.partialorder %v1197_v10, 8.507059e+37  ;;  %v1200_v48 = vor.u32 1.1754944e-38, %v1199_v31 }
 0x22b   :  { %v1305_v56 = vmul.f32 %v1289_v58, %v617_v18  ;;  %v1192_v63 = vadd.f32 %v1469_v3, %v1191_v53  ;;  %vm1195_vm14 = vmor %vm1193_vm13, %vm1194_vm12  ;;  %v1248_v45 = vadd.f32 0.00028619796, %v1247_v51  ;;  %v1259_v47 = vadd.f32 0.001143296, %v1258_v36  ;;  %v588_v51 = vpop.f32.mrf.mxu1  ;;  %v516_v36 = vpop.f32.mrf.mxu0 }
 0x22c   :  { %v855_v61 = vmul.f32 %v854_v43, %v2458_v17  ;;  %v1223_v13 = vadd.f32 0.112945676, %v1222_v9  ;;  %v1211_v50 = vmul.f32 %v1210_v55, %v2517_v24  ;;  %v626_v20 = vmul.f32 0.5, %v2409_v35  ;;  %v2567_v35 = vld [vmem:[%s2645_s4] ss:$0 sm:$0xff] }
 0x22d   :  { %v1321_v11 = vmul.f32 %v1305_v56, %v515_v25  ;;  %v1196_v14 = vsel %vm1195_vm14, %v1469_v3, %v1192_v63  ;;  %v1471_v12 = vpop.eup %1470  ;;  %v1249_v27 = vmul.f32 %v1248_v45, %v2539_v30  ;;  %v1260_v0 = vmul.f32 %v1259_v47, %v2539_v30 }
 0x22e   :  { %v1201_v29 = vsel %vm1198_vm15, %v1200_v48, %v1196_v14  ;;  %v869_v39 = vmul.f32 %v1471_v12, %v2535_v6  ;;  %v1224_v17 = vmul.f32 %v1223_v13, %v2517_v24  ;;  %v856_v59 = vadd.f32 1.1283791, %v855_v61 }
 0x22f   :  { %1337 = vst [vmem:[%s2647_s7 + $0x20] sm:$0xff] %v1321_v11  ;;  %v1202_v1 = vmul.f32 %v1201_v29, %v1177_v40  ;;  %v1261_v38 = vadd.f32 0.014752088, %v1260_v0  ;;  %v879_v2 = vand.u32 2147483648, %v2535_v6  ;;  %v1212_v44 = vadd.f32 0.05243302, %v1211_v50 }
 0x230   :  { %v870_v42 = vsub.f32 1.0, %v869_v39  ;;  %v1225_v33 = vadd.f32 0.4994258, %v1224_v17  ;;  %v1250_v5 = vadd.f32 0.0036580483, %v1249_v27  ;;  %vm874_vm1 = vweird.f32 %v1471_v12 }
 0x231   :  { %v1398_v37 = vclamps-f32 %v1202_v1, 1.0  ;;  %v1262_v3 = vmul.f32 %v1261_v38, %v2539_v30  ;;  %v877_v46 = vand.u32 2147483647, %v2535_v6  ;;  %v537_v8 = vadd.f32 %v2567_v35, %v536_v34 }
 0x232   :  { %v871_v60 = vmul.f32 %v1471_v12, %v870_v42  ;;  %v1226_v21 = vmul.f32 %v1225_v33, %v2517_v24  ;;  %vm873_vm2 = vweird.f32 %v2535_v6  ;;  %v880_v22 = vor.u32 1.1754944e-38, %v879_v2 }
 0x233   :  { %v1298_v7 = vadd.f32 1.0, %v1398_v37  ;;  %v1263_v49 = vadd.f32 0.112945676, %v1262_v3  ;;  %vm875_vm3 = vmor %vm873_vm2, %vm874_vm1  ;;  %v1213_v62 = vmul.f32 %v1212_v44, %v2517_v24  ;;  %v1251_v18 = vmul.f32 %v1250_v5, %v2539_v30 }
 0x234   :  { %v872_v32 = vadd.f32 %v1471_v12, %v871_v60  ;;  %v1227_v25 = vadd.f32 1.0, %v1226_v21  ;;  %v857_v10 = vmul.f32 %v856_v59, %v2436_v15  ;;  %vm878_vm4 = vcmp.eq.f32.partialorder %v877_v46, 8.507059e+37 }
 0x235   :  { %v1314_v19 = vmul.f32 %v1298_v7, %v626_v20  ;;  %v1264_v54 = vmul.f32 %v1263_v49, %v2539_v30  ;;  %v1214_v53 = vadd.f32 0.18741608, %v1213_v62  ;;  %v1252_v26 = vadd.f32 0.05243302, %v1251_v18 }
 0x236   :  { %v876_v31 = vsel %vm875_vm3, %v1471_v12, %v872_v32  ;;  %1472 = vrcp.f32 %v1227_v25  ;;  %v2581_v56 = vadd.f32 %v2510_v23, %v588_v51  ;;  %v618_v15 = vmul.f32 0.5, %v2426_v16 }
 0x237   :  { %v1330_v28 = vmul.f32 %v1314_v19, %v537_v8  ;;  %v881_v43 = vsel %vm878_vm4, %v880_v22, %v876_v31  ;;  %v1265_v58 = vadd.f32 0.4994258, %v1264_v54  ;;  %v1215_v45 = vmul.f32 %v1214_v53, %v2517_v24  ;;  %v539_v8 = vpop.f32.mrf.mxu2 }
 0x238   :  { %v882_v6 = vmul.f32 %v881_v43, %v857_v10  ;;  %v1253_v47 = vmul.f32 %v1252_v26, %v2539_v30  ;;  %v2587_v11 = vmul.f32 0.70710677, %v2581_v56  ;;  %v517_v14 = vadd.f32 %v2567_v35, %v516_v36 }
 0x239   :  { %1346 = vst [vmem:[%s2647_s7 + $0x68] sm:$0xff] %v1330_v28  ;;  %v1266_v55 = vmul.f32 %v1265_v58, %v2539_v30  ;;  %v1216_v50 = vadd.f32 1.1283791, %v1215_v45  ;;  %v1239_v27 = vand.u32 2147483648, %v1227_v25  ;;  %v1237_v1 = vand.u32 2147483647, %v1227_v25  ;;  %v590_v45 = vpop.f32.mrf.mxu1 }
 0x23a   :  { %v1390_v40 = vclamps-f32 %v882_v6, 1.0  ;;  %v885_v16 = vmul.f32 %v2587_v11, %v2587_v11  ;;  %v1254_v0 = vadd.f32 0.18741608, %v1253_v47  ;;  %vm1233_vm5 = vweird.f32 %v1227_v25 }
 0x23b   :  { %v1267_v9 = vadd.f32 1.0, %v1266_v55  ;;  %v1217_v37 = vmul.f32 %v1216_v50, %v2495_v57  ;;  %v1240_v59 = vor.u32 1.1754944e-38, %v1239_v27  ;;  %vm1238_vm7 = vcmp.eq.f32.partialorder %v1237_v1, 8.507059e+37 }
 0x23c   :  { %v1290_v63 = vadd.f32 1.0, %v1390_v40  ;;  %v1473_v48 = vpop.eup %1472  ;;  %v2595_v39 = vmin.f32 %v885_v16, 16.0  ;;  %v1255_v42 = vmul.f32 %v1254_v0, %v2539_v30  ;;  %v540_v28 = vadd.f32 %v2567_v35, %v539_v8 }
 0x23d   :  { %v1229_v13 = vmul.f32 %v1473_v48, %v1227_v25  ;;  %1474 = vrcp.f32 %v1267_v9  ;;  %vm1234_vm0 = vweird.f32 %v1473_v48  ;;  %v1279_v49 = vand.u32 2147483648, %v1267_v9 }
 0x23e   :  { %v1306_v61 = vmul.f32 %v1290_v63, %v618_v15  ;;  %v887_v17 = vmul.f32 2.1237322e-06, %v2595_v39  ;;  %v898_v38 = vmul.f32 3.8918573e-05, %v2595_v39  ;;  %vm1235_vm6 = vmor %vm1233_vm5, %vm1234_vm0  ;;  %v1256_v21 = vadd.f32 1.1283791, %v1255_v42 }
 0x23f   :  { %v1230_v29 = vsub.f32 1.0, %v1229_v13  ;;  %v1277_v22 = vand.u32 2147483647, %v1267_v9  ;;  %v627_v25 = vmul.f32 0.5, %v2482_v4  ;;  %vm1273_vm9 = vweird.f32 %v1267_v9  ;;  %v541_v15 = vpop.f32.mrf.mxu2 }
 0x240   :  { %v1322_v12 = vmul.f32 %v1306_v61, %v517_v14  ;;  %v888_v33 = vadd.f32 0.00028619796, %v887_v17  ;;  %v899_v3 = vadd.f32 0.001143296, %v898_v38  ;;  %v1280_v10 = vor.u32 1.1754944e-38, %v1279_v49 }
 0x241   :  { %v1231_v24 = vmul.f32 %v1473_v48, %v1230_v29  ;;  %v1257_v6 = vmul.f32 %v1256_v21, %v2525_v41  ;;  %vm1278_vm11 = vcmp.eq.f32.partialorder %v1277_v22, 8.507059e+37  ;;  %v628_v41 = vmul.f32 0.5, %v2513_v52 }
 0x242   :  { %1338 = vst [vmem:[%s2647_s7 + $0x28] sm:$0xff] %v1322_v12  ;;  %v889_v46 = vmul.f32 %v888_v33, %v2595_v39  ;;  %v900_v19 = vmul.f32 %v899_v3, %v2595_v39  ;;  %v2615_v14 = vadd.f32 %v2510_v23, %v590_v45  ;;  %v542_v61 = vadd.f32 %v2567_v35, %v541_v15 }
 0x243   :  { %v1232_v20 = vadd.f32 %v1473_v48, %v1231_v24  ;;  %v1475_v34 = vpop.eup %1474 }
 0x244   :  { %v1269_v44 = vmul.f32 %v1475_v34, %v1267_v9  ;;  %vm1274_vm8 = vweird.f32 %v1475_v34  ;;  %v890_v30 = vadd.f32 0.0036580483, %v889_v46  ;;  %v901_v62 = vadd.f32 0.014752088, %v900_v19 }
 0x245   :  { %v1236_v2 = vsel %vm1235_vm6, %v1473_v48, %v1232_v20  ;;  %vm1275_vm10 = vmor %vm1273_vm9, %vm1274_vm8  ;;  %v2620_v16 = vmul.f32 0.70710677, %v2615_v14 }
 0x246   :  { %v1241_v5 = vsel %vm1238_vm7, %v1240_v59, %v1236_v2  ;;  %v1270_v60 = vsub.f32 1.0, %v1269_v44  ;;  %v902_v31 = vmul.f32 %v901_v62, %v2595_v39  ;;  %v891_v26 = vmul.f32 %v890_v30, %v2595_v39 }
 0x247   :  { %v1242_v7 = vmul.f32 %v1241_v5, %v1217_v37  ;;  %v925_v52 = vmul.f32 %v2620_v16, %v2620_v16 }
 0x248   :  { %v1271_v32 = vmul.f32 %v1475_v34, %v1270_v60  ;;  %v903_v40 = vadd.f32 0.112945676, %v902_v31  ;;  %v892_v63 = vadd.f32 0.05243302, %v891_v26 }
 0x249   :  { %v1399_v57 = vclamps-f32 %v1242_v7, 1.0  ;;  %v926_v27 = vmin.f32 %v925_v52, 16.0 }
 0x24a   :  { %v1272_v54 = vadd.f32 %v1475_v34, %v1271_v32  ;;  %v904_v51 = vmul.f32 %v903_v40, %v2595_v39  ;;  %v893_v12 = vmul.f32 %v892_v63, %v2595_v39 }
 0x24b   :  { %v1299_v18 = vadd.f32 1.0, %v1399_v57  ;;  %v927_v0 = vmul.f32 2.1237322e-06, %v926_v27  ;;  %v938_v24 = vmul.f32 3.8918573e-05, %v926_v27 }
 0x24c   :  { %v1276_v58 = vsel %vm1275_vm10, %v1475_v34, %v1272_v54  ;;  %v905_v9 = vadd.f32 0.4994258, %v904_v51  ;;  %v894_v23 = vadd.f32 0.18741608, %v893_v12  ;;  %v619_v54 = vmul.f32 0.5, %v2581_v56 }
 0x24d   :  { %v1315_v43 = vmul.f32 %v1299_v18, %v627_v25  ;;  %v1281_v53 = vsel %vm1278_vm11, %v1280_v10, %v1276_v58  ;;  %v928_v38 = vadd.f32 0.00028619796, %v927_v0  ;;  %v939_v34 = vadd.f32 0.001143296, %v938_v24  ;;  %v519_v25 = vpop.f32.mrf.mxu0 }
 0x24e   :  { %v1282_v4 = vmul.f32 %v1281_v53, %v1257_v6  ;;  %v906_v47 = vmul.f32 %v905_v9, %v2595_v39  ;;  %v895_v20 = vmul.f32 %v894_v23, %v2595_v39  ;;  %v520_v31 = vadd.f32 %v2567_v35, %v519_v25 }
 0x24f   :  { %v1331_v55 = vmul.f32 %v1315_v43, %v540_v28  ;;  %v929_v59 = vmul.f32 %v928_v38, %v926_v27  ;;  %v940_v42 = vmul.f32 %v939_v34, %v926_v27  ;;  %v620_v12 = vmul.f32 0.5, %v2615_v14 }
 0x250   :  { %v1400_v36 = vclamps-f32 %v1282_v4, 1.0  ;;  %v907_v29 = vadd.f32 1.0, %v906_v47  ;;  %v896_v2 = vadd.f32 1.1283791, %v895_v20 }
 0x251   :  { %1347 = vst [vmem:[%s2647_s7 + $0x70] sm:$0xff] %v1331_v55  ;;  %v941_v3 = vadd.f32 0.014752088, %v940_v42  ;;  %v930_v7 = vadd.f32 0.0036580483, %v929_v59 }
 0x252   :  { %v1300_v48 = vadd.f32 1.0, %v1400_v36  ;;  %1476 = vrcp.f32 %v907_v29  ;;  %v919_v44 = vand.u32 2147483648, %v907_v29  ;;  %v917_v5 = vand.u32 2147483647, %v907_v29 }
 0x253   :  { %vm913_vm13 = vweird.f32 %v907_v29  ;;  %v942_v46 = vmul.f32 %v941_v3, %v926_v27  ;;  %v897_v39 = vmul.f32 %v896_v2, %v2587_v11  ;;  %v931_v57 = vmul.f32 %v930_v7, %v926_v27 }
 0x254   :  { %v1316_v13 = vmul.f32 %v1300_v48, %v628_v41  ;;  %v920_v8 = vor.u32 1.1754944e-38, %v919_v44  ;;  %vm918_vm15 = vcmp.eq.f32.partialorder %v917_v5, 8.507059e+37 }
 0x255   :  { %v943_v49 = vadd.f32 0.112945676, %v942_v46  ;;  %v932_v18 = vadd.f32 0.05243302, %v931_v57 }
 0x256   :  { %v1332_v50 = vmul.f32 %v1316_v13, %v542_v61  ;;  %v521_v13 = vpop.f32.mrf.mxu0 }
 0x257   :  { %v944_v22 = vmul.f32 %v943_v49, %v926_v27  ;;  %v933_v11 = vmul.f32 %v932_v18, %v926_v27 }
 0x258   :  { %1348 = vst [vmem:[%s2647_s7 + $0x78] sm:$0xff] %v1332_v50  ;;  %v1477_v1 = vpop.eup %1476  ;;  %v522_v50 = vadd.f32 %v2567_v35, %v521_v13 }
 0x259   :  { %v909_v17 = vmul.f32 %v1477_v1, %v907_v29  ;;  %vm914_vm12 = vweird.f32 %v1477_v1  ;;  %v945_v62 = vadd.f32 0.4994258, %v944_v22  ;;  %v934_v53 = vadd.f32 0.18741608, %v933_v11 }
 0x25a   :  { %vm915_vm14 = vmor %vm913_vm13, %vm914_vm12 }
 0x25b   :  { %v910_v37 = vsub.f32 1.0, %v909_v17  ;;  %v946_v10 = vmul.f32 %v945_v62, %v926_v27  ;;  %v935_v40 = vmul.f32 %v934_v53, %v926_v27 }
 0x25d   :  { %v911_v33 = vmul.f32 %v1477_v1, %v910_v37  ;;  %v947_v6 = vadd.f32 1.0, %v946_v10  ;;  %v936_v56 = vadd.f32 1.1283791, %v935_v40 }
 0x25f   :  { %v912_v60 = vadd.f32 %v1477_v1, %v911_v33  ;;  %1478 = vrcp.f32 %v947_v6  ;;  %v959_v51 = vand.u32 2147483648, %v947_v6  ;;  %v957_v15 = vand.u32 2147483647, %v947_v6 }
 0x260   :  { %vm953_vm2 = vweird.f32 %v947_v6  ;;  %v937_v41 = vmul.f32 %v936_v56, %v2620_v16 }
 0x261   :  { %v916_v21 = vsel %vm915_vm14, %v1477_v1, %v912_v60  ;;  %v960_v9 = vor.u32 1.1754944e-38, %v959_v51  ;;  %vm958_vm4 = vcmp.eq.f32.partialorder %v957_v15, 8.507059e+37 }
 0x262   :  { %v921_v19 = vsel %vm918_vm15, %v920_v8, %v916_v21 }
 0x263   :  { %v922_v32 = vmul.f32 %v921_v19, %v897_v39 }
 0x265   :  { %v1391_v30 = vclamps-f32 %v922_v32, 1.0  ;;  %v1479_v26 = vpop.eup %1478 }
 0x266   :  { %v949_v55 = vmul.f32 %v1479_v26, %v947_v6  ;;  %vm954_vm1 = vweird.f32 %v1479_v26 }
 0x267   :  { %v1291_v28 = vadd.f32 1.0, %v1391_v30  ;;  %vm955_vm3 = vmor %vm953_vm2, %vm954_vm1 }
 0x268   :  { %v950_v4 = vsub.f32 1.0, %v949_v55 }
 0x269   :  { %v1307_v43 = vmul.f32 %v1291_v28, %v619_v54 }
 0x26a   :  { %v951_v36 = vmul.f32 %v1479_v26, %v950_v4 }
 0x26b   :  { %v1323_v58 = vmul.f32 %v1307_v43, %v520_v31 }
 0x26c   :  { %v952_v63 = vadd.f32 %v1479_v26, %v951_v36 }
 0x26d   :  { %1339 = vst [vmem:[%s2647_s7 + $0x30] sm:$0xff] %v1323_v58 }
 0x26e   :  { %v956_v48 = vsel %vm955_vm3, %v1479_v26, %v952_v63 }
 0x26f   :  { %v961_v45 = vsel %vm958_vm4, %v960_v9, %v956_v48 }
 0x270   :  { %v962_v47 = vmul.f32 %v961_v45, %v937_v41 }
 0x272   :  { %v1392_v61 = vclamps-f32 %v962_v47, 1.0 }
 0x274   :  { %v1292_v29 = vadd.f32 1.0, %v1392_v61 }
 0x276   :  { %v1308_v52 = vmul.f32 %v1292_v29, %v620_v12 }
 0x278   :  { %v1324_v23 = vmul.f32 %v1308_v52, %v522_v50 }
 0x27a   :  { %1340 = vst [vmem:[%s2647_s7 + $0x38] sm:$0xff] %v1324_v23 }

// kernel: spatial_transformer.28
= control target key start
LH: loop header
LB: loop body
LE: loop exit
PB: predicated region body
PF: predicated region fallthrough
CT: control target
= control target key end

     0   :  { %vm47_vm0 = vcmask 523264   ;;  %s131_s1 = inlined_call_operand.vmem [shape: bf16[64,64], index: 1, kind: input, shape index: {}]   ;;  %s132_s0 = inlined_call_operand.vmem [shape: f32[16,64], index: 0, kind: input, shape index: {}]   ;;  %s133_s2 = inlined_call_operand.vmem [shape: f32[16,64], index: 2, kind: output, shape index: {}]  }
   0x1   :  { %v91_v0 = vld [vmem:[%s131_s1 + $0x18] sm:$0xff]  ;;  %v90_v1 = vld [vmem:[%s131_s1 + $0x10] sm:$0xff]  ;;  %v89_v2 = vld [vmem:[%s131_s1 + $0x8] sm:$0xff] }
   0x2   :  { %55 = vmatpush.bf16.msra.mxu0 %v91_v0  ;;  %v88_v3 = vld [vmem:[%s131_s1] sm:$0xff]  ;;  %v13_v5 = vld [vmem:[%s132_s0 + $0x8] sm:$0xff] }
   0x3   :  { %v12_v4 = vld [vmem:[%s132_s0] sm:$0xff] }
   0x4   :  { %v14_v6 = vpack.c.bf16 %v13_v5, %v12_v4 }
   0x6   :  { %56 = vmatpush.bf16.msra.mxu0 %v90_v1 }
   0xa   :  { %57 = vmatpush.bf16.msra.mxu0 %v89_v2 }
   0xe   :  { %58 = vmatpush.bf16.msra.mxu0 %v88_v3 }
  0x11   :  { %87 = vmatmul.msk.bf16.vlgmr.msra.gmra.mxu0 %vm47_vm0, %v14_v6 }
  0x8e   :  { %v60_v7 = vpop.f32.mrf.mxu0 }
  0x8f   :  { %65 = vst.msk [vmem:[%s133_s2] sm:$0xff] %vm47_vm0, %v60_v7 }
  0x96   :  { %v62_v8 = vpop.f32.mrf.mxu0 }
  0x97   :  { %66 = vst.msk [vmem:[%s133_s2 + $0x8] sm:$0xff] %vm47_vm0, %v62_v8 }

// kernel: spatial_transformer.29
= control target key start
LH: loop header
LB: loop body
LE: loop exit
PB: predicated region body
PF: predicated region fallthrough
CT: control target
= control target key end

     0   :  { %s1040_s12 = smov 0   ;;  %s1042_s13 = smov 0   ;;  %s1266_s0 = inlined_call_operand.vmem [shape: f32[8,64,8], index: 0, kind: input, shape index: {}]   ;;  %s1267_s1 = inlined_call_operand.vmem [shape: f32[8,8,8], index: 1, kind: input, shape index: {}]   ;;  %s1268_s2 = inlined_call_operand.vmem [shape: f32[8,8,8], index: 2, kind: input, shape index: {}]   ;;  %s1269_s3 = inlined_call_operand.vmem [shape: f32[8,64,8], index: 3, kind: output, shape index: {}]  }
   0x1   :  { %s1044_s14 = smov 0  }
   0x2 LB: > { %s32_s15 = sadd.s32 1, %s1011_s13  ;;  %p894_p0 = scmp.ge.s32.totalorder %s1015_s14, 1  ;;  %s1015_s14 = sphi %s1044_s14, %s13_s14   ;;  %s1011_s13 = sphi %s1042_s13, %s1271_s13   ;;  %s1007_s12 = sphi %s1040_s12, %s1270_s12  }
   0x3   : > { %p34_p1 = scmp.ge.s32.totalorder %s32_s15, 8  ;;  %p193_p2 = scmp.lt.s32.totalorder %s1015_s14, 9 }
   0x5   : > { %s1273_s15 = smov (%p34_p1, %s32_s15), 0  ;;  %p194_p3 = pnand %p894_p0, %p193_p2 }
   0x6   : > { %p240_p4 = scmp.lt.s32.totalorder (!%p194_p3), %s1007_s12, 7 }
   0x7   : > { %197 = sbr.rel (%p194_p3) target bundleno = 695 (0x2b7), region = 32 }
   0xc   : > { %s1275_s12 = smov (!%p240_p4, %s1007_s12), 7  ;;  %vm295_vm0 = vcmask 64512   ;;  %vm278_vm1 = vcmask 7168   ;;  %v1017_v25 = vmov -inf   ;;  %v1018_v40 = vmov 0  }
   0xd   : > { %s911_s16 = sshll.u32 %s1275_s12, 6  ;;  %s897_s17 = sshll.u32 %s1275_s12, 3  ;;  %283 = vst.msk [vmem:[#allocation2 + $0x20] sm:$0xff] %vm278_vm1, %v1017_v25  ;;  %944 = vset.pattern.permute.xlu1 %v1018_v40  ;;  %942 = vset.pattern.permute.xlu2 %v1018_v40  ;;  %v1019_v41 = vmov 0.0   ;;  %vm630_vm2 = vcmask 1043456  }
   0xe   : > { %s247_s20 = scalar_lea.vmem %s1266_s0, %s911_s16  ;;  %s255_s23 = scalar_lea.vmem %s1267_s1, %s897_s17  ;;  %279 = vst.msk [vmem:[#allocation2] sm:$0xff] %vm278_vm1, %v1017_v25  ;;  %943 = vset.pattern.permute.xlu0 %v1018_v40 }
   0xf   : > { %v324_v0 = vld [vmem:[%s255_s23] sm:$0xff]  ;;  %v305_v2 = vld [vmem:[%s247_s20 + $0x8] sm:$0xff]  ;;  %v306_v13 = vld [vmem:[%s247_s20 + $0x10] sm:$0xff]  ;;  %280 = vst.msk [vmem:[#allocation2 + $0x8] sm:$0xff] %vm278_vm1, %v1017_v25  ;;  %s262_s26 = scalar_lea.vmem %s1268_s2, %s897_s17  ;;  %s1239_s29 = scalar_lea.vmem %s1269_s3, %s911_s16 }
  0x10   : > { %v304_v1 = vld [vmem:[%s247_s20] sm:$0xff]  ;;  %v325_v3 = vpack.c.bf16 %v324_v0, %v324_v0  ;;  %v309_v5 = vld [vmem:[%s247_s20 + $0x28] sm:$0xff]  ;;  %v313_v7 = vmul.f32 0.35355338, %v305_v2  ;;  %v307_v14 = vld [vmem:[%s247_s20 + $0x18] sm:$0xff]  ;;  %281 = vst.msk [vmem:[#allocation2 + $0x10] sm:$0xff] %vm278_vm1, %v1017_v25 }
  0x11   : > { %v308_v4 = vld [vmem:[%s247_s20 + $0x20] sm:$0xff]  ;;  %v312_v6 = vmul.f32 0.35355338, %v304_v1  ;;  %v317_v10 = vmul.f32 0.35355338, %v309_v5  ;;  %v310_v15 = vld [vmem:[%s247_s20 + $0x30] sm:$0xff] }
  0x12   : > { %v342_v8 = vsel %vm295_vm0, %v325_v3, 0  ;;  %v316_v9 = vmul.f32 0.35355338, %v308_v4  ;;  %v311_v16 = vld [vmem:[%s247_s20 + $0x38] sm:$0xff]  ;;  %v314_v17 = vmul.f32 0.35355338, %v306_v13 }
  0x13   : > { %351 = vmatpush.bf16.xpose.msra.mxu0 %v342_v8  ;;  %913 = vmatpush.bf16.xpose.msra.mxu2 %v342_v8  ;;  %v320_v11 = vpack.c.bf16 %v313_v7, %v312_v6  ;;  %v315_v18 = vmul.f32 0.35355338, %v307_v14  ;;  %v318_v19 = vmul.f32 0.35355338, %v310_v15  ;;  %v319_v20 = vmul.f32 0.35355338, %v311_v16 }
  0x14   : > { %v322_v12 = vpack.c.bf16 %v317_v10, %v316_v9  ;;  %282 = vst.msk [vmem:[#allocation2 + $0x18] sm:$0xff] %vm278_vm1, %v1017_v25  ;;  %v377_v45 = vld [vmem:[#allocation2 + $0x20] sm:$0xff] }
  0x15   : > { %v321_v21 = vpack.c.bf16 %v315_v18, %v314_v17  ;;  %v323_v22 = vpack.c.bf16 %v319_v20, %v318_v19  ;;  %284 = vst.msk [vmem:[#allocation2 + $0x28] sm:$0xff] %vm278_vm1, %v1017_v25  ;;  %v373_v42 = vld [vmem:[#allocation2] sm:$0xff] }
  0x16   : > { %285 = vst.msk [vmem:[#allocation2 + $0x30] sm:$0xff] %vm278_vm1, %v1017_v25  ;;  %v374_v48 = vld [vmem:[#allocation2 + $0x8] sm:$0xff] }
  0x17   : > { %286 = vst.msk [vmem:[#allocation2 + $0x38] sm:$0xff] %vm278_vm1, %v1017_v25  ;;  %v375_v50 = vld [vmem:[#allocation2 + $0x10] sm:$0xff] }
  0x18   : > { %297 = vst.msk [vmem:[#allocation4 + $0x8] sm:$0xff] %vm295_vm0, %v1019_v41 }
  0x19   : > { %287 = vst.msk [vmem:[#allocation3] sm:$0xff] %vm278_vm1, %v1019_v41 }
  0x1a   : > { %901 = vmatmul.msk.bf16.vlgmr.msra.gmra.mxu0 %vm295_vm0, %v320_v11  ;;  %903 = vmatmul.msk.bf16.vlgmr.msra.gmra.mxu2 %vm295_vm0, %v322_v12  ;;  %288 = vst.msk [vmem:[#allocation3 + $0x8] sm:$0xff] %vm278_vm1, %v1019_v41 }
  0x1b   : > { %289 = vst.msk [vmem:[#allocation3 + $0x10] sm:$0xff] %vm278_vm1, %v1019_v41  ;;  %v376_v60 = vld [vmem:[#allocation2 + $0x18] sm:$0xff] }
  0x1c   : > { %290 = vst.msk [vmem:[#allocation3 + $0x18] sm:$0xff] %vm278_vm1, %v1019_v41  ;;  %v378_v56 = vld [vmem:[#allocation2 + $0x28] sm:$0xff] }
  0x1d   : > { %291 = vst.msk [vmem:[#allocation3 + $0x20] sm:$0xff] %vm278_vm1, %v1019_v41  ;;  %v379_v55 = vld [vmem:[#allocation2 + $0x30] sm:$0xff] }
  0x1e   : > { %292 = vst.msk [vmem:[#allocation3 + $0x28] sm:$0xff] %vm278_vm1, %v1019_v41  ;;  %v1140_v2 = vld [vmem:[#allocation2 + $0x38] sm:$0xff] }
  0x1f   : > { %293 = vst.msk [vmem:[#allocation3 + $0x30] sm:$0xff] %vm278_vm1, %v1019_v41 }
  0x20   : > { %294 = vst.msk [vmem:[#allocation3 + $0x38] sm:$0xff] %vm278_vm1, %v1019_v41 }
  0x21   : > { %296 = vst.msk [vmem:[#allocation4] sm:$0xff] %vm295_vm0, %v1019_v41 }
  0x22   : > { %298 = vst.msk [vmem:[#allocation4 + $0x10] sm:$0xff] %vm295_vm0, %v1019_v41 }
  0x23   : > { %299 = vst.msk [vmem:[#allocation4 + $0x18] sm:$0xff] %vm295_vm0, %v1019_v41 }
  0x24   : > { %300 = vst.msk [vmem:[#allocation4 + $0x20] sm:$0xff] %vm295_vm0, %v1019_v41 }
  0x25   : > { %301 = vst.msk [vmem:[#allocation4 + $0x28] sm:$0xff] %vm295_vm0, %v1019_v41 }
  0x26   : > { %302 = vst.msk [vmem:[#allocation4 + $0x30] sm:$0xff] %vm295_vm0, %v1019_v41 }
  0x27   : > { %303 = vst.msk [vmem:[#allocation4 + $0x38] sm:$0xff] %vm295_vm0, %v1019_v41 }
  0x2a   : > { %902 = vmatmul.msk.bf16.gmra.mxu0 %vm295_vm0, %v321_v21  ;;  %904 = vmatmul.msk.bf16.gmra.mxu2 %vm295_vm0, %v323_v22 }
  0x97   : > { %v1077_v23 = vpop.f32.mrf.mxu0 }
  0x98   : > { %v381_v24 = vsel %vm295_vm0, %v1077_v23, -inf }
  0x99   : > { %382 = vmax.xlane.f32.xlu0 %v381_v24 }
  0x9d   : > { %v1086_v26 = vpop.f32.mrf.mxu2 }
  0x9e   : > { %v393_v27 = vsel %vm295_vm0, %v1086_v26, -inf }
  0x9f   : > { %394 = vmax.xlane.f32.xlu1 %v393_v27  ;;  %v1092_v28 = vpop.f32.mrf.mxu0 }
  0xa0   : > { %v384_v30 = vsel %vm295_vm0, %v1092_v28, -inf }
  0xa5   : > { %v1095_v29 = vpop.f32.mrf.mxu2 }
  0xa6   : > { %v396_v35 = vsel %vm295_vm0, %v1095_v29, -inf }
  0xa7   : > { %385 = vmax.xlane.f32.xlu1 %v384_v30  ;;  %v1099_v31 = vpop.f32.mrf.mxu0  ;;  %v326_v30 = vld [vmem:[%s262_s26] sm:$0xff] }
  0xa8   : > { %v387_v32 = vsel %vm295_vm0, %v1099_v31, -inf }
  0xa9   : > { %388 = vmax.xlane.f32.xlu0 %v387_v32 }
  0xad   : > { %v1103_v33 = vpop.f32.mrf.mxu2 }
  0xae   : > { %v399_v34 = vsel %vm295_vm0, %v1103_v33, -inf }
  0xaf   : > { %400 = vmax.xlane.f32.xlu2 %v399_v34  ;;  %397 = vmax.xlane.f32.xlu1 %v396_v35  ;;  %v1109_v36 = vpop.f32.mrf.mxu0  ;;  %v327_v34 = vpack.c.bf16 %v326_v30, %v326_v30 }
  0xb0   : > { %v390_v37 = vsel %vm295_vm0, %v1109_v36, -inf }
  0xb1   : > { %391 = vmax.xlane.f32.xlu0 %v390_v37 }
  0xb5   : > { %v1113_v38 = vpop.f32.mrf.mxu2 }
  0xb6   : > { %v402_v39 = vsel %vm295_vm0, %v1113_v38, -inf }
  0xb7   : > { %403 = vmax.xlane.f32.xlu2 %v402_v39  ;;  %v632_v39 = vsel %vm630_vm2, %v327_v34, 0 }
  0xb8   : > { %914 = vmatpush.bf16.msra.mxu3 %v632_v39  ;;  %641 = vmatpush.bf16.msra.mxu1 %v632_v39 }
 0x10c   : > { %v383_v43 = vpop.xlane.xlu0 %382 }
 0x10d   : > { %v405_v44 = vmax.f32 %v373_v42, %v383_v43 }
 0x10f   : > { %679 = vst.msk [vmem:[#allocation2] sm:$0xff] %vm278_vm1, %v405_v44  ;;  %v413_v8 = vsub.f32 %v373_v42, %v405_v44 }
 0x111   : > { %v421_v10 = vmul.f32 1.442695, %v413_v8 }
 0x112   : > { %v395_v46 = vpop.xlane.xlu1 %394 }
 0x113   : > { %v409_v47 = vmax.f32 %v377_v45, %v395_v46 }
 0x115   : > { %683 = vst.msk [vmem:[#allocation2 + $0x20] sm:$0xff] %vm278_vm1, %v409_v47  ;;  %459 = vperm.xlu1 %944, %v409_v47   ;;  %v417_v1 = vsub.f32 %v377_v45, %v409_v47 }
 0x117   : > { %v429_v6 = vmul.f32 1.442695, %v417_v1 }
 0x11a   : > { %v386_v49 = vpop.xlane.xlu1 %385 }
 0x11b   : > { %v406_v51 = vmax.f32 %v374_v48, %v386_v49 }
 0x11c   : > { %v389_v52 = vpop.xlane.xlu0 %388 }
 0x11d   : > { %680 = vst.msk [vmem:[#allocation2 + $0x8] sm:$0xff] %vm278_vm1, %v406_v51  ;;  %v407_v53 = vmax.f32 %v375_v50, %v389_v52  ;;  %v414_v9 = vsub.f32 %v374_v48, %v406_v51 }
 0x11f   : > { %v415_v54 = vsub.f32 %v375_v50, %v407_v53  ;;  %681 = vst.msk [vmem:[#allocation2 + $0x10] sm:$0xff] %vm278_vm1, %v407_v53  ;;  %449 = vperm.xlu2 %942, %v407_v53   ;;  %v423_v11 = vmul.f32 1.442695, %v414_v9 }
 0x121   : > { %v425_v57 = vmul.f32 1.442695, %v415_v54 }
 0x122   : > { %v401_v58 = vpop.xlane.xlu2 %400  ;;  %v398_v59 = vpop.xlane.xlu1 %397 }
 0x123   : > { %v411_v61 = vmax.f32 %v379_v55, %v401_v58  ;;  %v410_v62 = vmax.f32 %v378_v56, %v398_v59  ;;  %945 = vpow2.f32 %v425_v57 }
 0x124   : > { %v392_v63 = vpop.xlane.xlu0 %391  ;;  %947 = vpow2.f32 %v429_v6 }
 0x125   : > { %685 = vst.msk [vmem:[#allocation2 + $0x30] sm:$0xff] %vm278_vm1, %v411_v61  ;;  %v408_v0 = vmax.f32 %v376_v60, %v392_v63  ;;  %949 = vpow2.f32 %v421_v10  ;;  %v419_v13 = vsub.f32 %v379_v55, %v411_v61  ;;  %v418_v14 = vsub.f32 %v378_v56, %v410_v62 }
 0x126   : > { %684 = vst.msk [vmem:[#allocation2 + $0x28] sm:$0xff] %vm278_vm1, %v410_v62  ;;  %951 = vpow2.f32 %v423_v11 }
 0x127   : > { %682 = vst.msk [vmem:[#allocation2 + $0x18] sm:$0xff] %vm278_vm1, %v408_v0  ;;  %464 = vperm.xlu2 %942, %v410_v62   ;;  %454 = vperm.xlu0 %943, %v408_v0   ;;  %v433_v15 = vmul.f32 1.442695, %v419_v13  ;;  %v431_v17 = vmul.f32 1.442695, %v418_v14  ;;  %v416_v19 = vsub.f32 %v376_v60, %v408_v0 }
 0x129   : > { %v1145_v5 = vpop.eup %945  ;;  %953 = vpow2.f32 %v433_v15  ;;  %v427_v20 = vmul.f32 1.442695, %v416_v19 }
 0x12a   : > { %v404_v3 = vpop.xlane.xlu2 %403  ;;  %v1153_v12 = vpop.eup %947  ;;  %955 = vpow2.f32 %v431_v17 }
 0x12b   : > { %v1143_v4 = vmax.f32 %v1140_v2, %v404_v3  ;;  %v1156_v16 = vpop.eup %949  ;;  %957 = vpow2.f32 %v427_v20 }
 0x12c   : > { %v1159_v18 = vpop.eup %951 }
 0x12d   : > { %v420_v7 = vsub.f32 %v1140_v2, %v1143_v4  ;;  %686 = vst.msk [vmem:[#allocation2 + $0x38] sm:$0xff] %vm278_vm1, %v1143_v4  ;;  %474 = vperm.xlu1 %944, %v1143_v4   ;;  %v506_v4 = vld [vmem:[#allocation3 + $0x28] sm:$0xff] }
 0x12f   : > { %469 = vperm.xlu2 %942, %v411_v61   ;;  %578 = vperm.xlu0 %943, %v1145_v5   ;;  %v1162_v21 = vpop.eup %953 }
 0x130   : > { %v1165_v22 = vpop.eup %955 }
 0x131   : > { %v1168_v24 = vpop.eup %957  ;;  %v514_v17 = vmul.f32 %v1165_v22, %v506_v4 }
 0x135   : > { %444 = vperm.xlu1 %944, %v406_v51  }
 0x137   : > { %439 = vperm.xlu2 %942, %v405_v44   ;;  %588 = vperm.xlu0 %943, %v1153_v12  }
 0x13d   : > { %568 = vperm.xlu1 %944, %v1156_v16  }
 0x13f   : > { %573 = vperm.xlu2 %942, %v1159_v18  }
 0x145   : > { %598 = vperm.xlu1 %944, %v1162_v21  }
 0x147   : > { %593 = vperm.xlu2 %942, %v1165_v22  }
 0x14d   : > { %583 = vperm.xlu1 %944, %v1168_v24  }
 0x179   : > { %v450_v25 = vpop.permute.xlu2 %449 }
 0x17a   : > { %v479_v35 = vsub.f32 %v1099_v31, %v450_v25  ;;  %v503_v25 = vld [vmem:[#allocation3 + $0x10] sm:$0xff] }
 0x17c   : > { %v489_v40 = vmul.f32 1.442695, %v479_v35  ;;  %v501_v35 = vld [vmem:[#allocation3] sm:$0xff] }
 0x181   : > { %v465_v27 = vpop.permute.xlu2 %464 }
 0x182   : > { %v482_v32 = vsub.f32 %v1095_v29, %v465_v27  ;;  %v511_v27 = vmul.f32 %v1145_v5, %v503_v25  ;;  %v563_v25 = vld [vmem:[#allocation4 + $0x28] sm:$0xff] }
 0x184   : > { %v495_v37 = vmul.f32 1.442695, %v482_v32 }
 0x186   : > { %959 = vpow2.f32 %v495_v37  ;;  %v509_v37 = vmul.f32 %v1156_v16, %v501_v35  ;;  %v508_v16 = vld [vmem:[#allocation3 + $0x38] sm:$0xff]  ;;  %v564_v35 = vld [vmem:[#allocation4 + $0x30] sm:$0xff] }
 0x187   : > { %961 = vpow2.f32 %v489_v40  ;;  %v460_v44 = vpop.permute.xlu1 %459 }
 0x188   : > { %v481_v47 = vsub.f32 %v1086_v26, %v460_v44 }
 0x189   : > { %v470_v41 = vpop.permute.xlu2 %469 }
 0x18a   : > { %v493_v49 = vmul.f32 1.442695, %v481_v47  ;;  %v483_v62 = vsub.f32 %v1103_v33, %v470_v41 }
 0x18c   : > { %v960_v42 = vpop.eup %959  ;;  %v497_v0 = vmul.f32 1.442695, %v483_v62 }
 0x18d   : > { %v532_v43 = vsel %vm295_vm0, %v960_v42, 0.0  ;;  %v962_v46 = vpop.eup %961 }
 0x18e   : > { %533 = vadd.xlane.f32.xlu1 %v532_v43  ;;  %v523_v48 = vsel %vm295_vm0, %v962_v46, 0.0 }
 0x191   : > { %v440_v45 = vpop.permute.xlu2 %439 }
 0x192   : > { %v477_v29 = vsub.f32 %v1077_v23, %v440_v45 }
 0x194   : > { %v485_v31 = vmul.f32 1.442695, %v477_v29 }
 0x196   : > { %963 = vpow2.f32 %v485_v31  ;;  %524 = vadd.xlane.f32.xlu1 %v523_v48 }
 0x197   : > { %965 = vpow2.f32 %v493_v49 }
 0x199   : > { %v455_v50 = vpop.permute.xlu0 %454  ;;  %v574_v22 = vpop.permute.xlu2 %573 }
 0x19a   : > { %v480_v51 = vsub.f32 %v1109_v36, %v455_v50 }
 0x19c   : > { %v964_v52 = vpop.eup %963  ;;  %v491_v53 = vmul.f32 1.442695, %v480_v51 }
 0x19d   : > { %v517_v54 = vsel %vm295_vm0, %v964_v52, 0.0  ;;  %v966_v26 = vpop.eup %965 }
 0x19e   : > { %967 = vpow2.f32 %v491_v53  ;;  %518 = vadd.xlane.f32.xlu0 %v517_v54  ;;  %v529_v58 = vsel %vm295_vm0, %v966_v26, 0.0  ;;  %v616_v8 = vpack.c.bf16 %v960_v42, %v966_v26  ;;  %v505_v42 = vld [vmem:[#allocation3 + $0x20] sm:$0xff]  ;;  %v560_v53 = vld [vmem:[#allocation4 + $0x10] sm:$0xff] }
 0x19f   : > { %v475_v55 = vpop.permute.xlu1 %474  ;;  %v513_v43 = vmul.f32 %v1153_v12, %v505_v42  ;;  %v502_v12 = vld [vmem:[#allocation3 + $0x8] sm:$0xff]  ;;  %v565_v42 = vld [vmem:[#allocation4 + $0x38] sm:$0xff] }
 0x1a0   : > { %v484_v23 = vsub.f32 %v1113_v38, %v475_v55  ;;  %v510_v54 = vmul.f32 %v1159_v18, %v502_v12 }
 0x1a1   : > { %v594_v47 = vpop.permute.xlu2 %593 }
 0x1a2   : > { %v499_v56 = vmul.f32 1.442695, %v484_v23 }
 0x1a4   : > { %v968_v57 = vpop.eup %967  ;;  %969 = vpow2.f32 %v499_v56 }
 0x1a5   : > { %v615_v59 = vpack.c.bf16 %v968_v57, %v962_v46  ;;  %v526_v11 = vsel %vm295_vm0, %v968_v57, 0.0 }
 0x1a6   : > { %530 = vadd.xlane.f32.xlu0 %v529_v58 }
 0x1a7   : > { %v445_v60 = vpop.permute.xlu1 %444  ;;  %906 = vmatmul.msk.bf16.vlgmr.msra.gmra.mxu3 %vm295_vm0, %v615_v59  ;;  %v507_v59 = vld [vmem:[#allocation3 + $0x30] sm:$0xff] }
 0x1a8   : > { %v478_v36 = vsub.f32 %v1092_v28, %v445_v60  ;;  %v435_v28 = vmul.f32 1.442695, %v420_v7  ;;  %v579_v7 = vpop.permute.xlu0 %578  ;;  %v558_v60 = vld [vmem:[#allocation4] sm:$0xff] }
 0x1a9   : > { %v608_v26 = vmul.f32 %v579_v7, %v560_v53 }
 0x1aa   : > { %v970_v61 = vpop.eup %969  ;;  %v487_v63 = vmul.f32 1.442695, %v478_v36  ;;  %v561_v36 = vld [vmem:[#allocation4 + $0x18] sm:$0xff] }
 0x1ab   : > { %v538_v38 = vsel %vm295_vm0, %v970_v61, 0.0 }
 0x1ac   : > { %971 = vpow2.f32 %v487_v63 }
 0x1ad   : > { %973 = vpow2.f32 %v497_v0 }
 0x1ae   : > { %539 = vadd.xlane.f32.xlu0 %v538_v38  ;;  %975 = vpow2.f32 %v435_v28  ;;  %v504_v28 = vld [vmem:[#allocation3 + $0x18] sm:$0xff] }
 0x1af   : > { %v1199_v14 = vpop.permute.xlu1 %568 }
 0x1b0   : > { %v1208_v30 = vpop.permute.xlu0 %588  ;;  %v606_v18 = vmul.f32 %v1199_v14, %v558_v60 }
 0x1b2   : > { %v972_v1 = vpop.eup %971 }
 0x1b3   : > { %v520_v3 = vsel %vm295_vm0, %v972_v1, 0.0  ;;  %v614_v6 = vpack.c.bf16 %v972_v1, %v964_v52  ;;  %v974_v33 = vpop.eup %973 }
 0x1b4   : > { %521 = vadd.xlane.f32.xlu2 %v520_v3  ;;  %v535_v9 = vsel %vm295_vm0, %v974_v33, 0.0  ;;  %v976_v10 = vpop.eup %975  ;;  %v617_v13 = vpack.c.bf16 %v970_v61, %v974_v33  ;;  %v515_v61 = vmul.f32 %v1162_v21, %v507_v59  ;;  %v559_v33 = vld [vmem:[#allocation4 + $0x8] sm:$0xff]  ;;  %v512_v21 = vmul.f32 %v1168_v24, %v504_v28 }
 0x1b5   : > { %905 = vmatmul.msk.bf16.vlgmr.msra.gmra.mxu1 %vm295_vm0, %v614_v6  ;;  %v516_v31 = vmul.f32 %v976_v10, %v508_v16 }
 0x1b7   : > { %907 = vmatmul.msk.bf16.gmra.mxu3 %vm295_vm0, %v616_v8  ;;  %v1201_v15 = vpop.permute.xlu1 %598 }
 0x1bc   : > { %536 = vadd.xlane.f32.xlu2 %v535_v9  ;;  %v562_v9 = vld [vmem:[#allocation4 + $0x20] sm:$0xff] }
 0x1bd   : > { %v610_v4 = vmul.f32 %v1208_v30, %v562_v9 }
 0x1bf   : > { %v1203_v2 = vpop.permute.xlu1 %583 }
 0x1c0   : > { %v609_v38 = vmul.f32 %v1203_v2, %v561_v36  ;;  %v607_v2 = vmul.f32 %v574_v22, %v559_v33 }
 0x1c2   : > { %603 = vperm.xlu0 %943, %v976_v10  }
 0x1c4   : > { %527 = vadd.xlane.f32.xlu2 %v526_v11 }
 0x1c7   : > { %908 = vmatmul.msk.bf16.gmra.mxu3 %vm295_vm0, %v617_v13 }
 0x201   : > { %v534_v19 = vpop.xlane.xlu1 %533 }
 0x202   : > { %v546_v20 = vadd.f32 %v534_v19, %v514_v17 }
 0x204   : > { %555 = vst.msk [vmem:[#allocation3 + $0x28] sm:$0xff] %vm278_vm1, %v546_v20 }
 0x209   : > { %v525_v32 = vpop.xlane.xlu1 %524 }
 0x20a   : > { %v543_v34 = vadd.f32 %v525_v32, %v511_v27  ;;  %v611_v27 = vmul.f32 %v594_v47, %v563_v25 }
 0x20b   : > { %v695_v5 = vld [vmem:[#allocation3 + $0x28] sm:$0xff] }
 0x20c   : > { %552 = vst.msk [vmem:[#allocation3 + $0x10] sm:$0xff] %vm278_vm1, %v543_v34 }
 0x211   : > { %v519_v39 = vpop.xlane.xlu0 %518 }
 0x212   : > { %v541_v40 = vadd.f32 %v519_v39, %v509_v37 }
 0x213   : > { %v692_v41 = vld [vmem:[#allocation3 + $0x10] sm:$0xff] }
 0x214   : > { %550 = vst.msk [vmem:[#allocation3] sm:$0xff] %vm278_vm1, %v541_v40  ;;  %977 = vrcp.f32 %v692_v41  ;;  %v612_v40 = vmul.f32 %v1201_v15, %v564_v35 }
 0x215   : > { %979 = vrcp.f32 %v695_v5 }
 0x219   : > { %v531_v44 = vpop.xlane.xlu0 %530 }
 0x21a   : > { %v978_v45 = vpop.eup %977  ;;  %v545_v46 = vadd.f32 %v531_v44, %v513_v43 }
 0x21b   : > { %726 = vperm.xlu0 %943, %v978_v45   ;;  %v690_v29 = vld [vmem:[#allocation3] sm:$0xff]  ;;  %v980_v48 = vpop.eup %979 }
 0x21c   : > { %554 = vst.msk [vmem:[#allocation3 + $0x20] sm:$0xff] %vm278_vm1, %v545_v46  ;;  %981 = vrcp.f32 %v690_v29 }
 0x221   : > { %v540_v49 = vpop.xlane.xlu0 %539 }
 0x222   : > { %v982_v50 = vpop.eup %981  ;;  %v548_v51 = vadd.f32 %v540_v49, %v516_v31 }
 0x223   : > { %716 = vperm.xlu2 %942, %v982_v50   ;;  %741 = vperm.xlu0 %943, %v980_v48   ;;  %v694_v52 = vld [vmem:[#allocation3 + $0x20] sm:$0xff] }
 0x224   : > { %557 = vst.msk [vmem:[#allocation3 + $0x38] sm:$0xff] %vm278_vm1, %v548_v51  ;;  %983 = vrcp.f32 %v694_v52 }
 0x227   : > { %v522_v55 = vpop.xlane.xlu2 %521 }
 0x228   : > { %v542_v23 = vadd.f32 %v522_v55, %v510_v54 }
 0x22a   : > { %v984_v56 = vpop.eup %983  ;;  %551 = vst.msk [vmem:[#allocation3 + $0x8] sm:$0xff] %vm278_vm1, %v542_v23  ;;  %v648_v57 = vpop.f32.mrf.mxu3 }
 0x22b   : > { %v665_v58 = vadd.f32 %v648_v57, %v608_v26  ;;  %736 = vperm.xlu1 %944, %v984_v56   ;;  %v697_v11 = vld [vmem:[#allocation3 + $0x38] sm:$0xff] }
 0x22d   : > { %673 = vst.msk [vmem:[#allocation4 + $0x10] sm:$0xff] %vm295_vm0, %v665_v58 }
 0x22f   : > { %v537_v62 = vpop.xlane.xlu2 %536 }
 0x230   : > { %v547_v63 = vadd.f32 %v537_v62, %v515_v61 }
 0x231   : > { %v691_v0 = vld [vmem:[#allocation3 + $0x8] sm:$0xff] }
 0x232   : > { %556 = vst.msk [vmem:[#allocation3 + $0x30] sm:$0xff] %vm278_vm1, %v547_v63  ;;  %v643_v1 = vpop.f32.mrf.mxu1  ;;  %v650_v3 = vpop.f32.mrf.mxu3  ;;  %985 = vrcp.f32 %v691_v0 }
 0x233   : > { %v663_v6 = vadd.f32 %v643_v1, %v606_v18  ;;  %v666_v8 = vadd.f32 %v650_v3, %v609_v38  ;;  %987 = vrcp.f32 %v697_v11 }
 0x234   : > { %v604_v43 = vpop.permute.xlu0 %603  ;;  %v708_v47 = vld [vmem:[#allocation4 + $0x10] sm:$0xff] }
 0x235   : > { %671 = vst.msk [vmem:[#allocation4] sm:$0xff] %vm295_vm0, %v663_v6  ;;  %v613_v44 = vmul.f32 %v604_v43, %v565_v42 }
 0x236   : > { %674 = vst.msk [vmem:[#allocation4 + $0x18] sm:$0xff] %vm295_vm0, %v666_v8 }
 0x237   : > { %v528_v10 = vpop.xlane.xlu2 %527 }
 0x238   : > { %v986_v13 = vpop.eup %985  ;;  %v544_v14 = vadd.f32 %v528_v10, %v512_v21 }
 0x239   : > { %721 = vperm.xlu1 %944, %v986_v13   ;;  %v988_v24 = vpop.eup %987  ;;  %v696_v37 = vld [vmem:[#allocation3 + $0x30] sm:$0xff] }
 0x23a   : > { %553 = vst.msk [vmem:[#allocation3 + $0x18] sm:$0xff] %vm278_vm1, %v544_v14  ;;  %v645_v7 = vpop.f32.mrf.mxu1  ;;  %v653_v17 = vpop.f32.mrf.mxu3 }
 0x23b   : > { %v664_v19 = vadd.f32 %v645_v7, %v607_v2  ;;  %v667_v20 = vadd.f32 %v653_v17, %v610_v4 }
 0x23c   : > { %v706_v15 = vld [vmem:[#allocation4] sm:$0xff] }
 0x23d   : > { %672 = vst.msk [vmem:[#allocation4 + $0x8] sm:$0xff] %vm295_vm0, %v664_v19  ;;  %v709_v54 = vld [vmem:[#allocation4 + $0x18] sm:$0xff] }
 0x23e   : > { %675 = vst.msk [vmem:[#allocation4 + $0x20] sm:$0xff] %vm295_vm0, %v667_v20 }
 0x241   : > { %751 = vperm.xlu1 %944, %v988_v24   ;;  %v693_v32 = vld [vmem:[#allocation3 + $0x18] sm:$0xff] }
 0x242   : > { %v655_v34 = vpop.f32.mrf.mxu3  ;;  %989 = vrcp.f32 %v693_v32 }
 0x243   : > { %v668_v30 = vadd.f32 %v655_v34, %v611_v27  ;;  %991 = vrcp.f32 %v696_v37 }
 0x244   : > { %v707_v26 = vld [vmem:[#allocation4 + $0x8] sm:$0xff] }
 0x245   : > { %676 = vst.msk [vmem:[#allocation4 + $0x28] sm:$0xff] %vm295_vm0, %v668_v30  ;;  %v710_v12 = vld [vmem:[#allocation4 + $0x20] sm:$0xff] }
 0x248   : > { %v990_v39 = vpop.eup %989 }
 0x249   : > { %731 = vperm.xlu2 %942, %v990_v39   ;;  %v992_v5 = vpop.eup %991 }
 0x24a   : > { %v658_v41 = vpop.f32.mrf.mxu3 }
 0x24b   : > { %v669_v22 = vadd.f32 %v658_v41, %v612_v40 }
 0x24c   : > { %v711_v49 = vld [vmem:[#allocation4 + $0x28] sm:$0xff] }
 0x24d   : > { %677 = vst.msk [vmem:[#allocation4 + $0x30] sm:$0xff] %vm295_vm0, %v669_v22 }
 0x251   : > { %746 = vperm.xlu2 %942, %v992_v5  }
 0x252   : > { %v660_v45 = vpop.f32.mrf.mxu3 }
 0x253   : > { %v670_v46 = vadd.f32 %v660_v45, %v613_v44 }
 0x254   : > { %v712_v57 = vld [vmem:[#allocation4 + $0x30] sm:$0xff] }
 0x255   : > { %678 = vst.msk [vmem:[#allocation4 + $0x38] sm:$0xff] %vm295_vm0, %v670_v46 }
 0x25c   : > { %v713_v36 = vld [vmem:[#allocation4 + $0x38] sm:$0xff] }
 0x27d   : > { %v717_v29 = vpop.permute.xlu2 %716 }
 0x27e   : > { %v754_v16 = vmul.f32 %v717_v29, %v706_v15 }
 0x280   : > { %762 = vst.msk [vmem:[%s1239_s29] sm:$0xff] %vm295_vm0, %v754_v16 }
 0x28d   : > { %v727_v31 = vpop.permute.xlu0 %726 }
 0x28e   : > { %v756_v48 = vmul.f32 %v727_v31, %v708_v47 }
 0x290   : > { %764 = vst.msk [vmem:[%s1239_s29 + $0x10] sm:$0xff] %vm295_vm0, %v756_v48 }
 0x295   : > { %v742_v50 = vpop.permute.xlu0 %741 }
 0x296   : > { %v759_v51 = vmul.f32 %v742_v50, %v711_v49 }
 0x298   : > { %767 = vst.msk [vmem:[%s1239_s29 + $0x28] sm:$0xff] %vm295_vm0, %v759_v51 }
 0x29d   : > { %v737_v52 = vpop.permute.xlu1 %736 }
 0x29e   : > { %v758_v53 = vmul.f32 %v737_v52, %v710_v12 }
 0x2a0   : > { %766 = vst.msk [vmem:[%s1239_s29 + $0x20] sm:$0xff] %vm295_vm0, %v758_v53 }
 0x2a3   : > { %v732_v55 = vpop.permute.xlu2 %731 }
 0x2a4   : > { %v757_v23 = vmul.f32 %v732_v55, %v709_v54 }
 0x2a6   : > { %765 = vst.msk [vmem:[%s1239_s29 + $0x18] sm:$0xff] %vm295_vm0, %v757_v23 }
 0x2ab   : > { %v722_v56 = vpop.permute.xlu1 %721  ;;  %v747_v58 = vpop.permute.xlu2 %746 }
 0x2ac   : > { %v755_v59 = vmul.f32 %v722_v56, %v707_v26  ;;  %v760_v60 = vmul.f32 %v747_v58, %v712_v57 }
 0x2ae   : > { %763 = vst.msk [vmem:[%s1239_s29 + $0x8] sm:$0xff] %vm295_vm0, %v755_v59 }
 0x2af   : > { %768 = vst.msk [vmem:[%s1239_s29 + $0x30] sm:$0xff] %vm295_vm0, %v760_v60 }
 0x2b3   : > { %v752_v61 = vpop.permute.xlu1 %751 }
 0x2b4   : > { %v761_v62 = vmul.f32 %v752_v61, %v713_v36 }
 0x2b6   : > { %769 = vst.msk [vmem:[%s1239_s29 + $0x38] sm:$0xff] %vm295_vm0, %v761_v62 }
 0x2b7 PF: > { %s13_s14 = sadd.s32 1, %s1015_s14   ;;  %s1270_s12 = smov %s1011_s13 }
 0x2b8   : > { %p10_p5 = scmp.ge.s32.totalorder %s13_s14, 10   ;;  %s1271_s13 = smov %s1273_s15 }
 0x2ba   :  { %12 = sbr.rel (!%p10_p5) target bundleno = 2 (0x2), region = 76 }

// kernel: spatial_transformer.33
= control target key start
LH: loop header
LB: loop body
LE: loop exit
PB: predicated region body
PF: predicated region fallthrough
CT: control target
= control target key end

     0   :  { %s493_s0 = inlined_call_operand.vmem [shape: f32[128,32], index: 0, kind: input, shape index: {}]   ;;  %s494_s1 = inlined_call_operand.vmem [shape: bf16[32,32], index: 1, kind: input, shape index: {}]   ;;  %s495_s2 = inlined_call_operand.vmem [shape: f32[1,32], index: 2, kind: input, shape index: {}]   ;;  %s496_s3 = inlined_call_operand.vmem [shape: f32[128,32], index: 3, kind: input, shape index: {}]   ;;  %s497_s4 = inlined_call_operand.<no memory space> [shape: f32[1,1], index: 4, kind: input, shape index: {}]   ;;  %s498_s5 = inlined_call_operand.hbm [shape: f32[128,32], index: 5, kind: output, shape index: {}]  }
   0x1   :  { %v10_v0 = vstv %s497_s4 }
   0x2   :  { %11 = vst [vmem:[#allocation2] sm:$0x1] %v10_v0 }
   0x3   :  { %v248_v1 = vld [vmem:[%s494_s1 + $0x8] sm:$0xff]  ;;  %v247_v2 = vld [vmem:[%s494_s1] sm:$0xff]  ;;  %v288_v5 = vmov 0   ;;  %vm68_vm0 = vcmask 261120  }
   0x4   :  { %v24_v3 = vld [vmem:[%s493_s0] sm:$0xff]  ;;  %v25_v4 = vld [vmem:[%s493_s0 + $0x8] sm:$0xff]  ;;  %259 = vset.pattern.permute.xlu0 %v288_v5  ;;  %99 = vmatpush.bf16.msra.mxu0 %v248_v1 }
   0x5   :  { %249 = vmatpush.bf16.msra.mxu1 %v248_v1  ;;  %v28_v6 = vld [vmem:[%s493_s0 + $0x20] sm:$0xff]  ;;  %v29_v7 = vld [vmem:[%s493_s0 + $0x28] sm:$0xff]  ;;  %250 = vmatpush.bf16.msra.mxu2 %v248_v1  ;;  %v40_v12 = vpack.c.bf16 %v25_v4, %v24_v3 }
   0x6   :  { %v32_v8 = vld [vmem:[%s493_s0 + $0x40] sm:$0xff]  ;;  %251 = vmatpush.bf16.msra.mxu3 %v248_v1  ;;  %v33_v9 = vld [vmem:[%s493_s0 + $0x48] sm:$0xff]  ;;  %v42_v13 = vpack.c.bf16 %v29_v7, %v28_v6 }
   0x7   :  { %v36_v10 = vld [vmem:[%s493_s0 + $0x60] sm:$0xff]  ;;  %v37_v11 = vld [vmem:[%s493_s0 + $0x68] sm:$0xff]  ;;  %v44_v14 = vpack.c.bf16 %v33_v9, %v32_v8 }
   0x8   :  { %100 = vmatpush.bf16.msra.mxu0 %v247_v2  ;;  %v46_v15 = vpack.c.bf16 %v37_v11, %v36_v10 }
   0x9   :  { %252 = vmatpush.bf16.msra.mxu1 %v247_v2  ;;  %v260_v16 = vld [vmem:[#allocation2] ss:$0 sm:$0xff]  ;;  %253 = vmatpush.bf16.msra.mxu2 %v247_v2 }
   0xa   :  { %254 = vmatpush.bf16.msra.mxu3 %v247_v2 }
   0xb   :  { %12 = vsyncpa [#allocation4], 0  ;;  %162 = vperm.xlu0 %259, %v260_v16   ;;  %239 = vmatmul.msk.bf16.vlgmr.msra.gmra.mxu0 %vm68_vm0, %v40_v12  ;;  %v26_v17 = vld [vmem:[%s493_s0 + $0x10] sm:$0xff]  ;;  %v27_v18 = vld [vmem:[%s493_s0 + $0x18] sm:$0xff]  ;;  %s289_s6 = smov [#allocation3]   ;;  %s219_s9 = sshll.u32 %s498_s5, 4  ;;  %s220_s9 = int_to_ptr.hbm [resolvable:$true] %s219_s9 }
   0xc   :  { %241 = vmatmul.msk.bf16.vlgmr.msra.gmra.mxu1 %vm68_vm0, %v42_v13  ;;  %243 = vmatmul.msk.bf16.vlgmr.msra.gmra.mxu2 %vm68_vm0, %v44_v14  ;;  %v30_v19 = vld [vmem:[%s493_s0 + $0x30] sm:$0xff]  ;;  %v31_v20 = vld [vmem:[%s493_s0 + $0x38] sm:$0xff]  ;;  %v41_v25 = vpack.c.bf16 %v27_v18, %v26_v17  ;;  %v390_v29 = vld [vmem:[%s495_s2] ss:$0 sm:$0xff]  ;;  %s217_s2 = sshll.u32 %s289_s6, 4  ;;  %s290_s10 = smov 128   ;;  %s218_s2 = int_to_ptr.vmem [resolvable:$true] %s217_s2 }
   0xd   :  { %245 = vmatmul.msk.bf16.vlgmr.msra.gmra.mxu3 %vm68_vm0, %v46_v15  ;;  %v34_v21 = vld [vmem:[%s493_s0 + $0x50] sm:$0xff]  ;;  %v35_v22 = vld [vmem:[%s493_s0 + $0x58] sm:$0xff]  ;;  %v43_v26 = vpack.c.bf16 %v31_v20, %v30_v19  ;;  %v142_v35 = vld [vmem:[%s496_s3] sm:$0xff] }
   0xe   :  { %v38_v23 = vld [vmem:[%s493_s0 + $0x70] sm:$0xff]  ;;  %v39_v24 = vld [vmem:[%s493_s0 + $0x78] sm:$0xff]  ;;  %v45_v27 = vpack.c.bf16 %v35_v22, %v34_v21  ;;  %v146_v36 = vld [vmem:[%s496_s3 + $0x20] sm:$0xff] }
   0xf   :  { %v47_v28 = vpack.c.bf16 %v39_v24, %v38_v23  ;;  %v150_v47 = vld [vmem:[%s496_s3 + $0x40] sm:$0xff]  ;;  %v143_v53 = vld [vmem:[%s496_s3 + $0x8] sm:$0xff]  ;;  %v144_v9 = vld [vmem:[%s496_s3 + $0x10] sm:$0xff] }
  0x10   :  { %v154_v48 = vld [vmem:[%s496_s3 + $0x60] sm:$0xff]  ;;  %v147_v54 = vld [vmem:[%s496_s3 + $0x28] sm:$0xff]  ;;  %v148_v10 = vld [vmem:[%s496_s3 + $0x30] sm:$0xff] }
  0x11   :  { %v151_v3 = vld [vmem:[%s496_s3 + $0x48] sm:$0xff]  ;;  %v152_v23 = vld [vmem:[%s496_s3 + $0x50] sm:$0xff] }
  0x12   :  { %v155_v4 = vld [vmem:[%s496_s3 + $0x68] sm:$0xff]  ;;  %v156_v24 = vld [vmem:[%s496_s3 + $0x70] sm:$0xff] }
  0x1b   :  { %240 = vmatmul.msk.bf16.gmra.mxu0 %vm68_vm0, %v41_v25 }
  0x1c   :  { %242 = vmatmul.msk.bf16.gmra.mxu1 %vm68_vm0, %v43_v26  ;;  %244 = vmatmul.msk.bf16.gmra.mxu2 %vm68_vm0, %v45_v27 }
  0x1d   :  { %246 = vmatmul.msk.bf16.gmra.mxu3 %vm68_vm0, %v47_v28 }
  0x7d   :  { %v392_v30 = vpop.permute.xlu0 %162 }
  0x88   :  { %v102_v31 = vpop.f32.mrf.mxu0 }
  0x89   :  { %v112_v32 = vpop.f32.mrf.mxu1  ;;  %v103_v33 = vadd.f32 %v390_v29, %v102_v31  ;;  %v145_v31 = vld [vmem:[%s496_s3 + $0x18] sm:$0xff] }
  0x8a   :  { %v113_v34 = vadd.f32 %v390_v29, %v112_v32  ;;  %v149_v32 = vld [vmem:[%s496_s3 + $0x38] sm:$0xff] }
  0x8b   :  { %v165_v37 = vmul.f32 %v392_v30, %v103_v33 }
  0x8c   :  { %v169_v38 = vmul.f32 %v392_v30, %v113_v34 }
  0x8d   :  { %v181_v39 = vadd.f32 %v165_v37, %v142_v35 }
  0x8e   :  { %v185_v40 = vadd.f32 %v169_v38, %v146_v36 }
  0x8f   :  { %v122_v41 = vpop.f32.mrf.mxu2  ;;  %197 = vst.msk [vmem:[#allocation3] sm:$0xff] %vm68_vm0, %v181_v39 }
  0x90   :  { %v132_v42 = vpop.f32.mrf.mxu3  ;;  %v123_v43 = vadd.f32 %v390_v29, %v122_v41  ;;  %201 = vst.msk [vmem:[#allocation3 + $0x20] sm:$0xff] %vm68_vm0, %v185_v40  ;;  %v104_v45 = vpop.f32.mrf.mxu0 }
  0x91   :  { %v133_v44 = vadd.f32 %v390_v29, %v132_v42  ;;  %v114_v46 = vpop.f32.mrf.mxu1  ;;  %v105_v49 = vadd.f32 %v390_v29, %v104_v45 }
  0x92   :  { %v115_v50 = vadd.f32 %v390_v29, %v114_v46  ;;  %v173_v51 = vmul.f32 %v392_v30, %v123_v43  ;;  %v153_v43 = vld [vmem:[%s496_s3 + $0x58] sm:$0xff] }
  0x93   :  { %v177_v52 = vmul.f32 %v392_v30, %v133_v44  ;;  %v166_v55 = vmul.f32 %v392_v30, %v105_v49  ;;  %v157_v44 = vld [vmem:[%s496_s3 + $0x78] sm:$0xff]  ;;  %s291_s3 = smov 8  }
  0x94   :  { %v170_v56 = vmul.f32 %v392_v30, %v115_v50  ;;  %v189_v57 = vadd.f32 %v173_v51, %v150_v47 }
  0x95   :  { %v193_v58 = vadd.f32 %v177_v52, %v154_v48  ;;  %v182_v59 = vadd.f32 %v166_v55, %v143_v53 }
  0x96   :  { %v186_v60 = vadd.f32 %v170_v56, %v147_v54  ;;  %205 = vst.msk [vmem:[#allocation3 + $0x40] sm:$0xff] %vm68_vm0, %v189_v57 }
  0x97   :  { %209 = vst.msk [vmem:[#allocation3 + $0x60] sm:$0xff] %vm68_vm0, %v193_v58  ;;  %v124_v61 = vpop.f32.mrf.mxu2 }
  0x98   :  { %v134_v62 = vpop.f32.mrf.mxu3  ;;  %198 = vst.msk [vmem:[#allocation3 + $0x8] sm:$0xff] %vm68_vm0, %v182_v59  ;;  %v125_v63 = vadd.f32 %v390_v29, %v124_v61  ;;  %v107_v1 = vpop.f32.mrf.mxu0 }
  0x99   :  { %v135_v0 = vadd.f32 %v390_v29, %v134_v62  ;;  %v117_v2 = vpop.f32.mrf.mxu1  ;;  %202 = vst.msk [vmem:[#allocation3 + $0x28] sm:$0xff] %vm68_vm0, %v186_v60  ;;  %v108_v5 = vadd.f32 %v390_v29, %v107_v1 }
  0x9a   :  { %v118_v6 = vadd.f32 %v390_v29, %v117_v2  ;;  %v174_v7 = vmul.f32 %v392_v30, %v125_v63 }
  0x9b   :  { %v178_v8 = vmul.f32 %v392_v30, %v135_v0  ;;  %v167_v11 = vmul.f32 %v392_v30, %v108_v5 }
  0x9c   :  { %v171_v12 = vmul.f32 %v392_v30, %v118_v6  ;;  %v190_v13 = vadd.f32 %v174_v7, %v151_v3 }
  0x9d   :  { %v194_v14 = vadd.f32 %v178_v8, %v155_v4  ;;  %v183_v15 = vadd.f32 %v167_v11, %v144_v9 }
  0x9e   :  { %v187_v16 = vadd.f32 %v171_v12, %v148_v10  ;;  %206 = vst.msk [vmem:[#allocation3 + $0x48] sm:$0xff] %vm68_vm0, %v190_v13 }
  0x9f   :  { %210 = vst.msk [vmem:[#allocation3 + $0x68] sm:$0xff] %vm68_vm0, %v194_v14  ;;  %v127_v17 = vpop.f32.mrf.mxu2 }
  0xa0   :  { %v137_v18 = vpop.f32.mrf.mxu3  ;;  %199 = vst.msk [vmem:[#allocation3 + $0x10] sm:$0xff] %vm68_vm0, %v183_v15  ;;  %v128_v19 = vadd.f32 %v390_v29, %v127_v17  ;;  %v109_v21 = vpop.f32.mrf.mxu0 }
  0xa1   :  { %v138_v20 = vadd.f32 %v390_v29, %v137_v18  ;;  %v119_v22 = vpop.f32.mrf.mxu1  ;;  %203 = vst.msk [vmem:[#allocation3 + $0x30] sm:$0xff] %vm68_vm0, %v187_v16  ;;  %v110_v25 = vadd.f32 %v390_v29, %v109_v21 }
  0xa2   :  { %v120_v26 = vadd.f32 %v390_v29, %v119_v22  ;;  %v175_v27 = vmul.f32 %v392_v30, %v128_v19 }
  0xa3   :  { %v179_v28 = vmul.f32 %v392_v30, %v138_v20  ;;  %v168_v33 = vmul.f32 %v392_v30, %v110_v25 }
  0xa4   :  { %v172_v34 = vmul.f32 %v392_v30, %v120_v26  ;;  %v191_v35 = vadd.f32 %v175_v27, %v152_v23 }
  0xa5   :  { %v195_v36 = vadd.f32 %v179_v28, %v156_v24  ;;  %v184_v37 = vadd.f32 %v168_v33, %v145_v31 }
  0xa6   :  { %v188_v38 = vadd.f32 %v172_v34, %v149_v32  ;;  %207 = vst.msk [vmem:[#allocation3 + $0x50] sm:$0xff] %vm68_vm0, %v191_v35 }
  0xa7   :  { %211 = vst.msk [vmem:[#allocation3 + $0x70] sm:$0xff] %vm68_vm0, %v195_v36  ;;  %v129_v39 = vpop.f32.mrf.mxu2 }
  0xa8   :  { %v139_v40 = vpop.f32.mrf.mxu3  ;;  %200 = vst.msk [vmem:[#allocation3 + $0x18] sm:$0xff] %vm68_vm0, %v184_v37  ;;  %v130_v41 = vadd.f32 %v390_v29, %v129_v39 }
  0xa9   :  { %v140_v42 = vadd.f32 %v390_v29, %v139_v40  ;;  %204 = vst.msk [vmem:[#allocation3 + $0x38] sm:$0xff] %vm68_vm0, %v188_v38 }
  0xaa   :  { %v176_v45 = vmul.f32 %v392_v30, %v130_v41 }
  0xab   :  { %v180_v29 = vmul.f32 %v392_v30, %v140_v42 }
  0xac   :  { %v192_v46 = vadd.f32 %v176_v45, %v153_v43 }
  0xad   :  { %v196_v47 = vadd.f32 %v180_v29, %v157_v44 }
  0xae   :  { %208 = vst.msk [vmem:[#allocation3 + $0x58] sm:$0xff] %vm68_vm0, %v192_v46 }
  0xaf   :  { %212 = vst.msk [vmem:[#allocation3 + $0x78] sm:$0xff] %vm68_vm0, %v196_v47 }
  0xb0   :  { %225 = dma.vmem_to_hbm [thread:$0]  %s218_s2, 2048, %s220_s9, [#allocation4], %s290_s10, %s290_s10, %s291_s3  }
  0xb1   :  { %286 = dma.done.wait [#allocation4], 2048  }
  0xb2   :  { %287 = vsyncadd [#allocation4], 4294965248 }
  0xb3   :  { %230 = vsyncpa [#allocation4], 1 }

</bundles_post_ra>
